<compile_context>
chip_gen: v7x
topology: tpu7x:2x2x1
jax: 0.10.0
libtpu: 0.0.40
codegen_flags: <defaults>
</compile_context>

<pallas_src>
import jax
import jax.numpy as jnp
import numpy as np
from jax.experimental import pallas as pl
from jax.experimental.pallas import tpu as pltpu


# Spatial sizes implied by the module: 32x32 -> conv1(5x5,s2) -> 14x14 ->
# three 3x3 convs -> 12, 10, 8 -> avg_pool2d(8) -> 1x1.
_H1 = 14          # conv1 output height/width: the "full grid" every layer runs on
_PAD_ROWS = 32    # >= 2*_H1 + 2 zero rows so shifted window reads stay in-bounds


# ------------------------------ Pallas kernel ------------------------------ #

def _mirrornet_kernel(p1_ref, w1_ref, b1_ref, w2_ref, b2_ref, w3_ref, b3_ref,
                      w4_ref, b4_ref, pool_ref, wl_ref, bl_ref, o_ref,
                      a1_sc, a2_sc, a3_sc):
    f32, bf16 = jnp.float32, jnp.bfloat16
    m_pad, c1 = a1_sc.shape
    m = m_pad - _PAD_ROWS                         # Bt * 196 real rows
    c2 = a2_sc.shape[1]
    c3 = a3_sc.shape[1]

    # Zero the padding rows so shifted reads past the last image stay finite.
    a1_sc[m:, :] = jnp.zeros((_PAD_ROWS, c1), bf16)
    a2_sc[m:, :] = jnp.zeros((_PAD_ROWS, c2), bf16)
    a3_sc[m:, :] = jnp.zeros((_PAD_ROWS, c3), bf16)

    # conv1 (5x5 stride 2): one GEMM, M = Bt*196, K = 128 (75 zero-padded), N = 64.
    y1 = jnp.dot(p1_ref[0], w1_ref[...], preferred_element_type=f32)
    a1_sc[:m, :] = jnp.maximum(y1 + b1_ref[...], 0.0).astype(bf16)

    def conv3x3_relu(src_ref, w_taps_ref, b_ref):
        # src_ref: (m_pad, cin) bf16 flattened activation; w_taps_ref: (9, cin, cout).
        cout = w_taps_ref.shape[2]
        acc = jnp.zeros((m, cout), f32)
        for i in range(3):
            for j in range(3):
                off = i * _H1 + j                 # row shift of tap (i, j)
                xt = src_ref[off:off + m, :]      # (m, cin) bf16 window read
                acc = acc + jnp.dot(xt, w_taps_ref[i * 3 + j],
                                    preferred_element_type=f32)
        return jnp.maximum(acc + b_ref[...], 0.0)

    a2_sc[:m, :] = conv3x3_relu(a1_sc, w2_ref, b2_ref).astype(bf16)
    a3_sc[:m, :] = conv3x3_relu(a2_sc, w3_ref, b3_ref).astype(bf16)
    y4 = conv3x3_relu(a3_sc, w4_ref, b4_ref)      # (m, 256) f32; valid on 8x8 region

    # Head: pooling as a GEMM with a 0/(1/64) selection matrix, then the linear
    # layer; all f32, output lane-padded to 128 classes.
    pooled = jnp.dot(pool_ref[...], y4, preferred_element_type=f32)     # (Bt, 256)
    o_ref[0] = (jnp.dot(pooled, wl_ref[...], preferred_element_type=f32)
                + bl_ref[...])


# -------------------------------- wrapper ----------------------------------- #

def _pick_block_b(batch):
    # Cap the batch tile at 8 images (M = 1568) and keep >= 2 grid steps so
    # v7x's two TensorCores both get work.
    if batch >= 16:
        return 8
    return max(1, batch // 2)


def _im2col(x_nhwc, kh, kw, stride):
    # (N, H, W, C) -> (N, Ho, Wo, kh*kw*C); column order = (kh, kw, cin).
    n, h, w, c = x_nhwc.shape
    ho = (h - kh) // stride + 1
    wo = (w - kw) // stride + 1
    cols = []
    for i in range(kh):
        for j in range(kw):
            cols.append(x_nhwc[:, i:i + stride * ho:stride,
                               j:j + stride * wo:stride, :])
    return jnp.concatenate(cols, axis=-1), ho, wo


def _conv_taps(w_oihw):
    # (Cout, Cin, 3, 3) -> (9, Cin, Cout) bf16, tap index t = i*3 + j.
    cout, cin, kh, kw = w_oihw.shape
    return (jnp.transpose(w_oihw, (2, 3, 1, 0))
            .reshape(kh * kw, cin, cout).astype(jnp.bfloat16))


def _pool_matrix(bt, h_full, h_valid):
    # (bt, bt*h_full*h_full) f32: 1/h_valid^2 over image b's valid top-left
    # h_valid x h_valid block, 0 elsewhere (folds the avg-pool into a GEMM).
    sel = np.zeros((bt, bt, h_full, h_full), np.float32)
    for b in range(bt):
        sel[b, b, :h_valid, :h_valid] = 1.0 / float(h_valid * h_valid)
    return jnp.asarray(sel.reshape(bt, bt * h_full * h_full))


@jax.jit
def mirrornet_forward(params, x_nchw):
    batch = x_nchw.shape[0]
    bt = _pick_block_b(batch)
    num_steps = -(-batch // bt)
    b_pad = num_steps * bt

    x = jnp.transpose(x_nchw, (0, 2, 3, 1))               # NCHW -> NHWC

    # conv1 patches (host-side glue for the strided 5x5 only); pad K 75 -> 128.
    # TODO(synk): move this 5x5 im2col into the kernel to cut HBM input traffic.
    patches, h1, _ = _im2col(x, 5, 5, 2)                   # (B, 14, 14, 75)
    assert h1 == _H1
    k_raw = patches.shape[-1]
    k_pad = 128
    p1 = patches.reshape(batch, h1 * h1, k_raw)
    p1 = jnp.pad(p1, ((0, b_pad - batch), (0, 0), (0, k_pad - k_raw)))
    p1 = p1.astype(jnp.bfloat16).reshape(num_steps, bt * h1 * h1, k_pad)

    c1 = params["w1"].shape[0]
    w1 = jnp.transpose(params["w1"], (2, 3, 1, 0)).reshape(k_raw, c1)
    w1 = jnp.pad(w1, ((0, k_pad - k_raw), (0, 0))).astype(jnp.bfloat16)
    b1 = params["b1"].reshape(1, -1).astype(jnp.float32)

    w2 = _conv_taps(params["w2"]); b2 = params["b2"].reshape(1, -1).astype(jnp.float32)
    w3 = _conv_taps(params["w3"]); b3 = params["b3"].reshape(1, -1).astype(jnp.float32)
    w4 = _conv_taps(params["w4"]); b4 = params["b4"].reshape(1, -1).astype(jnp.float32)
    c2, c3, c4 = params["w2"].shape[0], params["w3"].shape[0], params["w4"].shape[0]

    h4 = h1 - 6                                            # 8x8 valid region
    n_cls = params["wl"].shape[0]
    n_pad = 128                                            # lane-dense logits
    wl = jnp.pad(jnp.transpose(params["wl"]),
                 ((0, 0), (0, n_pad - n_cls))).astype(jnp.float32)
    bl = jnp.pad(params["bl"].reshape(1, -1),
                 ((0, 0), (0, n_pad - n_cls))).astype(jnp.float32)

    pool = _pool_matrix(bt, h1, h4)                        # (bt, bt*196) f32

    m = bt * h1 * h1
    m_pad = m + _PAD_ROWS

    args = (p1, w1, b1, w2, b2, w3, b3, w4, b4, pool, wl, bl)
    macs_per_img = (h1 * h1) * (k_pad * c1 + 9 * c1 * c2 + 9 * c2 * c3
                                + 9 * c3 * c4 + c4) + c4 * n_pad
    cost = pl.CostEstimate(
        flops=2 * b_pad * macs_per_img, transcendentals=0,
        bytes_accessed=sum(int(a.size) * a.dtype.itemsize for a in args)
        + b_pad * n_pad * 4)

    out = pl.pallas_call(
        _mirrornet_kernel,
        out_shape=jax.ShapeDtypeStruct((num_steps, bt, n_pad), jnp.float32),
        grid=(num_steps,),
        in_specs=[
            pl.BlockSpec((1, m, k_pad), lambda s: (s, 0, 0)),
            pl.BlockSpec(w1.shape, lambda s: (0, 0)),
            pl.BlockSpec(b1.shape, lambda s: (0, 0)),
            pl.BlockSpec(w2.shape, lambda s: (0, 0, 0)),
            pl.BlockSpec(b2.shape, lambda s: (0, 0)),
            pl.BlockSpec(w3.shape, lambda s: (0, 0, 0)),
            pl.BlockSpec(b3.shape, lambda s: (0, 0)),
            pl.BlockSpec(w4.shape, lambda s: (0, 0, 0)),
            pl.BlockSpec(b4.shape, lambda s: (0, 0)),
            pl.BlockSpec(pool.shape, lambda s: (0, 0)),
            pl.BlockSpec(wl.shape, lambda s: (0, 0)),
            pl.BlockSpec(bl.shape, lambda s: (0, 0)),
        ],
        out_specs=pl.BlockSpec((1, bt, n_pad), lambda s: (s, 0, 0)),
        scratch_shapes=[
            pltpu.VMEM((m_pad, c1), jnp.bfloat16),   # conv1 activation (flattened)
            pltpu.VMEM((m_pad, c2), jnp.bfloat16),   # conv2 activation
            pltpu.VMEM((m_pad, c3), jnp.bfloat16),   # conv3 activation
        ],
        compiler_params=pltpu.CompilerParams(
            dimension_semantics=("parallel",),
            vmem_limit_bytes=32 * 1024 * 1024,
        ),
        cost_estimate=cost,
    )(*args)
    return out.reshape(b_pad, n_pad)[:batch, :n_cls]


# ---------------------------- reference (JAX) ------------------------------- #

def reference_forward(params, x):
    def conv(x, w, b, stride):
        y = jax.lax.conv_general_dilated(
            x, w, (stride, stride), "VALID",
            dimension_numbers=("NCHW", "OIHW", "NCHW"))
        return jax.nn.relu(y + b[None, :, None, None])

    x = conv(x, params["w1"], params["b1"], 2)
    x = conv(x, params["w2"], params["b2"], 1)
    x = conv(x, params["w3"], params["b3"], 1)
    x = conv(x, params["w4"], params["b4"], 1)
    x = jnp.mean(x, axis=(2, 3))            # avg_pool2d(.., 8) on 8x8 + squeeze
    return x @ params["wl"].T + params["bl"]


# --------------------------------- main ------------------------------------ #

def _uniform(key, shape, fan_in):
    bound = 1.0 / np.sqrt(fan_in)
    return jax.random.uniform(key, shape, jnp.float32, -bound, bound)


def init_params(key):
    ks = jax.random.split(key, 10)
    return {
        "w1": _uniform(ks[0], (64, 3, 5, 5), 3 * 5 * 5),
        "b1": _uniform(ks[1], (64,), 3 * 5 * 5),
        "w2": _uniform(ks[2], (64, 64, 3, 3), 64 * 3 * 3),
        "b2": _uniform(ks[3], (64,), 64 * 3 * 3),
        "w3": _uniform(ks[4], (128, 64, 3, 3), 64 * 3 * 3),
        "b3": _uniform(ks[5], (128,), 64 * 3 * 3),
        "w4": _uniform(ks[6], (256, 128, 3, 3), 128 * 3 * 3),
        "b4": _uniform(ks[7], (256,), 128 * 3 * 3),
        "wl": _uniform(ks[8], (10, 256), 256),
        "bl": _uniform(ks[9], (10,), 256),
    }


if __name__ == "__main__":
    root = jax.random.PRNGKey(0)
    pkey, xkey = jax.random.split(root)
    params = init_params(pkey)

    # avg_pool2d(.., 8) after the conv stack implies 32x32 spatial input
    # (32 -> 14 -> 12 -> 10 -> 8).
    x = jax.random.normal(xkey, (2, 3, 32, 32), jnp.float32)

    out = jax.block_until_ready(mirrornet_forward(params, x))
    assert out.shape == (2, 10), out.shape

    ref = jax.block_until_ready(reference_forward(params, x))
    np.testing.assert_allclose(np.asarray(out), np.asarray(ref), rtol=2e-2, atol=2e-2)

    print("KERNEL_OK")
</pallas_src>

<mosaic_0001>
module attributes {stable_mosaic.version = 11 : i64} {
  func.func @_mirrornet_kernel(%arg0: i32, %arg1: memref<1x196x128xbf16, #tpu.memory_space<vmem>>, %arg2: memref<128x64xbf16, #tpu.memory_space<vmem>>, %arg3: memref<1x64xf32, #tpu.memory_space<vmem>>, %arg4: memref<9x64x64xbf16, #tpu.memory_space<vmem>>, %arg5: memref<1x64xf32, #tpu.memory_space<vmem>>, %arg6: memref<9x64x128xbf16, #tpu.memory_space<vmem>>, %arg7: memref<1x128xf32, #tpu.memory_space<vmem>>, %arg8: memref<9x128x256xbf16, #tpu.memory_space<vmem>>, %arg9: memref<1x256xf32, #tpu.memory_space<vmem>>, %arg10: memref<1x196xf32, #tpu.memory_space<vmem>>, %arg11: memref<256x128xf32, #tpu.memory_space<vmem>>, %arg12: memref<1x128xf32, #tpu.memory_space<vmem>>, %arg13: memref<1x1x128xf32, #tpu.memory_space<vmem>>, %arg14: memref<228x64xbf16, #tpu.memory_space<vmem>>, %arg15: memref<228x64xbf16, #tpu.memory_space<vmem>>, %arg16: memref<228x128xbf16, #tpu.memory_space<vmem>>) attributes {dimension_semantics = [#tpu.dimension_semantics<parallel>], iteration_bounds = array<i64: 2>, scalar_prefetch = 0 : i64, scratch_operands = 3 : i64, tpu.core_type = #tpu.core_type<tc>, window_params = [{transform_indices = @transform_0, window_bounds = array<i64: 1, 196, 128>}, {pipeline_mode = #tpu.pipeline_mode<synchronous>, transform_indices = @transform_1, window_bounds = array<i64: 128, 64>}, {pipeline_mode = #tpu.pipeline_mode<synchronous>, transform_indices = @transform_2, window_bounds = array<i64: 1, 64>}, {pipeline_mode = #tpu.pipeline_mode<synchronous>, transform_indices = @transform_3, window_bounds = array<i64: 9, 64, 64>}, {pipeline_mode = #tpu.pipeline_mode<synchronous>, transform_indices = @transform_4, window_bounds = array<i64: 1, 64>}, {pipeline_mode = #tpu.pipeline_mode<synchronous>, transform_indices = @transform_5, window_bounds = array<i64: 9, 64, 128>}, {pipeline_mode = #tpu.pipeline_mode<synchronous>, transform_indices = @transform_6, window_bounds = array<i64: 1, 128>}, {pipeline_mode = #tpu.pipeline_mode<synchronous>, transform_indices = @transform_7, window_bounds = array<i64: 9, 128, 256>}, {pipeline_mode = #tpu.pipeline_mode<synchronous>, transform_indices = @transform_8, window_bounds = array<i64: 1, 256>}, {pipeline_mode = #tpu.pipeline_mode<synchronous>, transform_indices = @transform_9, window_bounds = array<i64: 1, 196>}, {pipeline_mode = #tpu.pipeline_mode<synchronous>, transform_indices = @transform_10, window_bounds = array<i64: 256, 128>}, {pipeline_mode = #tpu.pipeline_mode<synchronous>, transform_indices = @transform_11, window_bounds = array<i64: 1, 128>}, {transform_indices = @transform_12, window_bounds = array<i64: 1, 1, 128>}]} {
    %cst = arith.constant 0.000000e+00 : bf16
    %0 = vector.broadcast %cst : bf16 to vector<32x64xbf16>
    %c196 = arith.constant 196 : index
    %c0 = arith.constant 0 : index
    %1 = vector.load %arg14[%c196, %c0] : memref<228x64xbf16, #tpu.memory_space<vmem>>, vector<32x64xbf16>
    tpu.vector_store %arg14[%c196, %c0], %0 {strides = array<i32>} : memref<228x64xbf16, #tpu.memory_space<vmem>>, vector<32x64xbf16>,
    %cst_0 = arith.constant 0.000000e+00 : bf16
    %2 = vector.broadcast %cst_0 : bf16 to vector<32x64xbf16>
    %c196_1 = arith.constant 196 : index
    %c0_2 = arith.constant 0 : index
    %3 = vector.load %arg15[%c196_1, %c0_2] : memref<228x64xbf16, #tpu.memory_space<vmem>>, vector<32x64xbf16>
    tpu.vector_store %arg15[%c196_1, %c0_2], %2 {strides = array<i32>} : memref<228x64xbf16, #tpu.memory_space<vmem>>, vector<32x64xbf16>,
    %cst_3 = arith.constant 0.000000e+00 : bf16
    %4 = vector.broadcast %cst_3 : bf16 to vector<32x128xbf16>
    %c196_4 = arith.constant 196 : index
    %c0_5 = arith.constant 0 : index
    %5 = vector.load %arg16[%c196_4, %c0_5] : memref<228x128xbf16, #tpu.memory_space<vmem>>, vector<32x128xbf16>
    tpu.vector_store %arg16[%c196_4, %c0_5], %4 {strides = array<i32>} : memref<228x128xbf16, #tpu.memory_space<vmem>>, vector<32x128xbf16>,
    %c0_6 = arith.constant 0 : index
    %c0_7 = arith.constant 0 : index
    %c0_8 = arith.constant 0 : index
    %6 = vector.load %arg1[%c0_6, %c0_7, %c0_8] : memref<1x196x128xbf16, #tpu.memory_space<vmem>>, vector<1x196x128xbf16>
    %7 = vector.shape_cast %6 : vector<1x196x128xbf16> to vector<196x128xbf16>
    %c0_9 = arith.constant 0 : index
    %c0_10 = arith.constant 0 : index
    %8 = vector.load %arg2[%c0_9, %c0_10] : memref<128x64xbf16, #tpu.memory_space<vmem>>, vector<128x64xbf16>
    %cst_11 = arith.constant dense<0.000000e+00> : vector<196x64xf32>
    %9 = tpu.matmul %7, %8, %cst_11 {dimension_numbers = #tpu.dot_dimension_numbers<[1], [0], [0], [1], [0, 0, 1, 1], [], []>} : vector<196x128xbf16>, vector<128x64xbf16>, vector<196x64xf32> -> vector<196x64xf32>
    %c0_12 = arith.constant 0 : index
    %c0_13 = arith.constant 0 : index
    %10 = vector.load %arg3[%c0_12, %c0_13] : memref<1x64xf32, #tpu.memory_space<vmem>>, vector<1x64xf32>
    %11 = vector.broadcast %10 : vector<1x64xf32> to vector<196x64xf32>
    %12 = arith.addf %9, %11 : vector<196x64xf32>
    %cst_14 = arith.constant 0.000000e+00 : f32
    %13 = vector.broadcast %cst_14 : f32 to vector<196x64xf32>
    %14 = arith.maximumf %12, %13 : vector<196x64xf32>
    %15 = arith.truncf %14 : vector<196x64xf32> to vector<196x64xbf16>
    %c0_15 = arith.constant 0 : index
    %c0_16 = arith.constant 0 : index
    %16 = vector.load %arg14[%c0_15, %c0_16] : memref<228x64xbf16, #tpu.memory_space<vmem>>, vector<196x64xbf16>
    tpu.vector_store %arg14[%c0_15, %c0_16], %15 {strides = array<i32>} : memref<228x64xbf16, #tpu.memory_space<vmem>>, vector<196x64xbf16>,
    %cst_17 = arith.constant 0.000000e+00 : f32
    %17 = vector.broadcast %cst_17 : f32 to vector<196x64xf32>
    %c0_18 = arith.constant 0 : index
    %c0_19 = arith.constant 0 : index
    %18 = vector.load %arg14[%c0_18, %c0_19] : memref<228x64xbf16, #tpu.memory_space<vmem>>, vector<196x64xbf16>
    %c0_20 = arith.constant 0 : index
    %c0_21 = arith.constant 0 : index
    %c0_22 = arith.constant 0 : index
    %19 = vector.load %arg4[%c0_20, %c0_21, %c0_22] : memref<9x64x64xbf16, #tpu.memory_space<vmem>>, vector<1x64x64xbf16>
    %20 = vector.shape_cast %19 : vector<1x64x64xbf16> to vector<64x64xbf16>
    %cst_23 = arith.constant dense<0.000000e+00> : vector<196x64xf32>
    %21 = tpu.matmul %18, %20, %cst_23 {dimension_numbers = #tpu.dot_dimension_numbers<[1], [0], [0], [1], [0, 0, 1, 1], [], []>} : vector<196x64xbf16>, vector<64x64xbf16>, vector<196x64xf32> -> vector<196x64xf32>
    %22 = arith.addf %17, %21 : vector<196x64xf32>
    %c1 = arith.constant 1 : index
    %c0_24 = arith.constant 0 : index
    %23 = vector.load %arg14[%c1, %c0_24] : memref<228x64xbf16, #tpu.memory_space<vmem>>, vector<196x64xbf16>
    %c1_25 = arith.constant 1 : index
    %c0_26 = arith.constant 0 : index
    %c0_27 = arith.constant 0 : index
    %24 = vector.load %arg4[%c1_25, %c0_26, %c0_27] : memref<9x64x64xbf16, #tpu.memory_space<vmem>>, vector<1x64x64xbf16>
    %25 = vector.shape_cast %24 : vector<1x64x64xbf16> to vector<64x64xbf16>
    %cst_28 = arith.constant dense<0.000000e+00> : vector<196x64xf32>
    %26 = tpu.matmul %23, %25, %cst_28 {dimension_numbers = #tpu.dot_dimension_numbers<[1], [0], [0], [1], [0, 0, 1, 1], [], []>} : vector<196x64xbf16>, vector<64x64xbf16>, vector<196x64xf32> -> vector<196x64xf32>
    %27 = arith.addf %22, %26 : vector<196x64xf32>
    %c2 = arith.constant 2 : index
    %c0_29 = arith.constant 0 : index
    %28 = vector.load %arg14[%c2, %c0_29] : memref<228x64xbf16, #tpu.memory_space<vmem>>, vector<196x64xbf16>
    %c2_30 = arith.constant 2 : index
    %c0_31 = arith.constant 0 : index
    %c0_32 = arith.constant 0 : index
    %29 = vector.load %arg4[%c2_30, %c0_31, %c0_32] : memref<9x64x64xbf16, #tpu.memory_space<vmem>>, vector<1x64x64xbf16>
    %30 = vector.shape_cast %29 : vector<1x64x64xbf16> to vector<64x64xbf16>
    %cst_33 = arith.constant dense<0.000000e+00> : vector<196x64xf32>
    %31 = tpu.matmul %28, %30, %cst_33 {dimension_numbers = #tpu.dot_dimension_numbers<[1], [0], [0], [1], [0, 0, 1, 1], [], []>} : vector<196x64xbf16>, vector<64x64xbf16>, vector<196x64xf32> -> vector<196x64xf32>
    %32 = arith.addf %27, %31 : vector<196x64xf32>
    %c14 = arith.constant 14 : index
    %c0_34 = arith.constant 0 : index
    %33 = vector.load %arg14[%c14, %c0_34] : memref<228x64xbf16, #tpu.memory_space<vmem>>, vector<196x64xbf16>
    %c3 = arith.constant 3 : index
    %c0_35 = arith.constant 0 : index
    %c0_36 = arith.constant 0 : index
    %34 = vector.load %arg4[%c3, %c0_35, %c0_36] : memref<9x64x64xbf16, #tpu.memory_space<vmem>>, vector<1x64x64xbf16>
    %35 = vector.shape_cast %34 : vector<1x64x64xbf16> to vector<64x64xbf16>
    %cst_37 = arith.constant dense<0.000000e+00> : vector<196x64xf32>
    %36 = tpu.matmul %33, %35, %cst_37 {dimension_numbers = #tpu.dot_dimension_numbers<[1], [0], [0], [1], [0, 0, 1, 1], [], []>} : vector<196x64xbf16>, vector<64x64xbf16>, vector<196x64xf32> -> vector<196x64xf32>
    %37 = arith.addf %32, %36 : vector<196x64xf32>
    %c15 = arith.constant 15 : index
    %c0_38 = arith.constant 0 : index
    %38 = vector.load %arg14[%c15, %c0_38] : memref<228x64xbf16, #tpu.memory_space<vmem>>, vector<196x64xbf16>
    %c4 = arith.constant 4 : index
    %c0_39 = arith.constant 0 : index
    %c0_40 = arith.constant 0 : index
    %39 = vector.load %arg4[%c4, %c0_39, %c0_40] : memref<9x64x64xbf16, #tpu.memory_space<vmem>>, vector<1x64x64xbf16>
    %40 = vector.shape_cast %39 : vector<1x64x64xbf16> to vector<64x64xbf16>
    %cst_41 = arith.constant dense<0.000000e+00> : vector<196x64xf32>
    %41 = tpu.matmul %38, %40, %cst_41 {dimension_numbers = #tpu.dot_dimension_numbers<[1], [0], [0], [1], [0, 0, 1, 1], [], []>} : vector<196x64xbf16>, vector<64x64xbf16>, vector<196x64xf32> -> vector<196x64xf32>
    %42 = arith.addf %37, %41 : vector<196x64xf32>
    %c16 = arith.constant 16 : index
    %c0_42 = arith.constant 0 : index
    %43 = vector.load %arg14[%c16, %c0_42] : memref<228x64xbf16, #tpu.memory_space<vmem>>, vector<196x64xbf16>
    %c5 = arith.constant 5 : index
    %c0_43 = arith.constant 0 : index
    %c0_44 = arith.constant 0 : index
    %44 = vector.load %arg4[%c5, %c0_43, %c0_44] : memref<9x64x64xbf16, #tpu.memory_space<vmem>>, vector<1x64x64xbf16>
    %45 = vector.shape_cast %44 : vector<1x64x64xbf16> to vector<64x64xbf16>
    %cst_45 = arith.constant dense<0.000000e+00> : vector<196x64xf32>
    %46 = tpu.matmul %43, %45, %cst_45 {dimension_numbers = #tpu.dot_dimension_numbers<[1], [0], [0], [1], [0, 0, 1, 1], [], []>} : vector<196x64xbf16>, vector<64x64xbf16>, vector<196x64xf32> -> vector<196x64xf32>
    %47 = arith.addf %42, %46 : vector<196x64xf32>
    %c28 = arith.constant 28 : index
    %c0_46 = arith.constant 0 : index
    %48 = vector.load %arg14[%c28, %c0_46] : memref<228x64xbf16, #tpu.memory_space<vmem>>, vector<196x64xbf16>
    %c6 = arith.constant 6 : index
    %c0_47 = arith.constant 0 : index
    %c0_48 = arith.constant 0 : index
    %49 = vector.load %arg4[%c6, %c0_47, %c0_48] : memref<9x64x64xbf16, #tpu.memory_space<vmem>>, vector<1x64x64xbf16>
    %50 = vector.shape_cast %49 : vector<1x64x64xbf16> to vector<64x64xbf16>
    %cst_49 = arith.constant dense<0.000000e+00> : vector<196x64xf32>
    %51 = tpu.matmul %48, %50, %cst_49 {dimension_numbers = #tpu.dot_dimension_numbers<[1], [0], [0], [1], [0, 0, 1, 1], [], []>} : vector<196x64xbf16>, vector<64x64xbf16>, vector<196x64xf32> -> vector<196x64xf32>
    %52 = arith.addf %47, %51 : vector<196x64xf32>
    %c29 = arith.constant 29 : index
    %c0_50 = arith.constant 0 : index
    %53 = vector.load %arg14[%c29, %c0_50] : memref<228x64xbf16, #tpu.memory_space<vmem>>, vector<196x64xbf16>
    %c7 = arith.constant 7 : index
    %c0_51 = arith.constant 0 : index
    %c0_52 = arith.constant 0 : index
    %54 = vector.load %arg4[%c7, %c0_51, %c0_52] : memref<9x64x64xbf16, #tpu.memory_space<vmem>>, vector<1x64x64xbf16>
    %55 = vector.shape_cast %54 : vector<1x64x64xbf16> to vector<64x64xbf16>
    %cst_53 = arith.constant dense<0.000000e+00> : vector<196x64xf32>
    %56 = tpu.matmul %53, %55, %cst_53 {dimension_numbers = #tpu.dot_dimension_numbers<[1], [0], [0], [1], [0, 0, 1, 1], [], []>} : vector<196x64xbf16>, vector<64x64xbf16>, vector<196x64xf32> -> vector<196x64xf32>
    %57 = arith.addf %52, %56 : vector<196x64xf32>
    %c30 = arith.constant 30 : index
    %c0_54 = arith.constant 0 : index
    %58 = vector.load %arg14[%c30, %c0_54] : memref<228x64xbf16, #tpu.memory_space<vmem>>, vector<196x64xbf16>
    %c8 = arith.constant 8 : index
    %c0_55 = arith.constant 0 : index
    %c0_56 = arith.constant 0 : index
    %59 = vector.load %arg4[%c8, %c0_55, %c0_56] : memref<9x64x64xbf16, #tpu.memory_space<vmem>>, vector<1x64x64xbf16>
    %60 = vector.shape_cast %59 : vector<1x64x64xbf16> to vector<64x64xbf16>
    %cst_57 = arith.constant dense<0.000000e+00> : vector<196x64xf32>
    %61 = tpu.matmul %58, %60, %cst_57 {dimension_numbers = #tpu.dot_dimension_numbers<[1], [0], [0], [1], [0, 0, 1, 1], [], []>} : vector<196x64xbf16>, vector<64x64xbf16>, vector<196x64xf32> -> vector<196x64xf32>
    %62 = arith.addf %57, %61 : vector<196x64xf32>
    %c0_58 = arith.constant 0 : index
    %c0_59 = arith.constant 0 : index
    %63 = vector.load %arg5[%c0_58, %c0_59] : memref<1x64xf32, #tpu.memory_space<vmem>>, vector<1x64xf32>
    %64 = vector.broadcast %63 : vector<1x64xf32> to vector<196x64xf32>
    %65 = arith.addf %62, %64 : vector<196x64xf32>
    %cst_60 = arith.constant 0.000000e+00 : f32
    %66 = vector.broadcast %cst_60 : f32 to vector<196x64xf32>
    %67 = arith.maximumf %65, %66 : vector<196x64xf32>
    %68 = arith.truncf %67 : vector<196x64xf32> to vector<196x64xbf16>
    %c0_61 = arith.constant 0 : index
    %c0_62 = arith.constant 0 : index
    %69 = vector.load %arg15[%c0_61, %c0_62] : memref<228x64xbf16, #tpu.memory_space<vmem>>, vector<196x64xbf16>
    tpu.vector_store %arg15[%c0_61, %c0_62], %68 {strides = array<i32>} : memref<228x64xbf16, #tpu.memory_space<vmem>>, vector<196x64xbf16>,
    %cst_63 = arith.constant 0.000000e+00 : f32
    %70 = vector.broadcast %cst_63 : f32 to vector<196x128xf32>
    %c0_64 = arith.constant 0 : index
    %c0_65 = arith.constant 0 : index
    %71 = vector.load %arg15[%c0_64, %c0_65] : memref<228x64xbf16, #tpu.memory_space<vmem>>, vector<196x64xbf16>
    %c0_66 = arith.constant 0 : index
    %c0_67 = arith.constant 0 : index
    %c0_68 = arith.constant 0 : index
    %72 = vector.load %arg6[%c0_66, %c0_67, %c0_68] : memref<9x64x128xbf16, #tpu.memory_space<vmem>>, vector<1x64x128xbf16>
    %73 = vector.shape_cast %72 : vector<1x64x128xbf16> to vector<64x128xbf16>
    %cst_69 = arith.constant dense<0.000000e+00> : vector<196x128xf32>
    %74 = tpu.matmul %71, %73, %cst_69 {dimension_numbers = #tpu.dot_dimension_numbers<[1], [0], [0], [1], [0, 0, 1, 1], [], []>} : vector<196x64xbf16>, vector<64x128xbf16>, vector<196x128xf32> -> vector<196x128xf32>
    %75 = arith.addf %70, %74 : vector<196x128xf32>
    %c1_70 = arith.constant 1 : index
    %c0_71 = arith.constant 0 : index
    %76 = vector.load %arg15[%c1_70, %c0_71] : memref<228x64xbf16, #tpu.memory_space<vmem>>, vector<196x64xbf16>
    %c1_72 = arith.constant 1 : index
    %c0_73 = arith.constant 0 : index
    %c0_74 = arith.constant 0 : index
    %77 = vector.load %arg6[%c1_72, %c0_73, %c0_74] : memref<9x64x128xbf16, #tpu.memory_space<vmem>>, vector<1x64x128xbf16>
    %78 = vector.shape_cast %77 : vector<1x64x128xbf16> to vector<64x128xbf16>
    %cst_75 = arith.constant dense<0.000000e+00> : vector<196x128xf32>
    %79 = tpu.matmul %76, %78, %cst_75 {dimension_numbers = #tpu.dot_dimension_numbers<[1], [0], [0], [1], [0, 0, 1, 1], [], []>} : vector<196x64xbf16>, vector<64x128xbf16>, vector<196x128xf32> -> vector<196x128xf32>
    %80 = arith.addf %75, %79 : vector<196x128xf32>
    %c2_76 = arith.constant 2 : index
    %c0_77 = arith.constant 0 : index
    %81 = vector.load %arg15[%c2_76, %c0_77] : memref<228x64xbf16, #tpu.memory_space<vmem>>, vector<196x64xbf16>
    %c2_78 = arith.constant 2 : index
    %c0_79 = arith.constant 0 : index
    %c0_80 = arith.constant 0 : index
    %82 = vector.load %arg6[%c2_78, %c0_79, %c0_80] : memref<9x64x128xbf16, #tpu.memory_space<vmem>>, vector<1x64x128xbf16>
    %83 = vector.shape_cast %82 : vector<1x64x128xbf16> to vector<64x128xbf16>
    %cst_81 = arith.constant dense<0.000000e+00> : vector<196x128xf32>
    %84 = tpu.matmul %81, %83, %cst_81 {dimension_numbers = #tpu.dot_dimension_numbers<[1], [0], [0], [1], [0, 0, 1, 1], [], []>} : vector<196x64xbf16>, vector<64x128xbf16>, vector<196x128xf32> -> vector<196x128xf32>
    %85 = arith.addf %80, %84 : vector<196x128xf32>
    %c14_82 = arith.constant 14 : index
    %c0_83 = arith.constant 0 : index
    %86 = vector.load %arg15[%c14_82, %c0_83] : memref<228x64xbf16, #tpu.memory_space<vmem>>, vector<196x64xbf16>
    %c3_84 = arith.constant 3 : index
    %c0_85 = arith.constant 0 : index
    %c0_86 = arith.constant 0 : index
    %87 = vector.load %arg6[%c3_84, %c0_85, %c0_86] : memref<9x64x128xbf16, #tpu.memory_space<vmem>>, vector<1x64x128xbf16>
    %88 = vector.shape_cast %87 : vector<1x64x128xbf16> to vector<64x128xbf16>
    %cst_87 = arith.constant dense<0.000000e+00> : vector<196x128xf32>
    %89 = tpu.matmul %86, %88, %cst_87 {dimension_numbers = #tpu.dot_dimension_numbers<[1], [0], [0], [1], [0, 0, 1, 1], [], []>} : vector<196x64xbf16>, vector<64x128xbf16>, vector<196x128xf32> -> vector<196x128xf32>
    %90 = arith.addf %85, %89 : vector<196x128xf32>
    %c15_88 = arith.constant 15 : index
    %c0_89 = arith.constant 0 : index
    %91 = vector.load %arg15[%c15_88, %c0_89] : memref<228x64xbf16, #tpu.memory_space<vmem>>, vector<196x64xbf16>
    %c4_90 = arith.constant 4 : index
    %c0_91 = arith.constant 0 : index
    %c0_92 = arith.constant 0 : index
    %92 = vector.load %arg6[%c4_90, %c0_91, %c0_92] : memref<9x64x128xbf16, #tpu.memory_space<vmem>>, vector<1x64x128xbf16>
    %93 = vector.shape_cast %92 : vector<1x64x128xbf16> to vector<64x128xbf16>
    %cst_93 = arith.constant dense<0.000000e+00> : vector<196x128xf32>
    %94 = tpu.matmul %91, %93, %cst_93 {dimension_numbers = #tpu.dot_dimension_numbers<[1], [0], [0], [1], [0, 0, 1, 1], [], []>} : vector<196x64xbf16>, vector<64x128xbf16>, vector<196x128xf32> -> vector<196x128xf32>
    %95 = arith.addf %90, %94 : vector<196x128xf32>
    %c16_94 = arith.constant 16 : index
    %c0_95 = arith.constant 0 : index
    %96 = vector.load %arg15[%c16_94, %c0_95] : memref<228x64xbf16, #tpu.memory_space<vmem>>, vector<196x64xbf16>
    %c5_96 = arith.constant 5 : index
    %c0_97 = arith.constant 0 : index
    %c0_98 = arith.constant 0 : index
    %97 = vector.load %arg6[%c5_96, %c0_97, %c0_98] : memref<9x64x128xbf16, #tpu.memory_space<vmem>>, vector<1x64x128xbf16>
    %98 = vector.shape_cast %97 : vector<1x64x128xbf16> to vector<64x128xbf16>
    %cst_99 = arith.constant dense<0.000000e+00> : vector<196x128xf32>
    %99 = tpu.matmul %96, %98, %cst_99 {dimension_numbers = #tpu.dot_dimension_numbers<[1], [0], [0], [1], [0, 0, 1, 1], [], []>} : vector<196x64xbf16>, vector<64x128xbf16>, vector<196x128xf32> -> vector<196x128xf32>
    %100 = arith.addf %95, %99 : vector<196x128xf32>
    %c28_100 = arith.constant 28 : index
    %c0_101 = arith.constant 0 : index
    %101 = vector.load %arg15[%c28_100, %c0_101] : memref<228x64xbf16, #tpu.memory_space<vmem>>, vector<196x64xbf16>
    %c6_102 = arith.constant 6 : index
    %c0_103 = arith.constant 0 : index
    %c0_104 = arith.constant 0 : index
    %102 = vector.load %arg6[%c6_102, %c0_103, %c0_104] : memref<9x64x128xbf16, #tpu.memory_space<vmem>>, vector<1x64x128xbf16>
    %103 = vector.shape_cast %102 : vector<1x64x128xbf16> to vector<64x128xbf16>
    %cst_105 = arith.constant dense<0.000000e+00> : vector<196x128xf32>
    %104 = tpu.matmul %101, %103, %cst_105 {dimension_numbers = #tpu.dot_dimension_numbers<[1], [0], [0], [1], [0, 0, 1, 1], [], []>} : vector<196x64xbf16>, vector<64x128xbf16>, vector<196x128xf32> -> vector<196x128xf32>
    %105 = arith.addf %100, %104 : vector<196x128xf32>
    %c29_106 = arith.constant 29 : index
    %c0_107 = arith.constant 0 : index
    %106 = vector.load %arg15[%c29_106, %c0_107] : memref<228x64xbf16, #tpu.memory_space<vmem>>, vector<196x64xbf16>
    %c7_108 = arith.constant 7 : index
    %c0_109 = arith.constant 0 : index
    %c0_110 = arith.constant 0 : index
    %107 = vector.load %arg6[%c7_108, %c0_109, %c0_110] : memref<9x64x128xbf16, #tpu.memory_space<vmem>>, vector<1x64x128xbf16>
    %108 = vector.shape_cast %107 : vector<1x64x128xbf16> to vector<64x128xbf16>
    %cst_111 = arith.constant dense<0.000000e+00> : vector<196x128xf32>
    %109 = tpu.matmul %106, %108, %cst_111 {dimension_numbers = #tpu.dot_dimension_numbers<[1], [0], [0], [1], [0, 0, 1, 1], [], []>} : vector<196x64xbf16>, vector<64x128xbf16>, vector<196x128xf32> -> vector<196x128xf32>
    %110 = arith.addf %105, %109 : vector<196x128xf32>
    %c30_112 = arith.constant 30 : index
    %c0_113 = arith.constant 0 : index
    %111 = vector.load %arg15[%c30_112, %c0_113] : memref<228x64xbf16, #tpu.memory_space<vmem>>, vector<196x64xbf16>
    %c8_114 = arith.constant 8 : index
    %c0_115 = arith.constant 0 : index
    %c0_116 = arith.constant 0 : index
    %112 = vector.load %arg6[%c8_114, %c0_115, %c0_116] : memref<9x64x128xbf16, #tpu.memory_space<vmem>>, vector<1x64x128xbf16>
    %113 = vector.shape_cast %112 : vector<1x64x128xbf16> to vector<64x128xbf16>
    %cst_117 = arith.constant dense<0.000000e+00> : vector<196x128xf32>
    %114 = tpu.matmul %111, %113, %cst_117 {dimension_numbers = #tpu.dot_dimension_numbers<[1], [0], [0], [1], [0, 0, 1, 1], [], []>} : vector<196x64xbf16>, vector<64x128xbf16>, vector<196x128xf32> -> vector<196x128xf32>
    %115 = arith.addf %110, %114 : vector<196x128xf32>
    %c0_118 = arith.constant 0 : index
    %c0_119 = arith.constant 0 : index
    %116 = vector.load %arg7[%c0_118, %c0_119] : memref<1x128xf32, #tpu.memory_space<vmem>>, vector<1x128xf32>
    %117 = vector.broadcast %116 : vector<1x128xf32> to vector<196x128xf32>
    %118 = arith.addf %115, %117 : vector<196x128xf32>
    %cst_120 = arith.constant 0.000000e+00 : f32
    %119 = vector.broadcast %cst_120 : f32 to vector<196x128xf32>
    %120 = arith.maximumf %118, %119 : vector<196x128xf32>
    %121 = arith.truncf %120 : vector<196x128xf32> to vector<196x128xbf16>
    %c0_121 = arith.constant 0 : index
    %c0_122 = arith.constant 0 : index
    %122 = vector.load %arg16[%c0_121, %c0_122] : memref<228x128xbf16, #tpu.memory_space<vmem>>, vector<196x128xbf16>
    tpu.vector_store %arg16[%c0_121, %c0_122], %121 {strides = array<i32>} : memref<228x128xbf16, #tpu.memory_space<vmem>>, vector<196x128xbf16>,
    %cst_123 = arith.constant 0.000000e+00 : f32
    %123 = vector.broadcast %cst_123 : f32 to vector<196x256xf32>
    %c0_124 = arith.constant 0 : index
    %c0_125 = arith.constant 0 : index
    %124 = vector.load %arg16[%c0_124, %c0_125] : memref<228x128xbf16, #tpu.memory_space<vmem>>, vector<196x128xbf16>
    %c0_126 = arith.constant 0 : index
    %c0_127 = arith.constant 0 : index
    %c0_128 = arith.constant 0 : index
    %125 = vector.load %arg8[%c0_126, %c0_127, %c0_128] : memref<9x128x256xbf16, #tpu.memory_space<vmem>>, vector<1x128x256xbf16>
    %126 = vector.shape_cast %125 : vector<1x128x256xbf16> to vector<128x256xbf16>
    %cst_129 = arith.constant dense<0.000000e+00> : vector<196x256xf32>
    %127 = tpu.matmul %124, %126, %cst_129 {dimension_numbers = #tpu.dot_dimension_numbers<[1], [0], [0], [1], [0, 0, 1, 1], [], []>} : vector<196x128xbf16>, vector<128x256xbf16>, vector<196x256xf32> -> vector<196x256xf32>
    %128 = arith.addf %123, %127 : vector<196x256xf32>
    %c1_130 = arith.constant 1 : index
    %c0_131 = arith.constant 0 : index
    %129 = vector.load %arg16[%c1_130, %c0_131] : memref<228x128xbf16, #tpu.memory_space<vmem>>, vector<196x128xbf16>
    %c1_132 = arith.constant 1 : index
    %c0_133 = arith.constant 0 : index
    %c0_134 = arith.constant 0 : index
    %130 = vector.load %arg8[%c1_132, %c0_133, %c0_134] : memref<9x128x256xbf16, #tpu.memory_space<vmem>>, vector<1x128x256xbf16>
    %131 = vector.shape_cast %130 : vector<1x128x256xbf16> to vector<128x256xbf16>
    %cst_135 = arith.constant dense<0.000000e+00> : vector<196x256xf32>
    %132 = tpu.matmul %129, %131, %cst_135 {dimension_numbers = #tpu.dot_dimension_numbers<[1], [0], [0], [1], [0, 0, 1, 1], [], []>} : vector<196x128xbf16>, vector<128x256xbf16>, vector<196x256xf32> -> vector<196x256xf32>
    %133 = arith.addf %128, %132 : vector<196x256xf32>
    %c2_136 = arith.constant 2 : index
    %c0_137 = arith.constant 0 : index
    %134 = vector.load %arg16[%c2_136, %c0_137] : memref<228x128xbf16, #tpu.memory_space<vmem>>, vector<196x128xbf16>
    %c2_138 = arith.constant 2 : index
    %c0_139 = arith.constant 0 : index
    %c0_140 = arith.constant 0 : index
    %135 = vector.load %arg8[%c2_138, %c0_139, %c0_140] : memref<9x128x256xbf16, #tpu.memory_space<vmem>>, vector<1x128x256xbf16>
    %136 = vector.shape_cast %135 : vector<1x128x256xbf16> to vector<128x256xbf16>
    %cst_141 = arith.constant dense<0.000000e+00> : vector<196x256xf32>
    %137 = tpu.matmul %134, %136, %cst_141 {dimension_numbers = #tpu.dot_dimension_numbers<[1], [0], [0], [1], [0, 0, 1, 1], [], []>} : vector<196x128xbf16>, vector<128x256xbf16>, vector<196x256xf32> -> vector<196x256xf32>
    %138 = arith.addf %133, %137 : vector<196x256xf32>
    %c14_142 = arith.constant 14 : index
    %c0_143 = arith.constant 0 : index
    %139 = vector.load %arg16[%c14_142, %c0_143] : memref<228x128xbf16, #tpu.memory_space<vmem>>, vector<196x128xbf16>
    %c3_144 = arith.constant 3 : index
    %c0_145 = arith.constant 0 : index
    %c0_146 = arith.constant 0 : index
    %140 = vector.load %arg8[%c3_144, %c0_145, %c0_146] : memref<9x128x256xbf16, #tpu.memory_space<vmem>>, vector<1x128x256xbf16>
    %141 = vector.shape_cast %140 : vector<1x128x256xbf16> to vector<128x256xbf16>
    %cst_147 = arith.constant dense<0.000000e+00> : vector<196x256xf32>
    %142 = tpu.matmul %139, %141, %cst_147 {dimension_numbers = #tpu.dot_dimension_numbers<[1], [0], [0], [1], [0, 0, 1, 1], [], []>} : vector<196x128xbf16>, vector<128x256xbf16>, vector<196x256xf32> -> vector<196x256xf32>
    %143 = arith.addf %138, %142 : vector<196x256xf32>
    %c15_148 = arith.constant 15 : index
    %c0_149 = arith.constant 0 : index
    %144 = vector.load %arg16[%c15_148, %c0_149] : memref<228x128xbf16, #tpu.memory_space<vmem>>, vector<196x128xbf16>
    %c4_150 = arith.constant 4 : index
    %c0_151 = arith.constant 0 : index
    %c0_152 = arith.constant 0 : index
    %145 = vector.load %arg8[%c4_150, %c0_151, %c0_152] : memref<9x128x256xbf16, #tpu.memory_space<vmem>>, vector<1x128x256xbf16>
    %146 = vector.shape_cast %145 : vector<1x128x256xbf16> to vector<128x256xbf16>
    %cst_153 = arith.constant dense<0.000000e+00> : vector<196x256xf32>
    %147 = tpu.matmul %144, %146, %cst_153 {dimension_numbers = #tpu.dot_dimension_numbers<[1], [0], [0], [1], [0, 0, 1, 1], [], []>} : vector<196x128xbf16>, vector<128x256xbf16>, vector<196x256xf32> -> vector<196x256xf32>
    %148 = arith.addf %143, %147 : vector<196x256xf32>
    %c16_154 = arith.constant 16 : index
    %c0_155 = arith.constant 0 : index
    %149 = vector.load %arg16[%c16_154, %c0_155] : memref<228x128xbf16, #tpu.memory_space<vmem>>, vector<196x128xbf16>
    %c5_156 = arith.constant 5 : index
    %c0_157 = arith.constant 0 : index
    %c0_158 = arith.constant 0 : index
    %150 = vector.load %arg8[%c5_156, %c0_157, %c0_158] : memref<9x128x256xbf16, #tpu.memory_space<vmem>>, vector<1x128x256xbf16>
    %151 = vector.shape_cast %150 : vector<1x128x256xbf16> to vector<128x256xbf16>
    %cst_159 = arith.constant dense<0.000000e+00> : vector<196x256xf32>
    %152 = tpu.matmul %149, %151, %cst_159 {dimension_numbers = #tpu.dot_dimension_numbers<[1], [0], [0], [1], [0, 0, 1, 1], [], []>} : vector<196x128xbf16>, vector<128x256xbf16>, vector<196x256xf32> -> vector<196x256xf32>
    %153 = arith.addf %148, %152 : vector<196x256xf32>
    %c28_160 = arith.constant 28 : index
    %c0_161 = arith.constant 0 : index
    %154 = vector.load %arg16[%c28_160, %c0_161] : memref<228x128xbf16, #tpu.memory_space<vmem>>, vector<196x128xbf16>
    %c6_162 = arith.constant 6 : index
    %c0_163 = arith.constant 0 : index
    %c0_164 = arith.constant 0 : index
    %155 = vector.load %arg8[%c6_162, %c0_163, %c0_164] : memref<9x128x256xbf16, #tpu.memory_space<vmem>>, vector<1x128x256xbf16>
    %156 = vector.shape_cast %155 : vector<1x128x256xbf16> to vector<128x256xbf16>
    %cst_165 = arith.constant dense<0.000000e+00> : vector<196x256xf32>
    %157 = tpu.matmul %154, %156, %cst_165 {dimension_numbers = #tpu.dot_dimension_numbers<[1], [0], [0], [1], [0, 0, 1, 1], [], []>} : vector<196x128xbf16>, vector<128x256xbf16>, vector<196x256xf32> -> vector<196x256xf32>
    %158 = arith.addf %153, %157 : vector<196x256xf32>
    %c29_166 = arith.constant 29 : index
    %c0_167 = arith.constant 0 : index
    %159 = vector.load %arg16[%c29_166, %c0_167] : memref<228x128xbf16, #tpu.memory_space<vmem>>, vector<196x128xbf16>
    %c7_168 = arith.constant 7 : index
    %c0_169 = arith.constant 0 : index
    %c0_170 = arith.constant 0 : index
    %160 = vector.load %arg8[%c7_168, %c0_169, %c0_170] : memref<9x128x256xbf16, #tpu.memory_space<vmem>>, vector<1x128x256xbf16>
    %161 = vector.shape_cast %160 : vector<1x128x256xbf16> to vector<128x256xbf16>
    %cst_171 = arith.constant dense<0.000000e+00> : vector<196x256xf32>
    %162 = tpu.matmul %159, %161, %cst_171 {dimension_numbers = #tpu.dot_dimension_numbers<[1], [0], [0], [1], [0, 0, 1, 1], [], []>} : vector<196x128xbf16>, vector<128x256xbf16>, vector<196x256xf32> -> vector<196x256xf32>
    %163 = arith.addf %158, %162 : vector<196x256xf32>
    %c30_172 = arith.constant 30 : index
    %c0_173 = arith.constant 0 : index
    %164 = vector.load %arg16[%c30_172, %c0_173] : memref<228x128xbf16, #tpu.memory_space<vmem>>, vector<196x128xbf16>
    %c8_174 = arith.constant 8 : index
    %c0_175 = arith.constant 0 : index
    %c0_176 = arith.constant 0 : index
    %165 = vector.load %arg8[%c8_174, %c0_175, %c0_176] : memref<9x128x256xbf16, #tpu.memory_space<vmem>>, vector<1x128x256xbf16>
    %166 = vector.shape_cast %165 : vector<1x128x256xbf16> to vector<128x256xbf16>
    %cst_177 = arith.constant dense<0.000000e+00> : vector<196x256xf32>
    %167 = tpu.matmul %164, %166, %cst_177 {dimension_numbers = #tpu.dot_dimension_numbers<[1], [0], [0], [1], [0, 0, 1, 1], [], []>} : vector<196x128xbf16>, vector<128x256xbf16>, vector<196x256xf32> -> vector<196x256xf32>
    %168 = arith.addf %163, %167 : vector<196x256xf32>
    %c0_178 = arith.constant 0 : index
    %c0_179 = arith.constant 0 : index
    %169 = vector.load %arg9[%c0_178, %c0_179] : memref<1x256xf32, #tpu.memory_space<vmem>>, vector<1x256xf32>
    %170 = vector.broadcast %169 : vector<1x256xf32> to vector<196x256xf32>
    %171 = arith.addf %168, %170 : vector<196x256xf32>
    %cst_180 = arith.constant 0.000000e+00 : f32
    %172 = vector.broadcast %cst_180 : f32 to vector<196x256xf32>
    %173 = arith.maximumf %171, %172 : vector<196x256xf32>
    %c0_181 = arith.constant 0 : index
    %c0_182 = arith.constant 0 : index
    %174 = vector.load %arg10[%c0_181, %c0_182] : memref<1x196xf32, #tpu.memory_space<vmem>>, vector<1x196xf32>
    %cst_183 = arith.constant dense<0.000000e+00> : vector<1x256xf32>
    %175 = tpu.matmul %174, %173, %cst_183 {dimension_numbers = #tpu.dot_dimension_numbers<[1], [0], [0], [1], [0, 0, 1, 1], [], []>} : vector<1x196xf32>, vector<196x256xf32>, vector<1x256xf32> -> vector<1x256xf32>
    %c0_184 = arith.constant 0 : index
    %c0_185 = arith.constant 0 : index
    %176 = vector.load %arg11[%c0_184, %c0_185] : memref<256x128xf32, #tpu.memory_space<vmem>>, vector<256x128xf32>
    %cst_186 = arith.constant dense<0.000000e+00> : vector<1x128xf32>
    %177 = tpu.matmul %175, %176, %cst_186 {dimension_numbers = #tpu.dot_dimension_numbers<[1], [0], [0], [1], [0, 0, 1, 1], [], []>} : vector<1x256xf32>, vector<256x128xf32>, vector<1x128xf32> -> vector<1x128xf32>
    %c0_187 = arith.constant 0 : index
    %c0_188 = arith.constant 0 : index
    %178 = vector.load %arg12[%c0_187, %c0_188] : memref<1x128xf32, #tpu.memory_space<vmem>>, vector<1x128xf32>
    %179 = arith.addf %177, %178 : vector<1x128xf32>
    %c0_189 = arith.constant 0 : index
    %c0_190 = arith.constant 0 : index
    %c0_191 = arith.constant 0 : index
    %180 = vector.load %arg13[%c0_189, %c0_190, %c0_191] : memref<1x1x128xf32, #tpu.memory_space<vmem>>, vector<1x1x128xf32>
    %181 = vector.shape_cast %180 : vector<1x1x128xf32> to vector<1x128xf32>
    %182 = vector.shape_cast %179 : vector<1x128xf32> to vector<1x1x128xf32>
    tpu.vector_store %arg13[%c0_189, %c0_190, %c0_191], %182 {strides = array<i32>} : memref<1x1x128xf32, #tpu.memory_space<vmem>>, vector<1x1x128xf32>,
    return
  }
  func.func @transform_0(%arg0: i32) -> (i32, i32, i32) {
    %c0_i32 = arith.constant 0 : i32
    %c0_i32_0 = arith.constant 0 : i32
    %c0_i32_1 = arith.constant 0 : i32
    return %arg0, %c0_i32, %c0_i32_0 : i32, i32, i32
  }
  func.func @transform_1(%arg0: i32) -> (i32, i32) {
    %c0_i32 = arith.constant 0 : i32
    %c0_i32_0 = arith.constant 0 : i32
    %c0_i32_1 = arith.constant 0 : i32
    return %c0_i32, %c0_i32_0 : i32, i32
  }
  func.func @transform_2(%arg0: i32) -> (i32, i32) {
    %c0_i32 = arith.constant 0 : i32
    %c0_i32_0 = arith.constant 0 : i32
    %c0_i32_1 = arith.constant 0 : i32
    return %c0_i32, %c0_i32_0 : i32, i32
  }
  func.func @transform_3(%arg0: i32) -> (i32, i32, i32) {
    %c0_i32 = arith.constant 0 : i32
    %c0_i32_0 = arith.constant 0 : i32
    %c0_i32_1 = arith.constant 0 : i32
    %c0_i32_2 = arith.constant 0 : i32
    return %c0_i32, %c0_i32_0, %c0_i32_1 : i32, i32, i32
  }
  func.func @transform_4(%arg0: i32) -> (i32, i32) {
    %c0_i32 = arith.constant 0 : i32
    %c0_i32_0 = arith.constant 0 : i32
    %c0_i32_1 = arith.constant 0 : i32
    return %c0_i32, %c0_i32_0 : i32, i32
  }
  func.func @transform_5(%arg0: i32) -> (i32, i32, i32) {
    %c0_i32 = arith.constant 0 : i32
    %c0_i32_0 = arith.constant 0 : i32
    %c0_i32_1 = arith.constant 0 : i32
    %c0_i32_2 = arith.constant 0 : i32
    return %c0_i32, %c0_i32_0, %c0_i32_1 : i32, i32, i32
  }
  func.func @transform_6(%arg0: i32) -> (i32, i32) {
    %c0_i32 = arith.constant 0 : i32
    %c0_i32_0 = arith.constant 0 : i32
    %c0_i32_1 = arith.constant 0 : i32
    return %c0_i32, %c0_i32_0 : i32, i32
  }
  func.func @transform_7(%arg0: i32) -> (i32, i32, i32) {
    %c0_i32 = arith.constant 0 : i32
    %c0_i32_0 = arith.constant 0 : i32
    %c0_i32_1 = arith.constant 0 : i32
    %c0_i32_2 = arith.constant 0 : i32
    return %c0_i32, %c0_i32_0, %c0_i32_1 : i32, i32, i32
  }
  func.func @transform_8(%arg0: i32) -> (i32, i32) {
    %c0_i32 = arith.constant 0 : i32
    %c0_i32_0 = arith.constant 0 : i32
    %c0_i32_1 = arith.constant 0 : i32
    return %c0_i32, %c0_i32_0 : i32, i32
  }
  func.func @transform_9(%arg0: i32) -> (i32, i32) {
    %c0_i32 = arith.constant 0 : i32
    %c0_i32_0 = arith.constant 0 : i32
    %c0_i32_1 = arith.constant 0 : i32
    return %c0_i32, %c0_i32_0 : i32, i32
  }
  func.func @transform_10(%arg0: i32) -> (i32, i32) {
    %c0_i32 = arith.constant 0 : i32
    %c0_i32_0 = arith.constant 0 : i32
    %c0_i32_1 = arith.constant 0 : i32
    return %c0_i32, %c0_i32_0 : i32, i32
  }
  func.func @transform_11(%arg0: i32) -> (i32, i32) {
    %c0_i32 = arith.constant 0 : i32
    %c0_i32_0 = arith.constant 0 : i32
    %c0_i32_1 = arith.constant 0 : i32
    return %c0_i32, %c0_i32_0 : i32, i32
  }
  func.func @transform_12(%arg0: i32) -> (i32, i32, i32) {
    %c0_i32 = arith.constant 0 : i32
    %c0_i32_0 = arith.constant 0 : i32
    %c0_i32_1 = arith.constant 0 : i32
    return %arg0, %c0_i32, %c0_i32_0 : i32, i32, i32
  }
}

</mosaic_0001>

<bundles_post_ra>
// kernel: mirrornet_forward.1
= control target key start
LH: loop header
LB: loop body
LE: loop exit
PB: predicated region body
PF: predicated region fallthrough
CT: control target
= control target key end

     0   :  { %s19291_s0 = inlined_call_operand.vmem [shape: bf16[2,196,128], index: 0, kind: input, shape index: {}]   ;;  %s19292_s1 = inlined_call_operand.vmem [shape: bf16[128,64], index: 1, kind: input, shape index: {}]   ;;  %s19293_s2 = inlined_call_operand.vmem [shape: f32[1,64], index: 2, kind: input, shape index: {}]   ;;  %s19294_s3 = inlined_call_operand.vmem [shape: bf16[9,64,64], index: 3, kind: input, shape index: {}]   ;;  %s19295_s4 = inlined_call_operand.vmem [shape: f32[1,64], index: 4, kind: input, shape index: {}]   ;;  %s19296_s5 = inlined_call_operand.vmem [shape: bf16[9,64,128], index: 5, kind: input, shape index: {}]   ;;  %s19297_s6 = inlined_call_operand.vmem [shape: f32[1,128], index: 6, kind: input, shape index: {}]   ;;  %s19298_s7 = inlined_call_operand.vmem [shape: bf16[9,128,256], index: 7, kind: input, shape index: {}]   ;;  %s19299_s8 = inlined_call_operand.vmem [shape: f32[1,256], index: 8, kind: input, shape index: {}]   ;;  %s19300_s9 = inlined_call_operand.vmem [shape: f32[1,196], index: 9, kind: input, shape index: {}]   ;;  %s19301_s10 = inlined_call_operand.vmem [shape: f32[256,128], index: 10, kind: input, shape index: {}]   ;;  %s19302_s11 = inlined_call_operand.vmem [shape: f32[1,128], index: 11, kind: input, shape index: {}]   ;;  %s19303_s12 = inlined_call_operand.hbm [shape: f32[2,1,128], index: 12, kind: output, shape index: {}]  }
   0x1   :  { %19373 = sst [smem:[#allocation68_spill]] %s19291_s0 }
   0x2   :  { %17 = vsyncpa [#allocation6], 0 }
   0x3   :  { %19 = vsyncpa [#allocation6 + $0x1], 0  ;;  %s14829_s21 = smov 0   ;;  %s14831_s22 = smov 0  }
   0x4   :  { %s14833_s23 = smov 0   ;;  %s14835_s24 = smov 0  }
   0x5 LB: > { %s14850_s25 = sadd.s32 4294967295, %s14758_s24   ;;  %s10960_s26 = sadd.s32 4294967294, %s14758_s24   ;;  %s14758_s24 = sphi %s14835_s24, %s19635_s24   ;;  %s14754_s23 = sphi %s14833_s23, %s19634_s23   ;;  %s14750_s22 = sphi %s14831_s22, %s19633_s22   ;;  %s14746_s21 = sphi %s14829_s21, %s19632_s21  }
   0x6   : > { %s14854_s27 = sadd.s32 1, %s14758_s24   ;;  %s289_s28 = sadd.s32 1, %s14754_s23 }
   0x7   : > { %s286_s29 = ssub.s32 %s14758_s24, %s14854_s27  ;;  %p299_p0 = scmp.ne.s32.totalorder %s14754_s23, %s14750_s22 }
   0x8   : > { %p287_p1 = scmp.eq.s32.totalorder %s286_s29, 0  ;;  %p300_p2 = scmp.eq.s32.totalorder %s14850_s25, 1 }
   0x9   : > { %p305_p3 = scmp.ne.s32.totalorder %s14750_s22, %s14746_s21  ;;  %p306_p4 = scmp.eq.s32.totalorder %s10960_s26, 1 }
   0xa   : > { %s14865_s30 = scalar_select %p287_p1, %s14754_s23, %s289_s28  }
   0xb   : > { %p14867_p5 = por %p300_p2, %p299_p0  ;;  %p14871_p6 = por %p306_p4, %p305_p3 }
   0xc   : > { %19374 = sst [smem:[#allocation8_spill]] %s14865_s30  ;;  %p10963_p7 = scmp.ge.s32.totalorder %s14758_s24, 1 }
   0xd   : > { %p365_p8 = scmp.lt.s32.totalorder %s14758_s24, 3 }
   0xf   : > { %p366_p9 = pnand %p10963_p7, %p365_p8 }
  0x11   : > { %369 = sbr.rel (%p366_p9) target bundleno = 3494 (0xda6), region = 68 }
  0x18   : > { %v14154_v0 = vld [vmem:[%s19292_s1] sm:$0xff]   ;;  %v19307_v1 = vmov 0.0   ;;  %v14155_v2 = vld [vmem:[%s19292_s1 + $0x8] sm:$0xff]   ;;  %vm14761_vm0 = vmmov 0   ;;  %p406_p10 = scmp.lt.s32.totalorder %s14850_s25, 1  ;;  %v14156_v3 = vld [vmem:[%s19292_s1 + $0x10] sm:$0xff]  }
  0x19   : > { %12491 = vmatprep.subr.bf16.mxu1 %v19307_v1  ;;  %12919 = vmatprep.subr.bf16.mxu0 %v19307_v1  ;;  %s19377_s0 = sld [smem:[#allocation68_spill]]  ;;  %v14157_v4 = vld [vmem:[%s19292_s1 + $0x18] sm:$0xff]   ;;  %v14158_v5 = vld [vmem:[%s19292_s1 + $0x20] sm:$0xff]   ;;  %v14159_v6 = vld [vmem:[%s19292_s1 + $0x28] sm:$0xff]   ;;  %vm414_vm1 = vcmask 519168   ;;  %vm418_vm2 = vcmask 517120  }
  0x1a   : > { %12492 = vmatpush3.bf16.msra.mxu1 %v14154_v0  ;;  %12507 = vmatprep.mubr.msk.bf16.mxu1 %vm14761_vm0, %v19307_v1  ;;  %s407_s19 = scalar_select %p406_p10, %s14850_s25, 1  ;;  %v14160_v7 = vld [vmem:[%s19292_s1 + $0x30] sm:$0xff]   ;;  %v14161_v8 = vld [vmem:[%s19292_s1 + $0x38] sm:$0xff]   ;;  %v14175_v10 = vld [vmem:[%s19294_s3 + $0x20] sm:$0xff]   ;;  %v19304_v30 = vmov 0   ;;  %vm412_vm3 = vcmask 519170  }
  0x1b   : > { %12493 = vmatprep.subr.bf16.mxu1 %v19307_v1  ;;  %12927 = vmatprep.mubr.msk.bf16.mxu0 %vm14761_vm0, %v19307_v1  ;;  %v14176_v11 = vld [vmem:[%s19294_s3 + $0x28] sm:$0xff]   ;;  %v14177_v13 = vld [vmem:[%s19294_s3 + $0x30] sm:$0xff]   ;;  %v14178_v25 = vld [vmem:[%s19294_s3 + $0x38] sm:$0xff]   ;;  %419 = vst.msk [vmem:[#allocation2 + $0x70] sm:$0x3] %vm418_vm2, %v19304_v30  ;;  %vm1123_vm5 = vcmask 523264  }
  0x1c   : > { %s14111_s28 = smul.u32 100, %s407_s19  ;;  %v14179_v26 = vld [vmem:[%s19294_s3 + $0xc0] sm:$0xff]   ;;  %v14182_v27 = vld [vmem:[%s19294_s3 + $0xc8] sm:$0xff]   ;;  %v14183_v28 = vld [vmem:[%s19294_s3 + $0xd0] sm:$0xff]   ;;  %424 = vst.msk [vmem:[#allocation3 + $0x70] sm:$0x3] %vm418_vm2, %v19304_v30 }
  0x1d   : > { %12920 = vmatpush3.bf16.msra.mxu0 %v14179_v26  ;;  %v14186_v29 = vld [vmem:[%s19294_s3 + $0xd8] sm:$0xff]   ;;  %415 = vst.msk [vmem:[#allocation2 + $0x64] sm:$0xf] %vm414_vm1, %v19304_v30  ;;  %416 = vst.msk [vmem:[#allocation2 + $0x68] sm:$0xf] %vm414_vm1, %v19304_v30  ;;  %vm2799_vm6 = vcmask 1045504  }
  0x1e   : > { %12494 = vmatpush3.bf16.msra.mxu1 %v14155_v2  ;;  %12921 = vmatprep.subr.bf16.mxu0 %v19307_v1  ;;  %417 = vst.msk [vmem:[#allocation2 + $0x6c] sm:$0xf] %vm414_vm1, %v19304_v30  ;;  %421 = vst.msk [vmem:[#allocation3 + $0x64] sm:$0xf] %vm414_vm1, %v19304_v30  ;;  %v15019_v31 = vld [vmem:[%s19293_s2] ss:$0 sm:$0xff] }
  0x1f   : > { %12495 = vmatprep.subr.bf16.mxu1 %v19307_v1  ;;  %s14899_s16 = scalar_lea.vmem %s19377_s0, %s14111_s28  ;;  %422 = vst.msk [vmem:[#allocation3 + $0x68] sm:$0xf] %vm414_vm1, %v19304_v30  ;;  %423 = vst.msk [vmem:[#allocation3 + $0x6c] sm:$0xf] %vm414_vm1, %v19304_v30  ;;  %vm995_vm4 = vsmask.f32 7424 }
  0x20   : > { %v14162_v9 = vld [vmem:[%s14899_s16] sm:$0xff]   ;;  %v14163_v12 = vld [vmem:[%s14899_s16 + $0x8] sm:$0xff]   ;;  %v14164_v14 = vld [vmem:[%s14899_s16 + $0x10] sm:$0xff]   ;;  %425 = vst [vmem:[#allocation4 + $0x60] sm:$0xc] %v19304_v30  ;;  %vm1852_vm9 = vcmask 1044480  }
  0x21   : > { %v14165_v15 = vld [vmem:[%s14899_s16 + $0x18] sm:$0xff]   ;;  %v14166_v16 = vld [vmem:[%s14899_s16 + $0x20] sm:$0xff]   ;;  %v14167_v17 = vld [vmem:[%s14899_s16 + $0x28] sm:$0xff]   ;;  %12922 = vmatpush3.bf16.msra.mxu0 %v14182_v27  ;;  %426 = vst [vmem:[#allocation4 + $0x64] sm:$0xf] %v19304_v30  ;;  %vm1502_vm10 = vcmask 1046528  }
  0x22   : > { %12496 = vmatpush3.bf16.msra.mxu1 %v14156_v3  ;;  %v14168_v18 = vld [vmem:[%s14899_s16 + $0x30] sm:$0xff]   ;;  %v14169_v19 = vld [vmem:[%s14899_s16 + $0x38] sm:$0xff]   ;;  %v14170_v20 = vld [vmem:[%s14899_s16 + $0x40] sm:$0xff]   ;;  %12923 = vmatprep.subr.bf16.mxu0 %v19307_v1  ;;  %427 = vst [vmem:[#allocation4 + $0x68] sm:$0xf] %v19304_v30  ;;  %vm10707_vm11 = vcmask 556032  }
  0x23   : > { %12497 = vmatprep.subr.bf16.mxu1 %v19307_v1  ;;  %v14171_v21 = vld [vmem:[%s14899_s16 + $0x48] sm:$0xff]   ;;  %v14172_v22 = vld [vmem:[%s14899_s16 + $0x50] sm:$0xff]   ;;  %v14173_v23 = vld [vmem:[%s14899_s16 + $0x58] sm:$0xff]   ;;  %428 = vst [vmem:[#allocation4 + $0x6c] sm:$0xf] %v19304_v30  ;;  %vm10710_vm12 = vcmask 1043456  }
  0x24   : > { %v14174_v24 = vld [vmem:[%s14899_s16 + $0x60] ss:$0 sps:$4 sm:$0x33]   ;;  %429 = vst [vmem:[#allocation4 + $0x70] sm:$0x3] %v19304_v30  ;;  %v14196_v27 = vld [vmem:[%s19294_s3 + $0x8] sm:$0xff]  }
  0x25   : > { %12924 = vmatpush3.bf16.msra.mxu0 %v14183_v28  ;;  %413 = vst.msk [vmem:[#allocation2 + $0x60] sm:$0xc] %vm412_vm3, %v19304_v30  ;;  %420 = vst.msk [vmem:[#allocation3 + $0x60] sm:$0xc] %vm412_vm3, %v19304_v30  ;;  %vm2115_vm7 = vsmask.f32 4352 }
  0x26   : > { %12498 = vmatpush3.bf16.msra.mxu1 %v14157_v4  ;;  %12925 = vmatprep.subr.bf16.mxu0 %v19307_v1  ;;  %vm3149_vm8 = vsmask.f32 5376  ;;  %s404_s26 = sand.u32 1, %s14750_s22   ;;  %s11980_s15 = sshll.u32 %s14850_s25, 4 }
  0x27   : > { %12499 = vmatprep.subr.bf16.mxu1 %v19307_v1  ;;  %s405_s30 = scalar_lea.vmem [#allocation5], %s404_s26  ;;  %s19249_s20 = scalar_lea.hbm %s19303_s12, %s11980_s15 }
  0x28   : > { %s10905_s17 = sshll.u32 %s405_s30, 4  ;;  %s10893_s19 = scalar_lea.sflag [#allocation6], %s404_s26  ;;  %s19251_s17 = int_to_ptr.vmem [resolvable:$true] %s10905_s17 }
  0x29   : > { %12926 = vmatpush3.bf16.msra.mxu0 %v14186_v29  ;;  %s14696_s28 = scalar_lea.vmem %s19251_s17, 16  ;;  %s14763_s25 = smov [#allocation5]  }
  0x2a   : > { %12500 = vmatpush3.bf16.msra.mxu1 %v14158_v5  ;;  %13039 = vmatprep.subr.bf16.mxu0 %v19307_v1  ;;  %p14697_p11 = scmp.ne.s32.totalorder %s19251_s17, %s14696_s28  ;;  %s14700_s29 = sshll.u32 %s14763_s25, 4  ;;  %s14701_s29 = int_to_ptr.vmem [resolvable:$false] %s14700_s29 }
  0x2b   : > { %12501 = vmatprep.subr.bf16.mxu1 %v19307_v1  ;;  %s14702_s0 = scalar_lea.vmem %s14701_s29, 32  ;;  %p14703_p0 = scmp.lt.s32.totalorder %s19251_s17, %s14701_s29 }
  0x2c   : > { %p14698_p12 = pnand %p14697_p11, %p14867_p5  ;;  %p14704_p1 = scmp.lt.s32.totalorder %s14702_s0, %s14696_s28 }
  0x2e   : > { %12502 = vmatpush3.bf16.msra.mxu1 %v14159_v6  ;;  %p14699_p13 = pneg %p14698_p12  ;;  %p14705_p2 = por %p14704_p1, %p14703_p0 }
  0x2f   : > { %12503 = vmatprep.subr.bf16.mxu1 %v19307_v1 }
  0x30   : > { %p14706_p3 = pnand %p14705_p2, %p14699_p13 }
  0x32   : > { %12504 = vmatpush3.bf16.msra.mxu1 %v14160_v7 }
  0x33   : > { %12505 = vmatprep.subr.bf16.mxu1 %v19307_v1 }
  0x36   : > { %12506 = vmatpush3.bf16.msra.mxu1 %v14161_v8 }
  0x37   : > { %12559 = vmatprep.subr.bf16.mxu1 %v19307_v1 }
  0x39   : > { %12508 = vmatmul.mubr.bf16.vlgmr.msra.gmra.mrb[0].mxu1 %v14162_v9 }
  0x3a   : > { %12511 = vmatprep.mubr.msk.bf16.mxu1 %vm14761_vm0, %v19307_v1  ;;  %12560 = vmatpush3.bf16.msra.mxu1 %v14175_v10 }
  0x3b   : > { %12561 = vmatprep.subr.bf16.mxu1 %v19307_v1 }
  0x3e   : > { %12562 = vmatpush3.bf16.msra.mxu1 %v14176_v11 }
  0x3f   : > { %12563 = vmatprep.subr.bf16.mxu1 %v19307_v1 }
  0x41   : > { %12512 = vmatmul.mubr.bf16.gmra.mrb[4].mxu1 %v14163_v12 }
  0x42   : > { %12515 = vmatprep.mubr.msk.bf16.mxu1 %vm14761_vm0, %v19307_v1  ;;  %12564 = vmatpush3.bf16.msra.mxu1 %v14177_v13 }
  0x43   : > { %12565 = vmatprep.subr.bf16.mxu1 %v19307_v1 }
  0x46   : > { %12566 = vmatpush3.bf16.msra.mxu1 %v14178_v25 }
  0x47   : > { %12619 = vmatprep.subr.bf16.mxu1 %v19307_v1 }
  0x49   : > { %12516 = vmatmul.mubr.bf16.gmra.mrb[8].mxu1 %v14164_v14 }
  0x4a   : > { %12519 = vmatprep.mubr.msk.bf16.mxu1 %vm14761_vm0, %v19307_v1 }
  0x51   : > { %12520 = vmatmul.mubr.bf16.gmra.mrb[12].mxu1 %v14165_v15 }
  0x52   : > { %12523 = vmatprep.mubr.msk.bf16.mxu1 %vm14761_vm0, %v19307_v1 }
  0x59   : > { %12524 = vmatmul.mubr.bf16.gmra.mrb[16].mxu1 %v14166_v16 }
  0x5a   : > { %12527 = vmatprep.mubr.msk.bf16.mxu1 %vm14761_vm0, %v19307_v1 }
  0x61   : > { %12528 = vmatmul.mubr.bf16.gmra.mrb[20].mxu1 %v14167_v17 }
  0x62   : > { %12531 = vmatprep.mubr.msk.bf16.mxu1 %vm14761_vm0, %v19307_v1 }
  0x69   : > { %12532 = vmatmul.mubr.bf16.gmra.mrb[24].mxu1 %v14168_v18 }
  0x6a   : > { %12535 = vmatprep.mubr.msk.bf16.mxu1 %vm14761_vm0, %v19307_v1 }
  0x71   : > { %12536 = vmatmul.mubr.bf16.gmra.mrb[28].mxu1 %v14169_v19 }
  0x72   : > { %12539 = vmatprep.mubr.msk.bf16.mxu1 %vm14761_vm0, %v19307_v1 }
  0x79   : > { %12540 = vmatmul.mubr.bf16.gmra.mrb[32].mxu1 %v14170_v20  ;;  %v14185_v20 = vld [vmem:[%s19294_s3] sm:$0xff]  }
  0x7a   : > { %12543 = vmatprep.mubr.msk.bf16.mxu1 %vm14761_vm0, %v19307_v1 }
  0x81   : > { %12544 = vmatmul.mubr.bf16.gmra.mrb[36].mxu1 %v14171_v21 }
  0x82   : > { %12547 = vmatprep.mubr.msk.bf16.mxu1 %vm14761_vm0, %v19307_v1 }
  0x89   : > { %12548 = vmatmul.mubr.bf16.gmra.mrb[40].mxu1 %v14172_v22 }
  0x8a   : > { %12551 = vmatprep.mubr.msk.bf16.mxu1 %vm14761_vm0, %v19307_v1 }
  0x91   : > { %12552 = vmatmul.mubr.bf16.gmra.mrb[44].mxu1 %v14173_v23 }
  0x92   : > { %12555 = vmatprep.mubr.msk.bf16.mxu1 %vm14761_vm0, %v19307_v1 }
  0x99   : > { %12556 = vmatmul.mubr.bf16.gmra.mrb[48].mxu1 %v14174_v24 }
  0x9a   : > { %12567 = vmatprep.mubr.msk.bf16.mxu1 %vm14761_vm0, %v19307_v1 }
 0x10c   : > { %v636_v32 = vpop.f32.mrb[0].mxu1 }
 0x10d   : > { %v637_v33 = vadd.f32 %v15019_v31, %v636_v32  ;;  %v12509_v34 = vpop.f32.mrb[1].mxu1 }
 0x10e   : > { %v639_v35 = vpop.f32.mrb[2].mxu1 }
 0x10f   : > { %v738_v36 = vmax.f32 %v637_v33, 0.0  ;;  %v640_v37 = vadd.f32 %v15019_v31, %v639_v35  ;;  %v12510_v38 = vpop.f32.mrb[3].mxu1 }
 0x111   : > { %v11983_v39 = vpack.c.bf16 %v738_v36, %v738_v36  ;;  %v739_v40 = vmax.f32 %v640_v37, 0.0 }
 0x113   : > { %864 = vst.msk [vmem:[#allocation2] sm:$0xf] %vm414_vm1, %v11983_v39  ;;  %v11984_v41 = vpack.c.bf16 %v739_v40, %v739_v40 }
 0x114   : > { %v644_v42 = vpop.f32.mrb[4].mxu1 }
 0x115   : > { %865 = vst.msk [vmem:[#allocation2 + $0x4] sm:$0xf] %vm414_vm1, %v11984_v41  ;;  %v645_v43 = vadd.f32 %v15019_v31, %v644_v42  ;;  %v12513_v44 = vpop.f32.mrb[5].mxu1 }
 0x116   : > { %v647_v45 = vpop.f32.mrb[6].mxu1 }
 0x117   : > { %v740_v46 = vmax.f32 %v645_v43, 0.0  ;;  %v648_v47 = vadd.f32 %v15019_v31, %v647_v45  ;;  %v12514_v48 = vpop.f32.mrb[7].mxu1 }
 0x119   : > { %v11985_v49 = vpack.c.bf16 %v740_v46, %v740_v46  ;;  %v741_v50 = vmax.f32 %v648_v47, 0.0 }
 0x11a   : > { %v889_v53 = vld [vmem:[#allocation2] sm:$0xf] }
 0x11b   : > { %866 = vst.msk [vmem:[#allocation2 + $0x8] sm:$0xf] %vm414_vm1, %v11985_v49  ;;  %v11986_v51 = vpack.c.bf16 %v741_v50, %v741_v50  ;;  %v14209_v50 = vld [vmem:[%s19294_s3 + $0x10] sm:$0xff]  }
 0x11c   : > { %v652_v52 = vpop.f32.mrb[8].mxu1  ;;  %v890_v54 = vld [vmem:[#allocation2 + $0x4] sm:$0xf] }
 0x11d   : > { %867 = vst.msk [vmem:[#allocation2 + $0xc] sm:$0xf] %vm414_vm1, %v11986_v51  ;;  %v653_v55 = vadd.f32 %v15019_v31, %v652_v52  ;;  %v12517_v56 = vpop.f32.mrb[9].mxu1  ;;  %v15030_v57 = vcombine.low %v889_v53, %v890_v54  ;;  %v1752_v9 = vld [vmem:[#allocation2 + $0x4] sm:$0x8] }
 0x11e   : > { %v655_v58 = vpop.f32.mrb[10].mxu1 }
 0x11f   : > { %v742_v59 = vmax.f32 %v653_v55, 0.0  ;;  %v656_v60 = vadd.f32 %v15019_v31, %v655_v58  ;;  %v12518_v61 = vpop.f32.mrb[11].mxu1  ;;  %v999_v62 = vshll.u32 %v15030_v57, 16  ;;  %v997_v11 = vshrl.u32 %v15030_v57, 16 }
 0x121   : > { %v11987_v63 = vpack.c.bf16 %v742_v59, %v742_v59  ;;  %v743_v0 = vmax.f32 %v656_v60, 0.0  ;;  %v1001_v3 = vrot.slane %v999_v62, 1  ;;  %v14193_v60 = vld [vmem:[%s19294_s3 + $0x100] sm:$0xff]  }
 0x122   : > { %v15035_v4 = vld [vmem:[#allocation2 + $0x8] sm:$0xf] }
 0x123   : > { %868 = vst.msk [vmem:[#allocation2 + $0x10] sm:$0xf] %vm414_vm1, %v11987_v63  ;;  %v11988_v2 = vpack.c.bf16 %v743_v0, %v743_v0  ;;  %19378 = vst [vmem:[#allocation9_spill] sm:$0xff] %v15035_v4  ;;  %v15044_v17 = vcombine.low %v1752_v9, %v15035_v4  ;;  %v1002_v18 = vor.u32 %v1001_v3, %v997_v11  ;;  %v14216_v3 = vld [vmem:[%s19294_s3 + $0x18] sm:$0xff]  }
 0x124   : > { %v660_v5 = vpop.f32.mrb[12].mxu1  ;;  %v14181_v6 = vld [vmem:[#allocation2 + $0x8] sm:$0xff]  }
 0x125   : > { %869 = vst.msk [vmem:[#allocation2 + $0x14] sm:$0xf] %vm414_vm1, %v11988_v2  ;;  %v661_v7 = vadd.f32 %v15019_v31, %v660_v5  ;;  %v12521_v8 = vpop.f32.mrb[13].mxu1  ;;  %v1004_v12 = vshll.u32 %v14181_v6, 16  ;;  %v15040_v13 = vld [vmem:[#allocation2 + $0xc] sm:$0xf] }
 0x126   : > { %v663_v10 = vpop.f32.mrb[14].mxu1  ;;  %19379 = vst [vmem:[#allocation10_spill] sm:$0xff] %v15040_v13  ;;  %v3049_v25 = vld [vmem:[#allocation2 + $0xc] sm:$0xc]  ;;  %v2117_v32 = vshrl.u32 %v15044_v17, 16  ;;  %v2120_v38 = vshll.u32 %v15044_v17, 16 }
 0x127   : > { %v744_v14 = vmax.f32 %v661_v7, 0.0  ;;  %v664_v15 = vadd.f32 %v15019_v31, %v663_v10  ;;  %v12522_v16 = vpop.f32.mrb[15].mxu1  ;;  %v1006_v19 = vrot.slane %v1004_v12, 1  ;;  %v1008_v40 = vshrl.u32 %v14181_v6, 16 }
 0x128   : > { %v15080_v51 = vrot.slane %v2117_v32, 3  ;;  %v15085_v56 = vrot.slane %v2120_v38, 4 }
 0x129   : > { %v11989_v22 = vpack.c.bf16 %v744_v14, %v744_v14  ;;  %v745_v23 = vmax.f32 %v664_v15, 0.0  ;;  %v1007_v24 = vsel %vm995_vm4, %v1002_v18, %v1006_v19  ;;  %v1010_v48 = vor.u32 %v1008_v40, %v1006_v19 }
 0x12a   : > { %12568 = vmatmul.mubr.msk.bf16.vlgmr.msra.gmra.mrb[52].mxu1 %vm1123_vm5, %v1007_v24  ;;  %v15057_v28 = vld [vmem:[#allocation2 + $0x10] sm:$0xf] }
 0x12b   : > { %870 = vst.msk [vmem:[#allocation2 + $0x18] sm:$0xf] %vm414_vm1, %v11989_v22  ;;  %v11990_v26 = vpack.c.bf16 %v745_v23, %v745_v23  ;;  %v15059_v29 = vld [vmem:[#allocation2 + $0x10] sm:$0xf]  ;;  %12571 = vmatprep.mubr.msk.bf16.mxu1 %vm14761_vm0, %v19307_v1  ;;  %12620 = vmatpush3.bf16.msra.mxu1 %v14185_v20  ;;  %v11242_v35 = vcombine.low %v3049_v25, %v15057_v28 }
 0x12c   : > { %19380 = vst [vmem:[#allocation11_spill] sm:$0xff] %v15059_v29  ;;  %v668_v33 = vpop.f32.mrb[16].mxu1  ;;  %v15064_v34 = vld [vmem:[#allocation2 + $0x10] sm:$0xff]   ;;  %12621 = vmatprep.subr.bf16.mxu1 %v19307_v1  ;;  %v15074_v42 = vcombine.low %v15040_v13, %v15059_v29 }
 0x12d   : > { %871 = vst.msk [vmem:[#allocation2 + $0x1c] sm:$0xf] %vm414_vm1, %v11990_v26  ;;  %v669_v36 = vadd.f32 %v15019_v31, %v668_v33  ;;  %v12525_v37 = vpop.f32.mrb[17].mxu1  ;;  %v1012_v41 = vshll.u32 %v15064_v34, 16  ;;  %v14187_v46 = vld [vmem:[#allocation2 + $0xc] sm:$0xfc]  }
 0x12e   : > { %v671_v39 = vpop.f32.mrb[18].mxu1  ;;  %v3151_v47 = vshrl.u32 %v11242_v35, 16  ;;  %v15082_v52 = vld [vmem:[#allocation2 + $0x14] sm:$0xf]  ;;  %v3154_v55 = vshll.u32 %v11242_v35, 16  ;;  %v2125_v61 = vshrl.u32 %v15074_v42, 16 }
 0x12f   : > { %v746_v43 = vmax.f32 %v669_v36, 0.0  ;;  %v672_v44 = vadd.f32 %v15019_v31, %v671_v39  ;;  %v12526_v45 = vpop.f32.mrb[19].mxu1  ;;  %v1014_v49 = vrot.slane %v1012_v41, 1  ;;  %12622 = vmatpush3.bf16.msra.mxu1 %v14196_v27  ;;  %19381 = vst [vmem:[#allocation12_spill] sm:$0xff] %v15082_v52  ;;  %v2800_v63 = vrot.slane %v14187_v46, 2 }
 0x130   : > { %12623 = vmatprep.subr.bf16.mxu1 %v19307_v1  ;;  %v3153_v2 = vrot.slane %v3151_v47, 2  ;;  %v2128_v9 = vshll.u32 %v15074_v42, 16  ;;  %v3156_v12 = vrot.slane %v3154_v55, 3  ;;  %v1016_v19 = vshrl.u32 %v15064_v34, 16  ;;  %v14195_v34 = vld [vmem:[%s19294_s3 + $0x108] sm:$0xff]   ;;  %v14199_v55 = vld [vmem:[%s19294_s3 + $0x110] sm:$0xff]  }
 0x131   : > { %v11991_v53 = vpack.c.bf16 %v746_v43, %v746_v43  ;;  %v747_v54 = vmax.f32 %v672_v44, 0.0  ;;  %v1015_v58 = vsel %vm995_vm4, %v1010_v48, %v1014_v49  ;;  %v2127_v22 = vrot.slane %v2125_v61, 3 }
 0x132   : > { %v15088_v59 = vld [vmem:[#allocation2 + $0x14] sm:$0xff]   ;;  %12572 = vmatmul.mubr.msk.bf16.gmra.mrb[56].mxu1 %vm1123_vm5, %v1015_v58  ;;  %v1018_v33 = vor.u32 %v1016_v19, %v1014_v49  ;;  %v2123_v36 = vor.u32 %v15085_v56, %v15080_v51  ;;  %v2130_v37 = vrot.slane %v2128_v9, 4  ;;  %v3157_v41 = vor.u32 %v3156_v12, %v3153_v2 }
 0x133   : > { %872 = vst.msk [vmem:[#allocation2 + $0x20] sm:$0xf] %vm414_vm1, %v11991_v53  ;;  %v11992_v62 = vpack.c.bf16 %v747_v54, %v747_v54  ;;  %v15096_v0 = vld [vmem:[#allocation2 + $0x14] sm:$0xff]   ;;  %v2801_v7 = vrot.slane %v15088_v59, 2  ;;  %12575 = vmatprep.mubr.msk.bf16.mxu1 %vm14761_vm0, %v19307_v1  ;;  %12624 = vmatpush3.bf16.msra.mxu1 %v14209_v50 }
 0x134   : > { %v676_v6 = vpop.f32.mrb[20].mxu1  ;;  %v15106_v8 = vld [vmem:[#allocation2 + $0x18] sm:$0xff]   ;;  %v3159_v14 = vshrl.u32 %v15096_v0, 16  ;;  %v3162_v15 = vshll.u32 %v15096_v0, 16  ;;  %12625 = vmatprep.subr.bf16.mxu1 %v19307_v1  ;;  %v15137_v46 = vor.u32 %v2130_v37, %v2127_v22 }
 0x135   : > { %873 = vst.msk [vmem:[#allocation2 + $0x24] sm:$0xf] %vm414_vm1, %v11992_v62  ;;  %v677_v10 = vadd.f32 %v15019_v31, %v676_v6  ;;  %v12529_v11 = vpop.f32.mrb[21].mxu1  ;;  %v2802_v18 = vsel %vm2799_vm6, %v2800_v63, %v2801_v7  ;;  %v1020_v20 = vshll.u32 %v15106_v8, 16  ;;  %v15121_v32 = vld [vmem:[#allocation2 + $0x18] sm:$0xf] }
 0x136   : > { %v679_v16 = vpop.f32.mrb[22].mxu1  ;;  %12928 = vmatmul.mubr.msk.bf16.vlgmr.msra.gmra.mrb[0].mxu0 %vm1123_vm5, %v2802_v18  ;;  %v3161_v26 = vrot.slane %v3159_v14, 2  ;;  %v3164_v27 = vrot.slane %v3162_v15, 3  ;;  %19382 = vst [vmem:[#allocation13_spill] sm:$0xff] %v15121_v32  ;;  %v15130_v38 = vld [vmem:[#allocation2 + $0x1c] sm:$0xf]  ;;  %v15141_v47 = vcombine.low %v15082_v52, %v15121_v32  ;;  %v15159_v56 = vsel %vm2115_vm7, %v2123_v36, %v15137_v46 }
 0x137   : > { %v748_v23 = vmax.f32 %v677_v10, 0.0  ;;  %v680_v24 = vadd.f32 %v15019_v31, %v679_v16  ;;  %v12530_v25 = vpop.f32.mrb[23].mxu1  ;;  %v1022_v35 = vrot.slane %v1020_v20, 1  ;;  %12931 = vmatprep.mubr.msk.bf16.mxu0 %vm14761_vm0, %v19307_v1  ;;  %13040 = vmatpush3.bf16.msra.mxu0 %v14193_v60  ;;  %19383 = vst [vmem:[#allocation14_spill] sm:$0xff] %v15130_v38  ;;  %v1024_v6 = vshrl.u32 %v15106_v8, 16  ;;  %v14201_v59 = vld [vmem:[%s19294_s3 + $0x118] sm:$0xff]  }
 0x138   : > { %13041 = vmatprep.subr.bf16.mxu0 %v19307_v1  ;;  %v3165_v43 = vor.u32 %v3164_v27, %v3161_v26  ;;  %12626 = vmatpush3.bf16.msra.mxu1 %v14216_v3  ;;  %v2134_v10 = vshrl.u32 %v15141_v47, 16 }
 0x139   : > { %v11993_v39 = vpack.c.bf16 %v748_v23, %v748_v23  ;;  %v749_v40 = vmax.f32 %v680_v24, 0.0  ;;  %v1023_v44 = vsel %vm995_vm4, %v1018_v33, %v1022_v35  ;;  %12679 = vmatprep.subr.bf16.mxu1 %v19307_v1  ;;  %v1026_v18 = vor.u32 %v1024_v6, %v1022_v35 }
 0x13a   : > { %v15134_v45 = vld [vmem:[#allocation2 + $0x1c] sm:$0xff]   ;;  %12576 = vmatmul.mubr.msk.bf16.gmra.mrb[60].mxu1 %vm1123_vm5, %v1023_v44  ;;  %v15162_v58 = vsel %vm3149_vm8, %v3157_v41, %v3165_v43 }
 0x13b   : > { %874 = vst.msk [vmem:[#allocation2 + $0x28] sm:$0xf] %vm414_vm1, %v11993_v39  ;;  %v11994_v49 = vpack.c.bf16 %v749_v40, %v749_v40  ;;  %v15147_v50 = vld [vmem:[#allocation2 + $0x1c] sm:$0xff]   ;;  %v2803_v53 = vrot.slane %v15134_v45, 2  ;;  %12579 = vmatprep.mubr.msk.bf16.mxu1 %vm14761_vm0, %v19307_v1  ;;  %13042 = vmatpush3.bf16.msra.mxu0 %v14195_v34  ;;  %19384 = vst [vmem:[#allocation15_spill] sm:$0xff] %v15162_v58  ;;  %v2136_v34 = vrot.slane %v2134_v10, 3 }
 0x13c   : > { %v684_v51 = vpop.f32.mrb[24].mxu1  ;;  %v15152_v54 = vld [vmem:[#allocation2 + $0x20] sm:$0xff]   ;;  %13043 = vmatprep.subr.bf16.mxu0 %v19307_v1  ;;  %v3168_v62 = vshrl.u32 %v15147_v50, 16  ;;  %v3171_v63 = vshll.u32 %v15147_v50, 16 }
 0x13d   : > { %875 = vst.msk [vmem:[#allocation2 + $0x2c] sm:$0xf] %vm414_vm1, %v11994_v49  ;;  %v685_v60 = vadd.f32 %v15019_v31, %v684_v51  ;;  %v12533_v61 = vpop.f32.mrb[25].mxu1  ;;  %v2804_v3 = vsel %vm2799_vm6, %v2801_v7, %v2803_v53  ;;  %v1028_v9 = vshll.u32 %v15152_v54, 16  ;;  %v2137_v7 = vshll.u32 %v15141_v47, 16 }
 0x13e   : > { %v687_v2 = vpop.f32.mrb[26].mxu1  ;;  %12932 = vmatmul.mubr.msk.bf16.gmra.mrb[4].mxu0 %vm1123_vm5, %v2804_v3  ;;  %v3170_v15 = vrot.slane %v3168_v62, 2  ;;  %v3173_v16 = vrot.slane %v3171_v63, 3  ;;  %v15183_v20 = vld [vmem:[#allocation2 + $0x24] sm:$0xf]  ;;  %v1032_v62 = vshrl.u32 %v15152_v54, 16 }
 0x13f   : > { %v750_v11 = vmax.f32 %v685_v60, 0.0  ;;  %v688_v12 = vadd.f32 %v15019_v31, %v687_v2  ;;  %v12534_v14 = vpop.f32.mrb[27].mxu1  ;;  %v1030_v19 = vrot.slane %v1028_v9, 1  ;;  %12935 = vmatprep.mubr.msk.bf16.mxu0 %vm14761_vm0, %v19307_v1  ;;  %13044 = vmatpush3.bf16.msra.mxu0 %v14199_v55  ;;  %19385 = vst [vmem:[#allocation16_spill] sm:$0xff] %v15183_v20  ;;  %v15186_v25 = vld [vmem:[#allocation2 + $0x20] sm:$0xf] }
 0x140   : > { %13045 = vmatprep.subr.bf16.mxu0 %v19307_v1  ;;  %v3174_v24 = vor.u32 %v3173_v16, %v3170_v15  ;;  %19386 = vst [vmem:[#allocation17_spill] sm:$0xff] %v15186_v25  ;;  %v2139_v44 = vrot.slane %v2137_v7, 4  ;;  %v15211_v55 = vcombine.low %v15130_v38, %v15186_v25 }
 0x141   : > { %v11995_v22 = vpack.c.bf16 %v750_v11, %v750_v11  ;;  %v751_v23 = vmax.f32 %v688_v12, 0.0  ;;  %v1031_v26 = vsel %vm995_vm4, %v1026_v18, %v1030_v19  ;;  %v1034_v12 = vor.u32 %v1032_v62, %v1030_v19 }
 0x142   : > { %v15189_v27 = vld [vmem:[#allocation2 + $0x24] sm:$0xff]   ;;  %12580 = vmatmul.mubr.msk.bf16.gmra.mrb[64].mxu1 %vm1123_vm5, %v1031_v26  ;;  %v15198_v37 = vsel %vm3149_vm8, %v3165_v43, %v3174_v24  ;;  %v2146_v26 = vshll.u32 %v15211_v55, 16 }
 0x143   : > { %876 = vst.msk [vmem:[#allocation2 + $0x30] sm:$0xf] %vm414_vm1, %v11995_v22  ;;  %v11996_v33 = vpack.c.bf16 %v751_v23, %v751_v23  ;;  %v15193_v35 = vld [vmem:[#allocation2 + $0x24] sm:$0xff]   ;;  %19387 = vst [vmem:[#allocation18_spill] sm:$0xff] %v15198_v37  ;;  %v2805_v40 = vrot.slane %v15189_v27, 2  ;;  %12583 = vmatprep.mubr.msk.bf16.mxu1 %vm14761_vm0, %v19307_v1  ;;  %13046 = vmatpush3.bf16.msra.mxu0 %v14201_v59  ;;  %v2143_v59 = vshrl.u32 %v15211_v55, 16 }
 0x144   : > { %v692_v39 = vpop.f32.mrb[28].mxu1  ;;  %v15203_v41 = vld [vmem:[#allocation2 + $0x28] sm:$0xff]   ;;  %v3177_v51 = vshrl.u32 %v15193_v35, 16  ;;  %v3180_v43 = vshll.u32 %v15193_v35, 16  ;;  %13159 = vmatprep.subr.bf16.mxu0 %v19307_v1 }
 0x145   : > { %877 = vst.msk [vmem:[#allocation2 + $0x34] sm:$0xf] %vm414_vm1, %v11996_v33  ;;  %v693_v45 = vadd.f32 %v15019_v31, %v692_v39  ;;  %v12537_v49 = vpop.f32.mrb[29].mxu1  ;;  %v2806_v61 = vsel %vm2799_vm6, %v2803_v53, %v2805_v40  ;;  %v1036_v63 = vshll.u32 %v15203_v41, 16  ;;  %v15219_v11 = vld [vmem:[#allocation2 + $0x2c] sm:$0xf]  ;;  %v2140_v53 = vor.u32 %v2139_v44, %v2136_v34 }
 0x146   : > { %v695_v60 = vpop.f32.mrb[30].mxu1  ;;  %12936 = vmatmul.mubr.msk.bf16.gmra.mrb[8].mxu0 %vm1123_vm5, %v2806_v61  ;;  %v3179_v9 = vrot.slane %v3177_v51, 2  ;;  %v3182_v10 = vrot.slane %v3180_v43, 3  ;;  %19388 = vst [vmem:[#allocation19_spill] sm:$0xff] %v15219_v11  ;;  %v15226_v7 = vld [vmem:[#allocation2 + $0x28] sm:$0xf] }
 0x147   : > { %v752_v2 = vmax.f32 %v693_v45, 0.0  ;;  %v696_v3 = vadd.f32 %v15019_v31, %v695_v60  ;;  %v12538_v6 = vpop.f32.mrb[31].mxu1  ;;  %v1038_v14 = vrot.slane %v1036_v63, 1  ;;  %12939 = vmatprep.mubr.msk.bf16.mxu0 %vm14761_vm0, %v19307_v1  ;;  %19389 = vst [vmem:[#allocation20_spill] sm:$0xff] %v15226_v7  ;;  %v15241_v39 = vcombine.low %v15183_v20, %v15226_v7  ;;  %v3490_v60 = vld [vmem:[#allocation2 + $0xc] sm:$0x8] }
 0x148   : > { %v15223_v18 = vor.u32 %v3182_v10, %v3179_v9  ;;  %v15245_v44 = vsel %vm2115_vm7, %v15137_v46, %v2140_v53  ;;  %v2145_v61 = vrot.slane %v2143_v59, 3  ;;  %v1040_v46 = vshrl.u32 %v15203_v41, 16 }
 0x149   : > { %v11997_v15 = vpack.c.bf16 %v752_v2, %v752_v2  ;;  %v753_v16 = vmax.f32 %v696_v3, 0.0  ;;  %v1039_v22 = vsel %vm995_vm4, %v1034_v12, %v1038_v14  ;;  %v2148_v2 = vrot.slane %v2146_v26, 4 }
 0x14a   : > { %v15229_v23 = vld [vmem:[#allocation2 + $0x2c] sm:$0xff]   ;;  %12584 = vmatmul.mubr.msk.bf16.gmra.mrb[68].mxu1 %vm1123_vm5, %v1039_v22  ;;  %v15249_v45 = vsel %vm3149_vm8, %v3174_v24, %v15223_v18  ;;  %v11280_v10 = vcombine.low %v3490_v60, %v15057_v28  ;;  %v1042_v12 = vor.u32 %v1040_v46, %v1038_v14  ;;  %v19309_v60 = vrot.slane %v15193_v35, 3 }
 0x14b   : > { %19390 = vst [vmem:[#allocation21_spill] sm:$0xff] %v15229_v23  ;;  %878 = vst.msk [vmem:[#allocation2 + $0x38] sm:$0xf] %vm414_vm1, %v11997_v15  ;;  %v11998_v27 = vpack.c.bf16 %v753_v16, %v753_v16  ;;  %v19306_v34 = vrot.slane %v15229_v23, 2  ;;  %12587 = vmatprep.mubr.msk.bf16.mxu1 %vm14761_vm0, %v19307_v1  ;;  %v2152_v15 = vshrl.u32 %v15241_v39, 16  ;;  %v2149_v26 = vor.u32 %v2148_v2, %v2145_v61 }
 0x14c   : > { %v700_v33 = vpop.f32.mrb[32].mxu1  ;;  %19391 = vst [vmem:[#allocation22_spill] sm:$0xff] %v15249_v45  ;;  %v15253_v43 = vld [vmem:[#allocation2 + $0x30] sm:$0xff]  }
 0x14d   : > { %879 = vst.msk [vmem:[#allocation2 + $0x3c] sm:$0xf] %vm414_vm1, %v11998_v27  ;;  %v701_v49 = vadd.f32 %v15019_v31, %v700_v33  ;;  %v12541_v51 = vpop.f32.mrb[33].mxu1  ;;  %v2808_v63 = vsel %vm2799_vm6, %v2805_v40, %v19306_v34  ;;  %v1044_v9 = vshll.u32 %v15253_v43, 16  ;;  %v15266_v40 = vld [vmem:[#allocation2 + $0x34] sm:$0xf] }
 0x14e   : > { %v703_v62 = vpop.f32.mrb[34].mxu1  ;;  %12940 = vmatmul.mubr.msk.bf16.gmra.mrb[12].mxu0 %vm1123_vm5, %v2808_v63  ;;  %19392 = vst [vmem:[#allocation23_spill] sm:$0xff] %v15266_v40  ;;  %v15268_v27 = vld [vmem:[#allocation2 + $0x30] sm:$0xf]  ;;  %v3504_v33 = vrot.slane %v15096_v0, 3  ;;  %v3503_v51 = vrot.slane %v11280_v10, 3  ;;  %v15280_v0 = vsel %vm2115_vm7, %v2140_v53, %v2149_v26 }
 0x14f   : > { %v754_v3 = vmax.f32 %v701_v49, 0.0  ;;  %v704_v24 = vadd.f32 %v15019_v31, %v703_v62  ;;  %v12542_v6 = vpop.f32.mrb[35].mxu1  ;;  %13047 = vmatprep.mubr.msk.bf16.mxu0 %vm14761_vm0, %v19307_v1  ;;  %v1046_v22 = vrot.slane %v1044_v9, 1  ;;  %19393 = vst [vmem:[#allocation24_spill] sm:$0xff] %v15268_v27  ;;  %v2155_v49 = vshll.u32 %v15241_v39, 16  ;;  %19394 = vst [vmem:[#allocation25_spill] sm:$0xff] %v15280_v0 }
 0x150   : > { %v2154_v61 = vrot.slane %v2152_v15, 3  ;;  %v3505_v6 = vsel %vm1852_vm9, %v3503_v51, %v3504_v33  ;;  %v1048_v9 = vshrl.u32 %v15253_v43, 16  ;;  %v15291_v53 = vcombine.low %v15219_v11, %v15268_v27 }
 0x151   : > { %v11999_v16 = vpack.c.bf16 %v754_v3, %v754_v3  ;;  %v755_v59 = vmax.f32 %v704_v24, 0.0  ;;  %v1047_v14 = vsel %vm995_vm4, %v1042_v12, %v1046_v22  ;;  %v2157_v46 = vrot.slane %v2155_v49, 4 }
 0x152   : > { %12588 = vmatmul.mubr.msk.bf16.gmra.mrb[72].mxu1 %vm1123_vm5, %v1047_v14  ;;  %v1050_v49 = vor.u32 %v1048_v9, %v1046_v22  ;;  %v15301_v30 = vld [vmem:[#allocation2 + $0x38] sm:$0xf] }
 0x153   : > { %880 = vst.msk [vmem:[#allocation2 + $0x40] sm:$0xf] %vm414_vm1, %v11999_v16  ;;  %v12000_v28 = vpack.c.bf16 %v755_v59, %v755_v59  ;;  %12591 = vmatprep.mubr.msk.bf16.mxu1 %vm14761_vm0, %v19307_v1  ;;  %v2158_v14 = vor.u32 %v2157_v46, %v2154_v61  ;;  %19396 = vst [vmem:[#allocation27_spill] sm:$0xff] %v15301_v30  ;;  %v2164_v61 = vshll.u32 %v15291_v53, 16 }
 0x154   : > { %v708_v62 = vpop.f32.mrb[36].mxu1  ;;  %v15277_v63 = vld [vmem:[#allocation2 + $0x38] sm:$0xff]  }
 0x155   : > { %881 = vst.msk [vmem:[#allocation2 + $0x44] sm:$0xf] %vm414_vm1, %v12000_v28  ;;  %v709_v2 = vadd.f32 %v15019_v31, %v708_v62  ;;  %v12545_v3 = vpop.f32.mrb[37].mxu1  ;;  %v1052_v10 = vshll.u32 %v15277_v63, 16  ;;  %v15295_v59 = vld [vmem:[#allocation2 + $0x3c] sm:$0xf] }
 0x156   : > { %v711_v24 = vpop.f32.mrb[38].mxu1  ;;  %13048 = vmatmul.mubr.msk.bf16.vlgmr.msra.gmra.mrb[16].mxu0 %vm1123_vm5, %v3505_v6  ;;  %19395 = vst [vmem:[#allocation26_spill] sm:$0xff] %v15295_v59  ;;  %v15299_v3 = vld [vmem:[#allocation2 + $0x64] sm:$0xff]   ;;  %v2161_v6 = vshrl.u32 %v15291_v53, 16  ;;  %v1056_v22 = vshrl.u32 %v15277_v63, 16 }
 0x157   : > { %v756_v12 = vmax.f32 %v709_v2, 0.0  ;;  %v712_v15 = vadd.f32 %v15019_v31, %v711_v24  ;;  %v12546_v16 = vpop.f32.mrb[39].mxu1  ;;  %v1054_v28 = vrot.slane %v1052_v10, 1  ;;  %13051 = vmatprep.mubr.msk.bf16.mxu0 %vm14761_vm0, %v19307_v1  ;;  %v3506_v24 = vrot.slane %v15147_v50, 3 }
 0x159   : > { %v12001_v51 = vpack.c.bf16 %v756_v12, %v756_v12  ;;  %v757_v62 = vmax.f32 %v712_v15, 0.0  ;;  %v1055_v2 = vsel %vm995_vm4, %v1050_v49, %v1054_v28  ;;  %v15313_v12 = vld [vmem:[#allocation2 + $0x2c] sm:$0xff]   ;;  %v15316_v15 = vsel %vm2115_vm7, %v2149_v26, %v2158_v14 }
 0x15a   : > { %12592 = vmatmul.mubr.msk.bf16.gmra.mrb[76].mxu1 %vm1123_vm5, %v1055_v2  ;;  %19397 = vst [vmem:[#allocation28_spill] sm:$0xff] %v15316_v15  ;;  %v3249_v49 = vshrl.u32 %v15299_v3, 16  ;;  %v3507_v34 = vsel %vm1852_vm9, %v3504_v33, %v3506_v24  ;;  %v15329_v19 = vld [vmem:[#allocation2 + $0x40] sm:$0xf]  ;;  %v3186_v33 = vshrl.u32 %v15313_v12, 16 }
 0x15b   : > { %882 = vst.msk [vmem:[#allocation2 + $0x48] sm:$0xf] %vm414_vm1, %v12001_v51  ;;  %v12002_v9 = vpack.c.bf16 %v757_v62, %v757_v62  ;;  %12595 = vmatprep.mubr.msk.bf16.mxu1 %vm14761_vm0, %v19307_v1  ;;  %v2163_v51 = vrot.slane %v2161_v6, 3  ;;  %v2166_v62 = vrot.slane %v2164_v61, 4  ;;  %19398 = vst [vmem:[#allocation29_spill] sm:$0xff] %v15329_v19  ;;  %v1058_v6 = vor.u32 %v1056_v22, %v1054_v28 }
 0x15c   : > { %v716_v46 = vpop.f32.mrb[40].mxu1  ;;  %v15311_v10 = vld [vmem:[#allocation2 + $0x40] sm:$0xff]   ;;  %v15346_v28 = vcombine.low %v15295_v59, %v15329_v19 }
 0x15d   : > { %883 = vst.msk [vmem:[#allocation2 + $0x4c] sm:$0xf] %vm414_vm1, %v12002_v9  ;;  %v717_v50 = vadd.f32 %v15019_v31, %v716_v46  ;;  %v12549_v16 = vpop.f32.mrb[41].mxu1  ;;  %v1060_v26 = vshll.u32 %v15311_v10, 16  ;;  %v15331_v36 = vld [vmem:[#allocation2 + $0x44] sm:$0xf]  ;;  %v15336_v48 = vor.u32 %v2166_v62, %v2163_v51 }
 0x15e   : > { %v719_v2 = vpop.f32.mrb[42].mxu1  ;;  %13052 = vmatmul.mubr.msk.bf16.gmra.mrb[20].mxu0 %vm1123_vm5, %v3507_v34  ;;  %19399 = vst [vmem:[#allocation30_spill] sm:$0xff] %v15331_v36  ;;  %v15341_v34 = vcombine.low %v15266_v40, %v15301_v30  ;;  %v1064_v45 = vshrl.u32 %v15311_v10, 16  ;;  %v2179_v58 = vshrl.u32 %v15346_v28, 16  ;;  %v2182_v40 = vshll.u32 %v15346_v28, 16 }
 0x15f   : > { %v758_v9 = vmax.f32 %v717_v50, 0.0  ;;  %v720_v46 = vadd.f32 %v15019_v31, %v719_v2  ;;  %v12550_v16 = vpop.f32.mrb[43].mxu1  ;;  %v1062_v61 = vrot.slane %v1060_v26, 1  ;;  %13055 = vmatprep.mubr.msk.bf16.mxu0 %vm14761_vm0, %v19307_v1  ;;  %v3189_v2 = vshll.u32 %v15313_v12, 16  ;;  %v15352_v26 = vld [vmem:[#allocation2 + $0x34] sm:$0xff]  }
 0x160   : > { %v2181_v11 = vrot.slane %v2179_v58, 3 }
 0x161   : > { %v12003_v5 = vpack.c.bf16 %v758_v9, %v758_v9  ;;  %v759_v50 = vmax.f32 %v720_v46, 0.0  ;;  %v1063_v16 = vsel %vm995_vm4, %v1058_v6, %v1062_v61  ;;  %v15354_v9 = vrot.slane %v3249_v49, 2 }
 0x162   : > { %12596 = vmatmul.mubr.msk.bf16.gmra.mrb[80].mxu1 %vm1123_vm5, %v1063_v16  ;;  %v3509_v6 = vsel %vm1852_vm9, %v3506_v24, %v19309_v60  ;;  %v15363_v22 = vld [vmem:[#allocation2 + $0x48] sm:$0xf]  ;;  %v19402_v46 = vmov 0.0   ;;  %v3188_v16 = vrot.slane %v3186_v33, 2  ;;  %v3191_v62 = vrot.slane %v3189_v2, 3 }
 0x163   : > { %884 = vst.msk [vmem:[#allocation2 + $0x50] sm:$0xf] %vm414_vm1, %v12003_v5  ;;  %v12004_v51 = vpack.c.bf16 %v759_v50, %v759_v50  ;;  %19400 = vst [vmem:[#allocation31_spill] sm:$0xff] %v15363_v22  ;;  %v15367_v5 = vsel %vm2115_vm7, %v2158_v14, %v15336_v48  ;;  %12599 = vmatprep.mubr.msk.bf16.mxu1 %vm14761_vm0, %v19402_v46  ;;  %v2170_v24 = vshrl.u32 %v15341_v34, 16  ;;  %v2173_v14 = vshll.u32 %v15341_v34, 16  ;;  %v15418_v58 = vld [vmem:[#allocation2 + $0x44] sm:$0xff]  }
 0x164   : > { %v724_v21 = vpop.f32.mrb[44].mxu1  ;;  %v15361_v1 = vld [vmem:[#allocation2 + $0x48] sm:$0xff]   ;;  %19401 = vst [vmem:[#allocation32_spill] sm:$0xff] %v15367_v5  ;;  %v3195_v33 = vshrl.u32 %v15352_v26, 16  ;;  %v15383_v2 = vcombine.low %v15331_v36, %v15363_v22  ;;  %v1066_v19 = vor.u32 %v1064_v45, %v1062_v61  ;;  %v2184_v61 = vrot.slane %v2182_v40, 4 }
 0x165   : > { %885 = vst.msk [vmem:[#allocation2 + $0x54] sm:$0xf] %vm414_vm1, %v12004_v51  ;;  %v725_v49 = vadd.f32 %v15019_v31, %v724_v21  ;;  %v12553_v50 = vpop.f32.mrb[45].mxu1  ;;  %v1068_v37 = vshll.u32 %v15361_v1, 16  ;;  %v15385_v23 = vld [vmem:[#allocation2 + $0x4c] sm:$0xf]  ;;  %v3192_v32 = vor.u32 %v3191_v62, %v3188_v16 }
 0x166   : > { %v727_v60 = vpop.f32.mrb[46].mxu1  ;;  %13056 = vmatmul.mubr.msk.bf16.gmra.mrb[24].mxu0 %vm1123_vm5, %v3509_v6  ;;  %19403 = vst [vmem:[#allocation33_spill] sm:$0xff] %v15385_v23  ;;  %v2172_v6 = vrot.slane %v2170_v24, 3  ;;  %v2175_v36 = vrot.slane %v2173_v14, 4  ;;  %v2188_v7 = vshrl.u32 %v15383_v2, 16  ;;  %v19406_v45 = vrot.slane %v15193_v35, 3 }
 0x167   : > { %v760_v51 = vmax.f32 %v725_v49, 0.0  ;;  %v728_v21 = vadd.f32 %v15019_v31, %v727_v60  ;;  %v12554_v50 = vpop.f32.mrb[47].mxu1  ;;  %v1070_v59 = vrot.slane %v1068_v37, 1  ;;  %13059 = vmatprep.mubr.msk.bf16.mxu0 %vm14761_vm0, %v19402_v46  ;;  %v3198_v49 = vshll.u32 %v15352_v26, 16 }
 0x168   : > { %v15390_v50 = vld [vmem:[#allocation2 + $0x3c] sm:$0xff]   ;;  %v2190_v22 = vrot.slane %v2188_v7, 3  ;;  %v1072_v25 = vshrl.u32 %v15361_v1, 16  ;;  %v3216_v62 = vshll.u32 %v15418_v58, 16 }
 0x169   : > { %v12005_v30 = vpack.c.bf16 %v760_v51, %v760_v51  ;;  %v761_v60 = vmax.f32 %v728_v21, 0.0  ;;  %v1071_v27 = vsel %vm995_vm4, %v1066_v19, %v1070_v59  ;;  %v2191_v51 = vshll.u32 %v15383_v2, 16 }
 0x16a   : > { %v15399_v21 = vld [vmem:[#allocation2 + $0x50] sm:$0xf]  ;;  %12600 = vmatmul.mubr.msk.bf16.gmra.mrb[84].mxu1 %vm1123_vm5, %v1071_v27  ;;  %v3197_v19 = vrot.slane %v3195_v33, 2  ;;  %v3200_v33 = vrot.slane %v3198_v49, 3  ;;  %v2185_v49 = vor.u32 %v2184_v61, %v2181_v11  ;;  %v1074_v7 = vor.u32 %v1072_v25, %v1070_v59 }
 0x16b   : > { %886 = vst.msk [vmem:[#allocation2 + $0x58] sm:$0xf] %vm414_vm1, %v12005_v30  ;;  %v12006_v37 = vpack.c.bf16 %v761_v60, %v761_v60  ;;  %19404 = vst [vmem:[#allocation34_spill] sm:$0xff] %v15399_v21  ;;  %v15407_v14 = vcombine.low %v15385_v23, %v15399_v21  ;;  %v19405_v60 = vrot.slane %v15313_v12, 3  ;;  %12603 = vmatprep.mubr.msk.bf16.mxu1 %vm14761_vm0, %v19402_v46  ;;  %v2193_v38 = vrot.slane %v2191_v51, 4 }
 0x16c   : > { %v732_v24 = vpop.f32.mrb[48].mxu1  ;;  %v15402_v20 = vld [vmem:[#allocation2 + $0x50] sm:$0xff]   ;;  %v19408_v11 = vrot.slane %v15352_v26, 3  ;;  %v19409_v25 = vrot.slane %v15313_v12, 3 }
 0x16d   : > { %887 = vst.msk [vmem:[#allocation2 + $0x5c] sm:$0xf] %vm414_vm1, %v12006_v37  ;;  %v733_v30 = vadd.f32 %v15019_v31, %v732_v24  ;;  %v12557_v40 = vpop.f32.mrb[49].mxu1  ;;  %v3511_v27 = vsel %vm1852_vm9, %v19406_v45, %v19405_v60  ;;  %v1076_v37 = vshll.u32 %v15402_v20, 16  ;;  %v3204_v31 = vshrl.u32 %v15390_v50, 16  ;;  %v15425_v45 = vld [vmem:[#allocation2 + $0x4c] sm:$0xff]  }
 0x16e   : > { %v735_v23 = vpop.f32.mrb[50].mxu1  ;;  %v3207_v24 = vshll.u32 %v15390_v50, 16  ;;  %13060 = vmatmul.mubr.msk.bf16.gmra.mrb[28].mxu0 %vm1123_vm5, %v3511_v27  ;;  %v2176_v60 = vor.u32 %v2175_v36, %v2172_v6  ;;  %v2197_v52 = vshrl.u32 %v15407_v14, 16  ;;  %v15430_v29 = vld [vmem:[#allocation2 + $0x54] sm:$0xf]  ;;  %v2200_v27 = vshll.u32 %v15407_v14, 16 }
 0x16f   : > { %v762_v40 = vmax.f32 %v733_v30, 0.0  ;;  %v12558_v35 = vpop.f32.mrb[51].mxu1  ;;  %v1078_v23 = vrot.slane %v1076_v37, 1  ;;  %13063 = vmatprep.mubr.msk.bf16.mxu0 %vm14761_vm0, %v19402_v46  ;;  %19407 = vst [vmem:[#allocation35_spill] sm:$0xff] %v15430_v29  ;;  %v3213_v30 = vshrl.u32 %v15418_v58, 16  ;;  %v3513_v59 = vsel %vm1852_vm9, %v19409_v25, %v19408_v11 }
 0x170   : > { %v2194_v35 = vor.u32 %v2193_v38, %v2190_v22  ;;  %v2199_v16 = vrot.slane %v2197_v52, 3  ;;  %v2202_v61 = vrot.slane %v2200_v27, 4  ;;  %v15450_v22 = vsel %vm2115_vm7, %v15336_v48, %v2176_v60 }
 0x171   : > { %v12007_v13 = vpack.c.bf16 %v762_v40, %v762_v40  ;;  %v1079_v36 = vsel %vm995_vm4, %v1074_v7, %v1078_v23  ;;  %19411 = vst [vmem:[#allocation37_spill] sm:$0xff] %v15450_v22  ;;  %v15453_v12 = vsel %vm2115_vm7, %v2176_v60, %v2185_v49  ;;  %v15456_v52 = vor.u32 %v3200_v33, %v3197_v19 }
 0x172   : > { %v15442_v6 = vld [vmem:[#allocation2 + $0x54] sm:$0xff]   ;;  %19412 = vst [vmem:[#allocation38_spill] sm:$0xff] %v15453_v12  ;;  %12604 = vmatmul.mubr.msk.bf16.gmra.mrb[88].mxu1 %vm1123_vm5, %v1079_v36  ;;  %v3222_v40 = vshrl.u32 %v15425_v45, 16  ;;  %v1080_v48 = vshrl.u32 %v15402_v20, 16  ;;  %v3225_v60 = vshll.u32 %v15425_v45, 16  ;;  %v2203_v27 = vor.u32 %v2202_v61, %v2199_v16 }
 0x173   : > { %888 = vst.msk [vmem:[#allocation2 + $0x60] sm:$0x3] %vm418_vm2, %v12007_v13  ;;  %v15444_v51 = vld [vmem:[#allocation2 + $0x58] sm:$0xf]  ;;  %12607 = vmatprep.mubr.msk.bf16.mxu1 %vm14761_vm0, %v19402_v46  ;;  %v15473_v33 = vsel %vm2115_vm7, %v2185_v49, %v2194_v35  ;;  %v3206_v11 = vrot.slane %v3204_v31, 2  ;;  %v3209_v25 = vrot.slane %v3207_v24, 3  ;;  %v15495_v22 = vsel %vm3149_vm8, %v15223_v18, %v3192_v32 }
 0x174   : > { %19410 = vst [vmem:[#allocation36_spill] sm:$0xff] %v15444_v51  ;;  %v15458_v13 = vld [vmem:[#allocation2 + $0x58] sm:$0xff]   ;;  %v15464_v7 = vcombine.low %v15430_v29, %v15444_v51  ;;  %19413 = vst [vmem:[#allocation39_spill] sm:$0xff] %v15473_v33  ;;  %v3215_v38 = vrot.slane %v3213_v30, 2  ;;  %v1082_v37 = vor.u32 %v1080_v48, %v1078_v23  ;;  %v3218_v29 = vrot.slane %v3216_v62, 3 }
 0x175   : > { %v15470_v19 = vld [vmem:[#allocation2 + $0x5c] sm:$0xf]  ;;  %v1084_v36 = vshll.u32 %v15458_v13, 16  ;;  %v3231_v21 = vshrl.u32 %v15442_v6, 16  ;;  %v3234_v49 = vshll.u32 %v15442_v6, 16  ;;  %v3224_v24 = vrot.slane %v3222_v40, 2 }
 0x176   : > { %13064 = vmatmul.mubr.msk.bf16.gmra.mrb[32].mxu0 %vm1123_vm5, %v3513_v59  ;;  %v2206_v4 = vshrl.u32 %v15464_v7, 16  ;;  %v2209_v16 = vshll.u32 %v15464_v7, 16  ;;  %v3227_v30 = vrot.slane %v3225_v60, 3  ;;  %v15486_v23 = vsel %vm2115_vm7, %v2194_v35, %v2203_v27  ;;  %19415 = vst [vmem:[#allocation41_spill] sm:$0xff] %v15495_v22 }
 0x177   : > { %v1086_v12 = vrot.slane %v1084_v36, 1  ;;  %13067 = vmatprep.mubr.msk.bf16.mxu0 %vm14761_vm0, %v19402_v46  ;;  %19414 = vst [vmem:[#allocation40_spill] sm:$0xff] %v15486_v23  ;;  %v3233_v36 = vrot.slane %v3231_v21, 2  ;;  %v15499_v40 = vsel %vm3149_vm8, %v3192_v32, %v15456_v52  ;;  %v3236_v35 = vrot.slane %v3234_v49, 3 }
 0x178   : > { %v2208_v59 = vrot.slane %v2206_v4, 3  ;;  %v2211_v33 = vrot.slane %v2209_v16, 4  ;;  %19416 = vst [vmem:[#allocation42_spill] sm:$0xff] %v15499_v40  ;;  %v19417_v21 = vrot.slane %v15390_v50, 3  ;;  %v19418_v16 = vrot.slane %v15352_v26, 3 }
 0x179   : > { %v1087_v62 = vsel %vm995_vm4, %v1082_v37, %v1086_v12  ;;  %v19419_v32 = vshll.u32 %v15299_v3, 16  ;;  %v1088_v22 = vshrl.u32 %v15458_v13, 16  ;;  %v3210_v15 = vor.u32 %v3209_v25, %v3206_v11 }
 0x17a   : > { %v15489_v61 = vld [vmem:[#allocation2 + $0x60] ss:$0 sps:$4 sm:$0x77]   ;;  %12608 = vmatmul.mubr.msk.bf16.gmra.mrb[92].mxu1 %vm1123_vm5, %v1087_v62  ;;  %v3515_v18 = vsel %vm1852_vm9, %v19418_v16, %v19417_v21  ;;  %v2212_v40 = vor.u32 %v2211_v33, %v2208_v59  ;;  %v3219_v26 = vor.u32 %v3218_v29, %v3215_v38  ;;  %v3228_v21 = vor.u32 %v3227_v30, %v3224_v24 }
 0x17b   : > { %v15491_v48 = vld [vmem:[#allocation2 + $0x5c] sm:$0xff]   ;;  %v1092_v4 = vshll.u32 %v15489_v61, 16  ;;  %12611 = vmatprep.mubr.msk.bf16.mxu1 %vm14761_vm0, %v19402_v46  ;;  %v3254_v62 = vrot.slane %v19419_v32, 3  ;;  %v1090_v16 = vor.u32 %v1088_v22, %v1086_v12  ;;  %v3237_v0 = vor.u32 %v3236_v35, %v3233_v36 }
 0x17c   : > { %v3240_v37 = vshrl.u32 %v15491_v48, 16  ;;  %v3243_v60 = vshll.u32 %v15491_v48, 16  ;;  %v1775_v31 = vld [vmem:[#allocation2 + $0x60] sm:$0xf]  ;;  %v3516_v29 = vrot.slane %v15418_v58, 3  ;;  %v15533_v12 = vsel %vm3149_vm8, %v15456_v52, %v3210_v15 }
 0x17d   : > { %v15515_v49 = vcombine.low %v15470_v19, %v1775_v31  ;;  %v1094_v51 = vrot.slane %v1092_v4, 1  ;;  %v15523_v31 = vor.u32 %v3254_v62, %v15354_v9  ;;  %v15539_v9 = vsel %vm3149_vm8, %v3219_v26, %v3228_v21  ;;  %v15609_v62 = vld [vmem:[#allocation2 + $0x10] sm:$0xff]  }
 0x17e   : > { %v3242_v23 = vrot.slane %v3240_v37, 2  ;;  %v3245_v5 = vrot.slane %v3243_v60, 3  ;;  %13068 = vmatmul.mubr.msk.bf16.gmra.mrb[36].mxu0 %vm1123_vm5, %v3515_v18  ;;  %v15527_v37 = vsel %vm2115_vm7, %v2203_v27, %v2212_v40  ;;  %19420 = vst [vmem:[#allocation43_spill] sm:$0xff] %v15539_v9  ;;  %v15543_v27 = vsel %vm3149_vm8, %v3228_v21, %v3237_v0  ;;  %v14669_v60 = vld [vmem:[#allocation2 + $0x8] sm:$0xff]   ;;  %v14226_v18 = vld [vmem:[%s19294_s3 + $0x58] sm:$0xff]  }
 0x17f   : > { %13071 = vmatprep.mubr.msk.bf16.mxu0 %vm14761_vm0, %v19402_v46  ;;  %v2215_v33 = vshrl.u32 %v15515_v49, 16  ;;  %v2218_v4 = vshll.u32 %v15515_v49, 16  ;;  %v1095_v11 = vsel %vm995_vm4, %v1090_v16, %v1094_v51  ;;  %19421 = vst [vmem:[#allocation44_spill] sm:$0xff] %v15543_v27  ;;  %v19424_v52 = vrot.slane %v15390_v50, 3  ;;  %v14671_v21 = vld [vmem:[#allocation2 + $0x4] sm:$0xf] }
 0x180   : > { %v3246_v59 = vor.u32 %v3245_v5, %v3242_v23  ;;  %v15536_v5 = vsel %vm3149_vm8, %v3210_v15, %v3219_v26  ;;  %v1096_v30 = vshrl.u32 %v15489_v61, 16  ;;  %v3518_v36 = vrot.slane %v15425_v45, 3  ;;  %v14224_v45 = vld [vmem:[%s19294_s3 + $0x48] sm:$0xff]  }
 0x181   : > { %v2217_v38 = vrot.slane %v2215_v33, 3  ;;  %v2220_v22 = vrot.slane %v2218_v4, 4  ;;  %v3517_v24 = vsel %vm1852_vm9, %v19424_v52, %v3516_v29  ;;  %v1504_v33 = vrot.slane %v14669_v60, 1  ;;  %v14228_v4 = vld [vmem:[%s19294_s3 + $0x60] sm:$0xff]  }
 0x182   : > { %12612 = vmatmul.mubr.msk.bf16.gmra.mrb[96].mxu1 %vm1123_vm5, %v1095_v11  ;;  %v15550_v25 = vsel %vm3149_vm8, %v3237_v0, %v3246_v59  ;;  %v15554_v15 = vsel %vm3149_vm8, %v3246_v59, %v15523_v31  ;;  %v1098_v0 = vor.u32 %v1096_v30, %v1094_v51  ;;  %v3519_v50 = vsel %vm1852_vm9, %v3516_v29, %v3518_v36  ;;  %v14229_v29 = vld [vmem:[%s19294_s3 + $0x68] sm:$0xff]  }
 0x183   : > { %12615 = vmatprep.mubr.msk.bf16.mxu1 %vm14761_vm0, %v19402_v46  ;;  %v15547_v58 = vor.u32 %v2220_v22, %v2217_v38  ;;  %19422 = vst [vmem:[#allocation45_spill] sm:$0xff] %v15550_v25  ;;  %19423 = vst [vmem:[#allocation46_spill] sm:$0xff] %v15554_v15  ;;  %v3520_v51 = vrot.slane %v15442_v6, 3  ;;  %v3522_v6 = vrot.slane %v15491_v48, 3  ;;  %v19332_v48 = vrot.slane %v15299_v3, 3 }
 0x184   : > { %v1506_v52 = vrot.slane %v15609_v62, 1 }
 0x185   : > { %v15563_v23 = vsel %vm2115_vm7, %v2212_v40, %v15547_v58  ;;  %v14221_v40 = vld [vmem:[%s19294_s3 + $0x40] sm:$0xff]   ;;  %v3521_v35 = vsel %vm1852_vm9, %v3518_v36, %v3520_v51  ;;  %v3523_v32 = vsel %vm1852_vm9, %v3520_v51, %v3522_v6  ;;  %v3525_v26 = vsel %vm1852_vm9, %v3522_v6, %v19332_v48 }
 0x186   : > { %13072 = vmatmul.mubr.msk.bf16.gmra.mrb[40].mxu0 %vm1123_vm5, %v3517_v24  ;;  %v1507_v36 = vsel %vm1502_vm10, %v1504_v33, %v1506_v52 }
 0x187   : > { %13075 = vmatprep.mubr.msk.bf16.mxu0 %vm14761_vm0, %v19402_v46 }
 0x18a   : > { %12616 = vmatmul.mubr.msk.bf16.gmra.mrb[100].mxu1 %vm1123_vm5, %v1098_v0  ;;  %v14230_v0 = vld [vmem:[%s19294_s3 + $0x70] sm:$0xff]  }
 0x18b   : > { %12627 = vmatprep.mubr.msk.bf16.mxu1 %vm14761_vm0, %v19402_v46 }
 0x18e   : > { %13076 = vmatmul.mubr.msk.bf16.gmra.mrb[44].mxu0 %vm1123_vm5, %v3519_v50  ;;  %v14231_v50 = vld [vmem:[%s19294_s3 + $0x78] sm:$0xff]  }
 0x18f   : > { %13079 = vmatprep.mubr.msk.bf16.mxu0 %vm14761_vm0, %v19402_v46 }
 0x192   : > { %12628 = vmatmul.mubr.msk.bf16.vlgmr.msra.gmra.mrb[104].mxu1 %vm1123_vm5, %v15030_v57  ;;  %v14225_v57 = vld [vmem:[%s19294_s3 + $0x50] sm:$0xff]  }
 0x193   : > { %12631 = vmatprep.mubr.msk.bf16.mxu1 %vm14761_vm0, %v19402_v46  ;;  %12680 = vmatpush3.bf16.msra.mxu1 %v14221_v40 }
 0x194   : > { %12681 = vmatprep.subr.bf16.mxu1 %v19402_v46 }
 0x196   : > { %13080 = vmatmul.mubr.msk.bf16.gmra.mrb[48].mxu0 %vm1123_vm5, %v3521_v35 }
 0x197   : > { %13083 = vmatprep.mubr.msk.bf16.mxu0 %vm14761_vm0, %v19402_v46  ;;  %12682 = vmatpush3.bf16.msra.mxu1 %v14224_v45  ;;  %v14672_v45 = vld [vmem:[#allocation2 + $0x18] sm:$0xff]  }
 0x198   : > { %12683 = vmatprep.subr.bf16.mxu1 %v19402_v46  ;;  %v1508_v35 = vrot.slane %v14672_v45, 1 }
 0x19a   : > { %12632 = vmatmul.mubr.msk.bf16.gmra.mrb[108].mxu1 %vm1123_vm5, %v14669_v60 }
 0x19b   : > { %12635 = vmatprep.mubr.msk.bf16.mxu1 %vm14761_vm0, %v19402_v46  ;;  %12684 = vmatpush3.bf16.msra.mxu1 %v14225_v57 }
 0x19c   : > { %12685 = vmatprep.subr.bf16.mxu1 %v19402_v46 }
 0x19e   : > { %13084 = vmatmul.mubr.msk.bf16.gmra.mrb[52].mxu0 %vm1123_vm5, %v3523_v32 }
 0x19f   : > { %13087 = vmatprep.mubr.msk.bf16.mxu0 %vm14761_vm0, %v19402_v46  ;;  %12686 = vmatpush3.bf16.msra.mxu1 %v14226_v18  ;;  %v1509_v18 = vsel %vm1502_vm10, %v1506_v52, %v1508_v35 }
 0x1a0   : > { %12739 = vmatprep.subr.bf16.mxu1 %v19402_v46 }
 0x1a2   : > { %12636 = vmatmul.mubr.msk.bf16.gmra.mrb[112].mxu1 %vm1123_vm5, %v15609_v62 }
 0x1a3   : > { %12639 = vmatprep.mubr.msk.bf16.mxu1 %vm14761_vm0, %v19402_v46 }
 0x1a6   : > { %13088 = vmatmul.mubr.msk.bf16.gmra.mrb[56].mxu0 %vm1123_vm5, %v3525_v26 }
 0x1a7   : > { %13091 = vmatprep.mubr.msk.bf16.mxu0 %vm14761_vm0, %v19402_v46 }
 0x1aa   : > { %12640 = vmatmul.mubr.msk.bf16.gmra.mrb[116].mxu1 %vm1123_vm5, %v15106_v8  ;;  %v14227_v8 = vld [vmem:[#allocation2 + $0x60] ss:$0 sps:$4 sm:$0x33]  }
 0x1ab   : > { %12643 = vmatprep.mubr.msk.bf16.mxu1 %vm14761_vm0, %v19402_v46 }
 0x1b2   : > { %12644 = vmatmul.mubr.msk.bf16.gmra.mrb[120].mxu1 %vm1123_vm5, %v15152_v54  ;;  %v1489_v54 = vld [vmem:[#allocation2] sm:$0xe] }
 0x1b3   : > { %12647 = vmatprep.mubr.msk.bf16.mxu1 %vm14761_vm0, %v19402_v46  ;;  %v11076_v16 = vcombine.low %v1489_v54, %v14671_v21  ;;  %v14673_v21 = vld [vmem:[#allocation2 + $0x20] sm:$0xff]  }
 0x1b5   : > { %v1503_v59 = vrot.slane %v11076_v16, 1  ;;  %v1510_v16 = vrot.slane %v14673_v21, 1 }
 0x1b7   : > { %v1505_v11 = vsel %vm1502_vm10, %v1503_v59, %v1504_v33 }
 0x1ba   : > { %12648 = vmatmul.mubr.msk.bf16.gmra.mrb[124].mxu1 %vm1123_vm5, %v15203_v41 }
 0x1bb   : > { %12651 = vmatprep.mubr.msk.bf16.mxu1 %vm14761_vm0, %v19402_v46 }
 0x1c2   : > { %12652 = vmatmul.mubr.msk.bf16.gmra.mrb[128].mxu1 %vm1123_vm5, %v15253_v43 }
 0x1c3   : > { %12655 = vmatprep.mubr.msk.bf16.mxu1 %vm14761_vm0, %v19402_v46 }
 0x1ca   : > { %12656 = vmatmul.mubr.msk.bf16.gmra.mrb[132].mxu1 %vm1123_vm5, %v15277_v63 }
 0x1cb   : > { %12659 = vmatprep.mubr.msk.bf16.mxu1 %vm14761_vm0, %v19402_v46 }
 0x1d2   : > { %12660 = vmatmul.mubr.msk.bf16.gmra.mrb[136].mxu1 %vm1123_vm5, %v15311_v10 }
 0x1d3   : > { %12663 = vmatprep.mubr.msk.bf16.mxu1 %vm14761_vm0, %v19402_v46 }
 0x1da   : > { %12664 = vmatmul.mubr.msk.bf16.gmra.mrb[140].mxu1 %vm1123_vm5, %v15361_v1 }
 0x1db   : > { %12667 = vmatprep.mubr.msk.bf16.mxu1 %vm14761_vm0, %v19402_v46 }
 0x1e2   : > { %12668 = vmatmul.mubr.msk.bf16.gmra.mrb[144].mxu1 %vm1123_vm5, %v15402_v20 }
 0x1e3   : > { %12671 = vmatprep.mubr.msk.bf16.mxu1 %vm14761_vm0, %v19402_v46 }
 0x1ea   : > { %12672 = vmatmul.mubr.msk.bf16.gmra.mrb[148].mxu1 %vm1123_vm5, %v15458_v13 }
 0x1eb   : > { %12675 = vmatprep.mubr.msk.bf16.mxu1 %vm14761_vm0, %v19402_v46 }
 0x1f2   : > { %12676 = vmatmul.mubr.msk.bf16.gmra.mrb[152].mxu1 %vm1123_vm5, %v14227_v8 }
 0x1f3   : > { %12687 = vmatprep.mubr.msk.bf16.mxu1 %vm14761_vm0, %v19402_v46 }
 0x1fa   : > { %12688 = vmatmul.mubr.msk.bf16.vlgmr.msra.gmra.mrb[156].mxu1 %vm1123_vm5, %v1505_v11  ;;  %v1511_v11 = vsel %vm1502_vm10, %v1508_v35, %v1510_v16 }
 0x1fb   : > { %12691 = vmatprep.mubr.msk.bf16.mxu1 %vm14761_vm0, %v19402_v46  ;;  %12740 = vmatpush3.bf16.msra.mxu1 %v14228_v4 }
 0x1fc   : > { %12741 = vmatprep.subr.bf16.mxu1 %v19402_v46 }
 0x1fd   : > { %v15670_v38 = vpop.f32.mrb[52].mxu1 }
 0x1fe   : > { %v12569_v22 = vpop.f32.mrb[53].mxu1 }
 0x1ff   : > { %v15674_v24 = vpop.f32.mrb[54].mxu1  ;;  %12742 = vmatpush3.bf16.msra.mxu1 %v14229_v29 }
 0x200   : > { %v12570_v30 = vpop.f32.mrb[55].mxu1  ;;  %12743 = vmatprep.subr.bf16.mxu1 %v19402_v46 }
 0x202   : > { %12692 = vmatmul.mubr.msk.bf16.gmra.mrb[160].mxu1 %vm1123_vm5, %v1507_v36  ;;  %v1512_v36 = vrot.slane %v15203_v41, 1  ;;  %v1514_v41 = vrot.slane %v15253_v43, 1  ;;  %v1516_v43 = vrot.slane %v15277_v63, 1  ;;  %v1518_v63 = vrot.slane %v15311_v10, 1 }
 0x203   : > { %12695 = vmatprep.mubr.msk.bf16.mxu1 %vm14761_vm0, %v19402_v46  ;;  %12744 = vmatpush3.bf16.msra.mxu1 %v14230_v0  ;;  %v1520_v10 = vrot.slane %v15361_v1, 1  ;;  %v1522_v1 = vrot.slane %v15402_v20, 1  ;;  %v1524_v20 = vrot.slane %v15458_v13, 1  ;;  %v1526_v13 = vrot.slane %v15489_v61, 1 }
 0x204   : > { %12745 = vmatprep.subr.bf16.mxu1 %v19402_v46  ;;  %v1513_v35 = vsel %vm1502_vm10, %v1510_v16, %v1512_v36  ;;  %v1515_v16 = vsel %vm1502_vm10, %v1512_v36, %v1514_v41  ;;  %v1517_v36 = vsel %vm1502_vm10, %v1514_v41, %v1516_v43  ;;  %v1519_v41 = vsel %vm1502_vm10, %v1516_v43, %v1518_v63 }
 0x205   : > { %v15687_v40 = vpop.f32.mrb[56].mxu1  ;;  %v1521_v43 = vsel %vm1502_vm10, %v1518_v63, %v1520_v10  ;;  %v1523_v63 = vsel %vm1502_vm10, %v1520_v10, %v1522_v1  ;;  %v1525_v10 = vsel %vm1502_vm10, %v1522_v1, %v1524_v20  ;;  %v1527_v1 = vsel %vm1502_vm10, %v1524_v20, %v1526_v13 }
 0x206   : > { %v12573_v51 = vpop.f32.mrb[57].mxu1 }
 0x207   : > { %v15690_v57 = vpop.f32.mrb[58].mxu1  ;;  %12746 = vmatpush3.bf16.msra.mxu1 %v14231_v50 }
 0x208   : > { %v12574_v6 = vpop.f32.mrb[59].mxu1  ;;  %12799 = vmatprep.subr.bf16.mxu1 %v19402_v46 }
 0x209   : > { %v15692_v60 = vpop.f32.mrb[0].mxu0 }
 0x20a   : > { %v12929_v32 = vpop.f32.mrb[1].mxu0  ;;  %12696 = vmatmul.mubr.msk.bf16.gmra.mrb[164].mxu1 %vm1123_vm5, %v1509_v18 }
 0x20b   : > { %v15697_v62 = vpop.f32.mrb[2].mxu0  ;;  %12699 = vmatprep.mubr.msk.bf16.mxu1 %vm14761_vm0, %v19402_v46 }
 0x20c   : > { %v12930_v26 = vpop.f32.mrb[3].mxu0 }
 0x20d   : > { %v15701_v8 = vpop.f32.mrb[60].mxu1 }
 0x20e   : > { %v12577_v54 = vpop.f32.mrb[61].mxu1 }
 0x20f   : > { %v15703_v33 = vpop.f32.mrb[62].mxu1 }
 0x210   : > { %v12578_v59 = vpop.f32.mrb[63].mxu1 }
 0x211   : > { %v15705_v4 = vpop.f32.mrb[4].mxu0 }
 0x212   : > { %v12933_v29 = vpop.f32.mrb[5].mxu0  ;;  %12700 = vmatmul.mubr.msk.bf16.gmra.mrb[168].mxu1 %vm1123_vm5, %v1511_v11 }
 0x213   : > { %v15709_v22 = vpop.f32.mrb[6].mxu0  ;;  %12703 = vmatprep.mubr.msk.bf16.mxu1 %vm14761_vm0, %v19402_v46 }
 0x214   : > { %v12934_v52 = vpop.f32.mrb[7].mxu0 }
 0x215   : > { %v15713_v30 = vpop.f32.mrb[64].mxu1 }
 0x216   : > { %v12581_v0 = vpop.f32.mrb[65].mxu1 }
 0x217   : > { %v15716_v50 = vpop.f32.mrb[66].mxu1 }
 0x218   : > { %v12582_v51 = vpop.f32.mrb[67].mxu1 }
 0x219   : > { %v15718_v45 = vpop.f32.mrb[8].mxu0 }
 0x21a   : > { %v12937_v6 = vpop.f32.mrb[9].mxu0  ;;  %12704 = vmatmul.mubr.msk.bf16.gmra.mrb[172].mxu1 %vm1123_vm5, %v1513_v35 }
 0x21b   : > { %v15722_v18 = vpop.f32.mrb[10].mxu0  ;;  %12707 = vmatprep.mubr.msk.bf16.mxu1 %vm14761_vm0, %v19402_v46 }
 0x21c   : > { %19425 = vst [vmem:[#allocation47_spill] sm:$0xff] %v15722_v18  ;;  %v12938_v32 = vpop.f32.mrb[11].mxu0  ;;  %v1853_v18 = vrot.slane %v15044_v17, 3  ;;  %v14244_v17 = vld [vmem:[%s19294_s3 + $0x88] sm:$0xff]  }
 0x21d   : > { %v15726_v26 = vpop.f32.mrb[68].mxu1 }
 0x21e   : > { %v12585_v54 = vpop.f32.mrb[69].mxu1 }
 0x21f   : > { %v15729_v21 = vpop.f32.mrb[70].mxu1 }
 0x220   : > { %v12586_v59 = vpop.f32.mrb[71].mxu1 }
 0x221   : > { %v15731_v11 = vpop.f32.mrb[12].mxu0 }
 0x222   : > { %19426 = vst [vmem:[#allocation48_spill] sm:$0xff] %v15731_v11  ;;  %v12941_v29 = vpop.f32.mrb[13].mxu0  ;;  %12708 = vmatmul.mubr.msk.bf16.gmra.mrb[176].mxu1 %vm1123_vm5, %v1515_v16 }
 0x223   : > { %v15735_v52 = vpop.f32.mrb[14].mxu0  ;;  %12711 = vmatprep.mubr.msk.bf16.mxu1 %vm14761_vm0, %v19402_v46 }
 0x224   : > { %19427 = vst [vmem:[#allocation49_spill] sm:$0xff] %v15735_v52  ;;  %v12942_v0 = vpop.f32.mrb[15].mxu0 }
 0x225   : > { %v15739_v51 = vpop.f32.mrb[72].mxu1 }
 0x226   : > { %v12589_v35 = vpop.f32.mrb[73].mxu1 }
 0x227   : > { %v15742_v6 = vpop.f32.mrb[74].mxu1 }
 0x228   : > { %v12590_v32 = vpop.f32.mrb[75].mxu1 }
 0x229   : > { %v15744_v54 = vpop.f32.mrb[16].mxu0 }
 0x22a   : > { %19428 = vst [vmem:[#allocation50_spill] sm:$0xff] %v15744_v54  ;;  %v13049_v59 = vpop.f32.mrb[17].mxu0  ;;  %12712 = vmatmul.mubr.msk.bf16.gmra.mrb[180].mxu1 %vm1123_vm5, %v1517_v36 }
 0x22b   : > { %v15748_v16 = vpop.f32.mrb[18].mxu0  ;;  %12715 = vmatprep.mubr.msk.bf16.mxu1 %vm14761_vm0, %v19402_v46 }
 0x22c   : > { %19429 = vst [vmem:[#allocation51_spill] sm:$0xff] %v15748_v16  ;;  %v13050_v29 = vpop.f32.mrb[19].mxu0 }
 0x22d   : > { %v15752_v0 = vpop.f32.mrb[76].mxu1 }
 0x22e   : > { %v12593_v35 = vpop.f32.mrb[77].mxu1 }
 0x22f   : > { %v15755_v48 = vpop.f32.mrb[78].mxu1 }
 0x230   : > { %v12594_v32 = vpop.f32.mrb[79].mxu1 }
 0x231   : > { %v15757_v54 = vpop.f32.mrb[20].mxu0 }
 0x232   : > { %19430 = vst [vmem:[#allocation52_spill] sm:$0xff] %v15757_v54  ;;  %v13053_v59 = vpop.f32.mrb[21].mxu0  ;;  %12716 = vmatmul.mubr.msk.bf16.gmra.mrb[184].mxu1 %vm1123_vm5, %v1519_v41 }
 0x233   : > { %v15761_v36 = vpop.f32.mrb[22].mxu0  ;;  %12719 = vmatprep.mubr.msk.bf16.mxu1 %vm14761_vm0, %v19402_v46 }
 0x234   : > { %19431 = vst [vmem:[#allocation53_spill] sm:$0xff] %v15761_v36  ;;  %v13054_v29 = vpop.f32.mrb[23].mxu0 }
 0x235   : > { %v15765_v16 = vpop.f32.mrb[80].mxu1 }
 0x236   : > { %v12597_v35 = vpop.f32.mrb[81].mxu1 }
 0x237   : > { %v15768_v15 = vpop.f32.mrb[82].mxu1 }
 0x238   : > { %v12598_v32 = vpop.f32.mrb[83].mxu1 }
 0x239   : > { %v15770_v54 = vpop.f32.mrb[24].mxu0 }
 0x23a   : > { %19432 = vst [vmem:[#allocation54_spill] sm:$0xff] %v15770_v54  ;;  %v13057_v59 = vpop.f32.mrb[25].mxu0  ;;  %12720 = vmatmul.mubr.msk.bf16.gmra.mrb[188].mxu1 %vm1123_vm5, %v1521_v43 }
 0x23b   : > { %v15774_v41 = vpop.f32.mrb[26].mxu0  ;;  %12723 = vmatprep.mubr.msk.bf16.mxu1 %vm14761_vm0, %v19402_v46 }
 0x23c   : > { %19433 = vst [vmem:[#allocation55_spill] sm:$0xff] %v15774_v41  ;;  %v13058_v29 = vpop.f32.mrb[27].mxu0 }
 0x23d   : > { %v15778_v36 = vpop.f32.mrb[84].mxu1 }
 0x23e   : > { %v12601_v35 = vpop.f32.mrb[85].mxu1 }
 0x23f   : > { %v15781_v25 = vpop.f32.mrb[86].mxu1 }
 0x240   : > { %v12602_v32 = vpop.f32.mrb[87].mxu1 }
 0x241   : > { %v15783_v54 = vpop.f32.mrb[28].mxu0 }
 0x242   : > { %19434 = vst [vmem:[#allocation56_spill] sm:$0xff] %v15783_v54  ;;  %v13061_v59 = vpop.f32.mrb[29].mxu0  ;;  %12724 = vmatmul.mubr.msk.bf16.gmra.mrb[192].mxu1 %vm1123_vm5, %v1523_v63 }
 0x243   : > { %v15787_v43 = vpop.f32.mrb[30].mxu0  ;;  %12727 = vmatprep.mubr.msk.bf16.mxu1 %vm14761_vm0, %v19402_v46 }
 0x244   : > { %19435 = vst [vmem:[#allocation57_spill] sm:$0xff] %v15787_v43  ;;  %v13062_v29 = vpop.f32.mrb[31].mxu0 }
 0x245   : > { %v15791_v41 = vpop.f32.mrb[88].mxu1 }
 0x246   : > { %v12605_v35 = vpop.f32.mrb[89].mxu1 }
 0x247   : > { %v15794_v52 = vpop.f32.mrb[90].mxu1 }
 0x248   : > { %v12606_v32 = vpop.f32.mrb[91].mxu1 }
 0x249   : > { %v15796_v54 = vpop.f32.mrb[32].mxu0 }
 0x24a   : > { %19436 = vst [vmem:[#allocation58_spill] sm:$0xff] %v15796_v54  ;;  %v13065_v59 = vpop.f32.mrb[33].mxu0  ;;  %12728 = vmatmul.mubr.msk.bf16.gmra.mrb[196].mxu1 %vm1123_vm5, %v1525_v10 }
 0x24b   : > { %v15800_v63 = vpop.f32.mrb[34].mxu0  ;;  %12731 = vmatprep.mubr.msk.bf16.mxu1 %vm14761_vm0, %v19402_v46 }
 0x24c   : > { %19437 = vst [vmem:[#allocation59_spill] sm:$0xff] %v15800_v63  ;;  %v13066_v29 = vpop.f32.mrb[35].mxu0 }
 0x24d   : > { %v15804_v43 = vpop.f32.mrb[92].mxu1 }
 0x24e   : > { %v12609_v35 = vpop.f32.mrb[93].mxu1 }
 0x24f   : > { %v15807_v27 = vpop.f32.mrb[94].mxu1 }
 0x250   : > { %v12610_v32 = vpop.f32.mrb[95].mxu1 }
 0x251   : > { %v15809_v54 = vpop.f32.mrb[36].mxu0 }
 0x252   : > { %19438 = vst [vmem:[#allocation60_spill] sm:$0xff] %v15809_v54  ;;  %v13069_v59 = vpop.f32.mrb[37].mxu0  ;;  %12732 = vmatmul.mubr.msk.bf16.gmra.mrb[200].mxu1 %vm1123_vm5, %v1527_v1 }
 0x253   : > { %v15813_v10 = vpop.f32.mrb[38].mxu0  ;;  %12735 = vmatprep.mubr.msk.bf16.mxu1 %vm14761_vm0, %v19402_v46 }
 0x254   : > { %19439 = vst [vmem:[#allocation61_spill] sm:$0xff] %v15813_v10  ;;  %v13070_v29 = vpop.f32.mrb[39].mxu0 }
 0x255   : > { %v15817_v63 = vpop.f32.mrb[96].mxu1  ;;  %v1854_v29 = vrot.slane %v15074_v42, 3 }
 0x256   : > { %v12613_v61 = vpop.f32.mrb[97].mxu1 }
 0x257   : > { %v15819_v35 = vpop.f32.mrb[98].mxu1 }
 0x258   : > { %v12614_v11 = vpop.f32.mrb[99].mxu1 }
 0x259   : > { %v15821_v32 = vpop.f32.mrb[40].mxu0  ;;  %v14237_v11 = vld [vmem:[%s19294_s3 + $0x80] sm:$0xff]  }
 0x25a   : > { %19440 = vst [vmem:[#allocation62_spill] sm:$0xff] %v15821_v32  ;;  %v13073_v54 = vpop.f32.mrb[41].mxu0  ;;  %12736 = vmatmul.mubr.msk.bf16.gmra.mrb[204].mxu1 %vm1123_vm5, %v1526_v13 }
 0x25b   : > { %v15824_v20 = vpop.f32.mrb[42].mxu0  ;;  %12747 = vmatprep.mubr.msk.bf16.mxu1 %vm14761_vm0, %v19402_v46 }
 0x25c   : > { %19441 = vst [vmem:[#allocation63_spill] sm:$0xff] %v15824_v20  ;;  %v13074_v1 = vpop.f32.mrb[43].mxu0 }
 0x25d   : > { %v15828_v59 = vpop.f32.mrb[100].mxu1  ;;  %v1855_v1 = vsel %vm1852_vm9, %v1853_v18, %v1854_v29 }
 0x25e   : > { %v12617_v10 = vpop.f32.mrb[101].mxu1 }
 0x25f   : > { %v1296_v61 = vpop.f32.mrb[102].mxu1  ;;  %v1856_v10 = vrot.slane %v15141_v47, 3 }
 0x260   : > { %v12618_v54 = vpop.f32.mrb[103].mxu1 }
 0x261   : > { %v15835_v13 = vpop.f32.mrb[44].mxu0  ;;  %v1857_v47 = vsel %vm1852_vm9, %v1854_v29, %v1856_v10 }
 0x262   : > { %v13077_v20 = vpop.f32.mrb[45].mxu0  ;;  %12748 = vmatmul.mubr.msk.bf16.vlgmr.msra.gmra.mrb[208].mxu1 %vm1123_vm5, %v1855_v1 }
 0x263   : > { %v15839_v32 = vpop.f32.mrb[46].mxu0  ;;  %12751 = vmatprep.mubr.msk.bf16.mxu1 %vm14761_vm0, %v19402_v46  ;;  %12800 = vmatpush3.bf16.msra.mxu1 %v14237_v11 }
 0x264   : > { %19442 = vst [vmem:[#allocation64_spill] sm:$0xff] %v15839_v32  ;;  %v13078_v9 = vpop.f32.mrb[47].mxu0  ;;  %12801 = vmatprep.subr.bf16.mxu1 %v19402_v46 }
 0x265   : > { %v1387_v42 = vpop.f32.mrb[104].mxu1  ;;  %v14251_v9 = vld [vmem:[%s19294_s3 + $0x90] sm:$0xff]  }
 0x266   : > { %v15849_v18 = vadd.f32 %v1387_v42, %v15670_v38  ;;  %v12629_v20 = vpop.f32.mrb[105].mxu1 }
 0x267   : > { %v1390_v61 = vpop.f32.mrb[106].mxu1  ;;  %12802 = vmatpush3.bf16.msra.mxu1 %v14244_v17  ;;  %v1858_v20 = vrot.slane %v15211_v55, 3 }
 0x268   : > { %v15855_v11 = vadd.f32 %v1390_v61, %v15674_v24  ;;  %v12630_v54 = vpop.f32.mrb[107].mxu1  ;;  %12803 = vmatprep.subr.bf16.mxu1 %v19402_v46  ;;  %v14258_v24 = vld [vmem:[%s19294_s3 + $0x98] sm:$0xff]  }
 0x269   : > { %v15857_v1 = vpop.f32.mrb[48].mxu0 }
 0x26a   : > { %v13081_v32 = vpop.f32.mrb[49].mxu0  ;;  %12752 = vmatmul.mubr.msk.bf16.gmra.mrb[212].mxu1 %vm1123_vm5, %v1857_v47 }
 0x26b   : > { %v15862_v38 = vpop.f32.mrb[50].mxu0  ;;  %12755 = vmatprep.mubr.msk.bf16.mxu1 %vm14761_vm0, %v19402_v46  ;;  %12804 = vmatpush3.bf16.msra.mxu1 %v14251_v9 }
 0x26c   : > { %19443 = vst [vmem:[#allocation65_spill] sm:$0xff] %v15862_v38  ;;  %v13082_v17 = vpop.f32.mrb[51].mxu0  ;;  %12805 = vmatprep.subr.bf16.mxu1 %v19402_v46 }
 0x26d   : > { %v1395_v42 = vpop.f32.mrb[108].mxu1  ;;  %v1859_v17 = vsel %vm1852_vm9, %v1856_v10, %v1858_v20 }
 0x26e   : > { %v15872_v32 = vadd.f32 %v1395_v42, %v15687_v40  ;;  %v12633_v29 = vpop.f32.mrb[109].mxu1 }
 0x26f   : > { %v1398_v61 = vpop.f32.mrb[110].mxu1  ;;  %12806 = vmatpush3.bf16.msra.mxu1 %v14258_v24 }
 0x270   : > { %v15875_v54 = vadd.f32 %v1398_v61, %v15690_v57  ;;  %v12634_v47 = vpop.f32.mrb[111].mxu1  ;;  %12859 = vmatprep.subr.bf16.mxu1 %v19402_v46  ;;  %v1860_v57 = vrot.slane %v15241_v39, 3 }
 0x271   : > { %v15877_v9 = vpop.f32.mrb[52].mxu0 }
 0x272   : > { %19444 = vst [vmem:[#allocation66_spill] sm:$0xff] %v15877_v9  ;;  %v13085_v38 = vpop.f32.mrb[53].mxu0  ;;  %12756 = vmatmul.mubr.msk.bf16.gmra.mrb[216].mxu1 %vm1123_vm5, %v1859_v17  ;;  %v1861_v17 = vsel %vm1852_vm9, %v1858_v20, %v1860_v57 }
 0x273   : > { %v15882_v55 = vpop.f32.mrb[54].mxu0  ;;  %12759 = vmatprep.mubr.msk.bf16.mxu1 %vm14761_vm0, %v19402_v46 }
 0x274   : > { %19445 = vst [vmem:[#allocation67_spill] sm:$0xff] %v15882_v55  ;;  %v13086_v40 = vpop.f32.mrb[55].mxu0 }
 0x275   : > { %v1403_v24 = vpop.f32.mrb[112].mxu1 }
 0x276   : > { %v15888_v42 = vadd.f32 %v1403_v24, %v15701_v8  ;;  %v12637_v29 = vpop.f32.mrb[113].mxu1  ;;  %v1862_v8 = vrot.slane %v15291_v53, 3 }
 0x277   : > { %v1406_v61 = vpop.f32.mrb[114].mxu1 }
 0x278   : > { %v15891_v47 = vadd.f32 %v1406_v61, %v15703_v33  ;;  %v12638_v10 = vpop.f32.mrb[115].mxu1 }
 0x279   : > { %v15893_v38 = vpop.f32.mrb[56].mxu0  ;;  %v1863_v10 = vsel %vm1852_vm9, %v1860_v57, %v1862_v8 }
 0x27a   : > { %v13089_v40 = vpop.f32.mrb[57].mxu0  ;;  %12760 = vmatmul.mubr.msk.bf16.gmra.mrb[220].mxu1 %vm1123_vm5, %v1861_v17  ;;  %v1864_v17 = vrot.slane %v15341_v34, 3 }
 0x27b   : > { %v15897_v55 = vpop.f32.mrb[58].mxu0  ;;  %12763 = vmatprep.mubr.msk.bf16.mxu1 %vm14761_vm0, %v19402_v46 }
 0x27c   : > { %v13090_v9 = vpop.f32.mrb[59].mxu0 }
 0x27d   : > { %v1411_v39 = vpop.f32.mrb[116].mxu1 }
 0x27e   : > { %v15903_v33 = vadd.f32 %v1411_v39, %v15713_v30  ;;  %v12641_v24 = vpop.f32.mrb[117].mxu1 }
 0x27f   : > { %v1414_v29 = vpop.f32.mrb[118].mxu1  ;;  %v1865_v24 = vsel %vm1852_vm9, %v1862_v8, %v1864_v17 }
 0x280   : > { %v15906_v61 = vadd.f32 %v1414_v29, %v15716_v50  ;;  %v12642_v20 = vpop.f32.mrb[119].mxu1  ;;  %v1866_v29 = vrot.slane %v15346_v28, 3 }
 0x282   : > { %12764 = vmatmul.mubr.msk.bf16.gmra.mrb[224].mxu1 %vm1123_vm5, %v1863_v10 }
 0x283   : > { %12767 = vmatprep.mubr.msk.bf16.mxu1 %vm14761_vm0, %v19402_v46 }
 0x285   : > { %v1419_v9 = vpop.f32.mrb[120].mxu1 }
 0x286   : > { %v15914_v53 = vadd.f32 %v1419_v9, %v15726_v26  ;;  %v12645_v30 = vpop.f32.mrb[121].mxu1  ;;  %v1867_v9 = vsel %vm1852_vm9, %v1864_v17, %v1866_v29 }
 0x287   : > { %v1422_v40 = vpop.f32.mrb[122].mxu1  ;;  %v1868_v30 = vrot.slane %v15383_v2, 3 }
 0x288   : > { %v15917_v39 = vadd.f32 %v1422_v40, %v15729_v21  ;;  %v12646_v50 = vpop.f32.mrb[123].mxu1 }
 0x28a   : > { %12768 = vmatmul.mubr.msk.bf16.gmra.mrb[228].mxu1 %vm1123_vm5, %v1865_v24  ;;  %v1869_v24 = vsel %vm1852_vm9, %v1866_v29, %v1868_v30 }
 0x28b   : > { %12771 = vmatprep.mubr.msk.bf16.mxu1 %vm14761_vm0, %v19402_v46 }
 0x28d   : > { %v1427_v57 = vpop.f32.mrb[124].mxu1 }
 0x28e   : > { %v15925_v34 = vadd.f32 %v1427_v57, %v15739_v51  ;;  %v12649_v26 = vpop.f32.mrb[125].mxu1  ;;  %v1870_v57 = vrot.slane %v15407_v14, 3 }
 0x28f   : > { %v1430_v20 = vpop.f32.mrb[126].mxu1 }
 0x290   : > { %v15928_v10 = vadd.f32 %v1430_v20, %v15742_v6  ;;  %v12650_v21 = vpop.f32.mrb[127].mxu1 }
 0x291   : > { %v1871_v21 = vsel %vm1852_vm9, %v1868_v30, %v1870_v57 }
 0x292   : > { %12772 = vmatmul.mubr.msk.bf16.gmra.mrb[232].mxu1 %vm1123_vm5, %v1867_v9  ;;  %v1872_v9 = vrot.slane %v15464_v7, 3 }
 0x293   : > { %12775 = vmatprep.mubr.msk.bf16.mxu1 %vm14761_vm0, %v19402_v46 }
 0x295   : > { %v1435_v8 = vpop.f32.mrb[128].mxu1 }
 0x296   : > { %v15936_v28 = vadd.f32 %v1435_v8, %v15752_v0  ;;  %v12653_v51 = vpop.f32.mrb[129].mxu1 }
 0x297   : > { %v1438_v40 = vpop.f32.mrb[130].mxu1 }
 0x298   : > { %v15939_v50 = vadd.f32 %v1438_v40, %v15755_v48  ;;  %v12654_v6 = vpop.f32.mrb[131].mxu1  ;;  %v1873_v40 = vsel %vm1852_vm9, %v1870_v57, %v1872_v9 }
 0x299   : > { %v1874_v6 = vrot.slane %v15515_v49, 3 }
 0x29a   : > { %12776 = vmatmul.mubr.msk.bf16.gmra.mrb[236].mxu1 %vm1123_vm5, %v1869_v24  ;;  %v15971_v24 = vld [vmem:[#allocation2 + $0x64] sm:$0xf] }
 0x29b   : > { %12779 = vmatprep.mubr.msk.bf16.mxu1 %vm14761_vm0, %v19402_v46 }
 0x29d   : > { %v1443_v17 = vpop.f32.mrb[132].mxu1 }
 0x29e   : > { %v15947_v2 = vadd.f32 %v1443_v17, %v15765_v16  ;;  %v12657_v0 = vpop.f32.mrb[133].mxu1  ;;  %v1777_v17 = vld [vmem:[#allocation2 + $0x68] sm:$0x1] }
 0x29f   : > { %v1446_v26 = vpop.f32.mrb[134].mxu1 }
 0x2a0   : > { %v15950_v20 = vadd.f32 %v1446_v26, %v15768_v15  ;;  %v12658_v48 = vpop.f32.mrb[135].mxu1  ;;  %v1875_v26 = vsel %vm1852_vm9, %v1872_v9, %v1874_v6 }
 0x2a1   : > { %v11114_v48 = vcombine.low %v15971_v24, %v1777_v17 }
 0x2a2   : > { %12780 = vmatmul.mubr.msk.bf16.gmra.mrb[240].mxu1 %vm1123_vm5, %v1871_v21 }
 0x2a3   : > { %12783 = vmatprep.mubr.msk.bf16.mxu1 %vm14761_vm0, %v19402_v46 }
 0x2a5   : > { %v1451_v29 = vpop.f32.mrb[136].mxu1 }
 0x2a6   : > { %v15958_v14 = vadd.f32 %v1451_v29, %v15778_v36  ;;  %v12661_v16 = vpop.f32.mrb[137].mxu1 }
 0x2a7   : > { %v1454_v8 = vpop.f32.mrb[138].mxu1 }
 0x2a8   : > { %v15961_v51 = vadd.f32 %v1454_v8, %v15781_v25  ;;  %v12662_v15 = vpop.f32.mrb[139].mxu1 }
 0x2aa   : > { %12784 = vmatmul.mubr.msk.bf16.gmra.mrb[244].mxu1 %vm1123_vm5, %v1873_v40 }
 0x2ab   : > { %12787 = vmatprep.mubr.msk.bf16.mxu1 %vm14761_vm0, %v19402_v46 }
 0x2ad   : > { %v1459_v30 = vpop.f32.mrb[140].mxu1 }
 0x2ae   : > { %v15969_v7 = vadd.f32 %v1459_v30, %v15791_v41  ;;  %v12665_v36 = vpop.f32.mrb[141].mxu1  ;;  %v1876_v41 = vrot.slane %v11114_v48, 3 }
 0x2af   : > { %v1462_v25 = vpop.f32.mrb[142].mxu1 }
 0x2b0   : > { %v15974_v0 = vadd.f32 %v1462_v25, %v15794_v52  ;;  %v12666_v57 = vpop.f32.mrb[143].mxu1  ;;  %v1877_v9 = vsel %vm1852_vm9, %v1874_v6, %v1876_v41 }
 0x2b2   : > { %12788 = vmatmul.mubr.msk.bf16.gmra.mrb[248].mxu1 %vm1123_vm5, %v1875_v26 }
 0x2b3   : > { %12791 = vmatprep.mubr.msk.bf16.mxu1 %vm14761_vm0, %v19402_v46 }
 0x2b5   : > { %v1467_v49 = vpop.f32.mrb[144].mxu1 }
 0x2b6   : > { %v15982_v21 = vadd.f32 %v1467_v49, %v15804_v43  ;;  %v12669_v29 = vpop.f32.mrb[145].mxu1 }
 0x2b7   : > { %v1470_v16 = vpop.f32.mrb[146].mxu1 }
 0x2b8   : > { %v15985_v52 = vadd.f32 %v1470_v16, %v15807_v27  ;;  %v12670_v8 = vpop.f32.mrb[147].mxu1 }
 0x2ba   : > { %12792 = vmatmul.mubr.msk.bf16.gmra.mrb[252].mxu1 %vm1123_vm5, %v1877_v9 }
 0x2bb   : > { %12795 = vmatprep.mubr.msk.bf16.mxu1 %vm14761_vm0, %v19402_v46 }
 0x2bd   : > { %v1475_v15 = vpop.f32.mrb[148].mxu1 }
 0x2be   : > { %v15992_v40 = vadd.f32 %v1475_v15, %v15817_v63  ;;  %v12673_v30 = vpop.f32.mrb[149].mxu1  ;;  %v14263_v63 = vld [vmem:[%s19294_s3 + $0xa0] sm:$0xff]  }
 0x2bf   : > { %v1478_v43 = vpop.f32.mrb[150].mxu1 }
 0x2c0   : > { %v15995_v36 = vadd.f32 %v1478_v43, %v15819_v35  ;;  %v12674_v17 = vpop.f32.mrb[151].mxu1  ;;  %v14264_v35 = vld [vmem:[%s19294_s3 + $0xa8] sm:$0xff]   ;;  %v19446_v43 = vld [vmem:[#allocation25_spill] sm:$0xff] }
 0x2c2   : > { %12796 = vmatmul.mubr.msk.bf16.gmra.mrb[0].mxu1 %vm1123_vm5, %v1876_v41 }
 0x2c3   : > { %12807 = vmatprep.mubr.msk.bf16.mxu1 %vm14761_vm0, %v19402_v46 }
 0x2c5   : > { %v1483_v27 = vpop.f32.mrb[152].mxu1 }
 0x2c6   : > { %v16001_v6 = vadd.f32 %v1483_v27, %v15828_v59  ;;  %v12677_v25 = vpop.f32.mrb[153].mxu1 }
 0x2c7   : > { %v1486_v57 = vpop.f32.mrb[154].mxu1 }
 0x2c8   : > { %v12678_v26 = vpop.f32.mrb[155].mxu1 }
 0x2ca   : > { %12808 = vmatmul.mubr.msk.bf16.vlgmr.msra.gmra.mrb[4].mxu1 %vm1123_vm5, %v15159_v56  ;;  %v14265_v56 = vld [vmem:[%s19294_s3 + $0xb0] sm:$0xff]  }
 0x2cb   : > { %12811 = vmatprep.mubr.msk.bf16.mxu1 %vm14761_vm0, %v19402_v46  ;;  %12860 = vmatpush3.bf16.msra.mxu1 %v14263_v63  ;;  %v19447_v63 = vld [vmem:[#allocation28_spill] sm:$0xff] }
 0x2cc   : > { %12861 = vmatprep.subr.bf16.mxu1 %v19402_v46 }
 0x2cd   : > { %v1625_v59 = vpop.f32.mrb[156].mxu1 }
 0x2ce   : > { %v16015_v48 = vadd.f32 %v1625_v59, %v15849_v18  ;;  %v12689_v49 = vpop.f32.mrb[157].mxu1  ;;  %v14266_v18 = vld [vmem:[%s19294_s3 + $0xb8] sm:$0xff]  }
 0x2cf   : > { %v1628_v41 = vpop.f32.mrb[158].mxu1  ;;  %12862 = vmatpush3.bf16.msra.mxu1 %v14264_v35 }
 0x2d0   : > { %v16021_v29 = vadd.f32 %v1628_v41, %v15855_v11  ;;  %v12690_v16 = vpop.f32.mrb[159].mxu1  ;;  %12863 = vmatprep.subr.bf16.mxu1 %v19402_v46 }
 0x2d2   : > { %12812 = vmatmul.mubr.msk.bf16.gmra.mrb[8].mxu1 %vm1123_vm5, %v15245_v44 }
 0x2d3   : > { %12815 = vmatprep.mubr.msk.bf16.mxu1 %vm14761_vm0, %v19402_v46  ;;  %12864 = vmatpush3.bf16.msra.mxu1 %v14265_v56  ;;  %v19448_v56 = vld [vmem:[#allocation32_spill] sm:$0xff] }
 0x2d4   : > { %12865 = vmatprep.subr.bf16.mxu1 %v19402_v46 }
 0x2d5   : > { %v1633_v8 = vpop.f32.mrb[160].mxu1 }
 0x2d6   : > { %v16033_v11 = vadd.f32 %v1633_v8, %v15872_v32  ;;  %v12693_v9 = vpop.f32.mrb[161].mxu1 }
 0x2d7   : > { %v1636_v15 = vpop.f32.mrb[162].mxu1  ;;  %12866 = vmatpush3.bf16.msra.mxu1 %v14266_v18 }
 0x2d8   : > { %v16036_v30 = vadd.f32 %v1636_v15, %v15875_v54  ;;  %v12694_v44 = vpop.f32.mrb[163].mxu1  ;;  %13719 = vmatprep.subr.bf16.mxu1 %v19402_v46  ;;  %v19449_v15 = vld [vmem:[#allocation37_spill] sm:$0xff] }
 0x2da   : > { %12816 = vmatmul.mubr.msk.bf16.gmra.mrb[12].mxu1 %vm1123_vm5, %v19446_v43 }
 0x2db   : > { %12819 = vmatprep.mubr.msk.bf16.mxu1 %vm14761_vm0, %v19402_v46 }
 0x2dd   : > { %v1641_v17 = vpop.f32.mrb[164].mxu1 }
 0x2de   : > { %v16044_v27 = vadd.f32 %v1641_v17, %v15888_v42  ;;  %v12697_v32 = vpop.f32.mrb[165].mxu1 }
 0x2df   : > { %v1644_v25 = vpop.f32.mrb[166].mxu1 }
 0x2e0   : > { %v16047_v57 = vadd.f32 %v1644_v25, %v15891_v47  ;;  %v12698_v54 = vpop.f32.mrb[167].mxu1  ;;  %v19450_v25 = vld [vmem:[#allocation38_spill] sm:$0xff] }
 0x2e2   : > { %12820 = vmatmul.mubr.msk.bf16.gmra.mrb[16].mxu1 %vm1123_vm5, %v19447_v63 }
 0x2e3   : > { %12823 = vmatprep.mubr.msk.bf16.mxu1 %vm14761_vm0, %v19402_v46 }
 0x2e5   : > { %v1649_v26 = vpop.f32.mrb[168].mxu1 }
 0x2e6   : > { %v16054_v35 = vadd.f32 %v1649_v26, %v15903_v33  ;;  %v12701_v59 = vpop.f32.mrb[169].mxu1 }
 0x2e7   : > { %v1652_v49 = vpop.f32.mrb[170].mxu1 }
 0x2e8   : > { %v16057_v42 = vadd.f32 %v1652_v49, %v15906_v61  ;;  %v12702_v41 = vpop.f32.mrb[171].mxu1  ;;  %v19451_v49 = vld [vmem:[#allocation39_spill] sm:$0xff] }
 0x2ea   : > { %12824 = vmatmul.mubr.msk.bf16.gmra.mrb[20].mxu1 %vm1123_vm5, %v19448_v56 }
 0x2eb   : > { %12827 = vmatprep.mubr.msk.bf16.mxu1 %vm14761_vm0, %v19402_v46 }
 0x2ed   : > { %v1657_v47 = vpop.f32.mrb[172].mxu1 }
 0x2ee   : > { %v16064_v16 = vadd.f32 %v1657_v47, %v15914_v53  ;;  %v12705_v18 = vpop.f32.mrb[173].mxu1 }
 0x2ef   : > { %v1660_v8 = vpop.f32.mrb[174].mxu1 }
 0x2f0   : > { %v16067_v33 = vadd.f32 %v1660_v8, %v15917_v39  ;;  %v12706_v9 = vpop.f32.mrb[175].mxu1  ;;  %v19452_v8 = vld [vmem:[#allocation40_spill] sm:$0xff] }
 0x2f1   : > { %v16103_v9 = vld [vmem:[#allocation2 + $0x68] sm:$0x3] }
 0x2f2   : > { %12828 = vmatmul.mubr.msk.bf16.gmra.mrb[24].mxu1 %vm1123_vm5, %v19449_v15 }
 0x2f3   : > { %12831 = vmatprep.mubr.msk.bf16.mxu1 %vm14761_vm0, %v19402_v46 }
 0x2f5   : > { %v1665_v61 = vpop.f32.mrb[176].mxu1 }
 0x2f6   : > { %v16074_v44 = vadd.f32 %v1665_v61, %v15925_v34  ;;  %v12709_v43 = vpop.f32.mrb[177].mxu1 }
 0x2f7   : > { %v1668_v17 = vpop.f32.mrb[178].mxu1 }
 0x2f8   : > { %v16077_v53 = vadd.f32 %v1668_v17, %v15928_v10  ;;  %v12710_v32 = vpop.f32.mrb[179].mxu1  ;;  %v11140_v17 = vcombine.low %v15971_v24, %v16103_v9 }
 0x2fa   : > { %12832 = vmatmul.mubr.msk.bf16.gmra.mrb[28].mxu1 %vm1123_vm5, %v19450_v25  ;;  %v2224_v32 = vshrl.u32 %v11140_v17, 16  ;;  %v2227_v25 = vshll.u32 %v11140_v17, 16 }
 0x2fb   : > { %12835 = vmatprep.mubr.msk.bf16.mxu1 %vm14761_vm0, %v19402_v46 }
 0x2fd   : > { %v1673_v39 = vpop.f32.mrb[180].mxu1 }
 0x2fe   : > { %v16084_v54 = vadd.f32 %v1673_v39, %v15936_v28  ;;  %v12713_v63 = vpop.f32.mrb[181].mxu1 }
 0x2ff   : > { %v1676_v26 = vpop.f32.mrb[182].mxu1 }
 0x300   : > { %v16087_v34 = vadd.f32 %v1676_v26, %v15939_v50  ;;  %v12714_v59 = vpop.f32.mrb[183].mxu1 }
 0x302   : > { %12836 = vmatmul.mubr.msk.bf16.gmra.mrb[32].mxu1 %vm1123_vm5, %v19451_v49  ;;  %v2226_v49 = vrot.slane %v2224_v32, 3 }
 0x303   : > { %12839 = vmatprep.mubr.msk.bf16.mxu1 %vm14761_vm0, %v19402_v46 }
 0x305   : > { %v1681_v10 = vpop.f32.mrb[184].mxu1 }
 0x306   : > { %v16094_v41 = vadd.f32 %v1681_v10, %v15947_v2  ;;  %v12717_v56 = vpop.f32.mrb[185].mxu1  ;;  %v2229_v10 = vrot.slane %v2227_v25, 4 }
 0x307   : > { %v1684_v47 = vpop.f32.mrb[186].mxu1 }
 0x308   : > { %v16097_v28 = vadd.f32 %v1684_v47, %v15950_v20  ;;  %v12718_v18 = vpop.f32.mrb[187].mxu1 }
 0x30a   : > { %12840 = vmatmul.mubr.msk.bf16.gmra.mrb[36].mxu1 %vm1123_vm5, %v19452_v8 }
 0x30b   : > { %12843 = vmatprep.mubr.msk.bf16.mxu1 %vm14761_vm0, %v19402_v46 }
 0x30d   : > { %v1689_v50 = vpop.f32.mrb[188].mxu1 }
 0x30e   : > { %v16106_v15 = vadd.f32 %v1689_v50, %v15958_v14  ;;  %v12721_v2 = vpop.f32.mrb[189].mxu1 }
 0x30f   : > { %v1692_v61 = vpop.f32.mrb[190].mxu1 }
 0x310   : > { %v16109_v43 = vadd.f32 %v1692_v61, %v15961_v51  ;;  %v12722_v20 = vpop.f32.mrb[191].mxu1 }
 0x312   : > { %12844 = vmatmul.mubr.msk.bf16.gmra.mrb[40].mxu1 %vm1123_vm5, %v15527_v37  ;;  %v2230_v37 = vor.u32 %v2229_v10, %v2226_v49 }
 0x313   : > { %12847 = vmatprep.mubr.msk.bf16.mxu1 %vm14761_vm0, %v19402_v46 }
 0x314   : > { %v2231_v50 = vsel %vm2115_vm7, %v15547_v58, %v2230_v37 }
 0x315   : > { %v1697_v39 = vpop.f32.mrb[192].mxu1 }
 0x316   : > { %v16118_v14 = vadd.f32 %v1697_v39, %v15969_v7  ;;  %v12725_v63 = vpop.f32.mrb[193].mxu1 }
 0x317   : > { %v1700_v26 = vpop.f32.mrb[194].mxu1  ;;  %v19454_v63 = vld [vmem:[#allocation10_spill] sm:$0xff] }
 0x318   : > { %v16121_v51 = vadd.f32 %v1700_v26, %v15974_v0  ;;  %v12726_v59 = vpop.f32.mrb[195].mxu1 }
 0x31a   : > { %12848 = vmatmul.mubr.msk.bf16.gmra.mrb[44].mxu1 %vm1123_vm5, %v15563_v23 }
 0x31b   : > { %12851 = vmatprep.mubr.msk.bf16.mxu1 %vm14761_vm0, %v19402_v46 }
 0x31d   : > { %v1705_v56 = vpop.f32.mrb[196].mxu1 }
 0x31e   : > { %v16128_v47 = vadd.f32 %v1705_v56, %v15982_v21  ;;  %v12729_v7 = vpop.f32.mrb[197].mxu1 }
 0x31f   : > { %v1708_v18 = vpop.f32.mrb[198].mxu1 }
 0x320   : > { %v16131_v8 = vadd.f32 %v1708_v18, %v15985_v52  ;;  %v12730_v0 = vpop.f32.mrb[199].mxu1  ;;  %v19456_v18 = vld [vmem:[#allocation11_spill] sm:$0xff] }
 0x321   : > { %v19457_v0 = vld [vmem:[#allocation12_spill] sm:$0xff] }
 0x322   : > { %12852 = vmatmul.mubr.msk.bf16.gmra.mrb[48].mxu1 %vm1123_vm5, %v2231_v50  ;;  %v19458_v50 = vcombine.low %v19456_v18, %v19457_v0 }
 0x323   : > { %12855 = vmatprep.mubr.msk.bf16.mxu1 %vm14761_vm0, %v19402_v46 }
 0x325   : > { %v1713_v23 = vpop.f32.mrb[200].mxu1 }
 0x326   : > { %v16139_v2 = vadd.f32 %v1713_v23, %v15992_v40  ;;  %v12733_v21 = vpop.f32.mrb[201].mxu1  ;;  %v19453_v40 = vld [vmem:[#allocation9_spill] sm:$0xff] }
 0x327   : > { %v1716_v61 = vpop.f32.mrb[202].mxu1  ;;  %v19455_v26 = vcombine.low %v19453_v40, %v19454_v63 }
 0x328   : > { %v16142_v20 = vadd.f32 %v1716_v61, %v15995_v36  ;;  %v12734_v52 = vpop.f32.mrb[203].mxu1  ;;  %v14674_v36 = vld [vmem:[%s19294_s3 + $0xc0] sm:$0xff]  }
 0x329   : > { %v14677_v52 = vld [vmem:[%s19294_s3 + $0xd8] sm:$0xff]  }
 0x32a   : > { %12856 = vmatmul.mubr.msk.bf16.gmra.mrb[52].mxu1 %vm1123_vm5, %v2230_v37  ;;  %v14675_v37 = vld [vmem:[%s19294_s3 + $0xc8] sm:$0xff]  }
 0x32b   : > { %12867 = vmatprep.mubr.msk.bf16.mxu1 %vm14761_vm0, %v19402_v46 }
 0x32d   : > { %v1721_v58 = vpop.f32.mrb[204].mxu1 }
 0x32e   : > { %v16148_v17 = vadd.f32 %v1721_v58, %v16001_v6  ;;  %v12737_v32 = vpop.f32.mrb[205].mxu1 }
 0x32f   : > { %v1724_v25 = vpop.f32.mrb[206].mxu1 }
 0x330   : > { %v12738_v39 = vpop.f32.mrb[207].mxu1  ;;  %v19459_v25 = vld [vmem:[#allocation13_spill] sm:$0xff] }
 0x331   : > { %v19460_v39 = vld [vmem:[#allocation14_spill] sm:$0xff] }
 0x332   : > { %12868 = vmatmul.mubr.msk.bf16.vlgmr.msra.gmra.mrb[56].mxu1 %vm1123_vm5, %v19455_v26  ;;  %v19461_v40 = vcombine.low %v19459_v25, %v19460_v39  ;;  %v19468_v39 = vld [vmem:[#allocation24_spill] sm:$0xff] }
 0x333   : > { %12871 = vmatprep.mubr.msk.bf16.mxu1 %vm14761_vm0, %v19402_v46  ;;  %13723 = vmatpush3.bf16.msra.mxu1 %v14674_v36 }
 0x334   : > { %13720 = vmatprep.subr.bf16.mxu1 %v19402_v46 }
 0x335   : > { %v1975_v6 = vpop.f32.mrb[208].mxu1 }
 0x336   : > { %v16161_v59 = vadd.f32 %v1975_v6, %v16015_v48  ;;  %v12749_v49 = vpop.f32.mrb[209].mxu1  ;;  %v14676_v48 = vld [vmem:[%s19294_s3 + $0xd0] sm:$0xff]  }
 0x337   : > { %v1978_v10 = vpop.f32.mrb[210].mxu1  ;;  %13724 = vmatpush3.bf16.msra.mxu1 %v14675_v37  ;;  %v19462_v49 = vld [vmem:[#allocation17_spill] sm:$0xff] }
 0x338   : > { %v16167_v56 = vadd.f32 %v1978_v10, %v16021_v29  ;;  %v12750_v7 = vpop.f32.mrb[211].mxu1  ;;  %13721 = vmatprep.subr.bf16.mxu1 %v19402_v46  ;;  %v19463_v10 = vld [vmem:[#allocation16_spill] sm:$0xff] }
 0x339   : > { %v19464_v37 = vcombine.low %v19462_v49, %v19463_v10  ;;  %v19471_v10 = vld [vmem:[#allocation27_spill] sm:$0xff] }
 0x33a   : > { %12872 = vmatmul.mubr.msk.bf16.gmra.mrb[60].mxu1 %vm1123_vm5, %v19458_v50 }
 0x33b   : > { %12875 = vmatprep.mubr.msk.bf16.mxu1 %vm14761_vm0, %v19402_v46  ;;  %13725 = vmatpush3.bf16.msra.mxu1 %v14676_v48  ;;  %v19465_v48 = vld [vmem:[#allocation20_spill] sm:$0xff] }
 0x33c   : > { %13722 = vmatprep.subr.bf16.mxu1 %v19402_v46 }
 0x33d   : > { %v1983_v29 = vpop.f32.mrb[212].mxu1 }
 0x33e   : > { %v16181_v23 = vadd.f32 %v1983_v29, %v16033_v11  ;;  %v12753_v21 = vpop.f32.mrb[213].mxu1  ;;  %v19466_v29 = vld [vmem:[#allocation19_spill] sm:$0xff] }
 0x33f   : > { %v1986_v61 = vpop.f32.mrb[214].mxu1  ;;  %13726 = vmatpush3.bf16.msra.mxu1 %v14677_v52  ;;  %v19467_v21 = vcombine.low %v19465_v48, %v19466_v29  ;;  %v19474_v29 = vld [vmem:[#allocation29_spill] sm:$0xff] }
 0x340   : > { %v16187_v58 = vadd.f32 %v1986_v61, %v16036_v30  ;;  %v12754_v32 = vpop.f32.mrb[215].mxu1  ;;  %12979 = vmatprep.subr.bf16.mxu1 %v19402_v46 }
 0x342   : > { %12876 = vmatmul.mubr.msk.bf16.gmra.mrb[64].mxu1 %vm1123_vm5, %v19461_v40  ;;  %v19469_v40 = vld [vmem:[#allocation23_spill] sm:$0xff] }
 0x343   : > { %12879 = vmatprep.mubr.msk.bf16.mxu1 %vm14761_vm0, %v19402_v46 }
 0x345   : > { %v1991_v11 = vpop.f32.mrb[216].mxu1 }
 0x346   : > { %v16197_v63 = vadd.f32 %v1991_v11, %v16044_v27  ;;  %v12757_v26 = vpop.f32.mrb[217].mxu1  ;;  %v19470_v11 = vcombine.low %v19468_v39, %v19469_v40  ;;  %v19477_v40 = vld [vmem:[#allocation31_spill] sm:$0xff] }
 0x347   : > { %v1994_v36 = vpop.f32.mrb[218].mxu1 }
 0x348   : > { %v16200_v30 = vadd.f32 %v1994_v36, %v16047_v57  ;;  %v12758_v6 = vpop.f32.mrb[219].mxu1 }
 0x34a   : > { %12880 = vmatmul.mubr.msk.bf16.gmra.mrb[68].mxu1 %vm1123_vm5, %v19464_v37  ;;  %v19472_v37 = vld [vmem:[#allocation26_spill] sm:$0xff] }
 0x34b   : > { %12883 = vmatprep.mubr.msk.bf16.mxu1 %vm14761_vm0, %v19402_v46 }
 0x34d   : > { %v1999_v7 = vpop.f32.mrb[220].mxu1 }
 0x34e   : > { %v16209_v18 = vadd.f32 %v1999_v7, %v16054_v35  ;;  %v12761_v27 = vpop.f32.mrb[221].mxu1  ;;  %v19473_v7 = vcombine.low %v19471_v10, %v19472_v37  ;;  %v19480_v37 = vld [vmem:[#allocation34_spill] sm:$0xff] }
 0x34f   : > { %v2002_v0 = vpop.f32.mrb[222].mxu1 }
 0x350   : > { %v16212_v50 = vadd.f32 %v2002_v0, %v16057_v42  ;;  %v12762_v57 = vpop.f32.mrb[223].mxu1 }
 0x352   : > { %12884 = vmatmul.mubr.msk.bf16.gmra.mrb[72].mxu1 %vm1123_vm5, %v19467_v21  ;;  %v19475_v21 = vld [vmem:[#allocation30_spill] sm:$0xff] }
 0x353   : > { %12887 = vmatprep.mubr.msk.bf16.mxu1 %vm14761_vm0, %v19402_v46 }
 0x355   : > { %v2007_v61 = vpop.f32.mrb[224].mxu1 }
 0x356   : > { %v16221_v52 = vadd.f32 %v2007_v61, %v16064_v16  ;;  %v12765_v35 = vpop.f32.mrb[225].mxu1  ;;  %v19476_v61 = vcombine.low %v19474_v29, %v19475_v21  ;;  %v19483_v21 = vld [vmem:[#allocation36_spill] sm:$0xff] }
 0x357   : > { %v2010_v32 = vpop.f32.mrb[226].mxu1 }
 0x358   : > { %v16224_v25 = vadd.f32 %v2010_v32, %v16067_v33  ;;  %v12766_v42 = vpop.f32.mrb[227].mxu1 }
 0x35a   : > { %12888 = vmatmul.mubr.msk.bf16.gmra.mrb[76].mxu1 %vm1123_vm5, %v19470_v11  ;;  %v19478_v11 = vld [vmem:[#allocation33_spill] sm:$0xff] }
 0x35b   : > { %12891 = vmatprep.mubr.msk.bf16.mxu1 %vm14761_vm0, %v19402_v46 }
 0x35d   : > { %v2015_v26 = vpop.f32.mrb[228].mxu1 }
 0x35e   : > { %v16233_v36 = vadd.f32 %v2015_v26, %v16074_v44  ;;  %v12769_v16 = vpop.f32.mrb[229].mxu1  ;;  %v19479_v26 = vcombine.low %v19477_v40, %v19478_v11 }
 0x35f   : > { %v2018_v6 = vpop.f32.mrb[230].mxu1 }
 0x360   : > { %v16236_v49 = vadd.f32 %v2018_v6, %v16077_v53  ;;  %v12770_v33 = vpop.f32.mrb[231].mxu1 }
 0x362   : > { %12892 = vmatmul.mubr.msk.bf16.gmra.mrb[80].mxu1 %vm1123_vm5, %v19473_v7  ;;  %v19481_v7 = vld [vmem:[#allocation35_spill] sm:$0xff] }
 0x363   : > { %12895 = vmatprep.mubr.msk.bf16.mxu1 %vm14761_vm0, %v19402_v46 }
 0x365   : > { %v2023_v27 = vpop.f32.mrb[232].mxu1 }
 0x366   : > { %v16245_v0 = vadd.f32 %v2023_v27, %v16084_v54  ;;  %v12773_v44 = vpop.f32.mrb[233].mxu1  ;;  %v19482_v27 = vcombine.low %v19480_v37, %v19481_v7 }
 0x367   : > { %v2026_v57 = vpop.f32.mrb[234].mxu1 }
 0x368   : > { %v16248_v48 = vadd.f32 %v2026_v57, %v16087_v34  ;;  %v12774_v53 = vpop.f32.mrb[235].mxu1 }
 0x36a   : > { %12896 = vmatmul.mubr.msk.bf16.gmra.mrb[84].mxu1 %vm1123_vm5, %v19476_v61  ;;  %v19484_v61 = vcombine.low %v19483_v21, %v15470_v19 }
 0x36b   : > { %12899 = vmatprep.mubr.msk.bf16.mxu1 %vm14761_vm0, %v19402_v46 }
 0x36d   : > { %v2031_v35 = vpop.f32.mrb[236].mxu1 }
 0x36e   : > { %v16257_v32 = vadd.f32 %v2031_v35, %v16094_v41  ;;  %v12777_v54 = vpop.f32.mrb[237].mxu1 }
 0x36f   : > { %v2034_v42 = vpop.f32.mrb[238].mxu1 }
 0x370   : > { %v16260_v39 = vadd.f32 %v2034_v42, %v16097_v28  ;;  %v12778_v34 = vpop.f32.mrb[239].mxu1 }
 0x371   : > { %v14678_v34 = vld [vmem:[#allocation2 + $0x60] sm:$0xf] }
 0x372   : > { %12900 = vmatmul.mubr.msk.bf16.gmra.mrb[88].mxu1 %vm1123_vm5, %v19479_v26  ;;  %v11177_v40 = vcombine.low %v14678_v34, %v15971_v24  ;;  %v11178_v26 = vcombine.low %v16103_v9, %v16103_v9  ;;  %v14274_v34 = vld [vmem:[%s19294_s3 + $0xf0] sm:$0xff]  }
 0x373   : > { %12903 = vmatprep.mubr.msk.bf16.mxu1 %vm14761_vm0, %v19402_v46 }
 0x375   : > { %v2039_v16 = vpop.f32.mrb[240].mxu1 }
 0x376   : > { %v16269_v6 = vadd.f32 %v2039_v16, %v16106_v15  ;;  %v12781_v41 = vpop.f32.mrb[241].mxu1 }
 0x377   : > { %v2042_v33 = vpop.f32.mrb[242].mxu1 }
 0x378   : > { %v16272_v10 = vadd.f32 %v2042_v33, %v16109_v43  ;;  %v12782_v28 = vpop.f32.mrb[243].mxu1  ;;  %v14198_v33 = vld [vmem:[#allocation2 + $0x34] sm:$0xff]  }
 0x379   : > { %v2809_v28 = vrot.slane %v14198_v33, 2 }
 0x37a   : > { %12904 = vmatmul.mubr.msk.bf16.gmra.mrb[92].mxu1 %vm1123_vm5, %v19482_v27  ;;  %v14268_v27 = vld [vmem:[%s19294_s3 + $0xe0] sm:$0xff]  }
 0x37b   : > { %12907 = vmatprep.mubr.msk.bf16.mxu1 %vm14761_vm0, %v19402_v46 }
 0x37d   : > { %v2047_v44 = vpop.f32.mrb[244].mxu1 }
 0x37e   : > { %v16281_v57 = vadd.f32 %v2047_v44, %v16118_v14  ;;  %v12785_v15 = vpop.f32.mrb[245].mxu1  ;;  %v19485_v44 = vld [vmem:[#allocation21_spill] sm:$0xff] }
 0x37f   : > { %v2050_v53 = vpop.f32.mrb[246].mxu1  ;;  %v19486_v15 = vrot.slane %v19485_v44, 2 }
 0x380   : > { %v16284_v29 = vadd.f32 %v2050_v53, %v16121_v51  ;;  %v12786_v43 = vpop.f32.mrb[247].mxu1 }
 0x381   : > { %v2810_v53 = vsel %vm2799_vm6, %v19486_v15, %v2809_v28  ;;  %v14267_v43 = vld [vmem:[#allocation2 + $0x3c] sm:$0xff]  }
 0x382   : > { %12908 = vmatmul.mubr.msk.bf16.gmra.mrb[96].mxu1 %vm1123_vm5, %v19484_v61  ;;  %v2811_v61 = vrot.slane %v14267_v43, 2 }
 0x383   : > { %12911 = vmatprep.mubr.msk.bf16.mxu1 %vm14761_vm0, %v19402_v46 }
 0x385   : > { %v2055_v35 = vpop.f32.mrb[248].mxu1 }
 0x386   : > { %v16293_v54 = vadd.f32 %v2055_v35, %v16128_v47  ;;  %v12789_v14 = vpop.f32.mrb[249].mxu1 }
 0x387   : > { %v2058_v42 = vpop.f32.mrb[250].mxu1 }
 0x388   : > { %v16297_v51 = vadd.f32 %v2058_v42, %v16131_v8  ;;  %v12790_v11 = vpop.f32.mrb[251].mxu1 }
 0x38a   : > { %12912 = vmatmul.mubr.msk.bf16.gmra.mrb[100].mxu1 %vm1123_vm5, %v11177_v40 }
 0x38b   : > { %12915 = vmatprep.mubr.msk.bf16.mxu1 %vm14761_vm0, %v19402_v46 }
 0x38d   : > { %v2063_v19 = vpop.f32.mrb[252].mxu1 }
 0x38e   : > { %v16305_v47 = vadd.f32 %v2063_v19, %v16139_v2  ;;  %v12793_v16 = vpop.f32.mrb[253].mxu1  ;;  %v2812_v19 = vsel %vm2799_vm6, %v2809_v28, %v2811_v61 }
 0x38f   : > { %v2066_v41 = vpop.f32.mrb[254].mxu1 }
 0x390   : > { %v16308_v24 = vadd.f32 %v2066_v41, %v16142_v20  ;;  %v12794_v8 = vpop.f32.mrb[255].mxu1 }
 0x392   : > { %12916 = vmatmul.mubr.msk.bf16.gmra.mrb[104].mxu1 %vm1123_vm5, %v11178_v26  ;;  %v14269_v26 = vld [vmem:[#allocation2 + $0x44] sm:$0xff]  }
 0x393   : > { %12943 = vmatprep.mubr.msk.bf16.mxu1 %vm14761_vm0, %v19402_v46  ;;  %v2813_v16 = vrot.slane %v14269_v26, 2  ;;  %v14273_v26 = vld [vmem:[#allocation2 + $0x5c] sm:$0xff]  }
 0x395   : > { %v2071_v37 = vpop.f32.mrb[0].mxu1 }
 0x396   : > { %v16314_v7 = vadd.f32 %v2071_v37, %v16148_v17  ;;  %v12797_v9 = vpop.f32.mrb[1].mxu1  ;;  %v14271_v17 = vld [vmem:[%s19294_s3 + $0xe8] sm:$0xff]  }
 0x397   : > { %v2074_v2 = vpop.f32.mrb[2].mxu1  ;;  %v2814_v9 = vsel %vm2799_vm6, %v2811_v61, %v2813_v16 }
 0x398   : > { %v12798_v20 = vpop.f32.mrb[3].mxu1  ;;  %v14270_v2 = vld [vmem:[#allocation2 + $0x4c] sm:$0xff]  }
 0x39a   : > { %12944 = vmatmul.mubr.msk.bf16.vlgmr.msra.gmra.mrb[108].mxu1 %vm1123_vm5, %v2810_v53 }
 0x39b   : > { %12947 = vmatprep.mubr.msk.bf16.mxu1 %vm14761_vm0, %v19402_v46  ;;  %12980 = vmatpush3.bf16.msra.mxu1 %v14268_v27 }
 0x39c   : > { %12981 = vmatprep.subr.bf16.mxu1 %v19402_v46 }
 0x39d   : > { %v2329_v21 = vpop.f32.mrb[4].mxu1 }
 0x39e   : > { %v16330_v35 = vadd.f32 %v2329_v21, %v16161_v59  ;;  %v12809_v14 = vpop.f32.mrb[5].mxu1  ;;  %v14277_v59 = vld [vmem:[%s19294_s3 + $0xf8] sm:$0xff]  }
 0x39f   : > { %v2332_v42 = vpop.f32.mrb[6].mxu1  ;;  %12982 = vmatpush3.bf16.msra.mxu1 %v14271_v17  ;;  %v14272_v17 = vld [vmem:[#allocation2 + $0x54] sm:$0xff]  }
 0x3a0   : > { %v16336_v40 = vadd.f32 %v2332_v42, %v16167_v56  ;;  %v12810_v11 = vpop.f32.mrb[7].mxu1  ;;  %12983 = vmatprep.subr.bf16.mxu1 %v19402_v46  ;;  %v2817_v61 = vrot.slane %v14272_v17, 2 }
 0x3a1   : > { %v14278_v11 = vld [vmem:[#allocation2 + $0x6c] sm:$0x1f]  }
 0x3a2   : > { %12948 = vmatmul.mubr.msk.bf16.gmra.mrb[112].mxu1 %vm1123_vm5, %v2812_v19 }
 0x3a3   : > { %12951 = vmatprep.mubr.msk.bf16.mxu1 %vm14761_vm0, %v19402_v46  ;;  %12984 = vmatpush3.bf16.msra.mxu1 %v14274_v34 }
 0x3a4   : > { %12985 = vmatprep.subr.bf16.mxu1 %v19402_v46 }
 0x3a5   : > { %v2337_v56 = vpop.f32.mrb[8].mxu1 }
 0x3a6   : > { %v16348_v41 = vadd.f32 %v2337_v56, %v16181_v23  ;;  %v12813_v8 = vpop.f32.mrb[9].mxu1  ;;  %v2815_v23 = vrot.slane %v14270_v2, 2  ;;  %v3261_v56 = vshll.u32 %v14278_v11, 16 }
 0x3a7   : > { %v2340_v33 = vpop.f32.mrb[10].mxu1  ;;  %12986 = vmatpush3.bf16.msra.mxu1 %v14277_v59  ;;  %v3258_v59 = vshrl.u32 %v14278_v11, 16 }
 0x3a8   : > { %v16351_v28 = vadd.f32 %v2340_v33, %v16187_v58  ;;  %v12814_v37 = vpop.f32.mrb[11].mxu1  ;;  %13099 = vmatprep.subr.bf16.mxu1 %v19402_v46  ;;  %v2816_v43 = vsel %vm2799_vm6, %v2813_v16, %v2815_v23  ;;  %v2818_v19 = vsel %vm2799_vm6, %v2815_v23, %v2817_v61  ;;  %v3526_v16 = vrot.slane %v14278_v11, 3 }
 0x3a9   : > { %v3263_v8 = vrot.slane %v3261_v56, 3  ;;  %v19487_v33 = vrot.slane %v15299_v3, 3 }
 0x3aa   : > { %12952 = vmatmul.mubr.msk.bf16.gmra.mrb[116].mxu1 %vm1123_vm5, %v2814_v9  ;;  %v2819_v9 = vrot.slane %v14273_v26, 2 }
 0x3ab   : > { %12955 = vmatprep.mubr.msk.bf16.mxu1 %vm14761_vm0, %v19402_v46 }
 0x3ad   : > { %v2345_v27 = vpop.f32.mrb[12].mxu1 }
 0x3ae   : > { %v16359_v20 = vadd.f32 %v2345_v27, %v16197_v63  ;;  %v12817_v44 = vpop.f32.mrb[13].mxu1 }
 0x3af   : > { %v2348_v15 = vpop.f32.mrb[14].mxu1 }
 0x3b0   : > { %v16362_v58 = vadd.f32 %v2348_v15, %v16200_v30  ;;  %v12818_v53 = vpop.f32.mrb[15].mxu1 }
 0x3b2   : > { %12956 = vmatmul.mubr.msk.bf16.gmra.mrb[120].mxu1 %vm1123_vm5, %v2816_v43  ;;  %v2820_v43 = vsel %vm2799_vm6, %v2817_v61, %v2819_v9 }
 0x3b3   : > { %12959 = vmatprep.mubr.msk.bf16.mxu1 %vm14761_vm0, %v19402_v46 }
 0x3b5   : > { %v2353_v21 = vpop.f32.mrb[16].mxu1 }
 0x3b6   : > { %v16369_v14 = vadd.f32 %v2353_v21, %v16209_v18  ;;  %v12821_v63 = vpop.f32.mrb[17].mxu1  ;;  %v3260_v18 = vrot.slane %v3258_v59, 2 }
 0x3b7   : > { %v2356_v42 = vpop.f32.mrb[18].mxu1 }
 0x3b8   : > { %v16372_v34 = vadd.f32 %v2356_v42, %v16212_v50  ;;  %v12822_v30 = vpop.f32.mrb[19].mxu1  ;;  %v3527_v50 = vsel %vm1852_vm9, %v19487_v33, %v3526_v16  ;;  %v16385_v23 = vor.u32 %v3263_v8, %v3260_v18  ;;  %v14276_v42 = vld [vmem:[#allocation2 + $0x6c] ss:$0 sps:$4 sm:$0xff]  }
 0x3b9   : > { %13092 = vmatmul.mubr.msk.bf16.gmra.mrb[60].mxu0 %vm1123_vm5, %v3527_v50 }
 0x3ba   : > { %12960 = vmatmul.mubr.msk.bf16.gmra.mrb[124].mxu1 %vm1123_vm5, %v2818_v19  ;;  %13095 = vmatprep.mubr.msk.bf16.mxu0 %vm14761_vm0, %v19402_v46  ;;  %v16395_v53 = vsel %vm3149_vm8, %v15523_v31, %v16385_v23  ;;  %v2823_v19 = vrot.slane %v14276_v42, 2  ;;  %v19489_v42 = vld [vmem:[#allocation18_spill] sm:$0xff] }
 0x3bb   : > { %12963 = vmatprep.mubr.msk.bf16.mxu1 %vm14761_vm0, %v19402_v46 }
 0x3bd   : > { %v2361_v37 = vpop.f32.mrb[20].mxu1 }
 0x3be   : > { %v16383_v2 = vadd.f32 %v2361_v37, %v16221_v52  ;;  %v12825_v27 = vpop.f32.mrb[21].mxu1  ;;  %v14275_v52 = vld [vmem:[#allocation2 + $0x64] sm:$0xff]  }
 0x3bf   : > { %v2364_v44 = vpop.f32.mrb[22].mxu1  ;;  %v2821_v21 = vrot.slane %v14275_v52, 2  ;;  %v19488_v52 = vld [vmem:[#allocation15_spill] sm:$0xff] }
 0x3c0   : > { %v16390_v15 = vadd.f32 %v2364_v44, %v16224_v25  ;;  %v12826_v3 = vpop.f32.mrb[23].mxu1 }
 0x3c1   : > { %13096 = vmatmul.mubr.msk.bf16.gmra.mrb[64].mxu0 %vm1123_vm5, %v3526_v16  ;;  %v2822_v11 = vsel %vm2799_vm6, %v2819_v9, %v2821_v21  ;;  %v2824_v16 = vsel %vm2799_vm6, %v2821_v21, %v2823_v19 }
 0x3c2   : > { %12964 = vmatmul.mubr.msk.bf16.gmra.mrb[128].mxu1 %vm1123_vm5, %v2820_v43  ;;  %13167 = vmatprep.mubr.msk.bf16.mxu0 %vm14761_vm0, %v19402_v46 }
 0x3c3   : > { %12967 = vmatprep.mubr.msk.bf16.mxu1 %vm14761_vm0, %v19402_v46 }
 0x3c5   : > { %v2369_v17 = vpop.f32.mrb[24].mxu1 }
 0x3c6   : > { %v16403_v25 = vadd.f32 %v2369_v17, %v16233_v36  ;;  %v12829_v63 = vpop.f32.mrb[25].mxu1 }
 0x3c7   : > { %v2372_v31 = vpop.f32.mrb[26].mxu1 }
 0x3c8   : > { %v16408_v61 = vadd.f32 %v2372_v31, %v16236_v49  ;;  %v12830_v30 = vpop.f32.mrb[27].mxu1 }
 0x3ca   : > { %12968 = vmatmul.mubr.msk.bf16.gmra.mrb[132].mxu1 %vm1123_vm5, %v2822_v11 }
 0x3cb   : > { %12971 = vmatprep.mubr.msk.bf16.mxu1 %vm14761_vm0, %v19402_v46 }
 0x3cd   : > { %v2377_v36 = vpop.f32.mrb[28].mxu1 }
 0x3ce   : > { %v16415_v26 = vadd.f32 %v2377_v36, %v16245_v0  ;;  %v12833_v59 = vpop.f32.mrb[29].mxu1 }
 0x3cf   : > { %v2380_v56 = vpop.f32.mrb[30].mxu1  ;;  %v19490_v59 = vld [vmem:[#allocation22_spill] sm:$0xff] }
 0x3d0   : > { %v16419_v49 = vadd.f32 %v2380_v56, %v16248_v48  ;;  %v12834_v18 = vpop.f32.mrb[31].mxu1 }
 0x3d2   : > { %12972 = vmatmul.mubr.msk.bf16.gmra.mrb[136].mxu1 %vm1123_vm5, %v2824_v16 }
 0x3d3   : > { %12975 = vmatprep.mubr.msk.bf16.mxu1 %vm14761_vm0, %v19402_v46 }
 0x3d5   : > { %v2385_v8 = vpop.f32.mrb[32].mxu1 }
 0x3d6   : > { %v16425_v33 = vadd.f32 %v2385_v8, %v16257_v32  ;;  %v12837_v50 = vpop.f32.mrb[33].mxu1 }
 0x3d7   : > { %v2388_v0 = vpop.f32.mrb[34].mxu1  ;;  %v19491_v50 = vld [vmem:[#allocation41_spill] sm:$0xff] }
 0x3d8   : > { %v16428_v37 = vadd.f32 %v2388_v0, %v16260_v39  ;;  %v12838_v9 = vpop.f32.mrb[35].mxu1 }
 0x3da   : > { %12976 = vmatmul.mubr.msk.bf16.gmra.mrb[140].mxu1 %vm1123_vm5, %v2823_v19 }
 0x3db   : > { %12987 = vmatprep.mubr.msk.bf16.mxu1 %vm14761_vm0, %v19402_v46 }
 0x3dd   : > { %v2393_v48 = vpop.f32.mrb[36].mxu1 }
 0x3de   : > { %v16434_v27 = vadd.f32 %v2393_v48, %v16269_v6  ;;  %v12841_v44 = vpop.f32.mrb[37].mxu1 }
 0x3df   : > { %v2396_v3 = vpop.f32.mrb[38].mxu1  ;;  %v19492_v44 = vld [vmem:[#allocation42_spill] sm:$0xff] }
 0x3e0   : > { %v16437_v32 = vadd.f32 %v2396_v3, %v16272_v10  ;;  %v12842_v43 = vpop.f32.mrb[39].mxu1 }
 0x3e2   : > { %12988 = vmatmul.mubr.msk.bf16.vlgmr.msra.gmra.mrb[144].mxu1 %vm1123_vm5, %v19488_v52 }
 0x3e3   : > { %12991 = vmatprep.mubr.msk.bf16.mxu1 %vm14761_vm0, %v19402_v46 }
 0x3e5   : > { %v2401_v39 = vpop.f32.mrb[40].mxu1 }
 0x3e6   : > { %v16444_v17 = vadd.f32 %v2401_v39, %v16281_v57  ;;  %v12845_v21 = vpop.f32.mrb[41].mxu1 }
 0x3e7   : > { %v2404_v63 = vpop.f32.mrb[42].mxu1 }
 0x3e8   : > { %v16447_v6 = vadd.f32 %v2404_v63, %v16284_v29  ;;  %v12846_v31 = vpop.f32.mrb[43].mxu1 }
 0x3ea   : > { %12992 = vmatmul.mubr.msk.bf16.gmra.mrb[148].mxu1 %vm1123_vm5, %v19489_v42 }
 0x3eb   : > { %12995 = vmatprep.mubr.msk.bf16.mxu1 %vm14761_vm0, %v19402_v46 }
 0x3ed   : > { %v2409_v10 = vpop.f32.mrb[44].mxu1 }
 0x3ee   : > { %v16454_v30 = vadd.f32 %v2409_v10, %v16293_v54  ;;  %v12849_v11 = vpop.f32.mrb[45].mxu1 }
 0x3ef   : > { %v2412_v19 = vpop.f32.mrb[46].mxu1 }
 0x3f0   : > { %v16457_v57 = vadd.f32 %v2412_v19, %v16297_v51  ;;  %v12850_v36 = vpop.f32.mrb[47].mxu1  ;;  %v14279_v51 = vld [vmem:[%s19296_s5 + $0x20] sm:$0xff]  }
 0x3f1   : > { %13100 = vmatpush3.bf16.msra.mxu1 %v14279_v51 }
 0x3f2   : > { %12996 = vmatmul.mubr.msk.bf16.gmra.mrb[152].mxu1 %vm1123_vm5, %v19490_v59  ;;  %13101 = vmatprep.subr.bf16.mxu1 %v19402_v46 }
 0x3f3   : > { %12999 = vmatprep.mubr.msk.bf16.mxu1 %vm14761_vm0, %v19402_v46 }
 0x3f5   : > { %v2417_v29 = vpop.f32.mrb[48].mxu1 }
 0x3f6   : > { %v16464_v56 = vadd.f32 %v2417_v29, %v16305_v47  ;;  %v12853_v16 = vpop.f32.mrb[49].mxu1 }
 0x3f7   : > { %v2420_v18 = vpop.f32.mrb[50].mxu1 }
 0x3f8   : > { %v16467_v54 = vadd.f32 %v2420_v18, %v16308_v24  ;;  %v12854_v8 = vpop.f32.mrb[51].mxu1 }
 0x3fa   : > { %13000 = vmatmul.mubr.msk.bf16.gmra.mrb[156].mxu1 %vm1123_vm5, %v19491_v50 }
 0x3fb   : > { %13003 = vmatprep.mubr.msk.bf16.mxu1 %vm14761_vm0, %v19402_v46 }
 0x3fd   : > { %v2425_v47 = vpop.f32.mrb[52].mxu1 }
 0x3fe   : > { %v16478_v0 = vadd.f32 %v2425_v47, %v16314_v7  ;;  %v12857_v24 = vpop.f32.mrb[53].mxu1 }
 0x3ff   : > { %v2428_v9 = vpop.f32.mrb[54].mxu1  ;;  %v19495_v24 = vld [vmem:[#allocation48_spill] sm:$0xff] }
 0x400   : > { %v12858_v48 = vpop.f32.mrb[55].mxu1  ;;  %v19496_v9 = vld [vmem:[#allocation44_spill] sm:$0xff] }
 0x401   : > { %v19497_v48 = vld [vmem:[#allocation49_spill] sm:$0xff] }
 0x402   : > { %13004 = vmatmul.mubr.msk.bf16.gmra.mrb[160].mxu1 %vm1123_vm5, %v19492_v44 }
 0x403   : > { %13007 = vmatprep.mubr.msk.bf16.mxu1 %vm14761_vm0, %v19402_v46 }
 0x405   : > { %v2575_v3 = vpop.f32.mrb[56].mxu1 }
 0x406   : > { %v2677_v43 = vadd.f32 %v2575_v3, %v16330_v35  ;;  %v12869_v52 = vpop.f32.mrb[57].mxu1 }
 0x407   : > { %v2578_v39 = vpop.f32.mrb[58].mxu1 }
 0x408   : > { %v2678_v21 = vadd.f32 %v2578_v39, %v16336_v40  ;;  %v12870_v63 = vpop.f32.mrb[59].mxu1  ;;  %v16487_v7 = vadd.f32 %v15692_v60, %v2677_v43  ;;  %v14280_v60 = vld [vmem:[%s19296_s5 + $0x28] sm:$0xff]  }
 0x409   : > { %13102 = vmatpush3.bf16.msra.mxu1 %v14280_v60 }
 0x40a   : > { %13008 = vmatmul.mubr.msk.bf16.gmra.mrb[164].mxu1 %vm1123_vm5, %v15533_v12  ;;  %v16492_v31 = vadd.f32 %v15697_v62, %v2678_v21  ;;  %13103 = vmatprep.subr.bf16.mxu1 %v19402_v46  ;;  %v19498_v21 = vld [vmem:[#allocation45_spill] sm:$0xff] }
 0x40b   : > { %13011 = vmatprep.mubr.msk.bf16.mxu1 %vm14761_vm0, %v19402_v46 }
 0x40d   : > { %v2583_v42 = vpop.f32.mrb[60].mxu1 }
 0x40e   : > { %v2679_v35 = vadd.f32 %v2583_v42, %v16348_v41  ;;  %v12873_v10 = vpop.f32.mrb[61].mxu1 }
 0x40f   : > { %v2586_v11 = vpop.f32.mrb[62].mxu1 }
 0x410   : > { %v2680_v40 = vadd.f32 %v2586_v11, %v16351_v28  ;;  %v12874_v19 = vpop.f32.mrb[63].mxu1  ;;  %v16502_v12 = vadd.f32 %v15705_v4, %v2679_v35 }
 0x412   : > { %13012 = vmatmul.mubr.msk.bf16.gmra.mrb[168].mxu1 %vm1123_vm5, %v15536_v5  ;;  %v16507_v62 = vadd.f32 %v15709_v22, %v2680_v40  ;;  %v19493_v5 = vld [vmem:[#allocation43_spill] sm:$0xff]  ;;  %v19499_v40 = vld [vmem:[#allocation46_spill] sm:$0xff] }
 0x413   : > { %13015 = vmatprep.mubr.msk.bf16.mxu1 %vm14761_vm0, %v19402_v46  ;;  %v19494_v22 = vld [vmem:[#allocation47_spill] sm:$0xff] }
 0x415   : > { %v2591_v41 = vpop.f32.mrb[64].mxu1 }
 0x416   : > { %v2681_v28 = vadd.f32 %v2591_v41, %v16359_v20  ;;  %v12877_v36 = vpop.f32.mrb[65].mxu1 }
 0x417   : > { %v2594_v59 = vpop.f32.mrb[66].mxu1 }
 0x418   : > { %v2682_v4 = vadd.f32 %v2594_v59, %v16362_v58  ;;  %v12878_v29 = vpop.f32.mrb[67].mxu1  ;;  %v16515_v16 = vadd.f32 %v15718_v45, %v2681_v28 }
 0x41a   : > { %13016 = vmatmul.mubr.msk.bf16.gmra.mrb[172].mxu1 %vm1123_vm5, %v19493_v5  ;;  %v16520_v18 = vadd.f32 %v19494_v22, %v2682_v4 }
 0x41b   : > { %13019 = vmatprep.mubr.msk.bf16.mxu1 %vm14761_vm0, %v19402_v46 }
 0x41d   : > { %v2599_v8 = vpop.f32.mrb[68].mxu1 }
 0x41e   : > { %v2683_v20 = vadd.f32 %v2599_v8, %v16369_v14  ;;  %v12881_v51 = vpop.f32.mrb[69].mxu1 }
 0x41f   : > { %v2602_v50 = vpop.f32.mrb[70].mxu1 }
 0x420   : > { %v2684_v58 = vadd.f32 %v2602_v50, %v16372_v34  ;;  %v12882_v47 = vpop.f32.mrb[71].mxu1  ;;  %v16527_v45 = vadd.f32 %v19495_v24, %v2683_v20  ;;  %v14284_v24 = vld [vmem:[%s19296_s5 + $0x10] sm:$0xff]  }
 0x422   : > { %13020 = vmatmul.mubr.msk.bf16.gmra.mrb[176].mxu1 %vm1123_vm5, %v19496_v9  ;;  %v16532_v44 = vadd.f32 %v19497_v48, %v2684_v58  ;;  %v14285_v9 = vld [vmem:[%s19296_s5 + $0x38] sm:$0xff]  }
 0x423   : > { %13023 = vmatprep.mubr.msk.bf16.mxu1 %vm14761_vm0, %v19402_v46 }
 0x425   : > { %v2607_v3 = vpop.f32.mrb[72].mxu1 }
 0x426   : > { %v16537_v14 = vadd.f32 %v2607_v3, %v16383_v2  ;;  %v12885_v43 = vpop.f32.mrb[73].mxu1  ;;  %v14281_v2 = vld [vmem:[%s19296_s5 + $0x30] sm:$0xff]  }
 0x427   : > { %v2610_v52 = vpop.f32.mrb[74].mxu1  ;;  %13104 = vmatpush3.bf16.msra.mxu1 %v14281_v2 }
 0x428   : > { %v16540_v34 = vadd.f32 %v2610_v52, %v16390_v15  ;;  %v12886_v39 = vpop.f32.mrb[75].mxu1  ;;  %13105 = vmatprep.subr.bf16.mxu1 %v19402_v46 }
 0x42a   : > { %13024 = vmatmul.mubr.msk.bf16.gmra.mrb[180].mxu1 %vm1123_vm5, %v19498_v21 }
 0x42b   : > { %13027 = vmatprep.mubr.msk.bf16.mxu1 %vm14761_vm0, %v19402_v46  ;;  %13106 = vmatpush3.bf16.msra.mxu1 %v14285_v9 }
 0x42c   : > { %13219 = vmatprep.subr.bf16.mxu1 %v19402_v46 }
 0x42d   : > { %v2615_v63 = vpop.f32.mrb[76].mxu1 }
 0x42e   : > { %v16547_v42 = vadd.f32 %v2615_v63, %v16403_v25  ;;  %v12889_v35 = vpop.f32.mrb[77].mxu1 }
 0x42f   : > { %v2618_v10 = vpop.f32.mrb[78].mxu1 }
 0x430   : > { %v16553_v15 = vadd.f32 %v2618_v10, %v16408_v61  ;;  %v12890_v11 = vpop.f32.mrb[79].mxu1 }
 0x432   : > { %13028 = vmatmul.mubr.msk.bf16.gmra.mrb[184].mxu1 %vm1123_vm5, %v19499_v40 }
 0x433   : > { %13031 = vmatprep.mubr.msk.bf16.mxu1 %vm14761_vm0, %v19402_v46 }
 0x435   : > { %v2623_v25 = vpop.f32.mrb[80].mxu1 }
 0x436   : > { %v16561_v19 = vadd.f32 %v2623_v25, %v16415_v26  ;;  %v12893_v60 = vpop.f32.mrb[81].mxu1 }
 0x437   : > { %v2626_v41 = vpop.f32.mrb[82].mxu1 }
 0x438   : > { %v16564_v28 = vadd.f32 %v2626_v41, %v16419_v49  ;;  %v12894_v61 = vpop.f32.mrb[83].mxu1 }
 0x43a   : > { %13032 = vmatmul.mubr.msk.bf16.gmra.mrb[188].mxu1 %vm1123_vm5, %v16395_v53 }
 0x43b   : > { %13035 = vmatprep.mubr.msk.bf16.mxu1 %vm14761_vm0, %v19402_v46 }
 0x43d   : > { %v2631_v36 = vpop.f32.mrb[84].mxu1 }
 0x43e   : > { %v16571_v59 = vadd.f32 %v2631_v36, %v16425_v33  ;;  %v12897_v4 = vpop.f32.mrb[85].mxu1 }
 0x43f   : > { %v2634_v29 = vpop.f32.mrb[86].mxu1 }
 0x440   : > { %v16574_v26 = vadd.f32 %v2634_v29, %v16428_v37  ;;  %v12898_v5 = vpop.f32.mrb[87].mxu1  ;;  %v14282_v37 = vld [vmem:[%s19296_s5] sm:$0xff]  }
 0x441   : > { %13160 = vmatpush3.bf16.msra.mxu0 %v14282_v37 }
 0x442   : > { %13036 = vmatmul.mubr.msk.bf16.gmra.mrb[192].mxu1 %vm1123_vm5, %v16385_v23  ;;  %v14283_v23 = vld [vmem:[%s19296_s5 + $0x8] sm:$0xff]   ;;  %13161 = vmatprep.subr.bf16.mxu0 %v19402_v46 }
 0x443   : > { %13107 = vmatprep.mubr.msk.bf16.mxu1 %vm14761_vm0, %v19402_v46 }
 0x445   : > { %v2639_v53 = vpop.f32.mrb[88].mxu1  ;;  %13162 = vmatpush3.bf16.msra.mxu0 %v14283_v23 }
 0x446   : > { %v16581_v49 = vadd.f32 %v2639_v53, %v16434_v27  ;;  %v12901_v22 = vpop.f32.mrb[89].mxu1  ;;  %13163 = vmatprep.subr.bf16.mxu0 %v19402_v46 }
 0x447   : > { %v2642_v8 = vpop.f32.mrb[90].mxu1 }
 0x448   : > { %v16584_v33 = vadd.f32 %v2642_v8, %v16437_v32  ;;  %v12902_v20 = vpop.f32.mrb[91].mxu1 }
 0x449   : > { %13164 = vmatpush3.bf16.msra.mxu0 %v14284_v24 }
 0x44a   : > { %13165 = vmatprep.subr.bf16.mxu0 %v19402_v46 }
 0x44d   : > { %v2647_v51 = vpop.f32.mrb[92].mxu1 }
 0x44e   : > { %v16594_v27 = vadd.f32 %v2647_v51, %v16444_v17  ;;  %v12905_v50 = vpop.f32.mrb[93].mxu1  ;;  %v14286_v17 = vld [vmem:[%s19296_s5 + $0x18] sm:$0xff]  }
 0x44f   : > { %v2650_v32 = vpop.f32.mrb[94].mxu1  ;;  %13166 = vmatpush3.bf16.msra.mxu0 %v14286_v17 }
 0x450   : > { %v16598_v58 = vadd.f32 %v2650_v32, %v16447_v6  ;;  %v12906_v47 = vpop.f32.mrb[95].mxu1  ;;  %13279 = vmatprep.subr.bf16.mxu0 %v19402_v46 }
 0x455   : > { %v2655_v48 = vpop.f32.mrb[96].mxu1 }
 0x456   : > { %v16612_v6 = vadd.f32 %v2655_v48, %v16454_v30  ;;  %v12909_v3 = vpop.f32.mrb[97].mxu1 }
 0x457   : > { %v2658_v43 = vpop.f32.mrb[98].mxu1 }
 0x458   : > { %v2698_v52 = vadd.f32 %v2658_v43, %v16457_v57  ;;  %v12910_v39 = vpop.f32.mrb[99].mxu1 }
 0x45d   : > { %v2663_v21 = vpop.f32.mrb[100].mxu1 }
 0x45e   : > { %v2699_v63 = vadd.f32 %v2663_v21, %v16464_v56  ;;  %v12913_v35 = vpop.f32.mrb[101].mxu1 }
 0x45f   : > { %v2666_v2 = vpop.f32.mrb[102].mxu1 }
 0x460   : > { %v2700_v10 = vadd.f32 %v2666_v2, %v16467_v54  ;;  %v12914_v11 = vpop.f32.mrb[103].mxu1 }
 0x465   : > { %v2671_v40 = vpop.f32.mrb[104].mxu1 }
 0x466   : > { %v2701_v30 = vadd.f32 %v2671_v40, %v16478_v0  ;;  %v12917_v25 = vpop.f32.mrb[105].mxu1 }
 0x467   : > { %v2674_v60 = vpop.f32.mrb[106].mxu1 }
 0x468   : > { %v12918_v41 = vpop.f32.mrb[107].mxu1 }
 0x46d   : > { %v2954_v61 = vpop.f32.mrb[108].mxu1 }
 0x46e   : > { %v16620_v36 = vadd.f32 %v2954_v61, %v16537_v14  ;;  %v12945_v57 = vpop.f32.mrb[109].mxu1 }
 0x46f   : > { %v2957_v4 = vpop.f32.mrb[110].mxu1 }
 0x470   : > { %v16623_v29 = vadd.f32 %v2957_v4, %v16540_v34  ;;  %v12946_v56 = vpop.f32.mrb[111].mxu1 }
 0x475   : > { %v2962_v5 = vpop.f32.mrb[112].mxu1 }
 0x476   : > { %v16626_v54 = vadd.f32 %v2962_v5, %v16547_v42  ;;  %v12949_v53 = vpop.f32.mrb[113].mxu1 }
 0x477   : > { %v2965_v22 = vpop.f32.mrb[114].mxu1 }
 0x478   : > { %v16629_v0 = vadd.f32 %v2965_v22, %v16553_v15  ;;  %v12950_v8 = vpop.f32.mrb[115].mxu1 }
 0x47d   : > { %v2970_v20 = vpop.f32.mrb[116].mxu1 }
 0x47e   : > { %v16632_v14 = vadd.f32 %v2970_v20, %v16561_v19  ;;  %v12953_v37 = vpop.f32.mrb[117].mxu1 }
 0x47f   : > { %v2973_v23 = vpop.f32.mrb[118].mxu1 }
 0x480   : > { %v16635_v34 = vadd.f32 %v2973_v23, %v16564_v28  ;;  %v12954_v51 = vpop.f32.mrb[119].mxu1 }
 0x485   : > { %v2978_v50 = vpop.f32.mrb[120].mxu1 }
 0x486   : > { %v16638_v42 = vadd.f32 %v2978_v50, %v16571_v59  ;;  %v12957_v32 = vpop.f32.mrb[121].mxu1 }
 0x487   : > { %v2981_v47 = vpop.f32.mrb[122].mxu1 }
 0x488   : > { %v16641_v15 = vadd.f32 %v2981_v47, %v16574_v26  ;;  %v12958_v24 = vpop.f32.mrb[123].mxu1 }
 0x48c   : > { %v16649_v43 = vpop.f32.mrb[60].mxu0 }
 0x48d   : > { %v2986_v9 = vpop.f32.mrb[124].mxu1  ;;  %v13093_v59 = vpop.f32.mrb[61].mxu0 }
 0x48e   : > { %v16644_v19 = vadd.f32 %v2986_v9, %v16581_v49  ;;  %v12961_v17 = vpop.f32.mrb[125].mxu1  ;;  %v16657_v11 = vpop.f32.mrb[62].mxu0  ;;  %v19501_v59 = vld [vmem:[#allocation51_spill] sm:$0xff] }
 0x48f   : > { %v2989_v48 = vpop.f32.mrb[126].mxu1  ;;  %v13094_v40 = vpop.f32.mrb[63].mxu0  ;;  %v19500_v17 = vld [vmem:[#allocation50_spill] sm:$0xff] }
 0x490   : > { %v16647_v28 = vadd.f32 %v2989_v48, %v16584_v33  ;;  %v12962_v3 = vpop.f32.mrb[127].mxu1 }
 0x494   : > { %v16659_v25 = vpop.f32.mrb[64].mxu0 }
 0x495   : > { %v2994_v39 = vpop.f32.mrb[128].mxu1  ;;  %v13097_v33 = vpop.f32.mrb[65].mxu0 }
 0x496   : > { %v16652_v21 = vadd.f32 %v2994_v39, %v16594_v27  ;;  %v12965_v26 = vpop.f32.mrb[129].mxu1  ;;  %v3724_v60 = vpop.f32.mrb[66].mxu0 }
 0x497   : > { %v2997_v35 = vpop.f32.mrb[130].mxu1  ;;  %v13098_v61 = vpop.f32.mrb[67].mxu0 }
 0x498   : > { %v16655_v2 = vadd.f32 %v2997_v35, %v16598_v58  ;;  %v12966_v49 = vpop.f32.mrb[131].mxu1 }
 0x49d   : > { %v3002_v41 = vpop.f32.mrb[132].mxu1 }
 0x49e   : > { %v16662_v57 = vadd.f32 %v3002_v41, %v16612_v6  ;;  %v12969_v27 = vpop.f32.mrb[133].mxu1 }
 0x49f   : > { %v3005_v4 = vpop.f32.mrb[134].mxu1  ;;  %v19502_v27 = vld [vmem:[#allocation52_spill] sm:$0xff] }
 0x4a0   : > { %v16664_v56 = vadd.f32 %v3005_v4, %v2698_v52  ;;  %v12970_v5 = vpop.f32.mrb[135].mxu1 }
 0x4a5   : > { %v3010_v58 = vpop.f32.mrb[136].mxu1 }
 0x4a6   : > { %v16666_v53 = vadd.f32 %v3010_v58, %v2699_v63  ;;  %v12973_v22 = vpop.f32.mrb[137].mxu1  ;;  %v16676_v63 = vld [vmem:[%s19295_s4] ss:$0 sm:$0xff] }
 0x4a7   : > { %v3013_v8 = vpop.f32.mrb[138].mxu1  ;;  %v19503_v22 = vld [vmem:[#allocation53_spill] sm:$0xff] }
 0x4a8   : > { %v16668_v20 = vadd.f32 %v3013_v8, %v2700_v10  ;;  %v12974_v37 = vpop.f32.mrb[139].mxu1 }
 0x4ad   : > { %v3018_v23 = vpop.f32.mrb[140].mxu1 }
 0x4ae   : > { %v16670_v51 = vadd.f32 %v3018_v23, %v2701_v30  ;;  %v12977_v50 = vpop.f32.mrb[141].mxu1 }
 0x4af   : > { %v3021_v32 = vpop.f32.mrb[142].mxu1 }
 0x4b0   : > { %v12978_v6 = vpop.f32.mrb[143].mxu1 }
 0x4b5   : > { %v3363_v47 = vpop.f32.mrb[144].mxu1 }
 0x4b6   : > { %v3465_v24 = vadd.f32 %v3363_v47, %v16487_v7  ;;  %v12989_v52 = vpop.f32.mrb[145].mxu1 }
 0x4b7   : > { %v3366_v9 = vpop.f32.mrb[146].mxu1  ;;  %v19504_v52 = vld [vmem:[#allocation54_spill] sm:$0xff] }
 0x4b8   : > { %v3727_v10 = vadd.f32 %v19500_v17, %v3465_v24  ;;  %v3466_v48 = vadd.f32 %v3366_v9, %v16492_v31  ;;  %v12990_v3 = vpop.f32.mrb[147].mxu1 }
 0x4ba   : > { %v3759_v30 = vadd.f32 %v16676_v63, %v3727_v10  ;;  %v3728_v39 = vadd.f32 %v19501_v59, %v3466_v48  ;;  %v19505_v59 = vld [vmem:[#allocation55_spill] sm:$0xff] }
 0x4bc   : > { %v3784_v26 = vmax.f32 %v3759_v30, 0.0  ;;  %v3760_v35 = vadd.f32 %v16676_v63, %v3728_v39  ;;  %v14303_v30 = vld [vmem:[%s19296_s5 + $0x60] sm:$0xff]  }
 0x4bd   : > { %v3371_v7 = vpop.f32.mrb[148].mxu1 }
 0x4be   : > { %v12008_v49 = vpack.c.bf16 %v3784_v26, %v3784_v26  ;;  %v3785_v40 = vmax.f32 %v3760_v35, 0.0  ;;  %v3467_v33 = vadd.f32 %v3371_v7, %v16502_v12  ;;  %v12993_v60 = vpop.f32.mrb[149].mxu1 }
 0x4bf   : > { %v3374_v41 = vpop.f32.mrb[150].mxu1 }
 0x4c0   : > { %3910 = vst.msk [vmem:[#allocation3] sm:$0xf] %vm414_vm1, %v12008_v49  ;;  %v12009_v61 = vpack.c.bf16 %v3785_v40, %v3785_v40  ;;  %v3729_v31 = vadd.f32 %v19502_v27, %v3467_v33  ;;  %v3468_v4 = vadd.f32 %v3374_v41, %v16507_v62  ;;  %v12994_v5 = vpop.f32.mrb[151].mxu1  ;;  %v14304_v40 = vld [vmem:[%s19296_s5 + $0x68] sm:$0xff]  }
 0x4c2   : > { %3911 = vst.msk [vmem:[#allocation3 + $0x4] sm:$0xf] %vm414_vm1, %v12009_v61  ;;  %v3761_v58 = vadd.f32 %v16676_v63, %v3729_v31  ;;  %v3730_v8 = vadd.f32 %v19503_v22, %v3468_v4  ;;  %v19506_v22 = vld [vmem:[#allocation56_spill] sm:$0xff] }
 0x4c4   : > { %v3786_v37 = vmax.f32 %v3761_v58, 0.0  ;;  %v3762_v23 = vadd.f32 %v16676_v63, %v3730_v8 }
 0x4c5   : > { %v3379_v12 = vpop.f32.mrb[152].mxu1 }
 0x4c6   : > { %v12010_v50 = vpack.c.bf16 %v3786_v37, %v3786_v37  ;;  %v3787_v32 = vmax.f32 %v3762_v23, 0.0  ;;  %v3469_v6 = vadd.f32 %v3379_v12, %v16515_v16  ;;  %v12997_v47 = vpop.f32.mrb[153].mxu1  ;;  %v14306_v12 = vld [vmem:[%s19296_s5 + $0x70] sm:$0xff]  }
 0x4c7   : > { %v3382_v24 = vpop.f32.mrb[154].mxu1  ;;  %v3935_v48 = vld [vmem:[#allocation3] sm:$0xf] }
 0x4c8   : > { %3912 = vst.msk [vmem:[#allocation3 + $0x8] sm:$0xf] %vm414_vm1, %v12010_v50  ;;  %v12011_v62 = vpack.c.bf16 %v3787_v32, %v3787_v32  ;;  %v3731_v9 = vadd.f32 %v19504_v52, %v3469_v6  ;;  %v3470_v17 = vadd.f32 %v3382_v24, %v16520_v18  ;;  %v12998_v10 = vpop.f32.mrb[155].mxu1  ;;  %v4533_v41 = vld [vmem:[#allocation3] sm:$0xe]  ;;  %v19507_v24 = vld [vmem:[#allocation57_spill] sm:$0xff] }
 0x4c9   : > { %v3936_v3 = vld [vmem:[#allocation3 + $0x4] sm:$0xf] }
 0x4ca   : > { %3913 = vst.msk [vmem:[#allocation3 + $0xc] sm:$0xf] %vm414_vm1, %v12011_v62  ;;  %v3763_v16 = vadd.f32 %v16676_v63, %v3731_v9  ;;  %v3732_v39 = vadd.f32 %v19505_v59, %v3470_v17  ;;  %v11332_v26 = vcombine.low %v3935_v48, %v3936_v3  ;;  %v11388_v31 = vcombine.low %v4533_v41, %v3936_v3 }
 0x4cc   : > { %v3788_v35 = vmax.f32 %v3763_v16, 0.0  ;;  %v3764_v7 = vadd.f32 %v16676_v63, %v3732_v39  ;;  %13168 = vmatmul.mubr.msk.bf16.vlgmr.msra.gmra.mrb[68].mxu0 %vm1123_vm5, %v11332_v26  ;;  %v4044_v18 = vshll.u32 %v11332_v26, 16  ;;  %v4042_v9 = vshrl.u32 %v11332_v26, 16  ;;  %v14291_v26 = vld [vmem:[%s19296_s5 + $0x40] sm:$0xff]  }
 0x4cd   : > { %v3387_v49 = vpop.f32.mrb[156].mxu1  ;;  %13171 = vmatprep.mubr.msk.bf16.mxu0 %vm14761_vm0, %v19402_v46  ;;  %13280 = vmatpush3.bf16.msra.mxu0 %v14303_v30  ;;  %v4546_v17 = vrot.slane %v11388_v31, 1 }
 0x4ce   : > { %v12012_v33 = vpack.c.bf16 %v3788_v35, %v3788_v35  ;;  %v3789_v60 = vmax.f32 %v3764_v7, 0.0  ;;  %v3471_v61 = vadd.f32 %v3387_v49, %v16527_v45  ;;  %v13001_v27 = vpop.f32.mrb[157].mxu1  ;;  %13281 = vmatprep.subr.bf16.mxu0 %v19402_v46  ;;  %v4795_v45 = vld [vmem:[#allocation3 + $0x4] sm:$0x8]  ;;  %v4046_v50 = vrot.slane %v4044_v18, 1 }
 0x4cf   : > { %v3390_v4 = vpop.f32.mrb[158].mxu1  ;;  %v16710_v5 = vld [vmem:[#allocation3 + $0x8] sm:$0xf] }
 0x4d0   : > { %3914 = vst.msk [vmem:[#allocation3 + $0x10] sm:$0xf] %vm414_vm1, %v12012_v33  ;;  %v12013_v58 = vpack.c.bf16 %v3789_v60, %v3789_v60  ;;  %v3733_v8 = vadd.f32 %v19506_v22, %v3471_v61  ;;  %v3472_v37 = vadd.f32 %v3390_v4, %v16532_v44  ;;  %v13002_v23 = vpop.f32.mrb[159].mxu1  ;;  %v16727_v44 = vcombine.low %v4795_v45, %v16710_v5  ;;  %v14309_v33 = vld [vmem:[%s19296_s5 + $0x78] sm:$0xff]  }
 0x4d1   : > { %v16718_v32 = vld [vmem:[#allocation3 + $0x8] sm:$0xff]   ;;  %13282 = vmatpush3.bf16.msra.mxu0 %v14304_v40  ;;  %v4047_v16 = vor.u32 %v4046_v50, %v4042_v9 }
 0x4d2   : > { %v16720_v6 = vld [vmem:[#allocation3 + $0xc] sm:$0xf]  ;;  %3915 = vst.msk [vmem:[#allocation3 + $0x14] sm:$0xf] %vm414_vm1, %v12013_v58  ;;  %v3765_v47 = vadd.f32 %v16676_v63, %v3733_v8  ;;  %v3734_v62 = vadd.f32 %v19507_v24, %v3472_v37  ;;  %13283 = vmatprep.subr.bf16.mxu0 %v19402_v46  ;;  %v4049_v10 = vshll.u32 %v16718_v32, 16  ;;  %v4547_v48 = vrot.slane %v16718_v32, 1 }
 0x4d3   : > { %v5158_v60 = vshrl.u32 %v16727_v44, 16  ;;  %v5161_v31 = vshll.u32 %v16727_v44, 16  ;;  %v14296_v37 = vld [vmem:[%s19296_s5 + $0x48] sm:$0xff]  }
 0x4d4   : > { %v3790_v3 = vmax.f32 %v3765_v47, 0.0  ;;  %v3766_v30 = vadd.f32 %v16676_v63, %v3734_v62  ;;  %13172 = vmatmul.mubr.msk.bf16.gmra.mrb[72].mxu0 %vm1123_vm5, %v16718_v32  ;;  %v4051_v59 = vrot.slane %v4049_v10, 1  ;;  %v16737_v39 = vsel %vm1502_vm10, %v4546_v17, %v4547_v48  ;;  %v19509_v47 = vld [vmem:[#allocation59_spill] sm:$0xff] }
 0x4d5   : > { %v3395_v35 = vpop.f32.mrb[160].mxu1  ;;  %13175 = vmatprep.mubr.msk.bf16.mxu0 %vm14761_vm0, %v19402_v46  ;;  %13284 = vmatpush3.bf16.msra.mxu0 %v14306_v12  ;;  %v4053_v12 = vshrl.u32 %v16718_v32, 16  ;;  %v5160_v62 = vrot.slane %v5158_v60, 3  ;;  %v5163_v10 = vrot.slane %v5161_v31, 4 }
 0x4d6   : > { %v12014_v7 = vpack.c.bf16 %v3790_v3, %v3790_v3  ;;  %v3791_v18 = vmax.f32 %v3766_v30, 0.0  ;;  %v3473_v49 = vadd.f32 %v3395_v35, %v16620_v36  ;;  %v13005_v40 = vpop.f32.mrb[161].mxu1  ;;  %13285 = vmatprep.subr.bf16.mxu0 %v19402_v46  ;;  %v4052_v41 = vsel %vm995_vm4, %v4047_v16, %v4051_v59  ;;  %v19508_v36 = vld [vmem:[#allocation58_spill] sm:$0xff] }
 0x4d7   : > { %v3398_v61 = vpop.f32.mrb[162].mxu1  ;;  %v16751_v27 = vld [vmem:[#allocation3 + $0x10] sm:$0xf]  ;;  %13108 = vmatmul.mubr.msk.bf16.vlgmr.msra.gmra.mrb[196].mxu1 %vm1123_vm5, %v4052_v41  ;;  %v4055_v30 = vor.u32 %v4053_v12, %v4051_v59 }
 0x4d8   : > { %3916 = vst.msk [vmem:[#allocation3 + $0x18] sm:$0xf] %vm414_vm1, %v12014_v7  ;;  %v12015_v4 = vpack.c.bf16 %v3791_v18, %v3791_v18  ;;  %v3735_v58 = vadd.f32 %v19508_v36, %v3473_v49  ;;  %v3474_v22 = vadd.f32 %v3398_v61, %v16623_v29  ;;  %v13006_v8 = vpop.f32.mrb[163].mxu1  ;;  %v16763_v23 = vcombine.low %v16720_v6, %v16751_v27  ;;  %v14300_v49 = vld [vmem:[%s19296_s5 + $0x50] sm:$0xff]  }
 0x4d9   : > { %v16766_v45 = vld [vmem:[#allocation3 + $0x10] sm:$0xff]   ;;  %13111 = vmatprep.mubr.msk.bf16.mxu1 %vm14761_vm0, %v19402_v46  ;;  %13220 = vmatpush3.bf16.msra.mxu1 %v14291_v26 }
 0x4da   : > { %v16770_v29 = vld [vmem:[#allocation3 + $0x14] sm:$0xf]  ;;  %3917 = vst.msk [vmem:[#allocation3 + $0x1c] sm:$0xf] %vm414_vm1, %v12015_v4  ;;  %v3767_v50 = vadd.f32 %v16676_v63, %v3735_v58  ;;  %v3736_v24 = vadd.f32 %v19509_v47, %v3474_v22  ;;  %13221 = vmatprep.subr.bf16.mxu1 %v19402_v46  ;;  %13286 = vmatpush3.bf16.msra.mxu0 %v14309_v33  ;;  %v5166_v32 = vshrl.u32 %v16763_v23, 16  ;;  %v4057_v9 = vshll.u32 %v16766_v45, 16 }
 0x4db   : > { %v4549_v17 = vrot.slane %v16766_v45, 1  ;;  %v5169_v3 = vshll.u32 %v16763_v23, 16  ;;  %13399 = vmatprep.subr.bf16.mxu0 %v19402_v46  ;;  %v5164_v58 = vor.u32 %v5163_v10, %v5160_v62  ;;  %v14307_v62 = vld [vmem:[%s19296_s5 + $0x58] sm:$0xff]  }
 0x4dc   : > { %v3792_v16 = vmax.f32 %v3767_v50, 0.0  ;;  %v3768_v35 = vadd.f32 %v16676_v63, %v3736_v24  ;;  %13176 = vmatmul.mubr.msk.bf16.gmra.mrb[76].mxu0 %vm1123_vm5, %v16766_v45  ;;  %v5168_v26 = vrot.slane %v5166_v32, 3  ;;  %v4059_v7 = vrot.slane %v4057_v9, 1  ;;  %v19511_v10 = vld [vmem:[#allocation61_spill] sm:$0xff] }
 0x4dd   : > { %v3403_v18 = vpop.f32.mrb[164].mxu1  ;;  %13179 = vmatprep.mubr.msk.bf16.mxu0 %vm14761_vm0, %v19402_v46  ;;  %13222 = vmatpush3.bf16.msra.mxu1 %v14296_v37  ;;  %v5171_v40 = vrot.slane %v5169_v3, 4  ;;  %v16790_v59 = vsel %vm1502_vm10, %v4547_v48, %v4549_v17  ;;  %v19510_v37 = vld [vmem:[#allocation60_spill] sm:$0xff] }
 0x4de   : > { %v12016_v60 = vpack.c.bf16 %v3792_v16, %v3792_v16  ;;  %v3793_v41 = vmax.f32 %v3768_v35, 0.0  ;;  %v3475_v61 = vadd.f32 %v3403_v18, %v16626_v54  ;;  %v13009_v31 = vpop.f32.mrb[165].mxu1  ;;  %13223 = vmatprep.subr.bf16.mxu1 %v19402_v46  ;;  %v4060_v36 = vsel %vm995_vm4, %v4055_v30, %v4059_v7 }
 0x4df   : > { %v3406_v4 = vpop.f32.mrb[166].mxu1  ;;  %v5172_v22 = vor.u32 %v5171_v40, %v5168_v26  ;;  %v16797_v8 = vld [vmem:[#allocation3 + $0x18] sm:$0xf]  ;;  %13112 = vmatmul.mubr.msk.bf16.gmra.mrb[200].mxu1 %vm1123_vm5, %v4060_v36 }
 0x4e0   : > { %3918 = vst.msk [vmem:[#allocation3 + $0x20] sm:$0xf] %vm414_vm1, %v12016_v60  ;;  %v12017_v48 = vpack.c.bf16 %v3793_v41, %v3793_v41  ;;  %v3737_v12 = vadd.f32 %v19510_v37, %v3475_v61  ;;  %v3476_v50 = vadd.f32 %v3406_v4, %v16629_v0  ;;  %v13010_v47 = vpop.f32.mrb[167].mxu1  ;;  %v16805_v54 = vcombine.low %v16770_v29, %v16797_v8 }
 0x4e1   : > { %v16807_v24 = vld [vmem:[#allocation3 + $0x18] sm:$0xff]   ;;  %13115 = vmatprep.mubr.msk.bf16.mxu1 %vm14761_vm0, %v19402_v46  ;;  %13224 = vmatpush3.bf16.msra.mxu1 %v14300_v49  ;;  %v16815_v32 = vsel %vm2115_vm7, %v5164_v58, %v5172_v22  ;;  %v4061_v0 = vshrl.u32 %v16766_v45, 16 }
 0x4e2   : > { %3919 = vst.msk [vmem:[#allocation3 + $0x24] sm:$0xf] %vm414_vm1, %v12017_v48  ;;  %v3769_v9 = vadd.f32 %v16676_v63, %v3737_v12  ;;  %v3738_v3 = vadd.f32 %v19511_v10, %v3476_v50  ;;  %13225 = vmatprep.subr.bf16.mxu1 %v19402_v46  ;;  %v5175_v30 = vshrl.u32 %v16805_v54, 16  ;;  %v16823_v16 = vld [vmem:[#allocation3 + $0x1c] sm:$0xf]  ;;  %v4065_v35 = vshll.u32 %v16807_v24, 16 }
 0x4e3   : > { %v4551_v26 = vrot.slane %v16807_v24, 1  ;;  %v5178_v18 = vshll.u32 %v16805_v54, 16  ;;  %v4063_v49 = vor.u32 %v4061_v0, %v4059_v7 }
 0x4e4   : > { %v3794_v40 = vmax.f32 %v3769_v9, 0.0  ;;  %v3770_v45 = vadd.f32 %v16676_v63, %v3738_v3  ;;  %13180 = vmatmul.mubr.msk.bf16.gmra.mrb[80].mxu0 %vm1123_vm5, %v16807_v24  ;;  %v5177_v60 = vrot.slane %v5175_v30, 3  ;;  %v4067_v41 = vrot.slane %v4065_v35, 1 }
 0x4e5   : > { %v3411_v61 = vpop.f32.mrb[168].mxu1  ;;  %13183 = vmatprep.mubr.msk.bf16.mxu0 %vm14761_vm0, %v19402_v46  ;;  %13226 = vmatpush3.bf16.msra.mxu1 %v14307_v62  ;;  %v5180_v31 = vrot.slane %v5178_v18, 4  ;;  %v16834_v4 = vsel %vm1502_vm10, %v4549_v17, %v4551_v26  ;;  %v19512_v62 = vld [vmem:[#allocation62_spill] sm:$0xff]  ;;  %v4069_v18 = vshrl.u32 %v16807_v24, 16 }
 0x4e6   : > { %v12018_v36 = vpack.c.bf16 %v3794_v40, %v3794_v40  ;;  %v3795_v58 = vmax.f32 %v3770_v45, 0.0  ;;  %v3477_v48 = vadd.f32 %v3411_v61, %v16632_v14  ;;  %v13013_v37 = vpop.f32.mrb[169].mxu1  ;;  %13339 = vmatprep.subr.bf16.mxu1 %v19402_v46  ;;  %v4068_v50 = vsel %vm995_vm4, %v4063_v49, %v4067_v41  ;;  %v19513_v49 = vld [vmem:[#allocation63_spill] sm:$0xff] }
 0x4e7   : > { %v3414_v12 = vpop.f32.mrb[170].mxu1  ;;  %v5181_v47 = vor.u32 %v5180_v31, %v5177_v60  ;;  %v16841_v0 = vld [vmem:[#allocation3 + $0x20] sm:$0xf]  ;;  %13116 = vmatmul.mubr.msk.bf16.gmra.mrb[204].mxu1 %vm1123_vm5, %v4068_v50 }
 0x4e8   : > { %3920 = vst.msk [vmem:[#allocation3 + $0x28] sm:$0xf] %vm414_vm1, %v12018_v36  ;;  %v12019_v17 = vpack.c.bf16 %v3795_v58, %v3795_v58  ;;  %v3739_v9 = vadd.f32 %v19512_v62, %v3477_v48  ;;  %v3478_v10 = vadd.f32 %v3414_v12, %v16635_v34  ;;  %v13014_v3 = vpop.f32.mrb[171].mxu1  ;;  %v16849_v14 = vcombine.low %v16823_v16, %v16841_v0 }
 0x4e9   : > { %v14293_v30 = vld [vmem:[#allocation3 + $0x20] sm:$0xff]   ;;  %13119 = vmatprep.mubr.msk.bf16.mxu1 %vm14761_vm0, %v19402_v46  ;;  %v16854_v35 = vsel %vm2115_vm7, %v5172_v22, %v5181_v47  ;;  %v4071_v58 = vor.u32 %v4069_v18, %v4067_v41 }
 0x4ea   : > { %3921 = vst.msk [vmem:[#allocation3 + $0x2c] sm:$0xf] %vm414_vm1, %v12019_v17  ;;  %v3771_v34 = vadd.f32 %v16676_v63, %v3739_v9  ;;  %v3740_v40 = vadd.f32 %v19513_v49, %v3478_v10  ;;  %v5184_v45 = vshrl.u32 %v16849_v14, 16  ;;  %v16861_v60 = vld [vmem:[#allocation3 + $0x24] sm:$0xf]  ;;  %v4073_v61 = vshll.u32 %v14293_v30, 16 }
 0x4eb   : > { %v4553_v31 = vrot.slane %v14293_v30, 1  ;;  %v5187_v36 = vshll.u32 %v16849_v14, 16 }
 0x4ec   : > { %v3796_v48 = vmax.f32 %v3771_v34, 0.0  ;;  %v3772_v22 = vadd.f32 %v16676_v63, %v3740_v40  ;;  %13184 = vmatmul.mubr.msk.bf16.gmra.mrb[84].mxu0 %vm1123_vm5, %v14293_v30  ;;  %v5186_v37 = vrot.slane %v5184_v45, 3  ;;  %v4075_v24 = vrot.slane %v4073_v61, 1 }
 0x4ed   : > { %v3419_v12 = vpop.f32.mrb[172].mxu1  ;;  %13187 = vmatprep.mubr.msk.bf16.mxu0 %vm14761_vm0, %v19402_v46  ;;  %v5189_v50 = vrot.slane %v5187_v36, 4  ;;  %v16869_v17 = vsel %vm1502_vm10, %v4551_v26, %v4553_v31 }
 0x4ee   : > { %v12020_v9 = vpack.c.bf16 %v3796_v48, %v3796_v48  ;;  %v3797_v41 = vmax.f32 %v3772_v22, 0.0  ;;  %v3479_v10 = vadd.f32 %v3419_v12, %v16638_v42  ;;  %v13017_v3 = vpop.f32.mrb[173].mxu1  ;;  %v4076_v34 = vsel %vm995_vm4, %v4071_v58, %v4075_v24 }
 0x4ef   : > { %v3422_v18 = vpop.f32.mrb[174].mxu1  ;;  %v5190_v49 = vor.u32 %v5189_v50, %v5186_v37  ;;  %v16875_v40 = vld [vmem:[#allocation3 + $0x28] sm:$0xf]  ;;  %13120 = vmatmul.mubr.msk.bf16.gmra.mrb[208].mxu1 %vm1123_vm5, %v4076_v34  ;;  %v4077_v22 = vshrl.u32 %v14293_v30, 16 }
 0x4f0   : > { %19514 = vst [vmem:[#allocation25_spill] sm:$0xff] %v16875_v40  ;;  %3922 = vst.msk [vmem:[#allocation3 + $0x30] sm:$0xf] %vm414_vm1, %v12020_v9  ;;  %v12021_v45 = vpack.c.bf16 %v3797_v41, %v3797_v41  ;;  %v3741_v26 = vadd.f32 %v15835_v13, %v3479_v10  ;;  %v3480_v61 = vadd.f32 %v3422_v18, %v16641_v15  ;;  %v13018_v36 = vpop.f32.mrb[175].mxu1  ;;  %13123 = vmatprep.mubr.msk.bf16.mxu1 %vm14761_vm0, %v19402_v46  ;;  %v19515_v15 = vld [vmem:[#allocation64_spill] sm:$0xff] }
 0x4f1   : > { %v16883_v42 = vcombine.low %v16861_v60, %v16875_v40  ;;  %v14294_v48 = vld [vmem:[#allocation3 + $0x28] sm:$0xff]   ;;  %v16888_v58 = vsel %vm2115_vm7, %v5181_v47, %v5190_v49  ;;  %v4079_v3 = vor.u32 %v4077_v22, %v4075_v24 }
 0x4f2   : > { %3923 = vst.msk [vmem:[#allocation3 + $0x34] sm:$0xf] %vm414_vm1, %v12021_v45  ;;  %v3773_v13 = vadd.f32 %v16676_v63, %v3741_v26  ;;  %v3742_v37 = vadd.f32 %v19515_v15, %v3480_v61  ;;  %v16894_v50 = vld [vmem:[#allocation3 + $0x2c] sm:$0xf]  ;;  %v4081_v9 = vshll.u32 %v14294_v48, 16  ;;  %v4555_v41 = vrot.slane %v14294_v48, 1 }
 0x4f3   : > { %v5193_v12 = vshrl.u32 %v16883_v42, 16  ;;  %19516 = vst [vmem:[#allocation28_spill] sm:$0xff] %v16894_v50  ;;  %v5196_v10 = vshll.u32 %v16883_v42, 16 }
 0x4f4   : > { %v3798_v18 = vmax.f32 %v3773_v13, 0.0  ;;  %v3774_v47 = vadd.f32 %v16676_v63, %v3742_v37  ;;  %13188 = vmatmul.mubr.msk.bf16.gmra.mrb[88].mxu0 %vm1123_vm5, %v14294_v48  ;;  %v4083_v30 = vrot.slane %v4081_v9, 1  ;;  %v16902_v61 = vsel %vm1502_vm10, %v4553_v31, %v4555_v41 }
 0x4f5   : > { %v5195_v34 = vrot.slane %v5193_v12, 3  ;;  %v3427_v45 = vpop.f32.mrb[176].mxu1  ;;  %13191 = vmatprep.mubr.msk.bf16.mxu0 %vm14761_vm0, %v19402_v46  ;;  %v5198_v26 = vrot.slane %v5196_v10, 4 }
 0x4f6   : > { %v12022_v15 = vpack.c.bf16 %v3798_v18, %v3798_v18  ;;  %v3799_v24 = vmax.f32 %v3774_v47, 0.0  ;;  %v3481_v22 = vadd.f32 %v3427_v45, %v16644_v19  ;;  %v13021_v13 = vpop.f32.mrb[177].mxu1  ;;  %v4084_v12 = vsel %vm995_vm4, %v4079_v3, %v4083_v30 }
 0x4f7   : > { %v3430_v37 = vpop.f32.mrb[178].mxu1  ;;  %v5199_v9 = vor.u32 %v5198_v26, %v5195_v34  ;;  %v16908_v62 = vld [vmem:[#allocation3 + $0x30] sm:$0xf]  ;;  %13124 = vmatmul.mubr.msk.bf16.gmra.mrb[212].mxu1 %vm1123_vm5, %v4084_v12 }
 0x4f8   : > { %19517 = vst [vmem:[#allocation32_spill] sm:$0xff] %v16908_v62  ;;  %3924 = vst.msk [vmem:[#allocation3 + $0x38] sm:$0xf] %vm414_vm1, %v12022_v15  ;;  %v12023_v10 = vpack.c.bf16 %v3799_v24, %v3799_v24  ;;  %v3743_v31 = vadd.f32 %v15857_v1, %v3481_v22  ;;  %v3482_v7 = vadd.f32 %v3430_v37, %v16647_v28  ;;  %v13022_v33 = vpop.f32.mrb[179].mxu1  ;;  %13127 = vmatprep.mubr.msk.bf16.mxu1 %vm14761_vm0, %v19402_v46 }
 0x4f9   : > { %v16916_v19 = vcombine.low %v16894_v50, %v16908_v62  ;;  %v16918_v18 = vld [vmem:[#allocation3 + $0x30] sm:$0xff]   ;;  %v16923_v3 = vsel %vm2115_vm7, %v5190_v49, %v5199_v9  ;;  %v4085_v1 = vshrl.u32 %v14294_v48, 16 }
 0x4fa   : > { %19518 = vst [vmem:[#allocation37_spill] sm:$0xff] %v16923_v3  ;;  %3925 = vst.msk [vmem:[#allocation3 + $0x3c] sm:$0xf] %vm414_vm1, %v12023_v10  ;;  %v3775_v28 = vadd.f32 %v16676_v63, %v3743_v31  ;;  %v19519_v33 = vld [vmem:[#allocation65_spill] sm:$0xff]  ;;  %v16929_v45 = vld [vmem:[#allocation3 + $0x34] sm:$0xf] }
 0x4fb   : > { %v3744_v47 = vadd.f32 %v19519_v33, %v3482_v7  ;;  %v5202_v34 = vshrl.u32 %v16916_v19, 16  ;;  %19520 = vst [vmem:[#allocation38_spill] sm:$0xff] %v16929_v45  ;;  %v4089_v26 = vshll.u32 %v16918_v18, 16  ;;  %v4557_v15 = vrot.slane %v16918_v18, 1 }
 0x4fc   : > { %v5205_v24 = vshll.u32 %v16916_v19, 16  ;;  %v4087_v22 = vor.u32 %v4085_v1, %v4083_v30  ;;  %v3800_v49 = vmax.f32 %v3775_v28, 0.0  ;;  %13192 = vmatmul.mubr.msk.bf16.gmra.mrb[92].mxu0 %vm1123_vm5, %v16918_v18 }
 0x4fd   : > { %v3776_v13 = vadd.f32 %v16676_v63, %v3744_v47  ;;  %v5204_v48 = vrot.slane %v5202_v34, 3  ;;  %v4091_v37 = vrot.slane %v4089_v26, 1  ;;  %v3435_v7 = vpop.f32.mrb[180].mxu1  ;;  %13195 = vmatprep.mubr.msk.bf16.mxu0 %vm14761_vm0, %v19402_v46  ;;  %v16940_v10 = vsel %vm1502_vm10, %v4555_v41, %v4557_v15  ;;  %v6090_v47 = vld [vmem:[#allocation3 + $0x10] sm:$0xf] }
 0x4fe   : > { %v5207_v12 = vrot.slane %v5205_v24, 4  ;;  %v12024_v30 = vpack.c.bf16 %v3800_v49, %v3800_v49  ;;  %v3483_v28 = vadd.f32 %v3435_v7, %v16652_v21  ;;  %v13025_v33 = vpop.f32.mrb[181].mxu1  ;;  %v19521_v41 = vld [vmem:[#allocation66_spill] sm:$0xff]  ;;  %v19523_v7 = vld [vmem:[#allocation67_spill] sm:$0xff] }
 0x4ff   : > { %v3801_v1 = vmax.f32 %v3776_v13, 0.0  ;;  %v3438_v36 = vpop.f32.mrb[182].mxu1  ;;  %v4092_v34 = vsel %vm995_vm4, %v4087_v22, %v4091_v37  ;;  %v16946_v52 = vld [vmem:[#allocation3 + $0x38] sm:$0xf]  ;;  %v4093_v22 = vshrl.u32 %v16918_v18, 16 }
 0x500   : > { %v5208_v26 = vor.u32 %v5207_v12, %v5204_v48  ;;  %3926 = vst.msk [vmem:[#allocation3 + $0x40] sm:$0xf] %vm414_vm1, %v12024_v30  ;;  %v3745_v3 = vadd.f32 %v19521_v41, %v3483_v28  ;;  %v3484_v50 = vadd.f32 %v3438_v36, %v16655_v2  ;;  %v13026_v31 = vpop.f32.mrb[183].mxu1  ;;  %13128 = vmatmul.mubr.msk.bf16.gmra.mrb[216].mxu1 %vm1123_vm5, %v4092_v34  ;;  %v16956_v49 = vld [vmem:[#allocation3 + $0x14] sm:$0xff]   ;;  %v6529_v2 = vld [vmem:[#allocation3 + $0xc] sm:$0x8] }
 0x501   : > { %v12025_v24 = vpack.c.bf16 %v3801_v1, %v3801_v1  ;;  %v16954_v21 = vcombine.low %v16929_v45, %v16946_v52  ;;  %v16959_v13 = vld [vmem:[#allocation3 + $0x38] sm:$0xff]   ;;  %13131 = vmatprep.mubr.msk.bf16.mxu1 %vm14761_vm0, %v19402_v46  ;;  %v11592_v18 = vcombine.low %v6529_v2, %v6090_v47  ;;  %v4095_v1 = vor.u32 %v4093_v22, %v4091_v37 }
 0x502   : > { %v16964_v48 = vsel %vm2115_vm7, %v5199_v9, %v5208_v26  ;;  %v3777_v36 = vadd.f32 %v16676_v63, %v3745_v3  ;;  %v3746_v12 = vadd.f32 %v19523_v7, %v3484_v50  ;;  %v16970_v30 = vld [vmem:[#allocation3 + $0x3c] sm:$0xf]  ;;  %v4097_v28 = vshll.u32 %v16959_v13, 16 }
 0x503   : > { %19522 = vst [vmem:[#allocation39_spill] sm:$0xff] %v16964_v48  ;;  %3927 = vst.msk [vmem:[#allocation3 + $0x44] sm:$0xf] %vm414_vm1, %v12025_v24  ;;  %v5211_v31 = vshrl.u32 %v16954_v21, 16  ;;  %v4559_v33 = vrot.slane %v16959_v13, 1  ;;  %v5214_v9 = vshll.u32 %v16954_v21, 16 }
 0x504   : > { %v3802_v34 = vmax.f32 %v3777_v36, 0.0  ;;  %v3778_v41 = vadd.f32 %v16676_v63, %v3746_v12  ;;  %13196 = vmatmul.mubr.msk.bf16.gmra.mrb[96].mxu0 %vm1123_vm5, %v16959_v13  ;;  %v4099_v24 = vrot.slane %v4097_v28, 1  ;;  %v6542_v62 = vrot.slane %v11592_v18, 3 }
 0x505   : > { %v5213_v3 = vrot.slane %v5211_v31, 3  ;;  %v3443_v7 = vpop.f32.mrb[184].mxu1  ;;  %13199 = vmatprep.mubr.msk.bf16.mxu0 %vm14761_vm0, %v19402_v46  ;;  %v5216_v37 = vrot.slane %v5214_v9, 4  ;;  %v16982_v47 = vsel %vm1502_vm10, %v4557_v15, %v4559_v33 }
 0x506   : > { %v12026_v2 = vpack.c.bf16 %v3802_v34, %v3802_v34  ;;  %v3803_v36 = vmax.f32 %v3778_v41, 0.0  ;;  %v3485_v12 = vadd.f32 %v3443_v7, %v16662_v57  ;;  %v13029_v48 = vpop.f32.mrb[185].mxu1  ;;  %v4100_v50 = vsel %vm995_vm4, %v4095_v1, %v4099_v24 }
 0x507   : > { %v3446_v31 = vpop.f32.mrb[186].mxu1  ;;  %v5217_v28 = vor.u32 %v5216_v37, %v5213_v3  ;;  %v16988_v45 = vld [vmem:[#allocation3 + $0x40] sm:$0xf]  ;;  %v19524_v1 = vrot.slane %v16956_v49, 3 }
 0x508   : > { %3928 = vst.msk [vmem:[#allocation3 + $0x48] sm:$0xf] %vm414_vm1, %v12026_v2  ;;  %v12027_v9 = vpack.c.bf16 %v3803_v36, %v3803_v36  ;;  %v3747_v15 = vadd.f32 %v15893_v38, %v3485_v12  ;;  %v3486_v40 = vadd.f32 %v3446_v31, %v16664_v56  ;;  %v13030_v22 = vpop.f32.mrb[187].mxu1  ;;  %13132 = vmatmul.mubr.msk.bf16.gmra.mrb[220].mxu1 %vm1123_vm5, %v4100_v50  ;;  %v4101_v56 = vshrl.u32 %v16959_v13, 16 }
 0x509   : > { %v16996_v57 = vcombine.low %v16970_v30, %v16988_v45  ;;  %13135 = vmatprep.mubr.msk.bf16.mxu1 %vm14761_vm0, %v19402_v46  ;;  %v17003_v18 = vsel %vm2115_vm7, %v5208_v26, %v5217_v28  ;;  %v17008_v38 = vsel %vm1852_vm9, %v6542_v62, %v19524_v1  ;;  %v17020_v62 = vld [vmem:[#allocation3 + $0x1c] sm:$0xff]  }
 0x50a   : > { %v16998_v48 = vld [vmem:[#allocation3 + $0x40] sm:$0xff]   ;;  %19525 = vst [vmem:[#allocation40_spill] sm:$0xff] %v17008_v38  ;;  %3929 = vst.msk [vmem:[#allocation3 + $0x4c] sm:$0xf] %vm414_vm1, %v12027_v9  ;;  %v3779_v34 = vadd.f32 %v16676_v63, %v3747_v15  ;;  %v3748_v41 = vadd.f32 %v15897_v55, %v3486_v40  ;;  %v4103_v22 = vor.u32 %v4101_v56, %v4099_v24  ;;  %v19337_v38 = vrot.slane %v17020_v62, 3 }
 0x50b   : > { %v5220_v3 = vshrl.u32 %v16996_v57, 16  ;;  %v17015_v50 = vld [vmem:[#allocation3 + $0x44] sm:$0xf]  ;;  %v4105_v26 = vshll.u32 %v16998_v48, 16  ;;  %v4561_v7 = vrot.slane %v16998_v48, 1  ;;  %v5223_v37 = vshll.u32 %v16996_v57, 16 }
 0x50c   : > { %19526 = vst [vmem:[#allocation9_spill] sm:$0xff] %v17020_v62  ;;  %v3804_v2 = vmax.f32 %v3779_v34, 0.0  ;;  %v3780_v13 = vadd.f32 %v16676_v63, %v3748_v41  ;;  %13200 = vmatmul.mubr.msk.bf16.gmra.mrb[100].mxu0 %vm1123_vm5, %v16998_v48 }
 0x50d   : > { %v5222_v55 = vrot.slane %v5220_v3, 3  ;;  %v4107_v40 = vrot.slane %v4105_v26, 1  ;;  %v3451_v36 = vpop.f32.mrb[188].mxu1  ;;  %13203 = vmatprep.mubr.msk.bf16.mxu0 %vm14761_vm0, %v19402_v46  ;;  %v5225_v12 = vrot.slane %v5223_v37, 4  ;;  %v17028_v31 = vsel %vm1502_vm10, %v4559_v33, %v4561_v7 }
 0x50e   : > { %v12028_v24 = vpack.c.bf16 %v3804_v2, %v3804_v2  ;;  %v3805_v15 = vmax.f32 %v3780_v13, 0.0  ;;  %v3487_v1 = vadd.f32 %v3451_v36, %v16666_v53  ;;  %v13033_v56 = vpop.f32.mrb[189].mxu1  ;;  %v4109_v36 = vshrl.u32 %v16998_v48, 16 }
 0x50f   : > { %v3454_v34 = vpop.f32.mrb[190].mxu1  ;;  %v4108_v41 = vsel %vm995_vm4, %v4103_v22, %v4107_v40  ;;  %v5226_v3 = vor.u32 %v5225_v12, %v5222_v55  ;;  %v17034_v26 = vld [vmem:[#allocation3 + $0x48] sm:$0xf] }
 0x510   : > { %3930 = vst.msk [vmem:[#allocation3 + $0x50] sm:$0xf] %vm414_vm1, %v12028_v24  ;;  %v12029_v33 = vpack.c.bf16 %v3805_v15, %v3805_v15  ;;  %v3749_v37 = vadd.f32 %v16649_v43, %v3487_v1  ;;  %v3488_v9 = vadd.f32 %v3454_v34, %v16668_v20  ;;  %v13034_v2 = vpop.f32.mrb[191].mxu1  ;;  %13136 = vmatmul.mubr.msk.bf16.gmra.mrb[224].mxu1 %vm1123_vm5, %v4108_v41  ;;  %v19527_v43 = vrot.slane %v16956_v49, 3 }
 0x511   : > { %v17043_v53 = vcombine.low %v17015_v50, %v17034_v26  ;;  %v14299_v22 = vld [vmem:[#allocation3 + $0x48] sm:$0xff]   ;;  %13139 = vmatprep.mubr.msk.bf16.mxu1 %vm14761_vm0, %v19402_v46  ;;  %v17050_v55 = vsel %vm2115_vm7, %v5217_v28, %v5226_v3  ;;  %v4111_v34 = vor.u32 %v4109_v36, %v4107_v40 }
 0x512   : > { %v17047_v13 = vld [vmem:[#allocation3 + $0x4c] sm:$0xf]  ;;  %v17057_v20 = vsel %vm1852_vm9, %v19527_v43, %v19337_v38  ;;  %3931 = vst.msk [vmem:[#allocation3 + $0x54] sm:$0xf] %vm414_vm1, %v12029_v33  ;;  %v3781_v12 = vadd.f32 %v16676_v63, %v3749_v37  ;;  %v3750_v24 = vadd.f32 %v16657_v11, %v3488_v9  ;;  %v4113_v1 = vshll.u32 %v14299_v22, 16 }
 0x513   : > { %19528 = vst [vmem:[#allocation10_spill] sm:$0xff] %v17057_v20  ;;  %v5229_v15 = vshrl.u32 %v17043_v53, 16  ;;  %v4563_v28 = vrot.slane %v14299_v22, 1  ;;  %v5232_v56 = vshll.u32 %v17043_v53, 16 }
 0x514   : > { %v3806_v41 = vmax.f32 %v3781_v12, 0.0  ;;  %v3782_v49 = vadd.f32 %v16676_v63, %v3750_v24  ;;  %13204 = vmatmul.mubr.msk.bf16.gmra.mrb[104].mxu0 %vm1123_vm5, %v14299_v22  ;;  %v4115_v33 = vrot.slane %v4113_v1, 1 }
 0x515   : > { %v5231_v2 = vrot.slane %v5229_v15, 3  ;;  %v3459_v43 = vpop.f32.mrb[192].mxu1  ;;  %13207 = vmatprep.mubr.msk.bf16.mxu0 %vm14761_vm0, %v19402_v46  ;;  %v5234_v48 = vrot.slane %v5232_v56, 4  ;;  %v17070_v11 = vsel %vm1502_vm10, %v4561_v7, %v4563_v28 }
 0x516   : > { %v12030_v37 = vpack.c.bf16 %v3806_v41, %v3806_v41  ;;  %v3807_v40 = vmax.f32 %v3782_v49, 0.0  ;;  %v3489_v36 = vadd.f32 %v3459_v43, %v16670_v51  ;;  %v13037_v12 = vpop.f32.mrb[193].mxu1  ;;  %v4116_v15 = vsel %vm995_vm4, %v4111_v34, %v4115_v33  ;;  %v17096_v43 = vld [vmem:[#allocation3 + $0x24] sm:$0xff]  }
 0x517   : > { %v3462_v24 = vpop.f32.mrb[194].mxu1  ;;  %v5235_v1 = vor.u32 %v5234_v48, %v5231_v2  ;;  %v17076_v38 = vld [vmem:[#allocation3 + $0x50] sm:$0xf]  ;;  %19530 = vst [vmem:[#allocation12_spill] sm:$0xff] %v17096_v43  ;;  %v4117_v48 = vshrl.u32 %v14299_v22, 16  ;;  %v6547_v9 = vrot.slane %v17096_v43, 3 }
 0x518   : > { %3932 = vst.msk [vmem:[#allocation3 + $0x58] sm:$0xf] %vm414_vm1, %v12030_v37  ;;  %v12031_v56 = vpack.c.bf16 %v3807_v40, %v3807_v40  ;;  %v3751_v7 = vadd.f32 %v16659_v25, %v3489_v36  ;;  %v13038_v20 = vpop.f32.mrb[195].mxu1  ;;  %13140 = vmatmul.mubr.msk.bf16.gmra.mrb[228].mxu1 %vm1123_vm5, %v4116_v15  ;;  %v17083_v41 = vcombine.low %v17047_v13, %v17076_v38 }
 0x519   : > { %v14301_v51 = vld [vmem:[#allocation3 + $0x50] sm:$0xff]   ;;  %13143 = vmatprep.mubr.msk.bf16.mxu1 %vm14761_vm0, %v19402_v46  ;;  %v17090_v49 = vsel %vm2115_vm7, %v5226_v3, %v5235_v1  ;;  %v4119_v15 = vor.u32 %v4117_v48, %v4115_v33 }
 0x51a   : > { %v17087_v34 = vld [vmem:[#allocation3 + $0x54] sm:$0xf]  ;;  %19529 = vst [vmem:[#allocation11_spill] sm:$0xff] %v17090_v49  ;;  %3933 = vst.msk [vmem:[#allocation3 + $0x5c] sm:$0xf] %vm414_vm1, %v12031_v56  ;;  %v3783_v25 = vadd.f32 %v16676_v63, %v3751_v7  ;;  %v5238_v20 = vshrl.u32 %v17083_v41, 16 }
 0x51b   : > { %v5241_v2 = vshll.u32 %v17083_v41, 16  ;;  %v4121_v37 = vshll.u32 %v14301_v51, 16  ;;  %v4565_v40 = vrot.slane %v14301_v51, 1 }
 0x51c   : > { %v3808_v12 = vmax.f32 %v3783_v25, 0.0  ;;  %13208 = vmatmul.mubr.msk.bf16.gmra.mrb[108].mxu0 %vm1123_vm5, %v14301_v51  ;;  %v5240_v3 = vrot.slane %v5238_v20, 3 }
 0x51d   : > { %v5243_v24 = vrot.slane %v5241_v2, 4  ;;  %v4123_v56 = vrot.slane %v4121_v37, 1  ;;  %13211 = vmatprep.mubr.msk.bf16.mxu0 %vm14761_vm0, %v19402_v46  ;;  %v17104_v63 = vsel %vm1502_vm10, %v4563_v28, %v4565_v40  ;;  %v19533_v2 = vrot.slane %v17020_v62, 3 }
 0x51e   : > { %v12032_v7 = vpack.c.bf16 %v3808_v12, %v3808_v12 }
 0x51f   : > { %v5244_v22 = vor.u32 %v5243_v24, %v5240_v3  ;;  %v4124_v49 = vsel %vm995_vm4, %v4119_v15, %v4123_v56  ;;  %v17108_v36 = vld [vmem:[#allocation3 + $0x58] sm:$0xf]  ;;  %v17126_v48 = vsel %vm1852_vm9, %v19533_v2, %v6547_v9  ;;  %v4125_v3 = vshrl.u32 %v14301_v51, 16 }
 0x520   : > { %19531 = vst [vmem:[#allocation13_spill] sm:$0xff] %v17108_v36  ;;  %3934 = vst.msk [vmem:[#allocation3 + $0x60] sm:$0x3] %vm418_vm2, %v12032_v7  ;;  %13144 = vmatmul.mubr.msk.bf16.gmra.mrb[232].mxu1 %vm1123_vm5, %v4124_v49  ;;  %v17114_v33 = vcombine.low %v17087_v34, %v17108_v36 }
 0x521   : > { %v17117_v25 = vsel %vm2115_vm7, %v5235_v1, %v5244_v22  ;;  %v14302_v28 = vld [vmem:[#allocation3 + $0x58] sm:$0xff]   ;;  %13147 = vmatprep.mubr.msk.bf16.mxu1 %vm14761_vm0, %v19402_v46  ;;  %19534 = vst [vmem:[#allocation17_spill] sm:$0xff] %v17126_v48  ;;  %v17132_v1 = vld [vmem:[#allocation3 + $0x2c] sm:$0xff]   ;;  %v4127_v62 = vor.u32 %v4125_v3, %v4123_v56 }
 0x522   : > { %19532 = vst [vmem:[#allocation14_spill] sm:$0xff] %v17117_v25  ;;  %v17121_v20 = vld [vmem:[#allocation3 + $0x5c] sm:$0xf]  ;;  %v5247_v49 = vshrl.u32 %v17114_v33, 16  ;;  %v5250_v37 = vshll.u32 %v17114_v33, 16  ;;  %19535 = vst [vmem:[#allocation16_spill] sm:$0xff] %v17132_v1 }
 0x523   : > { %v4129_v24 = vshll.u32 %v14302_v28, 16  ;;  %v4567_v15 = vrot.slane %v14302_v28, 1  ;;  %v6549_v12 = vrot.slane %v17132_v1, 3  ;;  %v4133_v3 = vshrl.u32 %v14302_v28, 16 }
 0x524   : > { %13212 = vmatmul.mubr.msk.bf16.gmra.mrb[112].mxu0 %vm1123_vm5, %v14302_v28  ;;  %v5249_v7 = vrot.slane %v5247_v49, 3  ;;  %v5252_v43 = vrot.slane %v5250_v37, 4  ;;  %v4896_v28 = vrot.slane %v16763_v23, 3 }
 0x525   : > { %v4131_v25 = vrot.slane %v4129_v24, 1  ;;  %13215 = vmatprep.mubr.msk.bf16.mxu0 %vm14761_vm0, %v19402_v46  ;;  %v17138_v2 = vsel %vm1502_vm10, %v4565_v40, %v4567_v15  ;;  %v17149_v56 = vsel %vm1852_vm9, %v6547_v9, %v6549_v12 }
 0x526   : > { %v5253_v48 = vor.u32 %v5252_v43, %v5249_v7  ;;  %19536 = vst [vmem:[#allocation20_spill] sm:$0xff] %v17149_v56 }
 0x527   : > { %v4132_v36 = vsel %vm995_vm4, %v4127_v62, %v4131_v25  ;;  %v17143_v51 = vld [vmem:[#allocation3 + $0x60] ss:$0 sps:$4 sm:$0x77]   ;;  %v4135_v7 = vor.u32 %v4133_v3, %v4131_v25  ;;  %v17182_v3 = vld [vmem:[#allocation3 + $0x34] sm:$0xff]  }
 0x528   : > { %13148 = vmatmul.mubr.msk.bf16.gmra.mrb[236].mxu1 %vm1123_vm5, %v4132_v36  ;;  %v17146_v49 = vsel %vm2115_vm7, %v5244_v22, %v5253_v48  ;;  %v14305_v37 = vld [vmem:[#allocation3 + $0x60] ss:$0 sps:$4 sm:$0x33]   ;;  %v4137_v43 = vshll.u32 %v17143_v51, 16  ;;  %v19346_v36 = vrot.slane %v17143_v51, 1 }
 0x529   : > { %13151 = vmatprep.mubr.msk.bf16.mxu1 %vm14761_vm0, %v19402_v46  ;;  %v17153_v40 = vld [vmem:[#allocation3 + $0x60] sm:$0xf] }
 0x52a   : > { %19537 = vst [vmem:[#allocation19_spill] sm:$0xff] %v17153_v40  ;;  %v17158_v62 = vcombine.low %v17121_v20, %v17153_v40  ;;  %v4139_v22 = vrot.slane %v4137_v43, 1  ;;  %v17169_v56 = vsel %vm1502_vm10, %v4567_v15, %v19346_v36  ;;  %v4895_v43 = vrot.slane %v16727_v44, 3  ;;  %v14326_v15 = vld [vmem:[%s19296_s5 + $0xa0] sm:$0xff]   ;;  %v17191_v44 = vld [vmem:[#allocation3 + $0x3c] sm:$0xff]  }
 0x52b   : > { %19539 = vst [vmem:[#allocation23_spill] sm:$0xff] %v17191_v44 }
 0x52c   : > { %13216 = vmatmul.mubr.msk.bf16.gmra.mrb[116].mxu0 %vm1123_vm5, %v14305_v37  ;;  %v5256_v9 = vshrl.u32 %v17158_v62, 16  ;;  %v5259_v24 = vshll.u32 %v17158_v62, 16  ;;  %v4140_v40 = vsel %vm995_vm4, %v4135_v7, %v4139_v22  ;;  %v14327_v7 = vld [vmem:[%s19296_s5 + $0xa8] sm:$0xff]  }
 0x52d   : > { %13287 = vmatprep.mubr.msk.bf16.mxu0 %vm14761_vm0, %v19402_v46 }
 0x52e   : > { %v5258_v1 = vrot.slane %v5256_v9, 3  ;;  %v5261_v37 = vrot.slane %v5259_v24, 4  ;;  %v4897_v9 = vsel %vm1852_vm9, %v4895_v43, %v4896_v28  ;;  %v17195_v24 = vld [vmem:[#allocation3 + $0x4c] sm:$0xff]   ;;  %v4898_v43 = vrot.slane %v16805_v54, 3  ;;  %v17217_v54 = vld [vmem:[#allocation3 + $0x64] sm:$0xff]  }
 0x52f   : > { %19541 = vst [vmem:[#allocation26_spill] sm:$0xff] %v17195_v24 }
 0x530   : > { %13152 = vmatmul.mubr.msk.bf16.gmra.mrb[240].mxu1 %vm1123_vm5, %v4140_v40  ;;  %v17177_v25 = vor.u32 %v5261_v37, %v5258_v1  ;;  %v4141_v40 = vshrl.u32 %v17143_v51, 16  ;;  %v17193_v1 = vld [vmem:[#allocation3 + $0x44] sm:$0xff]   ;;  %v6551_v37 = vrot.slane %v17182_v3, 3 }
 0x531   : > { %13155 = vmatprep.mubr.msk.bf16.mxu1 %vm14761_vm0, %v19402_v46  ;;  %19540 = vst [vmem:[#allocation27_spill] sm:$0xff] %v17193_v1  ;;  %v6555_v36 = vrot.slane %v17193_v1, 3 }
 0x532   : > { %19538 = vst [vmem:[#allocation24_spill] sm:$0xff] %v17177_v25  ;;  %v17187_v23 = vsel %vm2115_vm7, %v5253_v48, %v17177_v25  ;;  %v4143_v48 = vor.u32 %v4141_v40, %v4139_v22  ;;  %v6557_v25 = vrot.slane %v17195_v24, 3  ;;  %v14328_v22 = vld [vmem:[%s19296_s5 + $0xb0] sm:$0xff]   ;;  %v4899_v24 = vsel %vm1852_vm9, %v4896_v28, %v4898_v43 }
 0x533   : > { %v14375_v40 = vld [vmem:[#allocation3 + $0x5c] sm:$0xff]  }
 0x534   : > { %13288 = vmatmul.mubr.msk.bf16.vlgmr.msra.gmra.mrb[120].mxu0 %vm1123_vm5, %v4897_v9  ;;  %v6553_v9 = vrot.slane %v17191_v44, 3  ;;  %v17231_v44 = vsel %vm1852_vm9, %v6555_v36, %v6557_v25 }
 0x535   : > { %13291 = vmatprep.mubr.msk.bf16.mxu0 %vm14761_vm0, %v19402_v46  ;;  %13400 = vmatpush3.bf16.msra.mxu0 %v14326_v15  ;;  %v17214_v15 = vld [vmem:[#allocation3 + $0x54] sm:$0xff]   ;;  %19543 = vst [vmem:[#allocation30_spill] sm:$0xff] %v17231_v44 }
 0x536   : > { %13401 = vmatprep.subr.bf16.mxu0 %v19402_v46  ;;  %v17228_v1 = vsel %vm1852_vm9, %v6553_v9, %v6555_v36  ;;  %v6559_v28 = vrot.slane %v17214_v15, 3  ;;  %v6563_v36 = vrot.slane %v17217_v54, 3 }
 0x537   : > { %19542 = vst [vmem:[#allocation29_spill] sm:$0xff] %v17228_v1 }
 0x538   : > { %13156 = vmatmul.mubr.msk.bf16.gmra.mrb[244].mxu1 %vm1123_vm5, %v4143_v48  ;;  %v17220_v48 = vsel %vm1852_vm9, %v6549_v12, %v6551_v37  ;;  %v14314_v12 = vld [vmem:[%s19296_s5 + $0x80] sm:$0xff]   ;;  %v17246_v44 = vsel %vm1852_vm9, %v6557_v25, %v6559_v28 }
 0x539   : > { %13227 = vmatprep.mubr.msk.bf16.mxu1 %vm14761_vm0, %v19402_v46  ;;  %13402 = vmatpush3.bf16.msra.mxu0 %v14327_v7  ;;  %v17225_v7 = vsel %vm1852_vm9, %v6551_v37, %v6553_v9  ;;  %v14330_v37 = vld [vmem:[%s19296_s5 + $0xb8] sm:$0xff]   ;;  %v4900_v9 = vrot.slane %v16849_v14, 3  ;;  %v14319_v14 = vld [vmem:[%s19296_s5 + $0x88] sm:$0xff]  }
 0x53a   : > { %13403 = vmatprep.subr.bf16.mxu0 %v19402_v46 }
 0x53b   : > { %v4901_v25 = vsel %vm1852_vm9, %v4898_v43, %v4900_v9  ;;  %v14329_v43 = vld [vmem:[%s19296_s5 + $0x98] sm:$0xff]  }
 0x53c   : > { %13292 = vmatmul.mubr.msk.bf16.gmra.mrb[124].mxu0 %vm1123_vm5, %v4899_v24  ;;  %v6561_v24 = vrot.slane %v14375_v40, 3  ;;  %v4902_v40 = vrot.slane %v16883_v42, 3 }
 0x53d   : > { %13295 = vmatprep.mubr.msk.bf16.mxu0 %vm14761_vm0, %v19402_v46  ;;  %13404 = vmatpush3.bf16.msra.mxu0 %v14328_v22 }
 0x53e   : > { %13405 = vmatprep.subr.bf16.mxu0 %v19402_v46  ;;  %v17249_v1 = vsel %vm1852_vm9, %v6559_v28, %v6561_v24  ;;  %v17256_v22 = vsel %vm1852_vm9, %v6561_v24, %v6563_v36  ;;  %v4906_v28 = vrot.slane %v16954_v21, 3  ;;  %v4910_v21 = vrot.slane %v17043_v53, 3  ;;  %v17344_v24 = vld [vmem:[#allocation3 + $0x64] sm:$0xf] }
 0x53f   : > { %v4914_v53 = vrot.slane %v17114_v33, 3  ;;  %v4820_v33 = vld [vmem:[#allocation3 + $0x68] sm:$0x1] }
 0x540   : > { %13228 = vmatmul.mubr.msk.bf16.vlgmr.msra.gmra.mrb[248].mxu1 %vm1123_vm5, %v16737_v39  ;;  %v14323_v39 = vld [vmem:[%s19296_s5 + $0x90] sm:$0xff]  }
 0x541   : > { %13231 = vmatprep.mubr.msk.bf16.mxu1 %vm14761_vm0, %v19402_v46  ;;  %13340 = vmatpush3.bf16.msra.mxu1 %v14314_v12  ;;  %v4903_v12 = vsel %vm1852_vm9, %v4900_v9, %v4902_v40 }
 0x542   : > { %13341 = vmatprep.subr.bf16.mxu1 %v19402_v46  ;;  %13406 = vmatpush3.bf16.msra.mxu0 %v14330_v37  ;;  %v11426_v37 = vcombine.low %v17344_v24, %v4820_v33  ;;  %v19548_v33 = vcombine.low %v16841_v0, %v16861_v60 }
 0x543   : > { %13519 = vmatprep.subr.bf16.mxu0 %v19402_v46 }
 0x544   : > { %13296 = vmatmul.mubr.msk.bf16.gmra.mrb[128].mxu0 %vm1123_vm5, %v4901_v25  ;;  %v4918_v9 = vrot.slane %v11426_v37, 3  ;;  %v19545_v25 = vrot.slane %v17143_v51, 1  ;;  %v14334_v51 = vld [vmem:[%s19296_s5 + $0xc0] sm:$0xff]  }
 0x545   : > { %13299 = vmatprep.mubr.msk.bf16.mxu0 %vm14761_vm0, %v19402_v46  ;;  %13342 = vmatpush3.bf16.msra.mxu1 %v14319_v14 }
 0x546   : > { %13343 = vmatprep.subr.bf16.mxu1 %v19402_v46 }
 0x548   : > { %13232 = vmatmul.mubr.msk.bf16.gmra.mrb[252].mxu1 %vm1123_vm5, %v16790_v59  ;;  %v4904_v59 = vrot.slane %v16916_v19, 3  ;;  %v4908_v19 = vrot.slane %v16996_v57, 3  ;;  %v4912_v57 = vrot.slane %v17083_v41, 3  ;;  %v4916_v41 = vrot.slane %v17158_v62, 3 }
 0x549   : > { %13235 = vmatprep.mubr.msk.bf16.mxu1 %vm14761_vm0, %v19402_v46  ;;  %13344 = vmatpush3.bf16.msra.mxu1 %v14323_v39 }
 0x54a   : > { %13345 = vmatprep.subr.bf16.mxu1 %v19402_v46  ;;  %v4905_v42 = vsel %vm1852_vm9, %v4902_v40, %v4904_v59  ;;  %v19546_v40 = vcombine.low %v16751_v27, %v16770_v29  ;;  %v14339_v29 = vld [vmem:[%s19296_s5 + $0xc8] sm:$0xff]  }
 0x54c   : > { %13300 = vmatmul.mubr.msk.bf16.gmra.mrb[132].mxu0 %vm1123_vm5, %v4903_v12 }
 0x54d   : > { %13303 = vmatprep.mubr.msk.bf16.mxu0 %vm14761_vm0, %v19402_v46  ;;  %13346 = vmatpush3.bf16.msra.mxu1 %v14329_v43  ;;  %v14352_v43 = vld [vmem:[%s19296_s5 + $0xf8] sm:$0xff]  }
 0x54e   : > { %13459 = vmatprep.subr.bf16.mxu1 %v19402_v46 }
 0x550   : > { %13236 = vmatmul.mubr.msk.bf16.gmra.mrb[0].mxu1 %vm1123_vm5, %v16834_v4  ;;  %v4907_v4 = vsel %vm1852_vm9, %v4904_v59, %v4906_v28 }
 0x551   : > { %13239 = vmatprep.mubr.msk.bf16.mxu1 %vm14761_vm0, %v19402_v46 }
 0x554   : > { %13304 = vmatmul.mubr.msk.bf16.gmra.mrb[136].mxu0 %vm1123_vm5, %v4905_v42 }
 0x555   : > { %13307 = vmatprep.mubr.msk.bf16.mxu0 %vm14761_vm0, %v19402_v46 }
 0x558   : > { %13240 = vmatmul.mubr.msk.bf16.gmra.mrb[4].mxu1 %vm1123_vm5, %v16869_v17  ;;  %v4909_v17 = vsel %vm1852_vm9, %v4906_v28, %v4908_v19 }
 0x559   : > { %13243 = vmatprep.mubr.msk.bf16.mxu1 %vm14761_vm0, %v19402_v46 }
 0x55c   : > { %13308 = vmatmul.mubr.msk.bf16.gmra.mrb[140].mxu0 %vm1123_vm5, %v4907_v4  ;;  %v19547_v4 = vcombine.low %v16797_v8, %v16823_v16 }
 0x55d   : > { %13311 = vmatprep.mubr.msk.bf16.mxu0 %vm14761_vm0, %v19402_v46 }
 0x560   : > { %13244 = vmatmul.mubr.msk.bf16.gmra.mrb[8].mxu1 %vm1123_vm5, %v16902_v61  ;;  %v4911_v61 = vsel %vm1852_vm9, %v4908_v19, %v4910_v21 }
 0x561   : > { %13247 = vmatprep.mubr.msk.bf16.mxu1 %vm14761_vm0, %v19402_v46 }
 0x564   : > { %13312 = vmatmul.mubr.msk.bf16.gmra.mrb[144].mxu0 %vm1123_vm5, %v4909_v17 }
 0x565   : > { %13315 = vmatprep.mubr.msk.bf16.mxu0 %vm14761_vm0, %v19402_v46 }
 0x568   : > { %13248 = vmatmul.mubr.msk.bf16.gmra.mrb[12].mxu1 %vm1123_vm5, %v16940_v10  ;;  %v4913_v10 = vsel %vm1852_vm9, %v4910_v21, %v4912_v57  ;;  %v14343_v21 = vld [vmem:[%s19296_s5 + $0xd0] sm:$0xff]  }
 0x569   : > { %13251 = vmatprep.mubr.msk.bf16.mxu1 %vm14761_vm0, %v19402_v46 }
 0x56c   : > { %13316 = vmatmul.mubr.msk.bf16.gmra.mrb[148].mxu0 %vm1123_vm5, %v4911_v61 }
 0x56d   : > { %13319 = vmatprep.mubr.msk.bf16.mxu0 %vm14761_vm0, %v19402_v46 }
 0x570   : > { %13252 = vmatmul.mubr.msk.bf16.gmra.mrb[16].mxu1 %vm1123_vm5, %v16982_v47  ;;  %v4915_v47 = vsel %vm1852_vm9, %v4912_v57, %v4914_v53 }
 0x571   : > { %13255 = vmatprep.mubr.msk.bf16.mxu1 %vm14761_vm0, %v19402_v46 }
 0x574   : > { %13320 = vmatmul.mubr.msk.bf16.gmra.mrb[152].mxu0 %vm1123_vm5, %v4913_v10 }
 0x575   : > { %13323 = vmatprep.mubr.msk.bf16.mxu0 %vm14761_vm0, %v19402_v46 }
 0x578   : > { %13256 = vmatmul.mubr.msk.bf16.gmra.mrb[20].mxu1 %vm1123_vm5, %v17028_v31  ;;  %v4917_v31 = vsel %vm1852_vm9, %v4914_v53, %v4916_v41  ;;  %v14351_v53 = vld [vmem:[%s19296_s5 + $0xd8] sm:$0xff]  }
 0x579   : > { %13259 = vmatprep.mubr.msk.bf16.mxu1 %vm14761_vm0, %v19402_v46 }
 0x57c   : > { %13324 = vmatmul.mubr.msk.bf16.gmra.mrb[156].mxu0 %vm1123_vm5, %v4915_v47 }
 0x57d   : > { %13327 = vmatprep.mubr.msk.bf16.mxu0 %vm14761_vm0, %v19402_v46 }
 0x580   : > { %13260 = vmatmul.mubr.msk.bf16.gmra.mrb[24].mxu1 %vm1123_vm5, %v17070_v11  ;;  %v4919_v11 = vsel %vm1852_vm9, %v4916_v41, %v4918_v9 }
 0x581   : > { %13263 = vmatprep.mubr.msk.bf16.mxu1 %vm14761_vm0, %v19402_v46 }
 0x584   : > { %13328 = vmatmul.mubr.msk.bf16.gmra.mrb[160].mxu0 %vm1123_vm5, %v4917_v31 }
 0x585   : > { %13331 = vmatprep.mubr.msk.bf16.mxu0 %vm14761_vm0, %v19402_v46 }
 0x588   : > { %13264 = vmatmul.mubr.msk.bf16.gmra.mrb[28].mxu1 %vm1123_vm5, %v17104_v63  ;;  %v14346_v63 = vld [vmem:[%s19296_s5 + $0xe0] sm:$0xff]  }
 0x589   : > { %13267 = vmatprep.mubr.msk.bf16.mxu1 %vm14761_vm0, %v19402_v46 }
 0x58c   : > { %13332 = vmatmul.mubr.msk.bf16.gmra.mrb[164].mxu0 %vm1123_vm5, %v4919_v11 }
 0x58d   : > { %13335 = vmatprep.mubr.msk.bf16.mxu0 %vm14761_vm0, %v19402_v46 }
 0x590   : > { %13268 = vmatmul.mubr.msk.bf16.gmra.mrb[32].mxu1 %vm1123_vm5, %v17138_v2  ;;  %v19544_v2 = vcombine.low %v16710_v5, %v16720_v6  ;;  %v14350_v5 = vld [vmem:[%s19296_s5 + $0xf0] sm:$0xff]  }
 0x591   : > { %13271 = vmatprep.mubr.msk.bf16.mxu1 %vm14761_vm0, %v19402_v46 }
 0x594   : > { %13336 = vmatmul.mubr.msk.bf16.gmra.mrb[168].mxu0 %vm1123_vm5, %v4918_v9 }
 0x595   : > { %13407 = vmatprep.mubr.msk.bf16.mxu0 %vm14761_vm0, %v19402_v46 }
 0x598   : > { %13272 = vmatmul.mubr.msk.bf16.gmra.mrb[36].mxu1 %vm1123_vm5, %v17169_v56  ;;  %v14347_v56 = vld [vmem:[%s19296_s5 + $0xe8] sm:$0xff]  }
 0x599   : > { %13275 = vmatprep.mubr.msk.bf16.mxu1 %vm14761_vm0, %v19402_v46 }
 0x59c   : > { %13408 = vmatmul.mubr.msk.bf16.vlgmr.msra.gmra.mrb[172].mxu0 %vm1123_vm5, %v19544_v2 }
 0x59d   : > { %13411 = vmatprep.mubr.msk.bf16.mxu0 %vm14761_vm0, %v19402_v46  ;;  %13520 = vmatpush3.bf16.msra.mxu0 %v14346_v63 }
 0x59e   : > { %13521 = vmatprep.subr.bf16.mxu0 %v19402_v46 }
 0x59f   : > { %v4431_v62 = vpop.f32.mrb[68].mxu0 }
 0x5a0   : > { %v13169_v14 = vpop.f32.mrb[69].mxu0  ;;  %13276 = vmatmul.mubr.msk.bf16.gmra.mrb[40].mxu1 %vm1123_vm5, %v19545_v25  ;;  %v19550_v25 = vld [vmem:[#allocation28_spill] sm:$0xff] }
 0x5a1   : > { %v4434_v39 = vpop.f32.mrb[70].mxu0  ;;  %13347 = vmatprep.mubr.msk.bf16.mxu1 %vm14761_vm0, %v19402_v46  ;;  %13522 = vmatpush3.bf16.msra.mxu0 %v14347_v56  ;;  %v19549_v14 = vld [vmem:[#allocation25_spill] sm:$0xff] }
 0x5a2   : > { %v13170_v6 = vpop.f32.mrb[71].mxu0  ;;  %13523 = vmatprep.subr.bf16.mxu0 %v19402_v46 }
 0x5a4   : > { %13412 = vmatmul.mubr.msk.bf16.gmra.mrb[176].mxu0 %vm1123_vm5, %v19546_v40 }
 0x5a5   : > { %13415 = vmatprep.mubr.msk.bf16.mxu0 %vm14761_vm0, %v19402_v46  ;;  %13524 = vmatpush3.bf16.msra.mxu0 %v14350_v5 }
 0x5a6   : > { %13525 = vmatprep.subr.bf16.mxu0 %v19402_v46 }
 0x5a7   : > { %v4439_v12 = vpop.f32.mrb[72].mxu0 }
 0x5a8   : > { %v13173_v59 = vpop.f32.mrb[73].mxu0  ;;  %13348 = vmatmul.mubr.msk.bf16.vlgmr.msra.gmra.mrb[44].mxu1 %vm1123_vm5, %v16815_v32 }
 0x5a9   : > { %v4442_v27 = vpop.f32.mrb[74].mxu0  ;;  %13351 = vmatprep.mubr.msk.bf16.mxu1 %vm14761_vm0, %v19402_v46  ;;  %13460 = vmatpush3.bf16.msra.mxu1 %v14334_v51 }
 0x5aa   : > { %v13174_v42 = vpop.f32.mrb[75].mxu0  ;;  %13461 = vmatprep.subr.bf16.mxu1 %v19402_v46  ;;  %13526 = vmatpush3.bf16.msra.mxu0 %v14352_v43  ;;  %v4241_v28 = vpop.f32.mrb[196].mxu1 }
 0x5ab   : > { %v13109_v32 = vpop.f32.mrb[197].mxu1  ;;  %v17419_v19 = vadd.f32 %v4431_v62, %v4241_v28  ;;  %v19553_v28 = vld [vmem:[#allocation32_spill] sm:$0xff] }
 0x5ac   : > { %13416 = vmatmul.mubr.msk.bf16.gmra.mrb[180].mxu0 %vm1123_vm5, %v19547_v4  ;;  %v4244_v17 = vpop.f32.mrb[198].mxu1  ;;  %v19554_v4 = vld [vmem:[#allocation38_spill] sm:$0xff] }
 0x5ad   : > { %13419 = vmatprep.mubr.msk.bf16.mxu0 %vm14761_vm0, %v19402_v46  ;;  %13462 = vmatpush3.bf16.msra.mxu1 %v14339_v29  ;;  %v13110_v61 = vpop.f32.mrb[199].mxu1  ;;  %v17427_v57 = vadd.f32 %v4434_v39, %v4244_v17  ;;  %v19551_v39 = vcombine.low %v19549_v14, %v19550_v25  ;;  %v19555_v32 = vcombine.low %v19553_v28, %v19554_v4 }
 0x5ae   : > { %13463 = vmatprep.subr.bf16.mxu1 %v19402_v46 }
 0x5af   : > { %v4447_v8 = vpop.f32.mrb[76].mxu0 }
 0x5b0   : > { %v13177_v16 = vpop.f32.mrb[77].mxu0  ;;  %13352 = vmatmul.mubr.msk.bf16.gmra.mrb[48].mxu1 %vm1123_vm5, %v16854_v35 }
 0x5b1   : > { %v4450_v10 = vpop.f32.mrb[78].mxu0  ;;  %13355 = vmatprep.mubr.msk.bf16.mxu1 %vm14761_vm0, %v19402_v46  ;;  %13464 = vmatpush3.bf16.msra.mxu1 %v14343_v21 }
 0x5b2   : > { %v13178_v47 = vpop.f32.mrb[79].mxu0  ;;  %13465 = vmatprep.subr.bf16.mxu1 %v19402_v46  ;;  %v4249_v41 = vpop.f32.mrb[200].mxu1 }
 0x5b3   : > { %v13113_v31 = vpop.f32.mrb[201].mxu1  ;;  %v17441_v35 = vadd.f32 %v4439_v12, %v4249_v41  ;;  %v19552_v12 = vld [vmem:[#allocation37_spill] sm:$0xff] }
 0x5b4   : > { %13420 = vmatmul.mubr.msk.bf16.gmra.mrb[184].mxu0 %vm1123_vm5, %v19548_v33  ;;  %v4252_v37 = vpop.f32.mrb[202].mxu1 }
 0x5b5   : > { %13423 = vmatprep.mubr.msk.bf16.mxu0 %vm14761_vm0, %v19402_v46  ;;  %13466 = vmatpush3.bf16.msra.mxu1 %v14351_v53  ;;  %v13114_v9 = vpop.f32.mrb[203].mxu1  ;;  %v17446_v11 = vadd.f32 %v4442_v27, %v4252_v37  ;;  %v19556_v53 = vld [vmem:[#allocation39_spill] sm:$0xff]  ;;  %v19557_v37 = vcombine.low %v16946_v52, %v16970_v30 }
 0x5b6   : > { %13579 = vmatprep.subr.bf16.mxu1 %v19402_v46 }
 0x5b7   : > { %v4455_v63 = vpop.f32.mrb[80].mxu0 }
 0x5b8   : > { %v13181_v2 = vpop.f32.mrb[81].mxu0  ;;  %13356 = vmatmul.mubr.msk.bf16.gmra.mrb[52].mxu1 %vm1123_vm5, %v16888_v58 }
 0x5b9   : > { %v4458_v0 = vpop.f32.mrb[82].mxu0  ;;  %13359 = vmatprep.mubr.msk.bf16.mxu1 %vm14761_vm0, %v19402_v46 }
 0x5ba   : > { %v13182_v60 = vpop.f32.mrb[83].mxu0  ;;  %v4257_v56 = vpop.f32.mrb[204].mxu1 }
 0x5bb   : > { %v17452_v62 = vadd.f32 %v4447_v8, %v4257_v56  ;;  %v13117_v5 = vpop.f32.mrb[205].mxu1 }
 0x5bc   : > { %13424 = vmatmul.mubr.msk.bf16.gmra.mrb[188].mxu0 %vm1123_vm5, %v19551_v39  ;;  %v4260_v6 = vpop.f32.mrb[206].mxu1  ;;  %v19558_v39 = vcombine.low %v16988_v45, %v17015_v50 }
 0x5bd   : > { %13427 = vmatprep.mubr.msk.bf16.mxu0 %vm14761_vm0, %v19402_v46  ;;  %v17460_v40 = vadd.f32 %v4450_v10, %v4260_v6  ;;  %v13118_v58 = vpop.f32.mrb[207].mxu1 }
 0x5bf   : > { %v4463_v51 = vpop.f32.mrb[84].mxu0 }
 0x5c0   : > { %v13185_v43 = vpop.f32.mrb[85].mxu0  ;;  %13360 = vmatmul.mubr.msk.bf16.gmra.mrb[56].mxu1 %vm1123_vm5, %v19552_v12 }
 0x5c1   : > { %v4466_v59 = vpop.f32.mrb[86].mxu0  ;;  %13363 = vmatprep.mubr.msk.bf16.mxu1 %vm14761_vm0, %v19402_v46 }
 0x5c2   : > { %v13186_v27 = vpop.f32.mrb[87].mxu0  ;;  %v4265_v29 = vpop.f32.mrb[208].mxu1 }
 0x5c3   : > { %v17466_v42 = vadd.f32 %v4455_v63, %v4265_v29  ;;  %v13121_v17 = vpop.f32.mrb[209].mxu1  ;;  %v19559_v27 = vcombine.low %v17034_v26, %v17047_v13 }
 0x5c4   : > { %13428 = vmatmul.mubr.msk.bf16.gmra.mrb[192].mxu0 %vm1123_vm5, %v19555_v32  ;;  %v4268_v21 = vpop.f32.mrb[210].mxu1 }
 0x5c5   : > { %13431 = vmatprep.mubr.msk.bf16.mxu0 %vm14761_vm0, %v19402_v46  ;;  %v17474_v61 = vadd.f32 %v4458_v0, %v4268_v21  ;;  %v13122_v8 = vpop.f32.mrb[211].mxu1  ;;  %v19560_v21 = vld [vmem:[#allocation11_spill] sm:$0xff] }
 0x5c7   : > { %v4471_v16 = vpop.f32.mrb[88].mxu0 }
 0x5c8   : > { %v13189_v10 = vpop.f32.mrb[89].mxu0  ;;  %13364 = vmatmul.mubr.msk.bf16.gmra.mrb[60].mxu1 %vm1123_vm5, %v19556_v53 }
 0x5c9   : > { %v4474_v47 = vpop.f32.mrb[90].mxu0  ;;  %13367 = vmatprep.mubr.msk.bf16.mxu1 %vm14761_vm0, %v19402_v46  ;;  %v19561_v10 = vcombine.low %v17076_v38, %v17087_v34 }
 0x5ca   : > { %v13190_v41 = vpop.f32.mrb[91].mxu0  ;;  %v4273_v33 = vpop.f32.mrb[212].mxu1 }
 0x5cb   : > { %v17480_v31 = vadd.f32 %v4463_v51, %v4273_v33  ;;  %v13125_v9 = vpop.f32.mrb[213].mxu1 }
 0x5cc   : > { %13432 = vmatmul.mubr.msk.bf16.gmra.mrb[196].mxu0 %vm1123_vm5, %v19557_v37  ;;  %v4276_v63 = vpop.f32.mrb[214].mxu1 }
 0x5cd   : > { %13435 = vmatprep.mubr.msk.bf16.mxu0 %vm14761_vm0, %v19402_v46  ;;  %v17488_v2 = vadd.f32 %v4466_v59, %v4276_v63  ;;  %v13126_v0 = vpop.f32.mrb[215].mxu1  ;;  %v19562_v63 = vld [vmem:[#allocation14_spill] sm:$0xff] }
 0x5cf   : > { %v4479_v60 = vpop.f32.mrb[92].mxu0 }
 0x5d0   : > { %v13193_v56 = vpop.f32.mrb[93].mxu0  ;;  %13368 = vmatmul.mubr.msk.bf16.gmra.mrb[64].mxu1 %vm1123_vm5, %v17003_v18 }
 0x5d1   : > { %v4482_v14 = vpop.f32.mrb[94].mxu0  ;;  %13371 = vmatprep.mubr.msk.bf16.mxu1 %vm14761_vm0, %v19402_v46  ;;  %v19563_v56 = vld [vmem:[#allocation13_spill] sm:$0xff] }
 0x5d2   : > { %v13194_v52 = vpop.f32.mrb[95].mxu0 }
 0x5d3   : > { %v4281_v30 = vpop.f32.mrb[216].mxu1 }
 0x5d4   : > { %v17494_v25 = vadd.f32 %v4471_v16, %v4281_v30  ;;  %13436 = vmatmul.mubr.msk.bf16.gmra.mrb[200].mxu0 %vm1123_vm5, %v19558_v39  ;;  %v13129_v5 = vpop.f32.mrb[217].mxu1  ;;  %v5144_v30 = vld [vmem:[#allocation3 + $0x68] sm:$0x3] }
 0x5d5   : > { %v4284_v6 = vpop.f32.mrb[218].mxu1  ;;  %13439 = vmatprep.mubr.msk.bf16.mxu0 %vm14761_vm0, %v19402_v46 }
 0x5d6   : > { %v17502_v58 = vadd.f32 %v4474_v47, %v4284_v6  ;;  %v13130_v18 = vpop.f32.mrb[219].mxu1 }
 0x5d7   : > { %v4487_v51 = vpop.f32.mrb[96].mxu0 }
 0x5d8   : > { %v13197_v43 = vpop.f32.mrb[97].mxu0  ;;  %13372 = vmatmul.mubr.msk.bf16.gmra.mrb[68].mxu1 %vm1123_vm5, %v17050_v55 }
 0x5d9   : > { %v4490_v12 = vpop.f32.mrb[98].mxu0  ;;  %13375 = vmatprep.mubr.msk.bf16.mxu1 %vm14761_vm0, %v19402_v46 }
 0x5da   : > { %v13198_v45 = vpop.f32.mrb[99].mxu0 }
 0x5db   : > { %v4289_v50 = vpop.f32.mrb[220].mxu1  ;;  %v19565_v45 = vld [vmem:[#allocation19_spill] sm:$0xff] }
 0x5dc   : > { %v17508_v59 = vadd.f32 %v4479_v60, %v4289_v50  ;;  %13440 = vmatmul.mubr.msk.bf16.gmra.mrb[204].mxu0 %vm1123_vm5, %v19559_v27  ;;  %v13133_v29 = vpop.f32.mrb[221].mxu1  ;;  %v11489_v50 = vcombine.low %v19565_v45, %v17344_v24 }
 0x5dd   : > { %v4292_v28 = vpop.f32.mrb[222].mxu1  ;;  %13443 = vmatprep.mubr.msk.bf16.mxu0 %vm14761_vm0, %v19402_v46 }
 0x5de   : > { %v17516_v4 = vadd.f32 %v4482_v14, %v4292_v28  ;;  %v13134_v55 = vpop.f32.mrb[223].mxu1  ;;  %v19564_v14 = vcombine.low %v19563_v56, %v17121_v20 }
 0x5df   : > { %v4495_v32 = vpop.f32.mrb[100].mxu0 }
 0x5e0   : > { %v13201_v17 = vpop.f32.mrb[101].mxu0  ;;  %13376 = vmatmul.mubr.msk.bf16.gmra.mrb[72].mxu1 %vm1123_vm5, %v19560_v21 }
 0x5e1   : > { %v4498_v8 = vpop.f32.mrb[102].mxu0  ;;  %13379 = vmatprep.mubr.msk.bf16.mxu1 %vm14761_vm0, %v19402_v46  ;;  %v6089_v17 = vld [vmem:[#allocation3 + $0xc] sm:$0xc] }
 0x5e2   : > { %v13202_v26 = vpop.f32.mrb[103].mxu0 }
 0x5e3   : > { %v4297_v13 = vpop.f32.mrb[224].mxu1 }
 0x5e4   : > { %v17522_v16 = vadd.f32 %v4487_v51, %v4297_v13  ;;  %13444 = vmatmul.mubr.msk.bf16.gmra.mrb[208].mxu0 %vm1123_vm5, %v19561_v10  ;;  %v13137_v53 = vpop.f32.mrb[225].mxu1  ;;  %v11452_v51 = vcombine.low %v17344_v24, %v5144_v30 }
 0x5e5   : > { %v4300_v47 = vpop.f32.mrb[226].mxu1  ;;  %13447 = vmatprep.mubr.msk.bf16.mxu0 %vm14761_vm0, %v19402_v46 }
 0x5e6   : > { %v17530_v41 = vadd.f32 %v4490_v12, %v4300_v47  ;;  %v13138_v33 = vpop.f32.mrb[227].mxu1  ;;  %v5265_v29 = vshrl.u32 %v11452_v51, 16  ;;  %v5268_v28 = vshll.u32 %v11452_v51, 16  ;;  %v14680_v47 = vld [vmem:[#allocation3 + $0x14] sm:$0xff]  }
 0x5e7   : > { %v4503_v37 = vpop.f32.mrb[104].mxu0  ;;  %v6198_v33 = vshrl.u32 %v14680_v47, 16 }
 0x5e8   : > { %v13205_v9 = vpop.f32.mrb[105].mxu0  ;;  %13380 = vmatmul.mubr.msk.bf16.gmra.mrb[76].mxu1 %vm1123_vm5, %v19562_v63  ;;  %v5267_v24 = vrot.slane %v5265_v29, 3  ;;  %v5270_v53 = vrot.slane %v5268_v28, 4  ;;  %v11490_v63 = vcombine.low %v5144_v30, %v5144_v30  ;;  %v19566_v29 = vld [vmem:[#allocation24_spill] sm:$0xff] }
 0x5e9   : > { %v4506_v0 = vpop.f32.mrb[106].mxu0  ;;  %13383 = vmatprep.mubr.msk.bf16.mxu1 %vm14761_vm0, %v19402_v46 }
 0x5ea   : > { %v13206_v38 = vpop.f32.mrb[107].mxu0 }
 0x5eb   : > { %v4305_v34 = vpop.f32.mrb[228].mxu1 }
 0x5ec   : > { %v17536_v60 = vadd.f32 %v4495_v32, %v4305_v34  ;;  %13448 = vmatmul.mubr.msk.bf16.gmra.mrb[212].mxu0 %vm1123_vm5, %v19564_v14  ;;  %v13141_v52 = vpop.f32.mrb[229].mxu1 }
 0x5ed   : > { %v4308_v39 = vpop.f32.mrb[230].mxu1  ;;  %13451 = vmatprep.mubr.msk.bf16.mxu0 %vm14761_vm0, %v19402_v46  ;;  %v5271_v52 = vor.u32 %v5270_v53, %v5267_v24 }
 0x5ee   : > { %v17544_v5 = vadd.f32 %v4498_v8, %v4308_v39  ;;  %v13142_v6 = vpop.f32.mrb[231].mxu1  ;;  %v6200_v39 = vrot.slane %v6198_v33, 2 }
 0x5ef   : > { %v4511_v18 = vpop.f32.mrb[108].mxu0  ;;  %v5272_v28 = vsel %vm2115_vm7, %v19566_v29, %v5271_v52 }
 0x5f0   : > { %v13209_v43 = vpop.f32.mrb[109].mxu0  ;;  %13384 = vmatmul.mubr.msk.bf16.gmra.mrb[80].mxu1 %vm1123_vm5, %v17146_v49  ;;  %v14679_v49 = vld [vmem:[#allocation3 + $0x10] sm:$0xf] }
 0x5f1   : > { %v4514_v12 = vpop.f32.mrb[110].mxu0  ;;  %13387 = vmatprep.mubr.msk.bf16.mxu1 %vm14761_vm0, %v19402_v46  ;;  %v11554_v8 = vcombine.low %v6089_v17, %v14679_v49  ;;  %v19567_v17 = vld [vmem:[#allocation9_spill] sm:$0xff] }
 0x5f2   : > { %v13210_v20 = vpop.f32.mrb[111].mxu0 }
 0x5f3   : > { %v4313_v27 = vpop.f32.mrb[232].mxu1  ;;  %v6190_v34 = vshrl.u32 %v11554_v8, 16  ;;  %v6193_v56 = vshll.u32 %v11554_v8, 16 }
 0x5f4   : > { %v17553_v55 = vadd.f32 %v4503_v37, %v4313_v27  ;;  %13452 = vmatmul.mubr.msk.bf16.gmra.mrb[216].mxu0 %vm1123_vm5, %v11489_v50  ;;  %v13145_v32 = vpop.f32.mrb[233].mxu1  ;;  %v6201_v37 = vshll.u32 %v14680_v47, 16 }
 0x5f5   : > { %v4316_v21 = vpop.f32.mrb[234].mxu1  ;;  %13455 = vmatprep.mubr.msk.bf16.mxu0 %vm14761_vm0, %v19402_v46  ;;  %v6195_v30 = vrot.slane %v6193_v56, 3 }
 0x5f6   : > { %v17558_v26 = vadd.f32 %v4506_v0, %v4316_v21  ;;  %v13146_v13 = vpop.f32.mrb[235].mxu1  ;;  %v6203_v6 = vrot.slane %v6201_v37, 3  ;;  %v6210_v21 = vshll.u32 %v19567_v17, 16 }
 0x5f7   : > { %v4519_v10 = vpop.f32.mrb[112].mxu0 }
 0x5f8   : > { %v13213_v9 = vpop.f32.mrb[113].mxu0  ;;  %13388 = vmatmul.mubr.msk.bf16.gmra.mrb[84].mxu1 %vm1123_vm5, %v17187_v23  ;;  %v6192_v23 = vrot.slane %v6190_v34, 2  ;;  %v6204_v32 = vor.u32 %v6203_v6, %v6200_v39  ;;  %v6212_v33 = vrot.slane %v6210_v21, 3  ;;  %v14358_v39 = vld [vmem:[#allocation3 + $0x14] sm:$0xff]   ;;  %v19568_v6 = vld [vmem:[#allocation12_spill] sm:$0xff] }
 0x5f9   : > { %v4522_v38 = vpop.f32.mrb[114].mxu0  ;;  %13391 = vmatprep.mubr.msk.bf16.mxu1 %vm14761_vm0, %v19402_v46 }
 0x5fa   : > { %v13214_v0 = vpop.f32.mrb[115].mxu0  ;;  %v6196_v13 = vor.u32 %v6195_v30, %v6192_v23  ;;  %v14357_v30 = vld [vmem:[#allocation3 + $0xc] sm:$0xfc]  }
 0x5fb   : > { %v4321_v14 = vpop.f32.mrb[236].mxu1 }
 0x5fc   : > { %v17564_v51 = vadd.f32 %v4511_v18, %v4321_v14  ;;  %13456 = vmatmul.mubr.msk.bf16.gmra.mrb[220].mxu0 %vm1123_vm5, %v11490_v63  ;;  %v13149_v43 = vpop.f32.mrb[237].mxu1  ;;  %v6207_v18 = vshrl.u32 %v19567_v17, 16  ;;  %v6205_v53 = vsel %vm3149_vm8, %v6196_v13, %v6204_v32  ;;  %v5840_v13 = vrot.slane %v14357_v30, 2 }
 0x5fd   : > { %v4324_v20 = vpop.f32.mrb[238].mxu1  ;;  %13527 = vmatprep.mubr.msk.bf16.mxu0 %vm14761_vm0, %v19402_v46  ;;  %v6216_v43 = vshrl.u32 %v19568_v6, 16 }
 0x5fe   : > { %v17569_v45 = vadd.f32 %v4514_v12, %v4324_v20  ;;  %v13150_v50 = vpop.f32.mrb[239].mxu1  ;;  %v6209_v47 = vrot.slane %v6207_v18, 2  ;;  %v6219_v20 = vshll.u32 %v19568_v6, 16 }
 0x5ff   : > { %v4527_v27 = vpop.f32.mrb[116].mxu0  ;;  %v6218_v17 = vrot.slane %v6216_v43, 2 }
 0x600   : > { %v13217_v49 = vpop.f32.mrb[117].mxu0  ;;  %13392 = vmatmul.mubr.msk.bf16.gmra.mrb[88].mxu1 %vm1123_vm5, %v5272_v28  ;;  %v6213_v14 = vor.u32 %v6212_v33, %v6209_v47  ;;  %v5841_v28 = vrot.slane %v14358_v39, 2  ;;  %v6221_v18 = vrot.slane %v6219_v20, 3  ;;  %v14360_v47 = vld [vmem:[#allocation3 + $0x1c] sm:$0xff]   ;;  %v14369_v39 = vld [vmem:[%s19296_s5 + $0x108] sm:$0xff]  }
 0x601   : > { %v4530_v8 = vpop.f32.mrb[118].mxu0  ;;  %13395 = vmatprep.mubr.msk.bf16.mxu1 %vm14761_vm0, %v19402_v46 }
 0x602   : > { %v13218_v12 = vpop.f32.mrb[119].mxu0 }
 0x603   : > { %v4329_v24 = vpop.f32.mrb[240].mxu1 }
 0x604   : > { %v17579_v37 = vadd.f32 %v4519_v10, %v4329_v24  ;;  %13528 = vmatmul.mubr.msk.bf16.vlgmr.msra.gmra.mrb[224].mxu0 %vm1123_vm5, %v6205_v53  ;;  %v13153_v9 = vpop.f32.mrb[241].mxu1  ;;  %v6222_v53 = vor.u32 %v6221_v18, %v6218_v17  ;;  %v14376_v18 = vld [vmem:[%s19296_s5 + $0x110] sm:$0xff]  }
 0x605   : > { %v4332_v63 = vpop.f32.mrb[242].mxu1  ;;  %13531 = vmatprep.mubr.msk.bf16.mxu0 %vm14761_vm0, %v19402_v46 }
 0x606   : > { %v17584_v34 = vadd.f32 %v4522_v38, %v4332_v63  ;;  %v13154_v56 = vpop.f32.mrb[243].mxu1  ;;  %v6214_v38 = vsel %vm3149_vm8, %v6204_v32, %v6213_v14  ;;  %v5842_v32 = vsel %vm2799_vm6, %v5840_v13, %v5841_v28  ;;  %v6223_v20 = vsel %vm3149_vm8, %v6213_v14, %v6222_v53 }
 0x607   : > { %v5017_v0 = vpop.f32.mrb[120].mxu0 }
 0x608   : > { %v13289_v23 = vpop.f32.mrb[121].mxu0  ;;  %13396 = vmatmul.mubr.msk.bf16.gmra.mrb[92].mxu1 %vm1123_vm5, %v5271_v52  ;;  %v14361_v52 = vld [vmem:[%s19296_s5 + $0x100] sm:$0xff]  }
 0x609   : > { %v5020_v10 = vpop.f32.mrb[122].mxu0  ;;  %13467 = vmatprep.mubr.msk.bf16.mxu1 %vm14761_vm0, %v19402_v46  ;;  %v5843_v23 = vrot.slane %v14360_v47, 2  ;;  %v6237_v47 = vshll.u32 %v17182_v3, 16 }
 0x60a   : > { %v13290_v50 = vpop.f32.mrb[123].mxu0 }
 0x60b   : > { %v4337_v29 = vpop.f32.mrb[244].mxu1  ;;  %v5844_v13 = vsel %vm2799_vm6, %v5841_v28, %v5843_v23 }
 0x60c   : > { %v17592_v21 = vadd.f32 %v4527_v27, %v4337_v29  ;;  %13532 = vmatmul.mubr.msk.bf16.gmra.mrb[228].mxu0 %vm1123_vm5, %v6214_v38  ;;  %v13157_v49 = vpop.f32.mrb[245].mxu1  ;;  %v19569_v27 = vld [vmem:[#allocation16_spill] sm:$0xff] }
 0x60d   : > { %v4340_v8 = vpop.f32.mrb[246].mxu1  ;;  %13535 = vmatprep.mubr.msk.bf16.mxu0 %vm14761_vm0, %v19402_v46  ;;  %v6225_v33 = vshrl.u32 %v19569_v27, 16  ;;  %v6228_v9 = vshll.u32 %v19569_v27, 16 }
 0x60e   : > { %v13158_v12 = vpop.f32.mrb[247].mxu1 }
 0x60f   : > { %v5025_v24 = vpop.f32.mrb[124].mxu0  ;;  %v6227_v30 = vrot.slane %v6225_v33, 2  ;;  %v6230_v50 = vrot.slane %v6228_v9, 3  ;;  %v14363_v12 = vld [vmem:[#allocation3 + $0x24] sm:$0xff]  }
 0x610   : > { %v13293_v63 = vpop.f32.mrb[125].mxu0  ;;  %13468 = vmatmul.mubr.msk.bf16.vlgmr.msra.gmra.mrb[96].mxu1 %vm1123_vm5, %v5842_v32  ;;  %v6234_v32 = vshrl.u32 %v17182_v3, 16 }
 0x611   : > { %v5028_v56 = vpop.f32.mrb[126].mxu0  ;;  %13471 = vmatprep.mubr.msk.bf16.mxu1 %vm14761_vm0, %v19402_v46  ;;  %13580 = vmatpush3.bf16.msra.mxu1 %v14361_v52  ;;  %v6231_v52 = vor.u32 %v6230_v50, %v6227_v30  ;;  %v5845_v63 = vrot.slane %v14363_v12, 2 }
 0x612   : > { %v13294_v6 = vpop.f32.mrb[127].mxu0  ;;  %13581 = vmatprep.subr.bf16.mxu1 %v19402_v46 }
 0x613   : > { %v4668_v43 = vpop.f32.mrb[248].mxu1  ;;  %v6232_v3 = vsel %vm3149_vm8, %v6222_v53, %v6231_v52  ;;  %v6239_v6 = vrot.slane %v6237_v47, 3  ;;  %v5846_v53 = vsel %vm2799_vm6, %v5843_v23, %v5845_v63 }
 0x614   : > { %v4770_v29 = vadd.f32 %v4668_v43, %v17419_v19  ;;  %13536 = vmatmul.mubr.msk.bf16.gmra.mrb[232].mxu0 %vm1123_vm5, %v6223_v20  ;;  %v13229_v38 = vpop.f32.mrb[249].mxu1 }
 0x615   : > { %v4671_v17 = vpop.f32.mrb[250].mxu1  ;;  %13539 = vmatprep.mubr.msk.bf16.mxu0 %vm14761_vm0, %v19402_v46  ;;  %13582 = vmatpush3.bf16.msra.mxu1 %v14369_v39  ;;  %v6236_v39 = vrot.slane %v6234_v32, 2 }
 0x616   : > { %v4771_v49 = vadd.f32 %v4671_v17, %v17427_v57  ;;  %v13230_v14 = vpop.f32.mrb[251].mxu1  ;;  %13583 = vmatprep.subr.bf16.mxu1 %v19402_v46  ;;  %v17620_v8 = vadd.f32 %v5017_v0, %v4770_v29  ;;  %v14381_v0 = vld [vmem:[%s19296_s5 + $0x118] sm:$0xff]  }
 0x617   : > { %v5033_v19 = vpop.f32.mrb[128].mxu0  ;;  %v6240_v17 = vor.u32 %v6239_v6, %v6236_v39 }
 0x618   : > { %v13297_v27 = vpop.f32.mrb[129].mxu0  ;;  %13472 = vmatmul.mubr.msk.bf16.gmra.mrb[100].mxu1 %vm1123_vm5, %v5844_v13  ;;  %v17626_v33 = vadd.f32 %v5020_v10, %v4771_v49  ;;  %v19570_v49 = vld [vmem:[#allocation23_spill] sm:$0xff] }
 0x619   : > { %v5036_v57 = vpop.f32.mrb[130].mxu0  ;;  %13475 = vmatprep.mubr.msk.bf16.mxu1 %vm14761_vm0, %v19402_v46  ;;  %13584 = vmatpush3.bf16.msra.mxu1 %v14376_v18  ;;  %v14365_v18 = vld [vmem:[#allocation3 + $0x2c] sm:$0xff]   ;;  %v6246_v14 = vshll.u32 %v19570_v49, 16  ;;  %v6241_v47 = vsel %vm3149_vm8, %v6231_v52, %v6240_v17 }
 0x61a   : > { %v13298_v28 = vpop.f32.mrb[131].mxu0  ;;  %13585 = vmatprep.subr.bf16.mxu1 %v19402_v46  ;;  %v5847_v23 = vrot.slane %v14365_v18, 2 }
 0x61b   : > { %v4676_v9 = vpop.f32.mrb[252].mxu1 }
 0x61c   : > { %v4772_v10 = vadd.f32 %v4676_v9, %v17441_v35  ;;  %13540 = vmatmul.mubr.msk.bf16.gmra.mrb[236].mxu0 %vm1123_vm5, %v6232_v3  ;;  %v13233_v43 = vpop.f32.mrb[253].mxu1  ;;  %v6243_v35 = vshrl.u32 %v19570_v49, 16  ;;  %v5848_v52 = vsel %vm2799_vm6, %v5845_v63, %v5847_v23 }
 0x61d   : > { %v4679_v20 = vpop.f32.mrb[254].mxu1  ;;  %13543 = vmatprep.mubr.msk.bf16.mxu0 %vm14761_vm0, %v19402_v46  ;;  %13586 = vmatpush3.bf16.msra.mxu1 %v14381_v0  ;;  %v6248_v0 = vrot.slane %v6246_v14, 3 }
 0x61e   : > { %v4773_v30 = vadd.f32 %v4679_v20, %v17446_v11  ;;  %v13234_v50 = vpop.f32.mrb[255].mxu1  ;;  %v17640_v29 = vadd.f32 %v5025_v24, %v4772_v10  ;;  %v6245_v27 = vrot.slane %v6243_v35, 2  ;;  %v14367_v20 = vld [vmem:[#allocation3 + $0x34] sm:$0xff]  }
 0x61f   : > { %v5041_v38 = vpop.f32.mrb[132].mxu0  ;;  %v5849_v63 = vrot.slane %v14367_v20, 2 }
 0x620   : > { %v13301_v13 = vpop.f32.mrb[133].mxu0  ;;  %13476 = vmatmul.mubr.msk.bf16.gmra.mrb[104].mxu1 %vm1123_vm5, %v5846_v53  ;;  %v17646_v12 = vadd.f32 %v5028_v56, %v4773_v30  ;;  %v6249_v43 = vor.u32 %v6248_v0, %v6245_v27  ;;  %v19571_v30 = vld [vmem:[#allocation27_spill] sm:$0xff] }
 0x621   : > { %v5044_v32 = vpop.f32.mrb[134].mxu0  ;;  %13479 = vmatprep.mubr.msk.bf16.mxu1 %vm14761_vm0, %v19402_v46  ;;  %v6252_v50 = vshrl.u32 %v19571_v30, 16 }
 0x622   : > { %v13302_v11 = vpop.f32.mrb[135].mxu0  ;;  %v6250_v35 = vsel %vm3149_vm8, %v6240_v17, %v6249_v43  ;;  %v5850_v17 = vsel %vm2799_vm6, %v5847_v23, %v5849_v63 }
 0x623   : > { %v4684_v24 = vpop.f32.mrb[0].mxu1  ;;  %v6254_v14 = vrot.slane %v6252_v50, 2 }
 0x624   : > { %v4774_v28 = vadd.f32 %v4684_v24, %v17452_v62  ;;  %13544 = vmatmul.mubr.msk.bf16.gmra.mrb[240].mxu0 %vm1123_vm5, %v6241_v47  ;;  %v13237_v9 = vpop.f32.mrb[1].mxu1  ;;  %v6255_v62 = vshll.u32 %v19571_v30, 16 }
 0x625   : > { %v4687_v3 = vpop.f32.mrb[2].mxu1  ;;  %13547 = vmatprep.mubr.msk.bf16.mxu0 %vm14761_vm0, %v19402_v46 }
 0x626   : > { %v4775_v56 = vadd.f32 %v4687_v3, %v17460_v40  ;;  %v13238_v39 = vpop.f32.mrb[3].mxu1  ;;  %v17656_v6 = vadd.f32 %v5033_v19, %v4774_v28  ;;  %v6257_v13 = vrot.slane %v6255_v62, 3  ;;  %v14370_v3 = vld [vmem:[#allocation3 + $0x3c] sm:$0xff]  }
 0x627   : > { %v5049_v10 = vpop.f32.mrb[136].mxu0  ;;  %v5851_v23 = vrot.slane %v14370_v3, 2 }
 0x628   : > { %v13305_v53 = vpop.f32.mrb[137].mxu0  ;;  %13480 = vmatmul.mubr.msk.bf16.gmra.mrb[108].mxu1 %vm1123_vm5, %v5848_v52  ;;  %v17662_v18 = vadd.f32 %v5036_v57, %v4775_v56  ;;  %v6258_v9 = vor.u32 %v6257_v13, %v6254_v14  ;;  %v19572_v56 = vld [vmem:[#allocation26_spill] sm:$0xff] }
 0x629   : > { %v5052_v49 = vpop.f32.mrb[138].mxu0  ;;  %13483 = vmatprep.mubr.msk.bf16.mxu1 %vm14761_vm0, %v19402_v46  ;;  %v6261_v39 = vshrl.u32 %v19572_v56, 16 }
 0x62a   : > { %v13306_v40 = vpop.f32.mrb[139].mxu0  ;;  %v6259_v50 = vsel %vm3149_vm8, %v6249_v43, %v6258_v9  ;;  %v5852_v43 = vsel %vm2799_vm6, %v5849_v63, %v5851_v23 }
 0x62b   : > { %v4692_v19 = vpop.f32.mrb[4].mxu1  ;;  %v6263_v62 = vrot.slane %v6261_v39, 2 }
 0x62c   : > { %v4776_v11 = vadd.f32 %v4692_v19, %v17466_v42  ;;  %13548 = vmatmul.mubr.msk.bf16.gmra.mrb[244].mxu0 %vm1123_vm5, %v6250_v35  ;;  %v13241_v24 = vpop.f32.mrb[5].mxu1  ;;  %v6264_v42 = vshll.u32 %v19572_v56, 16 }
 0x62d   : > { %v4695_v47 = vpop.f32.mrb[6].mxu1  ;;  %13551 = vmatprep.mubr.msk.bf16.mxu0 %vm14761_vm0, %v19402_v46 }
 0x62e   : > { %v4777_v57 = vadd.f32 %v4695_v47, %v17474_v61  ;;  %v13242_v27 = vpop.f32.mrb[7].mxu1  ;;  %v17672_v0 = vadd.f32 %v5041_v38, %v4776_v11  ;;  %v6266_v53 = vrot.slane %v6264_v42, 3  ;;  %v6270_v47 = vshrl.u32 %v17214_v15, 16 }
 0x62f   : > { %v5057_v28 = vpop.f32.mrb[140].mxu0 }
 0x630   : > { %v13309_v52 = vpop.f32.mrb[141].mxu0  ;;  %13484 = vmatmul.mubr.msk.bf16.gmra.mrb[112].mxu1 %vm1123_vm5, %v5850_v17  ;;  %v17678_v20 = vadd.f32 %v5044_v32, %v4777_v57  ;;  %v6267_v24 = vor.u32 %v6266_v53, %v6263_v62  ;;  %v14373_v57 = vld [vmem:[#allocation3 + $0x44] sm:$0xff]   ;;  %v6272_v63 = vrot.slane %v6270_v47, 2 }
 0x631   : > { %v5060_v30 = vpop.f32.mrb[142].mxu0  ;;  %13487 = vmatprep.mubr.msk.bf16.mxu1 %vm14761_vm0, %v19402_v46  ;;  %v5853_v42 = vrot.slane %v14373_v57, 2 }
 0x632   : > { %v13310_v61 = vpop.f32.mrb[143].mxu0  ;;  %v6268_v56 = vsel %vm3149_vm8, %v6258_v9, %v6267_v24 }
 0x633   : > { %v4700_v38 = vpop.f32.mrb[8].mxu1  ;;  %v5854_v9 = vsel %vm2799_vm6, %v5851_v23, %v5853_v42 }
 0x634   : > { %v4778_v40 = vadd.f32 %v4700_v38, %v17480_v31  ;;  %13552 = vmatmul.mubr.msk.bf16.gmra.mrb[248].mxu0 %vm1123_vm5, %v6259_v50  ;;  %v13245_v19 = vpop.f32.mrb[9].mxu1  ;;  %v6273_v31 = vshll.u32 %v17214_v15, 16 }
 0x635   : > { %v4703_v35 = vpop.f32.mrb[10].mxu1  ;;  %13555 = vmatprep.mubr.msk.bf16.mxu0 %vm14761_vm0, %v19402_v46  ;;  %v14681_v19 = vld [vmem:[#allocation3 + $0x5c] sm:$0xff]  }
 0x636   : > { %v4779_v32 = vadd.f32 %v4703_v35, %v17488_v2  ;;  %v13246_v14 = vpop.f32.mrb[11].mxu1  ;;  %v17688_v13 = vadd.f32 %v5049_v10, %v4778_v40  ;;  %v6275_v39 = vrot.slane %v6273_v31, 3  ;;  %v14374_v40 = vld [vmem:[#allocation3 + $0x4c] sm:$0xff]   ;;  %v6279_v35 = vshrl.u32 %v14681_v19, 16 }
 0x637   : > { %v5065_v11 = vpop.f32.mrb[144].mxu0  ;;  %v5855_v31 = vrot.slane %v14374_v40, 2 }
 0x638   : > { %v13313_v27 = vpop.f32.mrb[145].mxu0  ;;  %13488 = vmatmul.mubr.msk.bf16.gmra.mrb[116].mxu1 %vm1123_vm5, %v5852_v43  ;;  %v17694_v17 = vadd.f32 %v5052_v49, %v4779_v32  ;;  %v6276_v62 = vor.u32 %v6275_v39, %v6272_v63  ;;  %v6281_v57 = vrot.slane %v6279_v35, 2 }
 0x639   : > { %v5068_v3 = vpop.f32.mrb[146].mxu0  ;;  %13491 = vmatprep.mubr.msk.bf16.mxu1 %vm14761_vm0, %v19402_v46 }
 0x63a   : > { %v13314_v2 = vpop.f32.mrb[147].mxu0 }
 0x63b   : > { %v4708_v10 = vpop.f32.mrb[12].mxu1 }
 0x63c   : > { %v4780_v52 = vadd.f32 %v4708_v10, %v17494_v25  ;;  %13556 = vmatmul.mubr.msk.bf16.gmra.mrb[252].mxu0 %vm1123_vm5, %v6268_v56  ;;  %v13249_v15 = vpop.f32.mrb[13].mxu1  ;;  %v6282_v25 = vshll.u32 %v14681_v19, 16 }
 0x63d   : > { %v4711_v61 = vpop.f32.mrb[14].mxu1  ;;  %13559 = vmatprep.mubr.msk.bf16.mxu0 %vm14761_vm0, %v19402_v46  ;;  %v14377_v15 = vld [vmem:[#allocation3 + $0x54] sm:$0xff]  }
 0x63e   : > { %v4781_v49 = vadd.f32 %v4711_v61, %v17502_v58  ;;  %v13250_v38 = vpop.f32.mrb[15].mxu1  ;;  %v17704_v50 = vadd.f32 %v5057_v28, %v4780_v52  ;;  %v6277_v28 = vsel %vm3149_vm8, %v6267_v24, %v6276_v62  ;;  %v6284_v23 = vrot.slane %v6282_v25, 3  ;;  %v14682_v61 = vld [vmem:[#allocation3 + $0x64] sm:$0xff]  }
 0x63f   : > { %v5073_v53 = vpop.f32.mrb[148].mxu0  ;;  %v5856_v24 = vsel %vm2799_vm6, %v5853_v42, %v5855_v31  ;;  %v5857_v35 = vrot.slane %v14377_v15, 2 }
 0x640   : > { %v13317_v32 = vpop.f32.mrb[149].mxu0  ;;  %13492 = vmatmul.mubr.msk.bf16.gmra.mrb[120].mxu1 %vm1123_vm5, %v5854_v9  ;;  %v17708_v14 = vadd.f32 %v5060_v30, %v4781_v49  ;;  %v6285_v52 = vor.u32 %v6284_v23, %v6281_v57  ;;  %v6288_v49 = vshrl.u32 %v14682_v61, 16 }
 0x641   : > { %v5076_v43 = vpop.f32.mrb[150].mxu0  ;;  %13495 = vmatprep.mubr.msk.bf16.mxu1 %vm14761_vm0, %v19402_v46 }
 0x642   : > { %v13318_v58 = vpop.f32.mrb[151].mxu0  ;;  %v6286_v42 = vsel %vm3149_vm8, %v6276_v62, %v6285_v52  ;;  %v6290_v25 = vrot.slane %v6288_v49, 2 }
 0x643   : > { %v4716_v47 = vpop.f32.mrb[16].mxu1 }
 0x644   : > { %v4782_v27 = vadd.f32 %v4716_v47, %v17508_v59  ;;  %13560 = vmatmul.mubr.msk.bf16.gmra.mrb[0].mxu0 %vm1123_vm5, %v6277_v28  ;;  %v13253_v2 = vpop.f32.mrb[17].mxu1  ;;  %v6291_v59 = vshll.u32 %v14682_v61, 16 }
 0x645   : > { %v4719_v10 = vpop.f32.mrb[18].mxu1  ;;  %13563 = vmatprep.mubr.msk.bf16.mxu0 %vm14761_vm0, %v19402_v46 }
 0x646   : > { %v4783_v30 = vadd.f32 %v4719_v10, %v17516_v4  ;;  %v13254_v56 = vpop.f32.mrb[19].mxu1  ;;  %v17718_v63 = vadd.f32 %v5065_v11, %v4782_v27  ;;  %v17726_v4 = vld [vmem:[#allocation3 + $0x6c] sm:$0x1f]   ;;  %v6293_v32 = vrot.slane %v6291_v59, 3  ;;  %v5858_v10 = vsel %vm2799_vm6, %v5855_v31, %v5857_v35 }
 0x647   : > { %v5081_v39 = vpop.f32.mrb[152].mxu0  ;;  %v6297_v47 = vshrl.u32 %v17726_v4, 16  ;;  %v6300_v57 = vshll.u32 %v17726_v4, 16 }
 0x648   : > { %v13321_v38 = vpop.f32.mrb[153].mxu0  ;;  %13496 = vmatmul.mubr.msk.bf16.gmra.mrb[124].mxu1 %vm1123_vm5, %v5856_v24  ;;  %v17722_v9 = vadd.f32 %v5068_v3, %v4783_v30  ;;  %v14379_v30 = vld [vmem:[#allocation3 + $0x5c] sm:$0xff]  }
 0x649   : > { %v5084_v40 = vpop.f32.mrb[154].mxu0  ;;  %13499 = vmatprep.mubr.msk.bf16.mxu1 %vm14761_vm0, %v19402_v46  ;;  %v6299_v61 = vrot.slane %v6297_v47, 2  ;;  %v6302_v49 = vrot.slane %v6300_v57, 3  ;;  %v5859_v38 = vrot.slane %v14379_v30, 2  ;;  %v14382_v30 = vld [vmem:[#allocation3 + $0x6c] ss:$0 sps:$4 sm:$0xff]  }
 0x64a   : > { %v13322_v11 = vpop.f32.mrb[155].mxu0 }
 0x64b   : > { %v4724_v19 = vpop.f32.mrb[20].mxu1 }
 0x64c   : > { %v4784_v58 = vadd.f32 %v4724_v19, %v17522_v16  ;;  %13564 = vmatmul.mubr.msk.bf16.gmra.mrb[4].mxu0 %vm1123_vm5, %v6286_v42  ;;  %v13257_v28 = vpop.f32.mrb[21].mxu1  ;;  %v6294_v16 = vor.u32 %v6293_v32, %v6290_v25 }
 0x64d   : > { %v4727_v3 = vpop.f32.mrb[22].mxu1  ;;  %13567 = vmatprep.mubr.msk.bf16.mxu0 %vm14761_vm0, %v19402_v46  ;;  %v5860_v28 = vsel %vm2799_vm6, %v5857_v35, %v5859_v38 }
 0x64e   : > { %v4785_v23 = vadd.f32 %v4727_v3, %v17530_v41  ;;  %v13258_v27 = vpop.f32.mrb[23].mxu1  ;;  %v17736_v62 = vadd.f32 %v5073_v53, %v4784_v58  ;;  %v6295_v53 = vsel %vm3149_vm8, %v6285_v52, %v6294_v16  ;;  %v14380_v52 = vld [vmem:[#allocation3 + $0x64] sm:$0xff]  }
 0x64f   : > { %v5089_v2 = vpop.f32.mrb[156].mxu0  ;;  %v5861_v27 = vrot.slane %v14380_v52, 2 }
 0x650   : > { %v13325_v56 = vpop.f32.mrb[157].mxu0  ;;  %13500 = vmatmul.mubr.msk.bf16.gmra.mrb[128].mxu1 %vm1123_vm5, %v5858_v10  ;;  %v17740_v24 = vadd.f32 %v5076_v43, %v4785_v23  ;;  %v6303_v43 = vor.u32 %v6302_v49, %v6299_v61 }
 0x651   : > { %v5092_v15 = vpop.f32.mrb[158].mxu0  ;;  %13503 = vmatprep.mubr.msk.bf16.mxu1 %vm14761_vm0, %v19402_v46 }
 0x652   : > { %v13326_v41 = vpop.f32.mrb[159].mxu0  ;;  %v6304_v57 = vsel %vm3149_vm8, %v6294_v16, %v6303_v43  ;;  %v5862_v16 = vsel %vm2799_vm6, %v5859_v38, %v5861_v27 }
 0x653   : > { %v4732_v59 = vpop.f32.mrb[24].mxu1 }
 0x654   : > { %v4786_v31 = vadd.f32 %v4732_v59, %v17536_v60  ;;  %13568 = vmatmul.mubr.msk.bf16.gmra.mrb[8].mxu0 %vm1123_vm5, %v6295_v53  ;;  %v13261_v11 = vpop.f32.mrb[25].mxu1  ;;  %v5863_v53 = vrot.slane %v14382_v30, 2 }
 0x655   : > { %v4735_v19 = vpop.f32.mrb[26].mxu1  ;;  %13571 = vmatprep.mubr.msk.bf16.mxu0 %vm14761_vm0, %v19402_v46 }
 0x656   : > { %v4787_v42 = vadd.f32 %v4735_v19, %v17544_v5  ;;  %v13262_v25 = vpop.f32.mrb[27].mxu1  ;;  %v17750_v32 = vadd.f32 %v5081_v39, %v4786_v31  ;;  %v5864_v38 = vsel %vm2799_vm6, %v5861_v27, %v5863_v53 }
 0x657   : > { %v5097_v58 = vpop.f32.mrb[160].mxu0 }
 0x658   : > { %v13329_v3 = vpop.f32.mrb[161].mxu0  ;;  %13504 = vmatmul.mubr.msk.bf16.gmra.mrb[132].mxu1 %vm1123_vm5, %v5860_v28  ;;  %v17754_v60 = vadd.f32 %v5084_v40, %v4787_v42  ;;  %v19573_v42 = vmov 0  }
 0x659   : > { %v5100_v47 = vpop.f32.mrb[162].mxu0  ;;  %13507 = vmatprep.mubr.msk.bf16.mxu1 %vm14761_vm0, %v19402_v46 }
 0x65a   : > { %v13330_v23 = vpop.f32.mrb[163].mxu0 }
 0x65b   : > { %v4740_v5 = vpop.f32.mrb[28].mxu1 }
 0x65c   : > { %v4788_v39 = vadd.f32 %v4740_v5, %v17553_v55  ;;  %v13265_v10 = vpop.f32.mrb[29].mxu1  ;;  %13572 = vmatmul.mubr.msk.bf16.gmra.mrb[12].mxu0 %vm1123_vm5, %v6304_v57 }
 0x65d   : > { %v4743_v35 = vpop.f32.mrb[30].mxu1  ;;  %13575 = vmatprep.mubr.msk.bf16.mxu0 %vm14761_vm0, %v19402_v46 }
 0x65e   : > { %v4789_v40 = vadd.f32 %v4743_v35, %v17558_v26  ;;  %v13266_v56 = vpop.f32.mrb[31].mxu1  ;;  %v17764_v61 = vadd.f32 %v5089_v2, %v4788_v39 }
 0x65f   : > { %v5105_v49 = vpop.f32.mrb[164].mxu0 }
 0x660   : > { %v13333_v41 = vpop.f32.mrb[165].mxu0  ;;  %13508 = vmatmul.mubr.msk.bf16.gmra.mrb[136].mxu1 %vm1123_vm5, %v5862_v16  ;;  %v17768_v55 = vadd.f32 %v5092_v15, %v4789_v40 }
 0x661   : > { %v5108_v59 = vpop.f32.mrb[166].mxu0  ;;  %13511 = vmatprep.mubr.msk.bf16.mxu1 %vm14761_vm0, %v19402_v46 }
 0x662   : > { %v13334_v31 = vpop.f32.mrb[167].mxu0 }
 0x663   : > { %v4748_v11 = vpop.f32.mrb[32].mxu1 }
 0x664   : > { %v4790_v26 = vadd.f32 %v4748_v11, %v17564_v51  ;;  %v13269_v19 = vpop.f32.mrb[33].mxu1  ;;  %13576 = vmatmul.mubr.msk.bf16.gmra.mrb[16].mxu0 %vm1123_vm5, %v6303_v43 }
 0x665   : > { %v4751_v2 = vpop.f32.mrb[34].mxu1  ;;  %7324 = vmatprep.mubr.bf16.mxu0 %v19573_v42  ;;  %v19574_v19 = vld [vmem:[#allocation40_spill] sm:$0xff] }
 0x666   : > { %v4791_v15 = vadd.f32 %v4751_v2, %v17569_v45  ;;  %v13270_v25 = vpop.f32.mrb[35].mxu1  ;;  %v17777_v28 = vadd.f32 %v5097_v58, %v4790_v26 }
 0x667   : > { %v5113_v52 = vpop.f32.mrb[168].mxu0 }
 0x668   : > { %13512 = vmatmul.mubr.msk.bf16.gmra.mrb[140].mxu1 %vm1123_vm5, %v5864_v38  ;;  %v13337_v3 = vpop.f32.mrb[169].mxu0  ;;  %v17780_v57 = vadd.f32 %v5100_v47, %v4791_v15 }
 0x669   : > { %v5116_v51 = vpop.f32.mrb[170].mxu0  ;;  %13515 = vmatprep.mubr.msk.bf16.mxu1 %vm14761_vm0, %v19402_v46 }
 0x66a   : > { %v13338_v43 = vpop.f32.mrb[171].mxu0 }
 0x66b   : > { %v4756_v23 = vpop.f32.mrb[36].mxu1 }
 0x66c   : > { %v4792_v5 = vadd.f32 %v4756_v23, %v17579_v37  ;;  %v13273_v27 = vpop.f32.mrb[37].mxu1  ;;  %v19575_v23 = vld [vmem:[#allocation10_spill] sm:$0xff] }
 0x66d   : > { %v4759_v39 = vpop.f32.mrb[38].mxu1 }
 0x66e   : > { %v4793_v45 = vadd.f32 %v4759_v39, %v17584_v34  ;;  %v13274_v58 = vpop.f32.mrb[39].mxu1  ;;  %v17786_v10 = vadd.f32 %v5105_v49, %v4792_v5 }
 0x66f   : > { %v5616_v35 = vpop.f32.mrb[172].mxu0 }
 0x670   : > { %v13409_v30 = vpop.f32.mrb[173].mxu0  ;;  %13516 = vmatmul.mubr.msk.bf16.gmra.mrb[144].mxu1 %vm1123_vm5, %v5863_v53  ;;  %v17789_v47 = vadd.f32 %v5108_v59, %v4793_v45 }
 0x671   : > { %v5619_v40 = vpop.f32.mrb[174].mxu0  ;;  %13587 = vmatprep.mubr.msk.bf16.mxu1 %vm14761_vm0, %v19402_v46 }
 0x672   : > { %v13410_v56 = vpop.f32.mrb[175].mxu0 }
 0x673   : > { %v4764_v16 = vpop.f32.mrb[40].mxu1 }
 0x674   : > { %v4794_v37 = vadd.f32 %v4764_v16, %v17592_v21  ;;  %v13277_v41 = vpop.f32.mrb[41].mxu1 }
 0x675   : > { %v4767_v31 = vpop.f32.mrb[42].mxu1  ;;  %v19576_v41 = vld [vmem:[#allocation17_spill] sm:$0xff] }
 0x676   : > { %v13278_v34 = vpop.f32.mrb[43].mxu1  ;;  %v17794_v11 = vadd.f32 %v5113_v52, %v4794_v37 }
 0x677   : > { %v5624_v49 = vpop.f32.mrb[176].mxu0 }
 0x678   : > { %v13413_v26 = vpop.f32.mrb[177].mxu0  ;;  %13588 = vmatmul.mubr.msk.bf16.vlgmr.msra.gmra.mrb[148].mxu1 %vm1123_vm5, %v19574_v19 }
 0x679   : > { %v5627_v59 = vpop.f32.mrb[178].mxu0  ;;  %13591 = vmatprep.mubr.msk.bf16.mxu1 %vm14761_vm0, %v19402_v46 }
 0x67a   : > { %v13414_v53 = vpop.f32.mrb[179].mxu0 }
 0x67b   : > { %v5370_v2 = vpop.f32.mrb[44].mxu1 }
 0x67c   : > { %v5472_v38 = vadd.f32 %v5370_v2, %v17620_v8  ;;  %v13349_v15 = vpop.f32.mrb[45].mxu1 }
 0x67d   : > { %v5373_v21 = vpop.f32.mrb[46].mxu1 }
 0x67e   : > { %v5473_v25 = vadd.f32 %v5373_v21, %v17626_v33  ;;  %v13350_v3 = vpop.f32.mrb[47].mxu1  ;;  %v17802_v52 = vadd.f32 %v5616_v35, %v5472_v38  ;;  %v14386_v38 = vld [vmem:[%s19298_s7 + $0x84] ss:$8 sps:$4 sm:$0xff]  }
 0x67f   : > { %v5632_v51 = vpop.f32.mrb[180].mxu0  ;;  %7292 = vmatprep.subr.bf16.mxu0 %v14386_v38 }
 0x680   : > { %v13417_v43 = vpop.f32.mrb[181].mxu0  ;;  %13592 = vmatmul.mubr.msk.bf16.gmra.mrb[152].mxu1 %vm1123_vm5, %v19575_v23  ;;  %v17806_v5 = vadd.f32 %v5619_v40, %v5473_v25  ;;  %v19577_v25 = vld [vmem:[#allocation20_spill] sm:$0xff] }
 0x681   : > { %v5635_v27 = vpop.f32.mrb[182].mxu0  ;;  %13595 = vmatprep.mubr.msk.bf16.mxu1 %vm14761_vm0, %v19402_v46 }
 0x682   : > { %v13418_v39 = vpop.f32.mrb[183].mxu0 }
 0x683   : > { %v5378_v8 = vpop.f32.mrb[48].mxu1 }
 0x684   : > { %v5474_v45 = vadd.f32 %v5378_v8, %v17640_v29  ;;  %v13353_v58 = vpop.f32.mrb[49].mxu1 }
 0x685   : > { %v5381_v33 = vpop.f32.mrb[50].mxu1 }
 0x686   : > { %v5475_v35 = vadd.f32 %v5381_v33, %v17646_v12  ;;  %v13354_v30 = vpop.f32.mrb[51].mxu1  ;;  %v17812_v56 = vadd.f32 %v5624_v49, %v5474_v45 }
 0x687   : > { %v5640_v16 = vpop.f32.mrb[184].mxu0 }
 0x688   : > { %v13421_v37 = vpop.f32.mrb[185].mxu0  ;;  %13596 = vmatmul.mubr.msk.bf16.gmra.mrb[156].mxu1 %vm1123_vm5, %v19576_v41  ;;  %v17816_v40 = vadd.f32 %v5627_v59, %v5475_v35  ;;  %v14384_v59 = vld [vmem:[%s19298_s7 + $0x80] ss:$8 sps:$4 sm:$0xff]  }
 0x689   : > { %v5643_v31 = vpop.f32.mrb[186].mxu0  ;;  %13599 = vmatprep.mubr.msk.bf16.mxu1 %vm14761_vm0, %v19402_v46  ;;  %7293 = vmatpush1.bf16.msra.mxu0 %v14384_v59 }
 0x68a   : > { %v13422_v34 = vpop.f32.mrb[187].mxu0 }
 0x68b   : > { %v5386_v29 = vpop.f32.mrb[52].mxu1 }
 0x68c   : > { %v5476_v26 = vadd.f32 %v5386_v29, %v17656_v6  ;;  %v13357_v19 = vpop.f32.mrb[53].mxu1 }
 0x68d   : > { %v5389_v12 = vpop.f32.mrb[54].mxu1 }
 0x68e   : > { %v5477_v49 = vadd.f32 %v5389_v12, %v17662_v18  ;;  %v13358_v53 = vpop.f32.mrb[55].mxu1  ;;  %v17822_v2 = vadd.f32 %v5632_v51, %v5476_v26 }
 0x68f   : > { %v5648_v15 = vpop.f32.mrb[188].mxu0 }
 0x690   : > { %v13425_v21 = vpop.f32.mrb[189].mxu0  ;;  %13600 = vmatmul.mubr.msk.bf16.gmra.mrb[160].mxu1 %vm1123_vm5, %v19577_v25  ;;  %v17832_v6 = vadd.f32 %v5635_v27, %v5477_v49 }
 0x691   : > { %v5651_v18 = vpop.f32.mrb[190].mxu0  ;;  %13603 = vmatprep.mubr.msk.bf16.mxu1 %vm14761_vm0, %v19402_v46 }
 0x692   : > { %v13426_v3 = vpop.f32.mrb[191].mxu0 }
 0x693   : > { %v5394_v51 = vpop.f32.mrb[56].mxu1 }
 0x694   : > { %v5478_v43 = vadd.f32 %v5394_v51, %v17672_v0  ;;  %v13361_v23 = vpop.f32.mrb[57].mxu1  ;;  %v14387_v0 = vld [vmem:[%s19298_s7 + $0x90] ss:$8 sps:$4 sm:$0xff]  }
 0x695   : > { %v5397_v39 = vpop.f32.mrb[58].mxu1  ;;  %v14390_v23 = vld [vmem:[%s19298_s7 + $0xa0] ss:$8 sps:$4 sm:$0xff]  }
 0x696   : > { %v5479_v8 = vadd.f32 %v5397_v39, %v17678_v20  ;;  %v13362_v45 = vpop.f32.mrb[59].mxu1  ;;  %v17838_v58 = vadd.f32 %v5640_v16, %v5478_v43  ;;  %v14389_v20 = vld [vmem:[%s19298_s7 + $0x94] ss:$8 sps:$4 sm:$0xff]  }
 0x697   : > { %v5656_v33 = vpop.f32.mrb[192].mxu0  ;;  %7294 = vmatprep.subr.bf16.mxu0 %v14389_v20 }
 0x698   : > { %v13429_v27 = vpop.f32.mrb[193].mxu0  ;;  %13604 = vmatmul.mubr.msk.bf16.gmra.mrb[164].mxu1 %vm1123_vm5, %v17220_v48  ;;  %v17842_v35 = vadd.f32 %v5643_v31, %v5479_v8  ;;  %7295 = vmatpush1.bf16.msra.mxu0 %v14387_v0 }
 0x699   : > { %v5659_v30 = vpop.f32.mrb[194].mxu0  ;;  %13607 = vmatprep.mubr.msk.bf16.mxu1 %vm14761_vm0, %v19402_v46 }
 0x69a   : > { %v13430_v37 = vpop.f32.mrb[195].mxu0 }
 0x69b   : > { %v5402_v16 = vpop.f32.mrb[60].mxu1 }
 0x69c   : > { %v5480_v41 = vadd.f32 %v5402_v16, %v17688_v13  ;;  %v13365_v34 = vpop.f32.mrb[61].mxu1 }
 0x69d   : > { %v5405_v48 = vpop.f32.mrb[62].mxu1 }
 0x69e   : > { %v5481_v31 = vadd.f32 %v5405_v48, %v17694_v17  ;;  %v13366_v29 = vpop.f32.mrb[63].mxu1  ;;  %v17854_v26 = vadd.f32 %v5648_v15, %v5480_v41  ;;  %v19579_v41 = vld [vmem:[#allocation30_spill] sm:$0xff] }
 0x69f   : > { %v5664_v19 = vpop.f32.mrb[196].mxu0 }
 0x6a0   : > { %v13433_v12 = vpop.f32.mrb[197].mxu0  ;;  %13608 = vmatmul.mubr.msk.bf16.gmra.mrb[168].mxu1 %vm1123_vm5, %v17225_v7  ;;  %v17858_v49 = vadd.f32 %v5651_v18, %v5481_v31  ;;  %v19578_v7 = vld [vmem:[#allocation29_spill] sm:$0xff] }
 0x6a1   : > { %v5667_v53 = vpop.f32.mrb[198].mxu0  ;;  %13611 = vmatprep.mubr.msk.bf16.mxu1 %vm14761_vm0, %v19402_v46 }
 0x6a2   : > { %v13434_v13 = vpop.f32.mrb[199].mxu0 }
 0x6a3   : > { %v5410_v59 = vpop.f32.mrb[64].mxu1 }
 0x6a4   : > { %v5482_v38 = vadd.f32 %v5410_v59, %v17704_v50  ;;  %v13369_v21 = vpop.f32.mrb[65].mxu1  ;;  %v14392_v50 = vld [vmem:[%s19298_s7 + $0xa4] ss:$8 sps:$4 sm:$0xff]  }
 0x6a5   : > { %v5413_v17 = vpop.f32.mrb[66].mxu1  ;;  %7296 = vmatprep.subr.bf16.mxu0 %v14392_v50 }
 0x6a6   : > { %v5483_v15 = vadd.f32 %v5413_v17, %v17708_v14  ;;  %v13370_v25 = vpop.f32.mrb[67].mxu1  ;;  %v17864_v3 = vadd.f32 %v5656_v33, %v5482_v38  ;;  %7297 = vmatpush1.bf16.msra.mxu0 %v14390_v23 }
 0x6a7   : > { %v5672_v51 = vpop.f32.mrb[200].mxu0 }
 0x6a8   : > { %v13437_v43 = vpop.f32.mrb[201].mxu0  ;;  %13612 = vmatmul.mubr.msk.bf16.gmra.mrb[172].mxu1 %vm1123_vm5, %v19578_v7  ;;  %v17868_v18 = vadd.f32 %v5659_v30, %v5483_v15 }
 0x6a9   : > { %v5675_v39 = vpop.f32.mrb[202].mxu0  ;;  %13615 = vmatprep.mubr.msk.bf16.mxu1 %vm14761_vm0, %v19402_v46 }
 0x6aa   : > { %v13438_v14 = vpop.f32.mrb[203].mxu0 }
 0x6ab   : > { %v5418_v8 = vpop.f32.mrb[68].mxu1 }
 0x6ac   : > { %v5484_v45 = vadd.f32 %v5418_v8, %v17718_v63  ;;  %v13373_v33 = vpop.f32.mrb[69].mxu1 }
 0x6ad   : > { %v5421_v27 = vpop.f32.mrb[70].mxu1 }
 0x6ae   : > { %v5485_v30 = vadd.f32 %v5421_v27, %v17722_v9  ;;  %v13374_v37 = vpop.f32.mrb[71].mxu1  ;;  %v17880_v0 = vadd.f32 %v5664_v19, %v5484_v45  ;;  %v14393_v9 = vld [vmem:[%s19298_s7 + $0xb0] ss:$8 sps:$4 sm:$0xff]   ;;  %v14395_v19 = vld [vmem:[%s19298_s7 + $0xb4] ss:$8 sps:$4 sm:$0xff]  }
 0x6af   : > { %v5680_v20 = vpop.f32.mrb[204].mxu0  ;;  %7298 = vmatprep.subr.bf16.mxu0 %v14395_v19 }
 0x6b0   : > { %v13441_v16 = vpop.f32.mrb[205].mxu0  ;;  %13616 = vmatmul.mubr.msk.bf16.gmra.mrb[176].mxu1 %vm1123_vm5, %v19579_v41  ;;  %v17884_v34 = vadd.f32 %v5667_v53, %v5485_v30  ;;  %7299 = vmatpush1.bf16.msra.mxu0 %v14393_v9 }
 0x6b1   : > { %v5683_v48 = vpop.f32.mrb[206].mxu0  ;;  %13619 = vmatprep.mubr.msk.bf16.mxu1 %vm14761_vm0, %v19402_v46 }
 0x6b2   : > { %v13442_v31 = vpop.f32.mrb[207].mxu0 }
 0x6b3   : > { %v5426_v63 = vpop.f32.mrb[72].mxu1 }
 0x6b4   : > { %v5486_v29 = vadd.f32 %v5426_v63, %v17736_v62  ;;  %v13377_v12 = vpop.f32.mrb[73].mxu1 }
 0x6b5   : > { %v5429_v13 = vpop.f32.mrb[74].mxu1 }
 0x6b6   : > { %v5487_v53 = vadd.f32 %v5429_v13, %v17740_v24  ;;  %v13378_v59 = vpop.f32.mrb[75].mxu1  ;;  %v17896_v38 = vadd.f32 %v5672_v51, %v5486_v29 }
 0x6b7   : > { %v5688_v21 = vpop.f32.mrb[208].mxu0 }
 0x6b8   : > { %v13445_v17 = vpop.f32.mrb[209].mxu0  ;;  %13620 = vmatmul.mubr.msk.bf16.gmra.mrb[180].mxu1 %vm1123_vm5, %v17246_v44  ;;  %v17900_v62 = vadd.f32 %v5675_v39, %v5487_v53  ;;  %v14396_v39 = vld [vmem:[%s19298_s7 + $0xc0] ss:$8 sps:$4 sm:$0xff]  }
 0x6b9   : > { %v5691_v15 = vpop.f32.mrb[210].mxu0  ;;  %13623 = vmatprep.mubr.msk.bf16.mxu1 %vm14761_vm0, %v19402_v46 }
 0x6ba   : > { %v13446_v25 = vpop.f32.mrb[211].mxu0 }
 0x6bb   : > { %v5434_v43 = vpop.f32.mrb[76].mxu1 }
 0x6bc   : > { %v5488_v24 = vadd.f32 %v5434_v43, %v17750_v32  ;;  %v13381_v7 = vpop.f32.mrb[77].mxu1  ;;  %v14398_v32 = vld [vmem:[%s19298_s7 + $0xc4] ss:$8 sps:$4 sm:$0xff]  }
 0x6bd   : > { %v5437_v51 = vpop.f32.mrb[78].mxu1  ;;  %7300 = vmatprep.subr.bf16.mxu0 %v14398_v32 }
 0x6be   : > { %v5489_v23 = vadd.f32 %v5437_v51, %v17754_v60  ;;  %v13382_v50 = vpop.f32.mrb[79].mxu1  ;;  %v17906_v14 = vadd.f32 %v5680_v20, %v5488_v24  ;;  %7301 = vmatpush1.bf16.msra.mxu0 %v14396_v39 }
 0x6bf   : > { %v5696_v8 = vpop.f32.mrb[212].mxu0  ;;  %v14401_v50 = vld [vmem:[%s19298_s7 + $0xd4] ss:$8 sps:$4 sm:$0xff]  }
 0x6c0   : > { %v13449_v45 = vpop.f32.mrb[213].mxu0  ;;  %13624 = vmatmul.mubr.msk.bf16.gmra.mrb[184].mxu1 %vm1123_vm5, %v17249_v1  ;;  %v17910_v44 = vadd.f32 %v5683_v48, %v5489_v23  ;;  %v14399_v23 = vld [vmem:[%s19298_s7 + $0xd0] ss:$8 sps:$4 sm:$0xff]   ;;  %7302 = vmatprep.subr.bf16.mxu0 %v14401_v50 }
 0x6c1   : > { %v5699_v33 = vpop.f32.mrb[214].mxu0  ;;  %13627 = vmatprep.mubr.msk.bf16.mxu1 %vm14761_vm0, %v19402_v46 }
 0x6c2   : > { %v13450_v60 = vpop.f32.mrb[215].mxu0  ;;  %7303 = vmatpush1.bf16.msra.mxu0 %v14399_v23 }
 0x6c3   : > { %v5442_v27 = vpop.f32.mrb[80].mxu1 }
 0x6c4   : > { %v5490_v1 = vadd.f32 %v5442_v27, %v17764_v61  ;;  %v13385_v30 = vpop.f32.mrb[81].mxu1  ;;  %v6565_v61 = vrot.slane %v17726_v4, 3 }
 0x6c5   : > { %v5445_v37 = vpop.f32.mrb[82].mxu1 }
 0x6c6   : > { %v5491_v20 = vadd.f32 %v5445_v37, %v17768_v55  ;;  %v13386_v16 = vpop.f32.mrb[83].mxu1  ;;  %v17922_v41 = vadd.f32 %v5688_v21, %v5490_v1  ;;  %v6566_v53 = vsel %vm1852_vm9, %v6563_v36, %v6565_v61 }
 0x6c7   : > { %v5704_v48 = vpop.f32.mrb[216].mxu0  ;;  %v14404_v16 = vld [vmem:[%s19298_s7 + $0xe4] ss:$8 sps:$4 sm:$0xff]  }
 0x6c8   : > { %v13453_v31 = vpop.f32.mrb[217].mxu0  ;;  %13628 = vmatmul.mubr.msk.bf16.gmra.mrb[188].mxu1 %vm1123_vm5, %v17256_v22  ;;  %v17926_v63 = vadd.f32 %v5691_v15, %v5491_v20  ;;  %v14402_v20 = vld [vmem:[%s19298_s7 + $0xe0] ss:$8 sps:$4 sm:$0xff]   ;;  %7304 = vmatprep.subr.bf16.mxu0 %v14404_v16 }
 0x6c9   : > { %v5707_v29 = vpop.f32.mrb[218].mxu0  ;;  %13631 = vmatprep.mubr.msk.bf16.mxu1 %vm14761_vm0, %v19402_v46  ;;  %7305 = vmatpush1.bf16.msra.mxu0 %v14402_v20 }
 0x6ca   : > { %v13454_v12 = vpop.f32.mrb[219].mxu0 }
 0x6cb   : > { %v5450_v9 = vpop.f32.mrb[84].mxu1 }
 0x6cc   : > { %v5492_v55 = vadd.f32 %v5450_v9, %v17777_v28  ;;  %v13389_v19 = vpop.f32.mrb[85].mxu1 }
 0x6cd   : > { %v5453_v13 = vpop.f32.mrb[86].mxu1 }
 0x6ce   : > { %v5493_v22 = vadd.f32 %v5453_v13, %v17780_v57  ;;  %v13390_v59 = vpop.f32.mrb[87].mxu1  ;;  %v17936_v21 = vadd.f32 %v5696_v8, %v5492_v55 }
 0x6cf   : > { %v5712_v17 = vpop.f32.mrb[220].mxu0 }
 0x6d0   : > { %13632 = vmatmul.mubr.msk.bf16.gmra.mrb[192].mxu1 %vm1123_vm5, %v6566_v53  ;;  %v13457_v15 = vpop.f32.mrb[221].mxu0  ;;  %v17939_v4 = vadd.f32 %v5699_v33, %v5493_v22 }
 0x6d1   : > { %v5715_v25 = vpop.f32.mrb[222].mxu0  ;;  %13635 = vmatprep.mubr.msk.bf16.mxu1 %vm14761_vm0, %v19402_v46 }
 0x6d2   : > { %v13458_v28 = vpop.f32.mrb[223].mxu0 }
 0x6d3   : > { %v5458_v43 = vpop.f32.mrb[88].mxu1 }
 0x6d4   : > { %v5494_v54 = vadd.f32 %v5458_v43, %v17786_v10  ;;  %v13393_v36 = vpop.f32.mrb[89].mxu1 }
 0x6d5   : > { %v5461_v24 = vpop.f32.mrb[90].mxu1 }
 0x6d6   : > { %v5495_v57 = vadd.f32 %v5461_v24, %v17789_v47  ;;  %v13394_v7 = vpop.f32.mrb[91].mxu1  ;;  %v17945_v51 = vadd.f32 %v5704_v48, %v5494_v54  ;;  %v14407_v24 = vld [vmem:[%s19298_s7 + $0xf4] ss:$8 sps:$4 sm:$0xff]  }
 0x6d7   : > { %v6402_v46 = vpop.f32.mrb[224].mxu0  ;;  %7306 = vmatprep.subr.bf16.mxu0 %v14407_v24 }
 0x6d8   : > { %v13529_v8 = vpop.f32.mrb[225].mxu0  ;;  %13636 = vmatmul.mubr.msk.bf16.gmra.mrb[196].mxu1 %vm1123_vm5, %v6565_v61  ;;  %v17954_v10 = vadd.f32 %v5707_v29, %v5495_v57 }
 0x6d9   : > { %v6405_v45 = vpop.f32.mrb[226].mxu0 }
 0x6da   : > { %v13530_v47 = vpop.f32.mrb[227].mxu0 }
 0x6db   : > { %v5466_v39 = vpop.f32.mrb[92].mxu1 }
 0x6dc   : > { %v5496_v32 = vadd.f32 %v5466_v39, %v17794_v11  ;;  %v13397_v33 = vpop.f32.mrb[93].mxu1 }
 0x6dd   : > { %v5469_v60 = vpop.f32.mrb[94].mxu1 }
 0x6de   : > { %v13398_v27 = vpop.f32.mrb[95].mxu1  ;;  %v17957_v1 = vadd.f32 %v5712_v17, %v5496_v32 }
 0x6df   : > { %v6410_v30 = vpop.f32.mrb[228].mxu0 }
 0x6e0   : > { %v13533_v37 = vpop.f32.mrb[229].mxu0 }
 0x6e1   : > { %v6413_v48 = vpop.f32.mrb[230].mxu0 }
 0x6e2   : > { %v13534_v31 = vpop.f32.mrb[231].mxu0 }
 0x6e3   : > { %v5962_v29 = vpop.f32.mrb[96].mxu1 }
 0x6e4   : > { %v6064_v11 = vadd.f32 %v5962_v29, %v17802_v52  ;;  %v13469_v61 = vpop.f32.mrb[97].mxu1 }
 0x6e5   : > { %v5965_v12 = vpop.f32.mrb[98].mxu1 }
 0x6e6   : > { %v6065_v9 = vadd.f32 %v5965_v12, %v17806_v5  ;;  %v13470_v55 = vpop.f32.mrb[99].mxu1  ;;  %v17967_v19 = vadd.f32 %v6402_v46, %v6064_v11  ;;  %v14405_v5 = vld [vmem:[%s19298_s7 + $0xf0] ss:$8 sps:$4 sm:$0xff]  }
 0x6e7   : > { %v6418_v13 = vpop.f32.mrb[232].mxu0  ;;  %7307 = vmatpush1.bf16.msra.mxu0 %v14405_v5 }
 0x6e8   : > { %v13537_v53 = vpop.f32.mrb[233].mxu0  ;;  %v17969_v22 = vadd.f32 %v6405_v45, %v6065_v9 }
 0x6e9   : > { %v6421_v59 = vpop.f32.mrb[234].mxu0 }
 0x6ea   : > { %v13538_v17 = vpop.f32.mrb[235].mxu0 }
 0x6eb   : > { %v5970_v15 = vpop.f32.mrb[100].mxu1 }
 0x6ec   : > { %v6066_v25 = vadd.f32 %v5970_v15, %v17812_v56  ;;  %v13473_v28 = vpop.f32.mrb[101].mxu1 }
 0x6ed   : > { %v5973_v43 = vpop.f32.mrb[102].mxu1 }
 0x6ee   : > { %v6067_v52 = vadd.f32 %v5973_v43, %v17816_v40  ;;  %v13474_v54 = vpop.f32.mrb[103].mxu1  ;;  %v17973_v36 = vadd.f32 %v6410_v30, %v6066_v25 }
 0x6ef   : > { %v6426_v57 = vpop.f32.mrb[236].mxu0 }
 0x6f0   : > { %v13541_v7 = vpop.f32.mrb[237].mxu0  ;;  %v17981_v23 = vadd.f32 %v6413_v48, %v6067_v52 }
 0x6f1   : > { %v6429_v56 = vpop.f32.mrb[238].mxu0 }
 0x6f2   : > { %v13542_v50 = vpop.f32.mrb[239].mxu0 }
 0x6f3   : > { %v5978_v40 = vpop.f32.mrb[104].mxu1 }
 0x6f4   : > { %v6068_v46 = vadd.f32 %v5978_v40, %v17822_v2  ;;  %v13477_v8 = vpop.f32.mrb[105].mxu1 }
 0x6f5   : > { %v5981_v45 = vpop.f32.mrb[106].mxu1 }
 0x6f6   : > { %v6069_v47 = vadd.f32 %v5981_v45, %v17832_v6  ;;  %v13478_v39 = vpop.f32.mrb[107].mxu1  ;;  %v17985_v32 = vadd.f32 %v6418_v13, %v6068_v46  ;;  %v14413_v6 = vld [vmem:[%s19298_s7 + $0x4] ss:$8 sps:$4 sm:$0xff]  }
 0x6f7   : > { %v6434_v33 = vpop.f32.mrb[240].mxu0  ;;  %7549 = vmatprep.subr.bf16.mxu0 %v14413_v6 }
 0x6f8   : > { %v13545_v60 = vpop.f32.mrb[241].mxu0  ;;  %v17987_v27 = vadd.f32 %v6421_v59, %v6069_v47 }
 0x6f9   : > { %v6437_v30 = vpop.f32.mrb[242].mxu0 }
 0x6fa   : > { %v13546_v37 = vpop.f32.mrb[243].mxu0 }
 0x6fb   : > { %v5986_v20 = vpop.f32.mrb[108].mxu1 }
 0x6fc   : > { %v6070_v16 = vadd.f32 %v5986_v20, %v17838_v58  ;;  %v13481_v48 = vpop.f32.mrb[109].mxu1 }
 0x6fd   : > { %v5989_v31 = vpop.f32.mrb[110].mxu1 }
 0x6fe   : > { %v6071_v2 = vadd.f32 %v5989_v31, %v17842_v35  ;;  %v13482_v29 = vpop.f32.mrb[111].mxu1  ;;  %v17991_v11 = vadd.f32 %v6426_v57, %v6070_v16 }
 0x6ff   : > { %v6442_v61 = vpop.f32.mrb[244].mxu0 }
 0x700   : > { %v13549_v12 = vpop.f32.mrb[245].mxu0  ;;  %v17996_v9 = vadd.f32 %v6429_v56, %v6071_v2 }
 0x701   : > { %v6445_v55 = vpop.f32.mrb[246].mxu0 }
 0x702   : > { %v13550_v13 = vpop.f32.mrb[247].mxu0 }
 0x703   : > { %v5994_v53 = vpop.f32.mrb[112].mxu1 }
 0x704   : > { %v6072_v58 = vadd.f32 %v5994_v53, %v17854_v26  ;;  %v13485_v59 = vpop.f32.mrb[113].mxu1 }
 0x705   : > { %v5997_v17 = vpop.f32.mrb[114].mxu1 }
 0x706   : > { %v6073_v35 = vadd.f32 %v5997_v17, %v17858_v49  ;;  %v13486_v15 = vpop.f32.mrb[115].mxu1  ;;  %v18000_v25 = vadd.f32 %v6434_v33, %v6072_v58 }
 0x707   : > { %v6450_v28 = vpop.f32.mrb[248].mxu0 }
 0x708   : > { %v13553_v43 = vpop.f32.mrb[249].mxu0  ;;  %v18002_v52 = vadd.f32 %v6437_v30, %v6073_v35 }
 0x709   : > { %v6453_v54 = vpop.f32.mrb[250].mxu0 }
 0x70a   : > { %v13554_v5 = vpop.f32.mrb[251].mxu0 }
 0x70b   : > { %v6002_v24 = vpop.f32.mrb[116].mxu1 }
 0x70c   : > { %v6074_v57 = vadd.f32 %v6002_v24, %v17864_v3  ;;  %v13489_v7 = vpop.f32.mrb[117].mxu1 }
 0x70d   : > { %v6005_v56 = vpop.f32.mrb[118].mxu1 }
 0x70e   : > { %v6075_v26 = vadd.f32 %v6005_v56, %v17868_v18  ;;  %v13490_v50 = vpop.f32.mrb[119].mxu1  ;;  %v18006_v40 = vadd.f32 %v6442_v61, %v6074_v57 }
 0x70f   : > { %v6458_v49 = vpop.f32.mrb[252].mxu0 }
 0x710   : > { %v13557_v46 = vpop.f32.mrb[253].mxu0  ;;  %v18008_v8 = vadd.f32 %v6445_v55, %v6075_v26 }
 0x711   : > { %v6461_v45 = vpop.f32.mrb[254].mxu0 }
 0x712   : > { %v13558_v47 = vpop.f32.mrb[255].mxu0 }
 0x713   : > { %v6010_v39 = vpop.f32.mrb[120].mxu1 }
 0x714   : > { %v6076_v33 = vadd.f32 %v6010_v39, %v17880_v0  ;;  %v13493_v60 = vpop.f32.mrb[121].mxu1 }
 0x715   : > { %v6013_v30 = vpop.f32.mrb[122].mxu1 }
 0x716   : > { %v6077_v3 = vadd.f32 %v6013_v30, %v17884_v34  ;;  %v13494_v37 = vpop.f32.mrb[123].mxu1  ;;  %v18012_v20 = vadd.f32 %v6450_v28, %v6076_v33 }
 0x717   : > { %v6466_v18 = vpop.f32.mrb[0].mxu0 }
 0x718   : > { %v13561_v16 = vpop.f32.mrb[1].mxu0  ;;  %v18014_v48 = vadd.f32 %v6453_v54, %v6077_v3 }
 0x719   : > { %v6469_v31 = vpop.f32.mrb[2].mxu0 }
 0x71a   : > { %v13562_v2 = vpop.f32.mrb[3].mxu0 }
 0x71b   : > { %v6018_v29 = vpop.f32.mrb[124].mxu1 }
 0x71c   : > { %v6078_v6 = vadd.f32 %v6018_v29, %v17896_v38  ;;  %v13497_v61 = vpop.f32.mrb[125].mxu1 }
 0x71d   : > { %v6021_v12 = vpop.f32.mrb[126].mxu1 }
 0x71e   : > { %v6079_v0 = vadd.f32 %v6021_v12, %v17900_v62  ;;  %v13498_v55 = vpop.f32.mrb[127].mxu1  ;;  %v18018_v13 = vadd.f32 %v6458_v49, %v6078_v6 }
 0x71f   : > { %v6474_v34 = vpop.f32.mrb[4].mxu0 }
 0x720   : > { %v13565_v53 = vpop.f32.mrb[5].mxu0  ;;  %v18020_v58 = vadd.f32 %v6461_v45, %v6079_v0 }
 0x721   : > { %v6477_v59 = vpop.f32.mrb[6].mxu0 }
 0x722   : > { %v13566_v17 = vpop.f32.mrb[7].mxu0 }
 0x723   : > { %v6026_v35 = vpop.f32.mrb[128].mxu1 }
 0x724   : > { %v6080_v15 = vadd.f32 %v6026_v35, %v17906_v14  ;;  %v13501_v28 = vpop.f32.mrb[129].mxu1 }
 0x725   : > { %v6029_v43 = vpop.f32.mrb[130].mxu1 }
 0x726   : > { %v6081_v38 = vadd.f32 %v6029_v43, %v17910_v44  ;;  %v13502_v54 = vpop.f32.mrb[131].mxu1  ;;  %v18024_v5 = vadd.f32 %v6466_v18, %v6080_v15 }
 0x727   : > { %v6482_v62 = vpop.f32.mrb[8].mxu0 }
 0x728   : > { %v13569_v24 = vpop.f32.mrb[9].mxu0  ;;  %v18026_v57 = vadd.f32 %v6469_v31, %v6081_v38 }
 0x729   : > { %v6485_v7 = vpop.f32.mrb[10].mxu0 }
 0x72a   : > { %v13570_v56 = vpop.f32.mrb[11].mxu0 }
 0x72b   : > { %v6034_v26 = vpop.f32.mrb[132].mxu1 }
 0x72c   : > { %v6082_v50 = vadd.f32 %v6034_v26, %v17922_v41  ;;  %v13505_v49 = vpop.f32.mrb[133].mxu1 }
 0x72d   : > { %v6037_v46 = vpop.f32.mrb[134].mxu1 }
 0x72e   : > { %v6083_v14 = vadd.f32 %v6037_v46, %v17926_v63  ;;  %v13506_v45 = vpop.f32.mrb[135].mxu1  ;;  %v18030_v47 = vadd.f32 %v6474_v34, %v6082_v50 }
 0x72f   : > { %v6490_v44 = vpop.f32.mrb[12].mxu0 }
 0x730   : > { %v13573_v39 = vpop.f32.mrb[13].mxu0  ;;  %v18032_v33 = vadd.f32 %v6477_v59, %v6083_v14 }
 0x731   : > { %v6493_v60 = vpop.f32.mrb[14].mxu0 }
 0x732   : > { %v13574_v30 = vpop.f32.mrb[15].mxu0 }
 0x733   : > { %v6042_v3 = vpop.f32.mrb[136].mxu1 }
 0x734   : > { %v6084_v37 = vadd.f32 %v6042_v3, %v17936_v21  ;;  %v13509_v18 = vpop.f32.mrb[137].mxu1 }
 0x735   : > { %v6045_v16 = vpop.f32.mrb[138].mxu1 }
 0x736   : > { %v6085_v41 = vadd.f32 %v6045_v16, %v17939_v4  ;;  %v13510_v31 = vpop.f32.mrb[139].mxu1  ;;  %v18036_v2 = vadd.f32 %v6482_v62, %v6084_v37 }
 0x737   : > { %v6498_v63 = vpop.f32.mrb[16].mxu0 }
 0x738   : > { %v18038_v29 = vadd.f32 %v6485_v7, %v6085_v41  ;;  %v13577_v6 = vpop.f32.mrb[17].mxu0 }
 0x739   : > { %v6501_v61 = vpop.f32.mrb[18].mxu0 }
 0x73a   : > { %v13578_v12 = vpop.f32.mrb[19].mxu0 }
 0x73b   : > { %v6050_v0 = vpop.f32.mrb[140].mxu1 }
 0x73c   : > { %v6086_v55 = vadd.f32 %v6050_v0, %v17945_v51  ;;  %v13513_v34 = vpop.f32.mrb[141].mxu1  ;;  %v18052_v51 = vld [vmem:[%s19297_s6] ss:$0 sm:$0xff] }
 0x73d   : > { %v6053_v53 = vpop.f32.mrb[142].mxu1 }
 0x73e   : > { %v6087_v21 = vadd.f32 %v6053_v53, %v17954_v10  ;;  %v18042_v59 = vadd.f32 %v6490_v44, %v6086_v55  ;;  %v13514_v17 = vpop.f32.mrb[143].mxu1 }
 0x740   : > { %v18044_v4 = vadd.f32 %v6493_v60, %v6087_v21 }
 0x743   : > { %v6058_v35 = vpop.f32.mrb[144].mxu1 }
 0x744   : > { %v6088_v15 = vadd.f32 %v6058_v35, %v17957_v1  ;;  %v13517_v28 = vpop.f32.mrb[145].mxu1 }
 0x745   : > { %v6061_v43 = vpop.f32.mrb[146].mxu1 }
 0x746   : > { %v18047_v38 = vadd.f32 %v6498_v63, %v6088_v15  ;;  %v13518_v54 = vpop.f32.mrb[147].mxu1 }
 0x74b   : > { %v6664_v62 = vpop.f32.mrb[148].mxu1 }
 0x74c   : > { %v6766_v10 = vadd.f32 %v6664_v62, %v17967_v19  ;;  %v13589_v24 = vpop.f32.mrb[149].mxu1 }
 0x74d   : > { %v6667_v7 = vpop.f32.mrb[150].mxu1 }
 0x74e   : > { %v6798_v56 = vadd.f32 %v18052_v51, %v6766_v10  ;;  %v6767_v26 = vadd.f32 %v6667_v7, %v17969_v22  ;;  %v13590_v1 = vpop.f32.mrb[151].mxu1 }
 0x750   : > { %v6799_v50 = vadd.f32 %v18052_v51, %v6767_v26  ;;  %v6823_v49 = vmax.f32 %v6798_v56, 0.0 }
 0x752   : > { %v6824_v46 = vmax.f32 %v6799_v50, 0.0 }
 0x753   : > { %v6672_v14 = vpop.f32.mrb[152].mxu1 }
 0x754   : > { %v12061_v45 = vpack.c.bf16 %v6824_v46, %v6823_v49  ;;  %v6768_v44 = vadd.f32 %v6672_v14, %v17973_v36  ;;  %v13593_v39 = vpop.f32.mrb[153].mxu1 }
 0x755   : > { %v6675_v60 = vpop.f32.mrb[154].mxu1 }
 0x756   : > { %12062 = vst [vmem:[#allocation4] sm:$0xff] %v12061_v45   ;;  %v6800_v19 = vadd.f32 %v18052_v51, %v6768_v44  ;;  %v6769_v30 = vadd.f32 %v6675_v60, %v17981_v23  ;;  %v13594_v3 = vpop.f32.mrb[155].mxu1  ;;  %v14411_v45 = vld [vmem:[%s19298_s7] ss:$8 sps:$4 sm:$0xff]   ;;  %v14417_v60 = vld [vmem:[%s19298_s7 + $0x14] ss:$8 sps:$4 sm:$0xff]  }
 0x758   : > { %v6801_v37 = vadd.f32 %v18052_v51, %v6769_v30  ;;  %v6825_v22 = vmax.f32 %v6800_v19, 0.0 }
 0x75a   : > { %v6826_v18 = vmax.f32 %v6801_v37, 0.0 }
 0x75b   : > { %v6680_v16 = vpop.f32.mrb[156].mxu1 }
 0x75c   : > { %v12066_v41 = vpack.c.bf16 %v6826_v18, %v6825_v22  ;;  %v6770_v31 = vadd.f32 %v6680_v16, %v17985_v32  ;;  %v13597_v63 = vpop.f32.mrb[157].mxu1  ;;  %v14415_v18 = vld [vmem:[%s19298_s7 + $0x10] ss:$8 sps:$4 sm:$0xff]   ;;  %v14422_v16 = vld [vmem:[%s19298_s7 + $0x24] ss:$8 sps:$4 sm:$0xff]  }
 0x75d   : > { %v6683_v6 = vpop.f32.mrb[158].mxu1  ;;  %v6974_v61 = vld [vmem:[#allocation4] sm:$0xf]  ;;  %v6975_v36 = vld [vmem:[#allocation4 + $0x4] sm:$0xf] }
 0x75e   : > { %12118 = vst [vmem:[#allocation4 + $0x8] sm:$0xff] %v12066_v41   ;;  %v6802_v12 = vadd.f32 %v18052_v51, %v6770_v31  ;;  %v6771_v0 = vadd.f32 %v6683_v6, %v17987_v27  ;;  %v13598_v55 = vpop.f32.mrb[159].mxu1  ;;  %v18065_v23 = vcombine.low %v6974_v61, %v6975_v36 }
 0x760   : > { %v6803_v34 = vadd.f32 %v18052_v51, %v6771_v0  ;;  %v7099_v53 = vshll.u32 %v18065_v23, 16  ;;  %v6827_v21 = vmax.f32 %v6802_v12, 0.0  ;;  %v7097_v26 = vshrl.u32 %v18065_v23, 16 }
 0x762   : > { %v6828_v17 = vmax.f32 %v6803_v34, 0.0  ;;  %v7101_v43 = vrot.slane %v7099_v53, 1 }
 0x763   : > { %v6688_v35 = vpop.f32.mrb[160].mxu1 }
 0x764   : > { %v12071_v32 = vpack.c.bf16 %v6828_v17, %v6827_v21  ;;  %v6772_v15 = vadd.f32 %v6688_v35, %v17991_v11  ;;  %v13601_v28 = vpop.f32.mrb[161].mxu1  ;;  %v8060_v11 = vld [vmem:[#allocation4 + $0x4] sm:$0x8]  ;;  %v7102_v14 = vor.u32 %v7101_v43, %v7097_v26 }
 0x765   : > { %v6691_v54 = vpop.f32.mrb[162].mxu1  ;;  %v18070_v62 = vld [vmem:[#allocation4 + $0x8] sm:$0xff]  }
 0x766   : > { %12119 = vst [vmem:[#allocation4 + $0x10] sm:$0xff] %v12071_v32   ;;  %v6804_v27 = vadd.f32 %v18052_v51, %v6772_v15  ;;  %v6773_v10 = vadd.f32 %v6691_v54, %v17996_v9  ;;  %v13602_v24 = vpop.f32.mrb[163].mxu1  ;;  %v18074_v7 = vld [vmem:[#allocation4 + $0x8] sm:$0xf]  ;;  %v18076_v56 = vld [vmem:[#allocation4 + $0xc] sm:$0xf] }
 0x767   : > { %v7104_v1 = vshll.u32 %v18070_v62, 16  ;;  %v18082_v49 = vcombine.low %v8060_v11, %v18074_v7  ;;  %v7108_v55 = vshrl.u32 %v18070_v62, 16  ;;  %v14426_v15 = vld [vmem:[%s19298_s7 + $0x34] ss:$8 sps:$4 sm:$0xff]  }
 0x768   : > { %v6805_v50 = vadd.f32 %v18052_v51, %v6773_v10  ;;  %v6829_v44 = vmax.f32 %v6804_v27, 0.0 }
 0x769   : > { %v7106_v9 = vrot.slane %v7104_v1, 1  ;;  %v8519_v41 = vshrl.u32 %v18082_v49, 16  ;;  %v8522_v0 = vshll.u32 %v18082_v49, 16 }
 0x76a   : > { %v6830_v39 = vmax.f32 %v6805_v50, 0.0 }
 0x76b   : > { %v6696_v19 = vpop.f32.mrb[164].mxu1  ;;  %v7107_v30 = vsel %vm995_vm4, %v7102_v14, %v7106_v9  ;;  %v7110_v35 = vor.u32 %v7108_v55, %v7106_v9  ;;  %v8521_v28 = vrot.slane %v8519_v41, 3  ;;  %v8524_v10 = vrot.slane %v8522_v0, 4 }
 0x76c   : > { %v12076_v3 = vpack.c.bf16 %v6830_v39, %v6829_v44  ;;  %v6774_v37 = vadd.f32 %v6696_v19, %v18000_v25  ;;  %v13605_v22 = vpop.f32.mrb[165].mxu1  ;;  %7325 = vmatmul.mubr.bf16.vlgmr.msra.gmra.mrb[20].mxu0 %v7107_v30  ;;  %v14431_v44 = vld [vmem:[%s19298_s7 + $0x44] ss:$8 sps:$4 sm:$0xff]  }
 0x76d   : > { %v6699_v31 = vpop.f32.mrb[166].mxu1  ;;  %7334 = vmatprep.mubr.bf16.mxu0 %v19573_v42  ;;  %v18102_v63 = vld [vmem:[#allocation4 + $0x10] sm:$0xff]   ;;  %7550 = vmatpush1.bf16.msra.mxu0 %v14411_v45 }
 0x76e   : > { %12120 = vst [vmem:[#allocation4 + $0x18] sm:$0xff] %v12076_v3   ;;  %v6806_v25 = vadd.f32 %v18052_v51, %v6774_v37  ;;  %v6775_v6 = vadd.f32 %v6699_v31, %v18002_v52  ;;  %v13606_v61 = vpop.f32.mrb[167].mxu1  ;;  %7551 = vmatprep.subr.bf16.mxu0 %v14417_v60  ;;  %v18106_v36 = vld [vmem:[#allocation4 + $0x10] sm:$0xf]  ;;  %v18108_v12 = vld [vmem:[#allocation4 + $0x14] sm:$0xf] }
 0x76f   : > { %v7112_v34 = vshll.u32 %v18102_v63, 16  ;;  %v18115_v53 = vcombine.low %v18076_v56, %v18106_v36  ;;  %v14420_v52 = vld [vmem:[%s19298_s7 + $0x20] ss:$8 sps:$4 sm:$0xff]   ;;  %v14424_v45 = vld [vmem:[%s19298_s7 + $0x30] ss:$8 sps:$4 sm:$0xff]   ;;  %v7116_v41 = vshrl.u32 %v18102_v63, 16 }
 0x770   : > { %v6807_v21 = vadd.f32 %v18052_v51, %v6775_v6  ;;  %v6831_v54 = vmax.f32 %v6806_v25, 0.0 }
 0x771   : > { %v7114_v32 = vrot.slane %v7112_v34, 1  ;;  %7552 = vmatpush1.bf16.msra.mxu0 %v14415_v18  ;;  %v8527_v43 = vshrl.u32 %v18115_v53, 16  ;;  %v8530_v24 = vshll.u32 %v18115_v53, 16  ;;  %v8525_v18 = vor.u32 %v8524_v10, %v8521_v28  ;;  %v14429_v34 = vld [vmem:[%s19298_s7 + $0x40] ss:$8 sps:$4 sm:$0xff]  }
 0x772   : > { %v6832_v27 = vmax.f32 %v6807_v21, 0.0  ;;  %7553 = vmatprep.subr.bf16.mxu0 %v14422_v16 }
 0x773   : > { %v6704_v26 = vpop.f32.mrb[168].mxu1  ;;  %v7115_v1 = vsel %vm995_vm4, %v7110_v35, %v7114_v32  ;;  %v8529_v11 = vrot.slane %v8527_v43, 3  ;;  %v8532_v39 = vrot.slane %v8530_v24, 4  ;;  %v7118_v0 = vor.u32 %v7116_v41, %v7114_v32  ;;  %v14436_v35 = vld [vmem:[%s19298_s7 + $0x54] ss:$8 sps:$4 sm:$0xff]  }
 0x774   : > { %v12081_v50 = vpack.c.bf16 %v6832_v27, %v6831_v54  ;;  %v6776_v14 = vadd.f32 %v6704_v26, %v18006_v40  ;;  %v13609_v9 = vpop.f32.mrb[169].mxu1  ;;  %7335 = vmatmul.mubr.bf16.gmra.mrb[24].mxu0 %v7115_v1  ;;  %v14434_v24 = vld [vmem:[%s19298_s7 + $0x50] ss:$8 sps:$4 sm:$0xff]  }
 0x775   : > { %v6707_v60 = vpop.f32.mrb[170].mxu1  ;;  %7344 = vmatprep.mubr.bf16.mxu0 %v19573_v42  ;;  %v18137_v19 = vld [vmem:[#allocation4 + $0x18] sm:$0xff]   ;;  %7554 = vmatpush1.bf16.msra.mxu0 %v14420_v52  ;;  %v8533_v16 = vor.u32 %v8532_v39, %v8529_v11 }
 0x776   : > { %12121 = vst [vmem:[#allocation4 + $0x20] sm:$0xff] %v12081_v50   ;;  %v6808_v40 = vadd.f32 %v18052_v51, %v6776_v14  ;;  %v6777_v30 = vadd.f32 %v6707_v60, %v18008_v8  ;;  %v13610_v3 = vpop.f32.mrb[171].mxu1  ;;  %7555 = vmatprep.subr.bf16.mxu0 %v14426_v15  ;;  %v18141_v37 = vld [vmem:[#allocation4 + $0x18] sm:$0xf]  ;;  %v18143_v22 = vld [vmem:[#allocation4 + $0x1c] sm:$0xf] }
 0x777   : > { %v7120_v31 = vshll.u32 %v18137_v19, 16  ;;  %v18149_v25 = vcombine.low %v18108_v12, %v18141_v37  ;;  %v18155_v61 = vsel %vm2115_vm7, %v8525_v18, %v8533_v16  ;;  %v14438_v60 = vld [vmem:[%s19298_s7 + $0x60] ss:$8 sps:$4 sm:$0xff]  }
 0x778   : > { %v6809_v6 = vadd.f32 %v18052_v51, %v6777_v30  ;;  %v6833_v21 = vmax.f32 %v6808_v40, 0.0 }
 0x779   : > { %v7122_v55 = vrot.slane %v7120_v31, 1  ;;  %7556 = vmatpush1.bf16.msra.mxu0 %v14424_v45  ;;  %v8536_v15 = vshrl.u32 %v18149_v25, 16  ;;  %v8539_v28 = vshll.u32 %v18149_v25, 16 }
 0x77a   : > { %v6834_v52 = vmax.f32 %v6809_v6, 0.0  ;;  %7557 = vmatprep.subr.bf16.mxu0 %v14431_v44  ;;  %v7124_v44 = vshrl.u32 %v18137_v19, 16 }
 0x77b   : > { %v6712_v43 = vpop.f32.mrb[172].mxu1  ;;  %v7123_v32 = vsel %vm995_vm4, %v7118_v0, %v7122_v55  ;;  %v8538_v26 = vrot.slane %v8536_v15, 3  ;;  %v8541_v45 = vrot.slane %v8539_v28, 4 }
 0x77c   : > { %v12086_v54 = vpack.c.bf16 %v6834_v52, %v6833_v21  ;;  %v6778_v27 = vadd.f32 %v6712_v43, %v18012_v20  ;;  %v13613_v10 = vpop.f32.mrb[173].mxu1  ;;  %7345 = vmatmul.mubr.bf16.gmra.mrb[28].mxu0 %v7123_v32  ;;  %v14440_v20 = vld [vmem:[%s19298_s7 + $0x64] ss:$8 sps:$4 sm:$0xff]   ;;  %v7126_v31 = vor.u32 %v7124_v44, %v7122_v55 }
 0x77d   : > { %v6715_v1 = vpop.f32.mrb[174].mxu1  ;;  %7354 = vmatprep.mubr.bf16.mxu0 %v19573_v42  ;;  %v18171_v11 = vld [vmem:[#allocation4 + $0x20] sm:$0xff]   ;;  %7558 = vmatpush1.bf16.msra.mxu0 %v14429_v34  ;;  %v8542_v41 = vor.u32 %v8541_v45, %v8538_v26 }
 0x77e   : > { %12122 = vst [vmem:[#allocation4 + $0x28] sm:$0xff] %v12086_v54   ;;  %v6810_v50 = vadd.f32 %v18052_v51, %v6778_v27  ;;  %v6779_v14 = vadd.f32 %v6715_v1, %v18014_v48  ;;  %v13614_v9 = vpop.f32.mrb[175].mxu1  ;;  %7559 = vmatprep.subr.bf16.mxu0 %v14436_v35  ;;  %v7128_v39 = vshll.u32 %v18171_v11, 16  ;;  %v18183_v40 = vld [vmem:[#allocation4 + $0x20] sm:$0xf]  ;;  %v7132_v45 = vshrl.u32 %v18171_v11, 16 }
 0x77f   : > { %19580 = vst [vmem:[#allocation31_spill] sm:$0xff] %v18183_v40  ;;  %v14444_v48 = vld [vmem:[%s19298_s7 + $0x74] ss:$8 sps:$4 sm:$0xff]   ;;  %v18191_v3 = vcombine.low %v18143_v22, %v18183_v40  ;;  %v18193_v18 = vld [vmem:[#allocation4 + $0x24] sm:$0xf]  ;;  %v18198_v52 = vsel %vm2115_vm7, %v8533_v16, %v8542_v41 }
 0x780   : > { %v6811_v30 = vadd.f32 %v18052_v51, %v6779_v14  ;;  %19581 = vst [vmem:[#allocation33_spill] sm:$0xff] %v18193_v18  ;;  %v7130_v6 = vrot.slane %v7128_v39, 1  ;;  %v6835_v34 = vmax.f32 %v6810_v50, 0.0  ;;  %v14442_v27 = vld [vmem:[%s19298_s7 + $0x70] ss:$8 sps:$4 sm:$0xff]  }
 0x781   : > { %7560 = vmatpush1.bf16.msra.mxu0 %v14434_v24  ;;  %v8545_v35 = vshrl.u32 %v18191_v3, 16  ;;  %v8548_v43 = vshll.u32 %v18191_v3, 16  ;;  %v14447_v16 = vld [vmem:[%s19298_s7 + $0x104] ss:$8 sps:$4 sm:$0xff]  }
 0x782   : > { %v6836_v21 = vmax.f32 %v6811_v30, 0.0  ;;  %7561 = vmatprep.subr.bf16.mxu0 %v14440_v20  ;;  %v7131_v28 = vsel %vm995_vm4, %v7126_v31, %v7130_v6 }
 0x783   : > { %v6720_v15 = vpop.f32.mrb[176].mxu1  ;;  %v8547_v10 = vrot.slane %v8545_v35, 3  ;;  %v8550_v20 = vrot.slane %v8548_v43, 4 }
 0x784   : > { %v12091_v32 = vpack.c.bf16 %v6836_v21, %v6835_v34  ;;  %v6780_v55 = vadd.f32 %v6720_v15, %v18018_v13  ;;  %v13617_v54 = vpop.f32.mrb[177].mxu1  ;;  %7355 = vmatmul.mubr.bf16.gmra.mrb[32].mxu0 %v7131_v28 }
 0x785   : > { %v6723_v24 = vpop.f32.mrb[178].mxu1  ;;  %7364 = vmatprep.mubr.bf16.mxu0 %v19573_v42  ;;  %v18211_v26 = vld [vmem:[#allocation4 + $0x28] sm:$0xff]   ;;  %7562 = vmatpush1.bf16.msra.mxu0 %v14438_v60  ;;  %v8551_v30 = vor.u32 %v8550_v20, %v8547_v10 }
 0x786   : > { %12123 = vst [vmem:[#allocation4 + $0x30] sm:$0xff] %v12091_v32   ;;  %v6812_v13 = vadd.f32 %v18052_v51, %v6780_v55  ;;  %v6781_v1 = vadd.f32 %v6723_v24, %v18020_v58  ;;  %v13618_v50 = vpop.f32.mrb[179].mxu1  ;;  %7563 = vmatprep.subr.bf16.mxu0 %v14444_v48  ;;  %v18215_v14 = vld [vmem:[#allocation4 + $0x28] sm:$0xf]  ;;  %v18217_v9 = vld [vmem:[#allocation4 + $0x2c] sm:$0xf]  ;;  %v7134_v48 = vor.u32 %v7132_v45, %v7130_v6 }
 0x787   : > { %19582 = vst [vmem:[#allocation34_spill] sm:$0xff] %v18215_v14  ;;  %19583 = vst [vmem:[#allocation35_spill] sm:$0xff] %v18217_v9  ;;  %v7136_v44 = vshll.u32 %v18211_v26, 16  ;;  %v18223_v39 = vcombine.low %v18193_v18, %v18215_v14  ;;  %v18230_v15 = vsel %vm2115_vm7, %v8542_v41, %v8551_v30  ;;  %v18417_v18 = vld [vmem:[#allocation4 + $0x64] sm:$0xff]  }
 0x788   : > { %v6813_v60 = vadd.f32 %v18052_v51, %v6781_v1  ;;  %v6837_v21 = vmax.f32 %v6812_v13, 0.0 }
 0x789   : > { %v7138_v31 = vrot.slane %v7136_v44, 1  ;;  %7564 = vmatpush1.bf16.msra.mxu0 %v14442_v27  ;;  %v8554_v34 = vshrl.u32 %v18223_v39, 16  ;;  %v8557_v28 = vshll.u32 %v18223_v39, 16 }
 0x78a   : > { %v6838_v35 = vmax.f32 %v6813_v60, 0.0  ;;  %7849 = vmatprep.subr.bf16.mxu0 %v14447_v16 }
 0x78b   : > { %v6728_v43 = vpop.f32.mrb[180].mxu1  ;;  %v7139_v32 = vsel %vm995_vm4, %v7134_v48, %v7138_v31  ;;  %v8556_v55 = vrot.slane %v8554_v34, 3  ;;  %v8559_v27 = vrot.slane %v8557_v28, 4 }
 0x78c   : > { %v12096_v54 = vpack.c.bf16 %v6838_v35, %v6837_v21  ;;  %v6782_v10 = vadd.f32 %v6728_v43, %v18024_v5  ;;  %v13621_v6 = vpop.f32.mrb[181].mxu1  ;;  %7365 = vmatmul.mubr.bf16.gmra.mrb[36].mxu0 %v7139_v32  ;;  %v7140_v5 = vshrl.u32 %v18211_v26, 16 }
 0x78d   : > { %v6731_v24 = vpop.f32.mrb[182].mxu1  ;;  %7374 = vmatprep.mubr.bf16.mxu0 %v19573_v42  ;;  %v18236_v13 = vld [vmem:[#allocation4 + $0x30] sm:$0xff]   ;;  %v8560_v45 = vor.u32 %v8559_v27, %v8556_v55 }
 0x78e   : > { %12124 = vst [vmem:[#allocation4 + $0x38] sm:$0xff] %v12096_v54   ;;  %v6814_v41 = vadd.f32 %v18052_v51, %v6782_v10  ;;  %v6783_v16 = vadd.f32 %v6731_v24, %v18026_v57  ;;  %v13622_v1 = vpop.f32.mrb[183].mxu1  ;;  %v18240_v50 = vld [vmem:[#allocation4 + $0x30] sm:$0xf]  ;;  %v18242_v20 = vld [vmem:[#allocation4 + $0x34] sm:$0xf]  ;;  %v7142_v21 = vor.u32 %v7140_v5, %v7138_v31 }
 0x78f   : > { %19584 = vst [vmem:[#allocation36_spill] sm:$0xff] %v18240_v50  ;;  %19585 = vst [vmem:[#allocation21_spill] sm:$0xff] %v18242_v20  ;;  %v7144_v44 = vshll.u32 %v18236_v13, 16  ;;  %v18248_v60 = vcombine.low %v18217_v9, %v18240_v50  ;;  %v18254_v57 = vsel %vm2115_vm7, %v8551_v30, %v8560_v45 }
 0x790   : > { %v6815_v48 = vadd.f32 %v18052_v51, %v6783_v16  ;;  %v6839_v43 = vmax.f32 %v6814_v41, 0.0 }
 0x791   : > { %v7146_v35 = vrot.slane %v7144_v44, 1  ;;  %v8563_v28 = vshrl.u32 %v18248_v60, 16  ;;  %v8566_v55 = vshll.u32 %v18248_v60, 16 }
 0x792   : > { %v6840_v32 = vmax.f32 %v6815_v48, 0.0 }
 0x793   : > { %v6736_v54 = vpop.f32.mrb[184].mxu1  ;;  %v7147_v10 = vsel %vm995_vm4, %v7142_v21, %v7146_v35  ;;  %v8565_v6 = vrot.slane %v8563_v28, 3  ;;  %v8568_v1 = vrot.slane %v8566_v55, 4 }
 0x794   : > { %v12101_v27 = vpack.c.bf16 %v6840_v32, %v6839_v43  ;;  %v6784_v24 = vadd.f32 %v6736_v54, %v18030_v47  ;;  %v13625_v16 = vpop.f32.mrb[185].mxu1  ;;  %7375 = vmatmul.mubr.bf16.gmra.mrb[40].mxu0 %v7147_v10  ;;  %v7148_v47 = vshrl.u32 %v18236_v13, 16 }
 0x795   : > { %v6739_v30 = vpop.f32.mrb[186].mxu1  ;;  %7384 = vmatprep.mubr.bf16.mxu0 %v19573_v42  ;;  %v18261_v31 = vld [vmem:[#allocation4 + $0x38] sm:$0xff]   ;;  %v8569_v28 = vor.u32 %v8568_v1, %v8565_v6 }
 0x796   : > { %12125 = vst [vmem:[#allocation4 + $0x40] sm:$0xff] %v12101_v27   ;;  %v6816_v41 = vadd.f32 %v18052_v51, %v6784_v24  ;;  %v6785_v5 = vadd.f32 %v6739_v30, %v18032_v33  ;;  %v13626_v44 = vpop.f32.mrb[187].mxu1  ;;  %v18265_v48 = vld [vmem:[#allocation4 + $0x38] sm:$0xf]  ;;  %v18267_v21 = vld [vmem:[#allocation4 + $0x3c] sm:$0xf]  ;;  %v7150_v10 = vor.u32 %v7148_v47, %v7146_v35 }
 0x797   : > { %19586 = vst [vmem:[#allocation15_spill] sm:$0xff] %v18265_v48  ;;  %19587 = vst [vmem:[#allocation18_spill] sm:$0xff] %v18267_v21  ;;  %v7152_v43 = vshll.u32 %v18261_v31, 16  ;;  %v18273_v32 = vcombine.low %v18242_v20, %v18265_v48  ;;  %v18279_v33 = vsel %vm2115_vm7, %v8560_v45, %v8569_v28 }
 0x798   : > { %v6817_v55 = vadd.f32 %v18052_v51, %v6785_v5  ;;  %v6841_v24 = vmax.f32 %v6816_v41, 0.0 }
 0x799   : > { %v7154_v27 = vrot.slane %v7152_v43, 1  ;;  %v8572_v6 = vshrl.u32 %v18273_v32, 16  ;;  %v8575_v1 = vshll.u32 %v18273_v32, 16 }
 0x79a   : > { %v6842_v16 = vmax.f32 %v6817_v55, 0.0 }
 0x79b   : > { %v6744_v30 = vpop.f32.mrb[188].mxu1  ;;  %v7155_v44 = vsel %vm995_vm4, %v7150_v10, %v7154_v27  ;;  %v8574_v34 = vrot.slane %v8572_v6, 3  ;;  %v8577_v54 = vrot.slane %v8575_v1, 4 }
 0x79c   : > { %v12106_v58 = vpack.c.bf16 %v6842_v16, %v6841_v24  ;;  %v6786_v5 = vadd.f32 %v6744_v30, %v18036_v2  ;;  %v13629_v0 = vpop.f32.mrb[189].mxu1  ;;  %7385 = vmatmul.mubr.bf16.gmra.mrb[44].mxu0 %v7155_v44  ;;  %v7156_v2 = vshrl.u32 %v18261_v31, 16 }
 0x79d   : > { %v6747_v45 = vpop.f32.mrb[190].mxu1  ;;  %7394 = vmatprep.mubr.bf16.mxu0 %v19573_v42  ;;  %v18286_v35 = vld [vmem:[#allocation4 + $0x40] sm:$0xff]   ;;  %v8578_v6 = vor.u32 %v8577_v54, %v8574_v34 }
 0x79e   : > { %12126 = vst [vmem:[#allocation4 + $0x48] sm:$0xff] %v12106_v58   ;;  %v6818_v41 = vadd.f32 %v18052_v51, %v6786_v5  ;;  %v6787_v47 = vadd.f32 %v6747_v45, %v18038_v29  ;;  %v13630_v43 = vpop.f32.mrb[191].mxu1  ;;  %v18290_v55 = vld [vmem:[#allocation4 + $0x40] sm:$0xf]  ;;  %v18292_v10 = vld [vmem:[#allocation4 + $0x44] sm:$0xf]  ;;  %v7158_v1 = vor.u32 %v7156_v2, %v7154_v27 }
 0x79f   : > { %19588 = vst [vmem:[#allocation22_spill] sm:$0xff] %v18290_v55  ;;  %19589 = vst [vmem:[#allocation41_spill] sm:$0xff] %v18292_v10  ;;  %v7160_v0 = vshll.u32 %v18286_v35, 16  ;;  %v18298_v24 = vcombine.low %v18267_v21, %v18290_v55  ;;  %v18304_v29 = vsel %vm2115_vm7, %v8569_v28, %v8578_v6 }
 0x7a0   : > { %v6819_v58 = vadd.f32 %v18052_v51, %v6787_v47  ;;  %v6843_v54 = vmax.f32 %v6818_v41, 0.0 }
 0x7a1   : > { %v7162_v30 = vrot.slane %v7160_v0, 1  ;;  %v8581_v34 = vshrl.u32 %v18298_v24, 16  ;;  %v8584_v5 = vshll.u32 %v18298_v24, 16 }
 0x7a2   : > { %v6844_v44 = vmax.f32 %v6819_v58, 0.0 }
 0x7a3   : > { %v6752_v45 = vpop.f32.mrb[192].mxu1  ;;  %v7163_v43 = vsel %vm995_vm4, %v7158_v1, %v7162_v30  ;;  %v8583_v8 = vrot.slane %v8581_v34, 3  ;;  %v8586_v16 = vrot.slane %v8584_v5, 4 }
 0x7a4   : > { %v12111_v17 = vpack.c.bf16 %v6844_v44, %v6843_v54  ;;  %v6788_v47 = vadd.f32 %v6752_v45, %v18042_v59  ;;  %v13633_v46 = vpop.f32.mrb[193].mxu1  ;;  %7395 = vmatmul.mubr.bf16.gmra.mrb[48].mxu0 %v7163_v43  ;;  %v7164_v59 = vshrl.u32 %v18286_v35, 16 }
 0x7a5   : > { %v6755_v28 = vpop.f32.mrb[194].mxu1  ;;  %7404 = vmatprep.mubr.bf16.mxu0 %v19573_v42  ;;  %v18311_v27 = vld [vmem:[#allocation4 + $0x48] sm:$0xff]   ;;  %v8587_v34 = vor.u32 %v8586_v16, %v8583_v8 }
 0x7a6   : > { %12127 = vst [vmem:[#allocation4 + $0x50] sm:$0xff] %v12111_v17   ;;  %v6820_v41 = vadd.f32 %v18052_v51, %v6788_v47  ;;  %v6789_v2 = vadd.f32 %v6755_v28, %v18044_v4  ;;  %v13634_v0 = vpop.f32.mrb[195].mxu1  ;;  %v18315_v58 = vld [vmem:[#allocation4 + $0x48] sm:$0xf]  ;;  %v18317_v1 = vld [vmem:[#allocation4 + $0x4c] sm:$0xf]  ;;  %v7166_v5 = vor.u32 %v7164_v59, %v7162_v30 }
 0x7a7   : > { %19590 = vst [vmem:[#allocation42_spill] sm:$0xff] %v18315_v58  ;;  %19591 = vst [vmem:[#allocation43_spill] sm:$0xff] %v18317_v1  ;;  %v7168_v46 = vshll.u32 %v18311_v27, 16  ;;  %v18323_v54 = vcombine.low %v18292_v10, %v18315_v58  ;;  %v18329_v4 = vsel %vm2115_vm7, %v8578_v6, %v8587_v34 }
 0x7a8   : > { %v6821_v17 = vadd.f32 %v18052_v51, %v6789_v2  ;;  %v6845_v16 = vmax.f32 %v6820_v41, 0.0 }
 0x7a9   : > { %v7170_v45 = vrot.slane %v7168_v46, 1  ;;  %v8590_v8 = vshrl.u32 %v18323_v54, 16  ;;  %v8593_v47 = vshll.u32 %v18323_v54, 16 }
 0x7aa   : > { %v6846_v43 = vmax.f32 %v6821_v17, 0.0 }
 0x7ab   : > { %v6760_v28 = vpop.f32.mrb[196].mxu1  ;;  %v7171_v0 = vsel %vm995_vm4, %v7166_v5, %v7170_v45  ;;  %v8592_v10 = vrot.slane %v8590_v8, 3  ;;  %v8595_v44 = vrot.slane %v8593_v47, 4  ;;  %v7172_v8 = vshrl.u32 %v18311_v27, 16 }
 0x7ac   : > { %v12116_v55 = vpack.c.bf16 %v6846_v43, %v6845_v16  ;;  %v6790_v2 = vadd.f32 %v6760_v28, %v18047_v38  ;;  %v13637_v21 = vpop.f32.mrb[197].mxu1  ;;  %7405 = vmatmul.mubr.bf16.gmra.mrb[52].mxu0 %v7171_v0 }
 0x7ad   : > { %v6763_v6 = vpop.f32.mrb[198].mxu1  ;;  %7414 = vmatprep.mubr.bf16.mxu0 %v19573_v42  ;;  %v18336_v30 = vld [vmem:[#allocation4 + $0x50] sm:$0xff]   ;;  %v8596_v5 = vor.u32 %v8595_v44, %v8592_v10  ;;  %v7174_v43 = vor.u32 %v7172_v8, %v7170_v45 }
 0x7ae   : > { %12128 = vst [vmem:[#allocation4 + $0x58] sm:$0xff] %v12116_v55   ;;  %v6822_v41 = vadd.f32 %v18052_v51, %v6790_v2  ;;  %v13638_v59 = vpop.f32.mrb[199].mxu1  ;;  %v18339_v46 = vld [vmem:[#allocation4 + $0x50] sm:$0xf]  ;;  %v18341_v17 = vld [vmem:[#allocation4 + $0x54] sm:$0xf] }
 0x7af   : > { %19592 = vst [vmem:[#allocation47_spill] sm:$0xff] %v18339_v46  ;;  %19593 = vst [vmem:[#allocation48_spill] sm:$0xff] %v18341_v17  ;;  %v7176_v38 = vshll.u32 %v18336_v30, 16  ;;  %v18347_v21 = vcombine.low %v18317_v1, %v18339_v46  ;;  %v18352_v51 = vsel %vm2115_vm7, %v8587_v34, %v8596_v5  ;;  %v7180_v8 = vshrl.u32 %v18336_v30, 16 }
 0x7b0   : > { %v6847_v16 = vmax.f32 %v6822_v41, 0.0 }
 0x7b1   : > { %v7178_v47 = vrot.slane %v7176_v38, 1  ;;  %v8599_v28 = vshrl.u32 %v18347_v21, 16  ;;  %v8602_v44 = vshll.u32 %v18347_v21, 16 }
 0x7b2   : > { %v12057_v10 = vpack.c.bf16 %v6847_v16, %v6847_v16 }
 0x7b3   : > { %v7179_v0 = vsel %vm995_vm4, %v7174_v43, %v7178_v47  ;;  %v8601_v2 = vrot.slane %v8599_v28, 3  ;;  %v8604_v6 = vrot.slane %v8602_v44, 4 }
 0x7b4   : > { %6973 = vst [vmem:[#allocation4 + $0x60] sm:$0x3] %v12057_v10  ;;  %7415 = vmatmul.mubr.bf16.gmra.mrb[56].mxu0 %v7179_v0  ;;  %v7182_v10 = vor.u32 %v7180_v8, %v7178_v47 }
 0x7b5   : > { %7424 = vmatprep.mubr.bf16.mxu0 %v19573_v42  ;;  %v18358_v41 = vld [vmem:[#allocation4 + $0x58] sm:$0xff]   ;;  %v8605_v45 = vor.u32 %v8604_v6, %v8601_v2 }
 0x7b6   : > { %v18360_v59 = vld [vmem:[#allocation4 + $0x58] sm:$0xf]  ;;  %v18362_v34 = vld [vmem:[#allocation4 + $0x5c] sm:$0xf]  ;;  %v7184_v38 = vshll.u32 %v18358_v41, 16  ;;  %v7188_v8 = vshrl.u32 %v18358_v41, 16 }
 0x7b7   : > { %19594 = vst [vmem:[#allocation44_spill] sm:$0xff] %v18360_v59  ;;  %19595 = vst [vmem:[#allocation49_spill] sm:$0xff] %v18362_v34  ;;  %v18368_v16 = vcombine.low %v18341_v17, %v18360_v59  ;;  %v18373_v28 = vsel %vm2115_vm7, %v8596_v5, %v8605_v45 }
 0x7b8   : > { %v7186_v44 = vrot.slane %v7184_v38, 1 }
 0x7b9   : > { %v8608_v0 = vshrl.u32 %v18368_v16, 16  ;;  %v8611_v2 = vshll.u32 %v18368_v16, 16 }
 0x7ba   : > { %v7187_v6 = vsel %vm995_vm4, %v7182_v10, %v7186_v44 }
 0x7bb   : > { %v18378_v55 = vld [vmem:[#allocation4 + $0x60] ss:$0 sps:$4 sm:$0x77]   ;;  %v8610_v46 = vrot.slane %v8608_v0, 3  ;;  %v8613_v17 = vrot.slane %v8611_v2, 4 }
 0x7bc   : > { %7425 = vmatmul.mubr.bf16.gmra.mrb[60].mxu0 %v7187_v6  ;;  %v7192_v43 = vshll.u32 %v18378_v55, 16  ;;  %v18382_v59 = vld [vmem:[#allocation4 + $0x60] sm:$0xf]  ;;  %v7190_v6 = vor.u32 %v7188_v8, %v7186_v44  ;;  %v18404_v44 = vld [vmem:[#allocation4 + $0x14] sm:$0xff]  }
 0x7bd   : > { %7434 = vmatprep.mubr.bf16.mxu0 %v19573_v42  ;;  %19596 = vst [vmem:[#allocation45_spill] sm:$0xff] %v18382_v59  ;;  %v18386_v5 = vcombine.low %v18362_v34, %v18382_v59  ;;  %v8614_v47 = vor.u32 %v8613_v17, %v8610_v46  ;;  %v7196_v17 = vshrl.u32 %v18378_v55, 16  ;;  %v10234_v59 = vld [vmem:[#allocation4 + $0xc] sm:$0x8]  ;;  %19597 = vst [vmem:[#allocation46_spill] sm:$0xff] %v18404_v44 }
 0x7be   : > { %v7194_v38 = vrot.slane %v7192_v43, 1  ;;  %v9707_v43 = vld [vmem:[#allocation4 + $0x10] sm:$0xf] }
 0x7bf   : > { %v18390_v10 = vsel %vm2115_vm7, %v8605_v45, %v8614_v47  ;;  %v8617_v0 = vshrl.u32 %v18386_v5, 16  ;;  %v8620_v2 = vshll.u32 %v18386_v5, 16  ;;  %v11960_v8 = vcombine.low %v10234_v59, %v9707_v43  ;;  %v14655_v59 = vld [vmem:[#allocation4 + $0x54] sm:$0xff]   ;;  %v14656_v43 = vld [vmem:[#allocation4 + $0x5c] sm:$0xff]  }
 0x7c0   : > { %v7195_v48 = vsel %vm995_vm4, %v7190_v6, %v7194_v38  ;;  %v7198_v45 = vor.u32 %v7196_v17, %v7194_v38  ;;  %v14650_v6 = vld [vmem:[#allocation4 + $0x44] sm:$0xff]   ;;  %v10256_v38 = vrot.slane %v18404_v44, 3  ;;  %v14450_v17 = vld [vmem:[%s19298_s7 + $0x114] ss:$8 sps:$4 sm:$0xff]  }
 0x7c1   : > { %v8619_v1 = vrot.slane %v8617_v0, 3  ;;  %v8622_v58 = vrot.slane %v8620_v2, 4  ;;  %v14642_v0 = vld [vmem:[#allocation4 + $0x34] sm:$0xff]   ;;  %v14646_v2 = vld [vmem:[#allocation4 + $0x3c] sm:$0xff]   ;;  %v10255_v34 = vrot.slane %v11960_v8, 3 }
 0x7c2   : > { %v10264_v40 = vrot.slane %v14642_v0, 3 }
 0x7c3   : > { %v18395_v20 = vor.u32 %v8622_v58, %v8619_v1  ;;  %v14637_v58 = vld [vmem:[#allocation4 + $0x24] sm:$0xff]   ;;  %v14641_v1 = vld [vmem:[#allocation4 + $0x2c] sm:$0xff]   ;;  %v18414_v9 = vsel %vm1852_vm9, %v10255_v34, %v10256_v38 }
 0x7c4   : > { %7435 = vmatmul.mubr.bf16.gmra.mrb[64].mxu0 %v7195_v48  ;;  %v14633_v48 = vld [vmem:[#allocation4 + $0x1c] sm:$0xff]   ;;  %19598 = vst [vmem:[#allocation50_spill] sm:$0xff] %v18414_v9  ;;  %v10260_v14 = vrot.slane %v14637_v58, 3  ;;  %v10262_v44 = vrot.slane %v14641_v1, 3  ;;  %v10266_v58 = vrot.slane %v14646_v2, 3  ;;  %v10268_v9 = vrot.slane %v14650_v6, 3 }
 0x7c5   : > { %7444 = vmatprep.mubr.bf16.mxu0 %v19573_v42  ;;  %v18400_v46 = vsel %vm2115_vm7, %v8614_v47, %v18395_v20  ;;  %v14445_v47 = vld [vmem:[%s19298_s7 + $0x100] ss:$8 sps:$4 sm:$0xff]   ;;  %v10258_v50 = vrot.slane %v14633_v48, 3  ;;  %v14448_v48 = vld [vmem:[%s19298_s7 + $0x110] ss:$8 sps:$4 sm:$0xff]   ;;  %v10272_v2 = vrot.slane %v14655_v59, 3 }
 0x7c6   : > { %v18433_v1 = vsel %vm1852_vm9, %v10260_v14, %v10262_v44  ;;  %v18436_v0 = vsel %vm1852_vm9, %v10262_v44, %v10264_v40  ;;  %v10274_v6 = vrot.slane %v14656_v43, 3  ;;  %v14454_v59 = vld [vmem:[%s19298_s7 + $0x130] ss:$8 sps:$4 sm:$0xff]   ;;  %v14459_v43 = vld [vmem:[%s19298_s7 + $0x144] ss:$8 sps:$4 sm:$0xff]  }
 0x7c7   : > { %v18420_v8 = vsel %vm1852_vm9, %v10256_v38, %v10258_v50  ;;  %v18427_v34 = vsel %vm1852_vm9, %v10258_v50, %v10260_v14  ;;  %v18439_v38 = vsel %vm1852_vm9, %v10264_v40, %v10266_v58  ;;  %v18442_v50 = vsel %vm1852_vm9, %v10266_v58, %v10268_v9  ;;  %v14451_v14 = vld [vmem:[%s19298_s7 + $0x120] ss:$8 sps:$4 sm:$0xff]   ;;  %v14460_v58 = vld [vmem:[%s19298_s7 + $0x150] ss:$8 sps:$4 sm:$0xff]  }
 0x7c8   : > { %19599 = vst [vmem:[#allocation51_spill] sm:$0xff] %v18427_v34  ;;  %v10276_v34 = vrot.slane %v18417_v18, 3  ;;  %v18455_v40 = vsel %vm1852_vm9, %v10272_v2, %v10274_v6  ;;  %v19073_v18 = vld [vmem:[%s19300_s9] sm:$0x3] }
 0x7cc   : > { %7445 = vmatmul.mubr.bf16.gmra.mrb[68].mxu0 %v7198_v45  ;;  %v14651_v45 = vld [vmem:[#allocation4 + $0x4c] sm:$0xff]  }
 0x7cd   : > { %7581 = vmatprep.mubr.bf16.mxu0 %v19573_v42 }
 0x7d4   : > { %7582 = vmatmul.mubr.bf16.vlgmr.msra.gmra.mrb[20].mxu0 %v18065_v23  ;;  %v14453_v23 = vld [vmem:[%s19298_s7 + $0x124] ss:$8 sps:$4 sm:$0xff]  }
 0x7d5   : > { %7591 = vmatprep.mubr.bf16.mxu0 %v19573_v42  ;;  %7850 = vmatpush1.bf16.msra.mxu0 %v14445_v47  ;;  %v10270_v47 = vrot.slane %v14651_v45, 3  ;;  %v14456_v45 = vld [vmem:[%s19298_s7 + $0x134] ss:$8 sps:$4 sm:$0xff]  }
 0x7d6   : > { %7851 = vmatprep.subr.bf16.mxu0 %v14450_v17 }
 0x7d7   : > { %v18445_v17 = vsel %vm1852_vm9, %v10268_v9, %v10270_v47  ;;  %v18452_v44 = vsel %vm1852_vm9, %v10270_v47, %v10272_v2  ;;  %v18463_v9 = vsel %vm1852_vm9, %v10274_v6, %v10276_v34  ;;  %v14463_v47 = vld [vmem:[%s19298_s7 + $0x160] ss:$8 sps:$4 sm:$0xff]   ;;  %v14469_v2 = vld [vmem:[%s19298_s7 + $0x174] ss:$8 sps:$4 sm:$0xff]   ;;  %v14467_v6 = vld [vmem:[%s19298_s7 + $0x170] ss:$8 sps:$4 sm:$0xff]  }
 0x7d9   : > { %7852 = vmatpush1.bf16.msra.mxu0 %v14448_v48  ;;  %v14457_v48 = vld [vmem:[%s19298_s7 + $0x140] ss:$8 sps:$4 sm:$0xff]  }
 0x7da   : > { %7853 = vmatprep.subr.bf16.mxu0 %v14453_v23  ;;  %v14465_v23 = vld [vmem:[%s19298_s7 + $0x164] ss:$8 sps:$4 sm:$0xff]  }
 0x7dc   : > { %7592 = vmatmul.mubr.bf16.gmra.mrb[24].mxu0 %v18070_v62  ;;  %v14462_v62 = vld [vmem:[%s19298_s7 + $0x154] ss:$8 sps:$4 sm:$0xff]  }
 0x7dd   : > { %7601 = vmatprep.mubr.bf16.mxu0 %v19573_v42  ;;  %7854 = vmatpush1.bf16.msra.mxu0 %v14451_v14  ;;  %v14473_v14 = vld [vmem:[%s19298_s7 + $0x184] ss:$8 sps:$4 sm:$0xff]  }
 0x7de   : > { %7855 = vmatprep.subr.bf16.mxu0 %v14456_v45  ;;  %v14466_v45 = vld [vmem:[#allocation4 + $0x60] ss:$0 sps:$4 sm:$0x33]  }
 0x7e1   : > { %7856 = vmatpush1.bf16.msra.mxu0 %v14454_v59  ;;  %v7710_v59 = vld [vmem:[#allocation4] sm:$0xe] }
 0x7e2   : > { %7857 = vmatprep.subr.bf16.mxu0 %v14459_v43  ;;  %v14683_v43 = vld [vmem:[#allocation4 + $0x4] sm:$0xf] }
 0x7e4   : > { %7602 = vmatmul.mubr.bf16.gmra.mrb[28].mxu0 %v18102_v63 }
 0x7e5   : > { %7611 = vmatprep.mubr.bf16.mxu0 %v19573_v42  ;;  %7858 = vmatpush1.bf16.msra.mxu0 %v14457_v48  ;;  %v11714_v48 = vcombine.low %v7710_v59, %v14683_v43  ;;  %v7734_v59 = vrot.slane %v18102_v63, 1  ;;  %v14477_v43 = vld [vmem:[%s19298_s7 + $0x1a0] ss:$8 sps:$4 sm:$0xff]   ;;  %v14480_v63 = vld [vmem:[%s19298_s7 + $0x1b0] ss:$8 sps:$4 sm:$0xff]  }
 0x7e6   : > { %7859 = vmatprep.subr.bf16.mxu0 %v14462_v62  ;;  %v14684_v62 = vld [vmem:[#allocation4 + $0x8] sm:$0xff]  }
 0x7e9   : > { %7860 = vmatpush1.bf16.msra.mxu0 %v14460_v58  ;;  %v7732_v58 = vrot.slane %v14684_v62, 1 }
 0x7ea   : > { %7861 = vmatprep.subr.bf16.mxu0 %v14465_v23  ;;  %v7731_v23 = vrot.slane %v11714_v48, 1  ;;  %v14482_v48 = vld [vmem:[%s19298_s7 + $0x1b4] ss:$8 sps:$4 sm:$0xff]  }
 0x7eb   : > { %v7735_v62 = vsel %vm1502_vm10, %v7732_v58, %v7734_v59 }
 0x7ec   : > { %7612 = vmatmul.mubr.bf16.gmra.mrb[32].mxu0 %v18137_v19 }
 0x7ed   : > { %7621 = vmatprep.mubr.bf16.mxu0 %v19573_v42  ;;  %7862 = vmatpush1.bf16.msra.mxu0 %v14463_v47  ;;  %v14471_v47 = vld [vmem:[%s19298_s7 + $0x180] ss:$8 sps:$4 sm:$0xff]  }
 0x7ee   : > { %7863 = vmatprep.subr.bf16.mxu0 %v14469_v2  ;;  %v14476_v2 = vld [vmem:[%s19298_s7 + $0x194] ss:$8 sps:$4 sm:$0xff]  }
 0x7f1   : > { %7864 = vmatpush1.bf16.msra.mxu0 %v14467_v6  ;;  %v7733_v6 = vsel %vm1502_vm10, %v7731_v23, %v7732_v58  ;;  %v14485_v23 = vld [vmem:[%s19298_s7 + $0x1c4] ss:$8 sps:$4 sm:$0xff]   ;;  %v14483_v58 = vld [vmem:[%s19298_s7 + $0x1c0] ss:$8 sps:$4 sm:$0xff]  }
 0x7f2   : > { %8286 = vmatprep.subr.bf16.mxu0 %v14473_v14  ;;  %v14474_v14 = vld [vmem:[%s19298_s7 + $0x190] ss:$8 sps:$4 sm:$0xff]  }
 0x7f4   : > { %7622 = vmatmul.mubr.bf16.gmra.mrb[36].mxu0 %v18171_v11 }
 0x7f5   : > { %7631 = vmatprep.mubr.bf16.mxu0 %v19573_v42 }
 0x7fc   : > { %7632 = vmatmul.mubr.bf16.gmra.mrb[40].mxu0 %v18211_v26 }
 0x7fd   : > { %7641 = vmatprep.mubr.bf16.mxu0 %v19573_v42 }
 0x804   : > { %7642 = vmatmul.mubr.bf16.gmra.mrb[44].mxu0 %v18236_v13 }
 0x805   : > { %7651 = vmatprep.mubr.bf16.mxu0 %v19573_v42 }
 0x80c   : > { %7652 = vmatmul.mubr.bf16.gmra.mrb[48].mxu0 %v18261_v31 }
 0x80d   : > { %7661 = vmatprep.mubr.bf16.mxu0 %v19573_v42 }
 0x814   : > { %7662 = vmatmul.mubr.bf16.gmra.mrb[52].mxu0 %v18286_v35 }
 0x815   : > { %7671 = vmatprep.mubr.bf16.mxu0 %v19573_v42 }
 0x81c   : > { %7672 = vmatmul.mubr.bf16.gmra.mrb[56].mxu0 %v18311_v27 }
 0x81d   : > { %7681 = vmatprep.mubr.bf16.mxu0 %v19573_v42 }
 0x824   : > { %7682 = vmatmul.mubr.bf16.gmra.mrb[60].mxu0 %v18336_v30 }
 0x825   : > { %7691 = vmatprep.mubr.bf16.mxu0 %v19573_v42 }
 0x82c   : > { %7692 = vmatmul.mubr.bf16.gmra.mrb[64].mxu0 %v18358_v41 }
 0x82d   : > { %7701 = vmatprep.mubr.bf16.mxu0 %v19573_v42 }
 0x834   : > { %7702 = vmatmul.mubr.bf16.gmra.mrb[72].mxu0 %v14466_v45  ;;  %v14479_v45 = vld [vmem:[%s19298_s7 + $0x1a4] ss:$8 sps:$4 sm:$0xff]  }
 0x835   : > { %7881 = vmatprep.mubr.bf16.mxu0 %v19573_v42 }
 0x83c   : > { %7882 = vmatmul.mubr.bf16.vlgmr.msra.gmra.mrb[20].mxu0 %v7733_v6 }
 0x83d   : > { %7891 = vmatprep.mubr.bf16.mxu0 %v19573_v42  ;;  %8287 = vmatpush1.bf16.msra.mxu0 %v14471_v47  ;;  %v7736_v47 = vrot.slane %v18137_v19, 1  ;;  %v14486_v19 = vld [vmem:[%s19298_s7 + $0x1d0] ss:$8 sps:$4 sm:$0xff]  }
 0x83e   : > { %8288 = vmatprep.subr.bf16.mxu0 %v14476_v2  ;;  %v14488_v2 = vld [vmem:[%s19298_s7 + $0x1d4] ss:$8 sps:$4 sm:$0xff]  }
 0x83f   : > { %v7737_v6 = vsel %vm1502_vm10, %v7734_v59, %v7736_v47  ;;  %v14489_v59 = vld [vmem:[%s19298_s7 + $0x1e0] ss:$8 sps:$4 sm:$0xff]  }
 0x841   : > { %8289 = vmatpush1.bf16.msra.mxu0 %v14474_v14  ;;  %v14491_v14 = vld [vmem:[%s19298_s7 + $0x1e4] ss:$8 sps:$4 sm:$0xff]  }
 0x842   : > { %8290 = vmatprep.subr.bf16.mxu0 %v14479_v45  ;;  %v7738_v45 = vrot.slane %v18171_v11, 1  ;;  %v14492_v11 = vld [vmem:[%s19298_s7 + $0x1f0] ss:$8 sps:$4 sm:$0xff]  }
 0x844   : > { %7892 = vmatmul.mubr.bf16.gmra.mrb[24].mxu0 %v7735_v62  ;;  %v14502_v62 = vld [vmem:[%s19298_s7 + $0x204] ss:$8 sps:$4 sm:$0xff]  }
 0x845   : > { %7901 = vmatprep.mubr.bf16.mxu0 %v19573_v42  ;;  %8291 = vmatpush1.bf16.msra.mxu0 %v14477_v43  ;;  %v14494_v43 = vld [vmem:[%s19298_s7 + $0x1f4] ss:$8 sps:$4 sm:$0xff]  }
 0x846   : > { %8292 = vmatprep.subr.bf16.mxu0 %v14482_v48  ;;  %v7739_v48 = vsel %vm1502_vm10, %v7736_v47, %v7738_v45  ;;  %v7742_v47 = vrot.slane %v18236_v13, 1  ;;  %v7748_v13 = vrot.slane %v18311_v27, 1  ;;  %v7754_v27 = vrot.slane %v18378_v55, 1  ;;  %v14500_v55 = vld [vmem:[%s19298_s7 + $0x200] ss:$8 sps:$4 sm:$0xff]  }
 0x849   : > { %8293 = vmatpush1.bf16.msra.mxu0 %v14480_v63  ;;  %v7740_v63 = vrot.slane %v18211_v26, 1  ;;  %v7746_v26 = vrot.slane %v18286_v35, 1  ;;  %v7752_v35 = vrot.slane %v18358_v41, 1 }
 0x84a   : > { %8294 = vmatprep.subr.bf16.mxu0 %v14485_v23 }
 0x84b   : > { %v7741_v23 = vsel %vm1502_vm10, %v7738_v45, %v7740_v63 }
 0x84c   : > { %7902 = vmatmul.mubr.bf16.gmra.mrb[28].mxu0 %v7737_v6 }
 0x84d   : > { %7911 = vmatprep.mubr.bf16.mxu0 %v19573_v42  ;;  %8295 = vmatpush1.bf16.msra.mxu0 %v14483_v58  ;;  %v7743_v58 = vsel %vm1502_vm10, %v7740_v63, %v7742_v47 }
 0x84e   : > { %8296 = vmatprep.subr.bf16.mxu0 %v14488_v2  ;;  %v7744_v2 = vrot.slane %v18261_v31, 1  ;;  %v7750_v31 = vrot.slane %v18336_v30, 1 }
 0x850   : > { %v7745_v6 = vsel %vm1502_vm10, %v7742_v47, %v7744_v2  ;;  %v7751_v45 = vsel %vm1502_vm10, %v7748_v13, %v7750_v31 }
 0x851   : > { %8297 = vmatpush1.bf16.msra.mxu0 %v14486_v19  ;;  %v7747_v19 = vsel %vm1502_vm10, %v7744_v2, %v7746_v26  ;;  %v14512_v2 = vld [vmem:[%s19298_s7 + $0x220] ss:$8 sps:$4 sm:$0xff]  }
 0x852   : > { %8298 = vmatprep.subr.bf16.mxu0 %v14491_v14  ;;  %v7749_v14 = vsel %vm1502_vm10, %v7746_v26, %v7748_v13  ;;  %v8173_v13 = vrot.slane %v18191_v3, 3  ;;  %v14531_v3 = vld [vmem:[%s19298_s7 + $0x250] ss:$8 sps:$4 sm:$0xff]  }
 0x854   : > { %7912 = vmatmul.mubr.bf16.gmra.mrb[32].mxu0 %v7739_v48  ;;  %v8169_v48 = vrot.slane %v18115_v53, 3  ;;  %v14505_v53 = vld [vmem:[%s19298_s7 + $0x210] ss:$8 sps:$4 sm:$0xff]  }
 0x855   : > { %7921 = vmatprep.mubr.bf16.mxu0 %v19573_v42  ;;  %8299 = vmatpush1.bf16.msra.mxu0 %v14489_v59  ;;  %v7753_v59 = vsel %vm1502_vm10, %v7750_v31, %v7752_v35  ;;  %v14533_v31 = vld [vmem:[%s19298_s7 + $0x254] ss:$8 sps:$4 sm:$0xff]  }
 0x856   : > { %8300 = vmatprep.subr.bf16.mxu0 %v14494_v43  ;;  %v7755_v43 = vsel %vm1502_vm10, %v7752_v35, %v7754_v27  ;;  %v14538_v35 = vld [vmem:[%s19298_s7 + $0x264] ss:$8 sps:$4 sm:$0xff]  }
 0x859   : > { %8301 = vmatpush1.bf16.msra.mxu0 %v14492_v11 }
 0x85a   : > { %8727 = vmatprep.subr.bf16.mxu0 %v14502_v62  ;;  %v8168_v62 = vrot.slane %v18082_v49, 3  ;;  %v14514_v49 = vld [vmem:[%s19298_s7 + $0x224] ss:$8 sps:$4 sm:$0xff]  }
 0x85c   : > { %7922 = vmatmul.mubr.bf16.gmra.mrb[36].mxu0 %v7741_v23  ;;  %v14507_v23 = vld [vmem:[%s19298_s7 + $0x214] ss:$8 sps:$4 sm:$0xff]   ;;  %v8170_v47 = vsel %vm1852_vm9, %v8168_v62, %v8169_v48  ;;  %v8177_v62 = vrot.slane %v18248_v60, 3  ;;  %v8183_v60 = vrot.slane %v18323_v54, 3  ;;  %v8189_v54 = vrot.slane %v18386_v5, 3 }
 0x85d   : > { %7931 = vmatprep.mubr.bf16.mxu0 %v19573_v42 }
 0x864   : > { %7932 = vmatmul.mubr.bf16.gmra.mrb[40].mxu0 %v7743_v58  ;;  %v8171_v58 = vrot.slane %v18149_v25, 3  ;;  %v14517_v25 = vld [vmem:[%s19298_s7 + $0x230] ss:$8 sps:$4 sm:$0xff]  }
 0x865   : > { %7941 = vmatprep.mubr.bf16.mxu0 %v19573_v42 }
 0x866   : > { %v8172_v26 = vsel %vm1852_vm9, %v8169_v48, %v8171_v58 }
 0x86c   : > { %7942 = vmatmul.mubr.bf16.gmra.mrb[44].mxu0 %v7745_v6  ;;  %v14519_v6 = vld [vmem:[%s19298_s7 + $0x234] ss:$8 sps:$4 sm:$0xff]  }
 0x86d   : > { %7951 = vmatprep.mubr.bf16.mxu0 %v19573_v42 }
 0x874   : > { %7952 = vmatmul.mubr.bf16.gmra.mrb[48].mxu0 %v7747_v19  ;;  %v14526_v19 = vld [vmem:[%s19298_s7 + $0x244] ss:$8 sps:$4 sm:$0xff]  }
 0x875   : > { %7961 = vmatprep.mubr.bf16.mxu0 %v19573_v42 }
 0x87c   : > { %7962 = vmatmul.mubr.bf16.gmra.mrb[52].mxu0 %v7749_v14  ;;  %v14524_v14 = vld [vmem:[%s19298_s7 + $0x240] ss:$8 sps:$4 sm:$0xff]  }
 0x87d   : > { %7971 = vmatprep.mubr.bf16.mxu0 %v19573_v42 }
 0x884   : > { %7972 = vmatmul.mubr.bf16.gmra.mrb[56].mxu0 %v7751_v45  ;;  %v8174_v45 = vsel %vm1852_vm9, %v8171_v58, %v8173_v13 }
 0x885   : > { %7981 = vmatprep.mubr.bf16.mxu0 %v19573_v42 }
 0x88c   : > { %7982 = vmatmul.mubr.bf16.gmra.mrb[60].mxu0 %v7753_v59  ;;  %v8175_v59 = vrot.slane %v18223_v39, 3  ;;  %v14541_v39 = vld [vmem:[%s19298_s7 + $0x270] ss:$8 sps:$4 sm:$0xff]  }
 0x88d   : > { %7991 = vmatprep.mubr.bf16.mxu0 %v19573_v42 }
 0x88e   : > { %v8176_v48 = vsel %vm1852_vm9, %v8173_v13, %v8175_v59 }
 0x894   : > { %7992 = vmatmul.mubr.bf16.gmra.mrb[64].mxu0 %v7755_v43  ;;  %v14543_v43 = vld [vmem:[%s19298_s7 + $0x274] ss:$8 sps:$4 sm:$0xff]  }
 0x895   : > { %8001 = vmatprep.mubr.bf16.mxu0 %v19573_v42 }
 0x89c   : > { %8002 = vmatmul.mubr.bf16.gmra.mrb[76].mxu0 %v7754_v27  ;;  %v14536_v27 = vld [vmem:[%s19298_s7 + $0x260] ss:$8 sps:$4 sm:$0xff]  }
 0x89d   : > { %8318 = vmatprep.mubr.bf16.mxu0 %v19573_v42 }
 0x89f   : > { %v18602_v30 = vpop.f32.mrb[68].mxu0 }
 0x8a0   : > { %v18605_v41 = vpop.f32.mrb[69].mxu0 }
 0x8a1   : > { %v7450_v11 = vpop.f32.mrb[70].mxu0 }
 0x8a2   : > { %v7451_v63 = vpop.f32.mrb[71].mxu0  ;;  %v14546_v11 = vld [vmem:[%s19298_s7 + $0x284] ss:$8 sps:$4 sm:$0xff]  }
 0x8a3   : > { %v8179_v63 = vrot.slane %v18273_v32, 3  ;;  %v8185_v32 = vrot.slane %v18347_v21, 3 }
 0x8a4   : > { %8319 = vmatmul.mubr.bf16.vlgmr.msra.gmra.mrb[20].mxu0 %v8170_v47  ;;  %v8181_v47 = vrot.slane %v18298_v24, 3  ;;  %v8187_v24 = vrot.slane %v18368_v16, 3 }
 0x8a5   : > { %8328 = vmatprep.mubr.bf16.mxu0 %v19573_v42  ;;  %8728 = vmatpush1.bf16.msra.mxu0 %v14500_v55  ;;  %v8178_v55 = vsel %vm1852_vm9, %v8175_v59, %v8177_v62  ;;  %v8186_v58 = vsel %vm1852_vm9, %v8183_v60, %v8185_v32  ;;  %v14549_v59 = vld [vmem:[%s19298_s7 + $0x294] ss:$8 sps:$4 sm:$0xff]  }
 0x8a6   : > { %8729 = vmatprep.subr.bf16.mxu0 %v14507_v23  ;;  %v8180_v23 = vsel %vm1852_vm9, %v8177_v62, %v8179_v63  ;;  %v14564_v62 = vld [vmem:[%s19298_s7 + $0x2e4] ss:$8 sps:$4 sm:$0xff]  }
 0x8a9   : > { %8730 = vmatpush1.bf16.msra.mxu0 %v14505_v53  ;;  %v8182_v53 = vsel %vm1852_vm9, %v8179_v63, %v8181_v47  ;;  %v14567_v63 = vld [vmem:[%s19298_s7 + $0x2f0] ss:$8 sps:$4 sm:$0xff]  }
 0x8aa   : > { %8731 = vmatprep.subr.bf16.mxu0 %v14514_v49  ;;  %v8184_v49 = vsel %vm1852_vm9, %v8181_v47, %v8183_v60 }
 0x8ac   : > { %8329 = vmatmul.mubr.bf16.gmra.mrb[24].mxu0 %v8172_v26  ;;  %v8085_v26 = vld [vmem:[#allocation4 + $0x68] sm:$0x1] }
 0x8ad   : > { %8338 = vmatprep.mubr.bf16.mxu0 %v19573_v42  ;;  %8732 = vmatpush1.bf16.msra.mxu0 %v14512_v2  ;;  %v8188_v2 = vsel %vm1852_vm9, %v8185_v32, %v8187_v24 }
 0x8ae   : > { %8733 = vmatprep.subr.bf16.mxu0 %v14519_v6  ;;  %v18686_v6 = vld [vmem:[#allocation4 + $0x64] sm:$0xf] }
 0x8af   : > { %v11759_v21 = vcombine.low %v18686_v6, %v8085_v26  ;;  %v14578_v26 = vld [vmem:[%s19298_s7 + $0x324] ss:$8 sps:$4 sm:$0xff]  }
 0x8b1   : > { %8734 = vmatpush1.bf16.msra.mxu0 %v14517_v25  ;;  %v8190_v25 = vsel %vm1852_vm9, %v8187_v24, %v8189_v54  ;;  %v14575_v24 = vld [vmem:[%s19298_s7 + $0x314] ss:$8 sps:$4 sm:$0xff]  }
 0x8b2   : > { %8735 = vmatprep.subr.bf16.mxu0 %v14526_v19  ;;  %v8191_v19 = vrot.slane %v11759_v21, 3  ;;  %v14579_v21 = vld [vmem:[%s19298_s7 + $0x330] ss:$8 sps:$4 sm:$0xff]  }
 0x8b4   : > { %8339 = vmatmul.mubr.bf16.gmra.mrb[28].mxu0 %v8174_v45  ;;  %v8192_v16 = vsel %vm1852_vm9, %v8189_v54, %v8191_v19  ;;  %v14573_v54 = vld [vmem:[%s19298_s7 + $0x310] ss:$8 sps:$4 sm:$0xff]  }
 0x8b5   : > { %8348 = vmatprep.mubr.bf16.mxu0 %v19573_v42  ;;  %8736 = vmatpush1.bf16.msra.mxu0 %v14524_v14 }
 0x8b6   : > { %8737 = vmatprep.subr.bf16.mxu0 %v14533_v31 }
 0x8b9   : > { %8738 = vmatpush1.bf16.msra.mxu0 %v14531_v3  ;;  %v14544_v3 = vld [vmem:[%s19298_s7 + $0x280] ss:$8 sps:$4 sm:$0xff]  }
 0x8ba   : > { %8739 = vmatprep.subr.bf16.mxu0 %v14538_v35 }
 0x8bc   : > { %8349 = vmatmul.mubr.bf16.gmra.mrb[32].mxu0 %v8176_v48  ;;  %v14558_v48 = vld [vmem:[%s19298_s7 + $0x2c4] ss:$8 sps:$4 sm:$0xff]  }
 0x8bd   : > { %8358 = vmatprep.mubr.bf16.mxu0 %v19573_v42  ;;  %8740 = vmatpush1.bf16.msra.mxu0 %v14536_v27  ;;  %v14550_v27 = vld [vmem:[%s19298_s7 + $0x2a0] ss:$8 sps:$4 sm:$0xff]  }
 0x8be   : > { %8741 = vmatprep.subr.bf16.mxu0 %v14543_v43  ;;  %v14553_v43 = vld [vmem:[%s19298_s7 + $0x2b0] ss:$8 sps:$4 sm:$0xff]  }
 0x8c1   : > { %8742 = vmatpush1.bf16.msra.mxu0 %v14541_v39  ;;  %v14556_v39 = vld [vmem:[%s19298_s7 + $0x2c0] ss:$8 sps:$4 sm:$0xff]  }
 0x8c2   : > { %9061 = vmatprep.subr.bf16.mxu0 %v14546_v11  ;;  %v14559_v11 = vld [vmem:[%s19298_s7 + $0x2d0] ss:$8 sps:$4 sm:$0xff]  }
 0x8c4   : > { %8359 = vmatmul.mubr.bf16.gmra.mrb[36].mxu0 %v8178_v55  ;;  %v14562_v55 = vld [vmem:[%s19298_s7 + $0x2e0] ss:$8 sps:$4 sm:$0xff]  }
 0x8c5   : > { %8368 = vmatprep.mubr.bf16.mxu0 %v19573_v42 }
 0x8cc   : > { %8369 = vmatmul.mubr.bf16.gmra.mrb[40].mxu0 %v8180_v23  ;;  %v14572_v23 = vld [vmem:[%s19298_s7 + $0x304] ss:$8 sps:$4 sm:$0xff]  }
 0x8cd   : > { %8378 = vmatprep.mubr.bf16.mxu0 %v19573_v42 }
 0x8d4   : > { %8379 = vmatmul.mubr.bf16.gmra.mrb[44].mxu0 %v8182_v53 }
 0x8d5   : > { %8388 = vmatprep.mubr.bf16.mxu0 %v19573_v42 }
 0x8dc   : > { %8389 = vmatmul.mubr.bf16.gmra.mrb[48].mxu0 %v8184_v49 }
 0x8dd   : > { %8398 = vmatprep.mubr.bf16.mxu0 %v19573_v42 }
 0x8e4   : > { %8399 = vmatmul.mubr.bf16.gmra.mrb[52].mxu0 %v8186_v58  ;;  %v14570_v58 = vld [vmem:[%s19298_s7 + $0x300] ss:$8 sps:$4 sm:$0xff]  }
 0x8e5   : > { %8408 = vmatprep.mubr.bf16.mxu0 %v19573_v42 }
 0x8ec   : > { %8409 = vmatmul.mubr.bf16.gmra.mrb[56].mxu0 %v8188_v2  ;;  %v19600_v2 = vcombine.low %v18074_v7, %v18076_v56  ;;  %v14581_v7 = vld [vmem:[%s19298_s7 + $0x334] ss:$8 sps:$4 sm:$0xff]   ;;  %v19601_v56 = vcombine.low %v18106_v36, %v18108_v12  ;;  %v19602_v12 = vcombine.low %v18141_v37, %v18143_v22 }
 0x8ed   : > { %8418 = vmatprep.mubr.bf16.mxu0 %v19573_v42  ;;  %v14587_v36 = vld [vmem:[%s19298_s7 + $0x354] ss:$8 sps:$4 sm:$0xff]  }
 0x8ee   : > { %v14593_v37 = vld [vmem:[%s19298_s7 + $0x374] ss:$8 sps:$4 sm:$0xff]  }
 0x8ef   : > { %v19603_v22 = vld [vmem:[#allocation31_spill] sm:$0xff] }
 0x8f4   : > { %8419 = vmatmul.mubr.bf16.gmra.mrb[60].mxu0 %v8190_v25  ;;  %v14576_v25 = vld [vmem:[%s19298_s7 + $0x320] ss:$8 sps:$4 sm:$0xff]  }
 0x8f5   : > { %8428 = vmatprep.mubr.bf16.mxu0 %v19573_v42 }
 0x8fc   : > { %8429 = vmatmul.mubr.bf16.gmra.mrb[64].mxu0 %v8192_v16  ;;  %v14582_v16 = vld [vmem:[%s19298_s7 + $0x340] ss:$8 sps:$4 sm:$0xff]  }
 0x8fd   : > { %8438 = vmatprep.mubr.bf16.mxu0 %v19573_v42 }
 0x904   : > { %8439 = vmatmul.mubr.bf16.gmra.mrb[80].mxu0 %v8191_v19  ;;  %v14584_v19 = vld [vmem:[%s19298_s7 + $0x344] ss:$8 sps:$4 sm:$0xff]  }
 0x905   : > { %8759 = vmatprep.mubr.bf16.mxu0 %v19573_v42 }
 0x907   : > { %v7703_v5 = vpop.f32.mrb[72].mxu0 }
 0x908   : > { %v18695_v13 = vadd.f32 %v7703_v5, %v18602_v30  ;;  %v7705_v14 = vpop.f32.mrb[73].mxu0  ;;  %v14547_v30 = vld [vmem:[%s19298_s7 + $0x290] ss:$8 sps:$4 sm:$0xff]  }
 0x909   : > { %v18698_v31 = vadd.f32 %v7705_v14, %v18605_v41  ;;  %v7707_v45 = vpop.f32.mrb[74].mxu0  ;;  %v14552_v41 = vld [vmem:[%s19298_s7 + $0x2a4] ss:$8 sps:$4 sm:$0xff]   ;;  %v14585_v5 = vld [vmem:[%s19298_s7 + $0x350] ss:$8 sps:$4 sm:$0xff]  }
 0x90a   : > { %v7708_v35 = vpop.f32.mrb[75].mxu0  ;;  %v14588_v14 = vld [vmem:[%s19298_s7 + $0x360] ss:$8 sps:$4 sm:$0xff]  }
 0x90b   : > { %v14599_v35 = vld [vmem:[%s19298_s7 + $0x384] ss:$8 sps:$4 sm:$0xff]  }
 0x90c   : > { %8760 = vmatmul.mubr.bf16.vlgmr.msra.gmra.mrb[20].mxu0 %v18155_v61  ;;  %v14555_v61 = vld [vmem:[%s19298_s7 + $0x2b4] ss:$8 sps:$4 sm:$0xff]  }
 0x90d   : > { %8769 = vmatprep.mubr.bf16.mxu0 %v19573_v42  ;;  %9062 = vmatpush1.bf16.msra.mxu0 %v14544_v3  ;;  %v14591_v3 = vld [vmem:[%s19298_s7 + $0x370] ss:$8 sps:$4 sm:$0xff]  }
 0x90e   : > { %9063 = vmatprep.subr.bf16.mxu0 %v14549_v59  ;;  %v19606_v59 = vld [vmem:[#allocation34_spill] sm:$0xff] }
 0x911   : > { %9064 = vmatpush1.bf16.msra.mxu0 %v14547_v30  ;;  %v19607_v30 = vld [vmem:[#allocation35_spill] sm:$0xff] }
 0x912   : > { %9065 = vmatprep.subr.bf16.mxu0 %v14552_v41  ;;  %v19608_v41 = vcombine.low %v19606_v59, %v19607_v30  ;;  %v14620_v59 = vld [vmem:[%s19298_s7 + $0x3d0] ss:$8 sps:$4 sm:$0xff]   ;;  %v14626_v30 = vld [vmem:[%s19298_s7 + $0x3e4] ss:$8 sps:$4 sm:$0xff]  }
 0x914   : > { %8770 = vmatmul.mubr.bf16.gmra.mrb[24].mxu0 %v18198_v52  ;;  %v14561_v52 = vld [vmem:[%s19298_s7 + $0x2d4] ss:$8 sps:$4 sm:$0xff]  }
 0x915   : > { %8779 = vmatprep.mubr.bf16.mxu0 %v19573_v42  ;;  %9066 = vmatpush1.bf16.msra.mxu0 %v14550_v27  ;;  %v19609_v27 = vld [vmem:[#allocation36_spill] sm:$0xff] }
 0x916   : > { %9067 = vmatprep.subr.bf16.mxu0 %v14555_v61  ;;  %v19610_v61 = vld [vmem:[#allocation21_spill] sm:$0xff] }
 0x919   : > { %9068 = vmatpush1.bf16.msra.mxu0 %v14553_v43  ;;  %v19611_v43 = vcombine.low %v19609_v27, %v19610_v61  ;;  %v14624_v27 = vld [vmem:[%s19298_s7 + $0x3e0] ss:$8 sps:$4 sm:$0xff]   ;;  %v14630_v61 = vld [vmem:[%s19298_s7 + $0x3f4] ss:$8 sps:$4 sm:$0xff]  }
 0x91a   : > { %9069 = vmatprep.subr.bf16.mxu0 %v14558_v48  ;;  %v19612_v48 = vld [vmem:[#allocation15_spill] sm:$0xff] }
 0x91c   : > { %8780 = vmatmul.mubr.bf16.gmra.mrb[28].mxu0 %v18230_v15  ;;  %v14569_v15 = vld [vmem:[%s19298_s7 + $0x2f4] ss:$8 sps:$4 sm:$0xff]  }
 0x91d   : > { %8789 = vmatprep.mubr.bf16.mxu0 %v19573_v42  ;;  %9070 = vmatpush1.bf16.msra.mxu0 %v14556_v39  ;;  %v19613_v39 = vld [vmem:[#allocation18_spill] sm:$0xff] }
 0x91e   : > { %9071 = vmatprep.subr.bf16.mxu0 %v14561_v52  ;;  %v19614_v52 = vcombine.low %v19612_v48, %v19613_v39  ;;  %v14605_v48 = vld [vmem:[#allocation4 + $0x34] sm:$0xff]   ;;  %v14628_v39 = vld [vmem:[%s19298_s7 + $0x3f0] ss:$8 sps:$4 sm:$0xff]  }
 0x921   : > { %9072 = vmatpush1.bf16.msra.mxu0 %v14559_v11  ;;  %v19615_v11 = vld [vmem:[#allocation22_spill] sm:$0xff] }
 0x922   : > { %9073 = vmatprep.subr.bf16.mxu0 %v14564_v62  ;;  %v19616_v62 = vld [vmem:[#allocation41_spill] sm:$0xff] }
 0x924   : > { %8790 = vmatmul.mubr.bf16.gmra.mrb[32].mxu0 %v18254_v57  ;;  %v18766_v57 = vld [vmem:[#allocation4 + $0x68] sm:$0x3] }
 0x925   : > { %8799 = vmatprep.mubr.bf16.mxu0 %v19573_v42  ;;  %9074 = vmatpush1.bf16.msra.mxu0 %v14562_v55  ;;  %v19617_v55 = vcombine.low %v19615_v11, %v19616_v62  ;;  %v9386_v11 = vrot.slane %v14605_v48, 2  ;;  %v14640_v48 = vld [vmem:[%s19298_s7 + $0x414] ss:$8 sps:$4 sm:$0xff]  }
 0x926   : > { %9075 = vmatprep.subr.bf16.mxu0 %v14569_v15  ;;  %v19618_v15 = vld [vmem:[#allocation42_spill] sm:$0xff] }
 0x929   : > { %9076 = vmatpush1.bf16.msra.mxu0 %v14567_v63  ;;  %v19619_v63 = vld [vmem:[#allocation43_spill] sm:$0xff] }
 0x92a   : > { %9495 = vmatprep.subr.bf16.mxu0 %v14572_v23  ;;  %v19620_v23 = vcombine.low %v19618_v15, %v19619_v63 }
 0x92c   : > { %8800 = vmatmul.mubr.bf16.gmra.mrb[36].mxu0 %v18279_v33  ;;  %v11792_v33 = vcombine.low %v18686_v6, %v18766_v57 }
 0x92d   : > { %8809 = vmatprep.mubr.bf16.mxu0 %v19573_v42 }
 0x934   : > { %8810 = vmatmul.mubr.bf16.gmra.mrb[40].mxu0 %v18304_v29  ;;  %v8626_v29 = vshrl.u32 %v11792_v33, 16 }
 0x935   : > { %8819 = vmatprep.mubr.bf16.mxu0 %v19573_v42 }
 0x936   : > { %v8628_v47 = vrot.slane %v8626_v29, 3  ;;  %v19622_v29 = vld [vmem:[#allocation48_spill] sm:$0xff] }
 0x93c   : > { %8820 = vmatmul.mubr.bf16.gmra.mrb[44].mxu0 %v18329_v4  ;;  %v8629_v4 = vshll.u32 %v11792_v33, 16  ;;  %v19621_v33 = vld [vmem:[#allocation47_spill] sm:$0xff] }
 0x93d   : > { %8829 = vmatprep.mubr.bf16.mxu0 %v19573_v42 }
 0x93e   : > { %v8631_v53 = vrot.slane %v8629_v4, 4  ;;  %v19623_v4 = vcombine.low %v19621_v33, %v19622_v29 }
 0x944   : > { %8830 = vmatmul.mubr.bf16.gmra.mrb[48].mxu0 %v18352_v51  ;;  %v8632_v51 = vor.u32 %v8631_v53, %v8628_v47  ;;  %v19624_v47 = vld [vmem:[#allocation44_spill] sm:$0xff]  ;;  %v19625_v53 = vld [vmem:[#allocation49_spill] sm:$0xff] }
 0x945   : > { %8839 = vmatprep.mubr.bf16.mxu0 %v19573_v42 }
 0x94c   : > { %8840 = vmatmul.mubr.bf16.gmra.mrb[52].mxu0 %v18373_v28  ;;  %v8633_v28 = vsel %vm2115_vm7, %v18395_v20, %v8632_v51 }
 0x94d   : > { %8849 = vmatprep.mubr.bf16.mxu0 %v19573_v42 }
 0x954   : > { %8850 = vmatmul.mubr.bf16.gmra.mrb[56].mxu0 %v18390_v10 }
 0x955   : > { %8859 = vmatprep.mubr.bf16.mxu0 %v19573_v42 }
 0x95c   : > { %8860 = vmatmul.mubr.bf16.gmra.mrb[60].mxu0 %v18400_v46 }
 0x95d   : > { %8869 = vmatprep.mubr.bf16.mxu0 %v19573_v42 }
 0x964   : > { %8870 = vmatmul.mubr.bf16.gmra.mrb[64].mxu0 %v8633_v28  ;;  %v19627_v28 = vld [vmem:[#allocation45_spill] sm:$0xff] }
 0x965   : > { %8879 = vmatprep.mubr.bf16.mxu0 %v19573_v42 }
 0x96c   : > { %8880 = vmatmul.mubr.bf16.gmra.mrb[84].mxu0 %v8632_v51  ;;  %v19626_v51 = vcombine.low %v19624_v47, %v19625_v53 }
 0x96d   : > { %9093 = vmatprep.mubr.bf16.mxu0 %v19573_v42 }
 0x96f   : > { %v8003_v10 = vpop.f32.mrb[76].mxu0 }
 0x970   : > { %v18779_v60 = vadd.f32 %v8003_v10, %v18695_v13  ;;  %v8005_v49 = vpop.f32.mrb[77].mxu0  ;;  %v14590_v13 = vld [vmem:[%s19298_s7 + $0x364] ss:$8 sps:$4 sm:$0xff]   ;;  %v11836_v10 = vcombine.low %v19627_v28, %v18686_v6 }
 0x971   : > { %v18782_v32 = vadd.f32 %v8005_v49, %v18698_v31  ;;  %v8007_v46 = vpop.f32.mrb[78].mxu0  ;;  %v19604_v31 = vld [vmem:[#allocation33_spill] sm:$0xff]  ;;  %v11837_v49 = vcombine.low %v18766_v57, %v18766_v57 }
 0x972   : > { %v8008_v20 = vpop.f32.mrb[79].mxu0  ;;  %v19605_v45 = vcombine.low %v19603_v22, %v19604_v31  ;;  %v14595_v46 = vld [vmem:[#allocation4 + $0x14] sm:$0xff]  }
 0x973   : > { %v14597_v57 = vld [vmem:[%s19298_s7 + $0x380] ss:$8 sps:$4 sm:$0xff]  }
 0x974   : > { %9094 = vmatmul.mubr.bf16.vlgmr.msra.gmra.mrb[20].mxu0 %v19600_v2  ;;  %v14615_v31 = vld [vmem:[%s19298_s7 + $0x3c0] ss:$8 sps:$4 sm:$0xff]  }
 0x975   : > { %9103 = vmatprep.mubr.bf16.mxu0 %v19573_v42  ;;  %9496 = vmatpush1.bf16.msra.mxu0 %v14570_v58  ;;  %v14594_v58 = vld [vmem:[#allocation4 + $0xc] sm:$0xfc]  }
 0x976   : > { %9497 = vmatprep.subr.bf16.mxu0 %v14575_v24  ;;  %v9378_v24 = vrot.slane %v14595_v46, 2 }
 0x979   : > { %9498 = vmatpush1.bf16.msra.mxu0 %v14573_v54 }
 0x97a   : > { %9499 = vmatprep.subr.bf16.mxu0 %v14578_v26 }
 0x97c   : > { %9104 = vmatmul.mubr.bf16.gmra.mrb[24].mxu0 %v19601_v56  ;;  %v14603_v56 = vld [vmem:[%s19298_s7 + $0x394] ss:$8 sps:$4 sm:$0xff]  }
 0x97d   : > { %9113 = vmatprep.mubr.bf16.mxu0 %v19573_v42  ;;  %9500 = vmatpush1.bf16.msra.mxu0 %v14576_v25  ;;  %v9377_v25 = vrot.slane %v14594_v58, 2 }
 0x97e   : > { %9501 = vmatprep.subr.bf16.mxu0 %v14581_v7 }
 0x981   : > { %9502 = vmatpush1.bf16.msra.mxu0 %v14579_v21  ;;  %v9379_v21 = vsel %vm2799_vm6, %v9377_v25, %v9378_v24 }
 0x982   : > { %9503 = vmatprep.subr.bf16.mxu0 %v14584_v19  ;;  %v14596_v19 = vld [vmem:[#allocation4 + $0x1c] sm:$0xff]  }
 0x984   : > { %9114 = vmatmul.mubr.bf16.gmra.mrb[28].mxu0 %v19602_v12  ;;  %v14612_v12 = vld [vmem:[%s19298_s7 + $0x3b4] ss:$8 sps:$4 sm:$0xff]  }
 0x985   : > { %9123 = vmatprep.mubr.bf16.mxu0 %v19573_v42  ;;  %9504 = vmatpush1.bf16.msra.mxu0 %v14582_v16  ;;  %v9380_v16 = vrot.slane %v14596_v19, 2  ;;  %v19628_v19 = vld [vmem:[#allocation46_spill] sm:$0xff] }
 0x986   : > { %9505 = vmatprep.subr.bf16.mxu0 %v14587_v36  ;;  %v14606_v36 = vld [vmem:[%s19298_s7 + $0x3a0] ss:$8 sps:$4 sm:$0xff]  }
 0x989   : > { %9506 = vmatpush1.bf16.msra.mxu0 %v14585_v5  ;;  %v9381_v5 = vsel %vm2799_vm6, %v9378_v24, %v9380_v16 }
 0x98a   : > { %9507 = vmatprep.subr.bf16.mxu0 %v14590_v13  ;;  %v14600_v13 = vld [vmem:[#allocation4 + $0x24] sm:$0xff]  }
 0x98b   : > { %v9382_v22 = vrot.slane %v14600_v13, 2 }
 0x98c   : > { %9124 = vmatmul.mubr.bf16.gmra.mrb[32].mxu0 %v19605_v45  ;;  %v14622_v45 = vld [vmem:[%s19298_s7 + $0x3d4] ss:$8 sps:$4 sm:$0xff]  }
 0x98d   : > { %9133 = vmatprep.mubr.bf16.mxu0 %v19573_v42  ;;  %9508 = vmatpush1.bf16.msra.mxu0 %v14588_v14  ;;  %v14610_v14 = vld [vmem:[%s19298_s7 + $0x3b0] ss:$8 sps:$4 sm:$0xff]  }
 0x98e   : > { %9509 = vmatprep.subr.bf16.mxu0 %v14593_v37  ;;  %v14617_v37 = vld [vmem:[%s19298_s7 + $0x3c4] ss:$8 sps:$4 sm:$0xff]  }
 0x991   : > { %9510 = vmatpush1.bf16.msra.mxu0 %v14591_v3  ;;  %v9383_v3 = vsel %vm2799_vm6, %v9380_v16, %v9382_v22 }
 0x992   : > { %10023 = vmatprep.subr.bf16.mxu0 %v14599_v35  ;;  %v14604_v35 = vld [vmem:[#allocation4 + $0x2c] sm:$0xff]  }
 0x994   : > { %9134 = vmatmul.mubr.bf16.gmra.mrb[36].mxu0 %v19608_v41  ;;  %v9384_v41 = vrot.slane %v14604_v35, 2 }
 0x995   : > { %9143 = vmatprep.mubr.bf16.mxu0 %v19573_v42 }
 0x996   : > { %v9387_v62 = vsel %vm2799_vm6, %v9384_v41, %v9386_v11 }
 0x99c   : > { %9144 = vmatmul.mubr.bf16.gmra.mrb[40].mxu0 %v19611_v43  ;;  %v9385_v43 = vsel %vm2799_vm6, %v9382_v22, %v9384_v41 }
 0x99d   : > { %9153 = vmatprep.mubr.bf16.mxu0 %v19573_v42 }
 0x9a4   : > { %9154 = vmatmul.mubr.bf16.gmra.mrb[44].mxu0 %v19614_v52  ;;  %v14636_v52 = vld [vmem:[%s19298_s7 + $0x404] ss:$8 sps:$4 sm:$0xff]  }
 0x9a5   : > { %9163 = vmatprep.mubr.bf16.mxu0 %v19573_v42 }
 0x9ac   : > { %9164 = vmatmul.mubr.bf16.gmra.mrb[48].mxu0 %v19617_v55  ;;  %v14609_v55 = vld [vmem:[#allocation4 + $0x3c] sm:$0xff]  }
 0x9ad   : > { %9173 = vmatprep.mubr.bf16.mxu0 %v19573_v42  ;;  %v9388_v15 = vrot.slane %v14609_v55, 2  ;;  %v14687_v55 = vld [vmem:[#allocation4 + $0x24] sm:$0xff]  }
 0x9af   : > { %v9389_v63 = vsel %vm2799_vm6, %v9386_v11, %v9388_v15  ;;  %v14645_v11 = vld [vmem:[%s19298_s7 + $0x424] ss:$8 sps:$4 sm:$0xff]  }
 0x9b4   : > { %9174 = vmatmul.mubr.bf16.gmra.mrb[52].mxu0 %v19620_v23  ;;  %v14613_v23 = vld [vmem:[#allocation4 + $0x44] sm:$0xff]  }
 0x9b5   : > { %9183 = vmatprep.mubr.bf16.mxu0 %v19573_v42  ;;  %v9390_v33 = vrot.slane %v14613_v23, 2  ;;  %v14643_v23 = vld [vmem:[%s19298_s7 + $0x420] ss:$8 sps:$4 sm:$0xff]  }
 0x9b7   : > { %v9391_v29 = vsel %vm2799_vm6, %v9388_v15, %v9390_v33  ;;  %v9841_v15 = vshrl.u32 %v14687_v55, 16 }
 0x9bc   : > { %9184 = vmatmul.mubr.bf16.gmra.mrb[56].mxu0 %v19623_v4  ;;  %v14614_v4 = vld [vmem:[#allocation4 + $0x4c] sm:$0xff]  }
 0x9bd   : > { %9193 = vmatprep.mubr.bf16.mxu0 %v19573_v42  ;;  %v9392_v47 = vrot.slane %v14614_v4, 2  ;;  %v9843_v4 = vrot.slane %v9841_v15, 2 }
 0x9bf   : > { %v9393_v53 = vsel %vm2799_vm6, %v9390_v33, %v9392_v47  ;;  %v14649_v33 = vld [vmem:[%s19298_s7 + $0x434] ss:$8 sps:$4 sm:$0xff]  }
 0x9c4   : > { %9194 = vmatmul.mubr.bf16.gmra.mrb[60].mxu0 %v19626_v51  ;;  %v14618_v51 = vld [vmem:[#allocation4 + $0x54] sm:$0xff]  }
 0x9c5   : > { %9203 = vmatprep.mubr.bf16.mxu0 %v19573_v42  ;;  %v9394_v28 = vrot.slane %v14618_v51, 2  ;;  %v14654_v51 = vld [vmem:[%s19298_s7 + $0x444] ss:$8 sps:$4 sm:$0xff]  }
 0x9cc   : > { %9204 = vmatmul.mubr.bf16.gmra.mrb[64].mxu0 %v11836_v10  ;;  %v9395_v10 = vsel %vm2799_vm6, %v9392_v47, %v9394_v28 }
 0x9cd   : > { %9213 = vmatprep.mubr.bf16.mxu0 %v19573_v42 }
 0x9d4   : > { %9214 = vmatmul.mubr.bf16.gmra.mrb[88].mxu0 %v11837_v49  ;;  %v14619_v49 = vld [vmem:[#allocation4 + $0x5c] sm:$0xff]  }
 0x9d5   : > { %9527 = vmatprep.mubr.bf16.mxu0 %v19573_v42  ;;  %v9396_v46 = vrot.slane %v14619_v49, 2 }
 0x9d7   : > { %v8440_v20 = vpop.f32.mrb[80].mxu0  ;;  %v9397_v58 = vsel %vm2799_vm6, %v9394_v28, %v9396_v46 }
 0x9d8   : > { %v18883_v2 = vadd.f32 %v8440_v20, %v18779_v60  ;;  %v8442_v54 = vpop.f32.mrb[81].mxu0  ;;  %v14601_v60 = vld [vmem:[%s19298_s7 + $0x390] ss:$8 sps:$4 sm:$0xff]  }
 0x9d9   : > { %v18886_v26 = vadd.f32 %v8442_v54, %v18782_v32  ;;  %v8444_v6 = vpop.f32.mrb[82].mxu0  ;;  %v14608_v32 = vld [vmem:[%s19298_s7 + $0x3a4] ss:$8 sps:$4 sm:$0xff]   ;;  %v14627_v54 = vld [vmem:[#allocation4 + $0x6c] ss:$0 sps:$4 sm:$0xff]  }
 0x9da   : > { %v8445_v7 = vpop.f32.mrb[83].mxu0  ;;  %v14623_v20 = vld [vmem:[#allocation4 + $0x64] sm:$0xff]   ;;  %v9400_v25 = vrot.slane %v14627_v54, 2 }
 0x9db   : > { %v9398_v24 = vrot.slane %v14623_v20, 2  ;;  %v9706_v7 = vld [vmem:[#allocation4 + $0xc] sm:$0xc] }
 0x9dc   : > { %9528 = vmatmul.mubr.bf16.vlgmr.msra.gmra.mrb[20].mxu0 %v9379_v21  ;;  %v14659_v20 = vld [vmem:[%s19298_s7 + $0x454] ss:$8 sps:$4 sm:$0xff]  }
 0x9dd   : > { %9537 = vmatprep.mubr.bf16.mxu0 %v19573_v42  ;;  %10024 = vmatpush1.bf16.msra.mxu0 %v14597_v57  ;;  %v9399_v6 = vsel %vm2799_vm6, %v9396_v46, %v9398_v24  ;;  %v9401_v57 = vsel %vm2799_vm6, %v9398_v24, %v9400_v25 }
 0x9de   : > { %10025 = vmatprep.subr.bf16.mxu0 %v14603_v56  ;;  %v14685_v56 = vld [vmem:[#allocation4 + $0x10] sm:$0xf] }
 0x9df   : > { %v11915_v21 = vcombine.low %v9706_v7, %v14685_v56  ;;  %v14689_v56 = vld [vmem:[#allocation4 + $0x34] sm:$0xff]  }
 0x9e1   : > { %10026 = vmatpush1.bf16.msra.mxu0 %v14601_v60  ;;  %v9823_v60 = vshrl.u32 %v19628_v19, 16  ;;  %v9815_v16 = vshrl.u32 %v11915_v21, 16 }
 0x9e2   : > { %10027 = vmatprep.subr.bf16.mxu0 %v14608_v32  ;;  %v9826_v32 = vshll.u32 %v19628_v19, 16  ;;  %v9862_v19 = vshll.u32 %v14689_v56, 16 }
 0x9e3   : > { %v9817_v13 = vrot.slane %v9815_v16, 2 }
 0x9e4   : > { %9538 = vmatmul.mubr.bf16.gmra.mrb[24].mxu0 %v9381_v5  ;;  %v9828_v5 = vrot.slane %v9826_v32, 3  ;;  %v14667_v32 = vld [vmem:[%s19298_s7 + $0x474] ss:$8 sps:$4 sm:$0xff]  }
 0x9e5   : > { %9547 = vmatprep.mubr.bf16.mxu0 %v19573_v42  ;;  %10028 = vmatpush1.bf16.msra.mxu0 %v14606_v36  ;;  %v9818_v36 = vshll.u32 %v11915_v21, 16  ;;  %v9859_v21 = vshrl.u32 %v14689_v56, 16 }
 0x9e6   : > { %10029 = vmatprep.subr.bf16.mxu0 %v14612_v12  ;;  %v9825_v12 = vrot.slane %v9823_v60, 2  ;;  %v14661_v60 = vld [vmem:[%s19298_s7 + $0x460] ss:$8 sps:$4 sm:$0xff]  }
 0x9e8   : > { %v9829_v22 = vor.u32 %v9828_v5, %v9825_v12  ;;  %v9864_v12 = vrot.slane %v9862_v19, 3  ;;  %v14665_v5 = vld [vmem:[%s19298_s7 + $0x470] ss:$8 sps:$4 sm:$0xff]  }
 0x9e9   : > { %10030 = vmatpush1.bf16.msra.mxu0 %v14610_v14  ;;  %v9820_v14 = vrot.slane %v9818_v36, 3  ;;  %v9861_v36 = vrot.slane %v9859_v21, 2 }
 0x9ea   : > { %10031 = vmatprep.subr.bf16.mxu0 %v14617_v37 }
 0x9ec   : > { %9548 = vmatmul.mubr.bf16.gmra.mrb[28].mxu0 %v9383_v3 }
 0x9ed   : > { %9557 = vmatprep.mubr.bf16.mxu0 %v19573_v42  ;;  %10032 = vmatpush1.bf16.msra.mxu0 %v14615_v31  ;;  %v14686_v31 = vld [vmem:[#allocation4 + $0x1c] sm:$0xff]  }
 0x9ee   : > { %10033 = vmatprep.subr.bf16.mxu0 %v14622_v45  ;;  %v9832_v45 = vshrl.u32 %v14686_v31, 16  ;;  %v9835_v3 = vshll.u32 %v14686_v31, 16 }
 0x9f1   : > { %10034 = vmatpush1.bf16.msra.mxu0 %v14620_v59 }
 0x9f2   : > { %10035 = vmatprep.subr.bf16.mxu0 %v14626_v30 }
 0x9f4   : > { %9558 = vmatmul.mubr.bf16.gmra.mrb[32].mxu0 %v9385_v43 }
 0x9f5   : > { %9567 = vmatprep.mubr.bf16.mxu0 %v19573_v42  ;;  %10036 = vmatpush1.bf16.msra.mxu0 %v14624_v27  ;;  %v9821_v27 = vor.u32 %v9820_v14, %v9817_v13  ;;  %v9865_v13 = vor.u32 %v9864_v12, %v9861_v36  ;;  %v14690_v14 = vld [vmem:[#allocation4 + $0x3c] sm:$0xff]  }
 0x9f6   : > { %10037 = vmatprep.subr.bf16.mxu0 %v14630_v61  ;;  %v14634_v61 = vld [vmem:[%s19298_s7 + $0x400] ss:$8 sps:$4 sm:$0xff]  }
 0x9f9   : > { %10038 = vmatpush1.bf16.msra.mxu0 %v14628_v39  ;;  %v9830_v39 = vsel %vm3149_vm8, %v9821_v27, %v9829_v22 }
 0x9fa   : > { %10373 = vmatprep.subr.bf16.mxu0 %v14636_v52  ;;  %v9834_v52 = vrot.slane %v9832_v45, 2 }
 0x9fc   : > { %9568 = vmatmul.mubr.bf16.gmra.mrb[36].mxu0 %v9387_v62 }
 0x9fd   : > { %9577 = vmatprep.mubr.bf16.mxu0 %v19573_v42 }
 0xa04   : > { %9578 = vmatmul.mubr.bf16.gmra.mrb[40].mxu0 %v9389_v63  ;;  %v9844_v63 = vshll.u32 %v14687_v55, 16 }
 0xa05   : > { %9587 = vmatprep.mubr.bf16.mxu0 %v19573_v42 }
 0xa06   : > { %v9846_v47 = vrot.slane %v9844_v63, 3 }
 0xa08   : > { %v9847_v28 = vor.u32 %v9846_v47, %v9843_v4 }
 0xa0c   : > { %9588 = vmatmul.mubr.bf16.gmra.mrb[44].mxu0 %v9391_v29 }
 0xa0d   : > { %9597 = vmatprep.mubr.bf16.mxu0 %v19573_v42 }
 0xa14   : > { %9598 = vmatmul.mubr.bf16.gmra.mrb[48].mxu0 %v9393_v53  ;;  %v14647_v53 = vld [vmem:[%s19298_s7 + $0x430] ss:$8 sps:$4 sm:$0xff]  }
 0xa15   : > { %9607 = vmatprep.mubr.bf16.mxu0 %v19573_v42 }
 0xa1c   : > { %9608 = vmatmul.mubr.bf16.gmra.mrb[52].mxu0 %v9395_v10  ;;  %v14688_v10 = vld [vmem:[#allocation4 + $0x2c] sm:$0xff]  }
 0xa1d   : > { %9617 = vmatprep.mubr.bf16.mxu0 %v19573_v42  ;;  %v9850_v49 = vshrl.u32 %v14688_v10, 16  ;;  %v9853_v46 = vshll.u32 %v14688_v10, 16 }
 0xa1f   : > { %v9852_v54 = vrot.slane %v9850_v49, 2 }
 0xa24   : > { %9618 = vmatmul.mubr.bf16.gmra.mrb[56].mxu0 %v9397_v58  ;;  %v14652_v58 = vld [vmem:[%s19298_s7 + $0x440] ss:$8 sps:$4 sm:$0xff]  }
 0xa25   : > { %9627 = vmatprep.mubr.bf16.mxu0 %v19573_v42 }
 0xa2c   : > { %9628 = vmatmul.mubr.bf16.gmra.mrb[60].mxu0 %v9399_v6  ;;  %v9855_v6 = vrot.slane %v9853_v46, 3 }
 0xa2d   : > { %9637 = vmatprep.mubr.bf16.mxu0 %v19573_v42 }
 0xa2e   : > { %v9856_v7 = vor.u32 %v9855_v6, %v9852_v54  ;;  %v14695_v54 = vld [vmem:[#allocation4 + $0x64] sm:$0xff]  }
 0xa2f   : > { %v9913_v6 = vshrl.u32 %v14695_v54, 16 }
 0xa30   : > { %v9857_v16 = vsel %vm3149_vm8, %v9847_v28, %v9856_v7  ;;  %v9866_v31 = vsel %vm3149_vm8, %v9856_v7, %v9865_v13 }
 0xa31   : > { %v9915_v56 = vrot.slane %v9913_v6, 2 }
 0xa34   : > { %9638 = vmatmul.mubr.bf16.gmra.mrb[64].mxu0 %v9401_v57  ;;  %v14663_v57 = vld [vmem:[%s19298_s7 + $0x464] ss:$8 sps:$4 sm:$0xff]  }
 0xa35   : > { %9647 = vmatprep.mubr.bf16.mxu0 %v19573_v42 }
 0xa3c   : > { %9648 = vmatmul.mubr.bf16.gmra.mrb[92].mxu0 %v9400_v25  ;;  %v14657_v25 = vld [vmem:[%s19298_s7 + $0x450] ss:$8 sps:$4 sm:$0xff]  }
 0xa3d   : > { %10055 = vmatprep.mubr.bf16.mxu0 %v19573_v42 }
 0xa3f   : > { %v8881_v37 = vpop.f32.mrb[84].mxu0 }
 0xa40   : > { %v18964_v35 = vadd.f32 %v8881_v37, %v18883_v2  ;;  %v8883_v59 = vpop.f32.mrb[85].mxu0  ;;  %v9837_v2 = vrot.slane %v9835_v3, 3  ;;  %v9868_v37 = vshrl.u32 %v14690_v14, 16 }
 0xa41   : > { %v18967_v30 = vadd.f32 %v8883_v59, %v18886_v26  ;;  %v8885_v41 = vpop.f32.mrb[86].mxu0  ;;  %v14638_v26 = vld [vmem:[%s19298_s7 + $0x410] ss:$8 sps:$4 sm:$0xff]  }
 0xa42   : > { %v8886_v43 = vpop.f32.mrb[87].mxu0  ;;  %v9838_v62 = vor.u32 %v9837_v2, %v9834_v52  ;;  %v9870_v45 = vrot.slane %v9868_v37, 2  ;;  %v14691_v41 = vld [vmem:[#allocation4 + $0x44] sm:$0xff]   ;;  %v14692_v2 = vld [vmem:[#allocation4 + $0x4c] sm:$0xff]  }
 0xa43   : > { %v9877_v27 = vshrl.u32 %v14691_v41, 16 }
 0xa44   : > { %10056 = vmatmul.mubr.bf16.vlgmr.msra.gmra.mrb[20].mxu0 %v9830_v39  ;;  %v9839_v29 = vsel %vm3149_vm8, %v9829_v22, %v9838_v62  ;;  %v9848_v24 = vsel %vm3149_vm8, %v9838_v62, %v9847_v28  ;;  %v9871_v22 = vshll.u32 %v14690_v14, 16  ;;  %v14694_v28 = vld [vmem:[#allocation4 + $0x5c] sm:$0xff]  }
 0xa45   : > { %10065 = vmatprep.mubr.bf16.mxu0 %v19573_v42  ;;  %10374 = vmatpush1.bf16.msra.mxu0 %v14634_v61  ;;  %v9880_v61 = vshll.u32 %v14691_v41, 16  ;;  %v9904_v10 = vshrl.u32 %v14694_v28, 16  ;;  %v9907_v49 = vshll.u32 %v14694_v28, 16  ;;  %v19630_v41 = vld [vmem:[#allocation51_spill] sm:$0xff] }
 0xa46   : > { %10375 = vmatprep.subr.bf16.mxu0 %v14640_v48  ;;  %v9873_v3 = vrot.slane %v9871_v22, 3  ;;  %v9879_v48 = vrot.slane %v9877_v27, 2 }
 0xa47   : > { %v9882_v39 = vrot.slane %v9880_v61, 3 }
 0xa48   : > { %v9874_v59 = vor.u32 %v9873_v3, %v9870_v45 }
 0xa49   : > { %10376 = vmatpush1.bf16.msra.mxu0 %v14638_v26  ;;  %v9883_v52 = vor.u32 %v9882_v39, %v9879_v48  ;;  %v9886_v26 = vshrl.u32 %v14692_v2, 16 }
 0xa4a   : > { %10377 = vmatprep.subr.bf16.mxu0 %v14645_v11  ;;  %v9875_v43 = vsel %vm3149_vm8, %v9865_v13, %v9874_v59  ;;  %v9889_v11 = vshll.u32 %v14692_v2, 16 }
 0xa4b   : > { %v9884_v62 = vsel %vm3149_vm8, %v9874_v59, %v9883_v52  ;;  %v9888_v55 = vrot.slane %v9886_v26, 2  ;;  %v19629_v59 = vld [vmem:[#allocation50_spill] sm:$0xff] }
 0xa4c   : > { %10066 = vmatmul.mubr.bf16.gmra.mrb[24].mxu0 %v9839_v29  ;;  %v9891_v15 = vrot.slane %v9889_v11, 3 }
 0xa4d   : > { %10075 = vmatprep.mubr.bf16.mxu0 %v19573_v42  ;;  %10378 = vmatpush1.bf16.msra.mxu0 %v14643_v23  ;;  %v14693_v23 = vld [vmem:[#allocation4 + $0x54] sm:$0xff]  }
 0xa4e   : > { %10379 = vmatprep.subr.bf16.mxu0 %v14649_v33  ;;  %v9892_v63 = vor.u32 %v9891_v15, %v9888_v55  ;;  %v9895_v33 = vshrl.u32 %v14693_v23, 16  ;;  %v9898_v29 = vshll.u32 %v14693_v23, 16 }
 0xa50   : > { %v9893_v4 = vsel %vm3149_vm8, %v9883_v52, %v9892_v63  ;;  %v9897_v47 = vrot.slane %v9895_v33, 2  ;;  %v10584_v52 = vld [vmem:[%s19299_s8] sm:$0x3] }
 0xa51   : > { %10380 = vmatpush1.bf16.msra.mxu0 %v14647_v53  ;;  %v9900_v53 = vrot.slane %v9898_v29, 3 }
 0xa52   : > { %10381 = vmatprep.subr.bf16.mxu0 %v14654_v51 }
 0xa53   : > { %v9901_v51 = vor.u32 %v9900_v53, %v9897_v47 }
 0xa54   : > { %10076 = vmatmul.mubr.bf16.gmra.mrb[28].mxu0 %v9848_v24 }
 0xa55   : > { %10085 = vmatprep.mubr.bf16.mxu0 %v19573_v42  ;;  %10382 = vmatpush1.bf16.msra.mxu0 %v14652_v58  ;;  %v9902_v46 = vsel %vm3149_vm8, %v9892_v63, %v9901_v51  ;;  %v9906_v58 = vrot.slane %v9904_v10, 2 }
 0xa56   : > { %10383 = vmatprep.subr.bf16.mxu0 %v14659_v20  ;;  %v9909_v20 = vrot.slane %v9907_v49, 3 }
 0xa58   : > { %v9910_v24 = vor.u32 %v9909_v20, %v9906_v58 }
 0xa59   : > { %10384 = vmatpush1.bf16.msra.mxu0 %v14657_v25  ;;  %v9916_v25 = vshll.u32 %v14695_v54, 16 }
 0xa5a   : > { %10385 = vmatprep.subr.bf16.mxu0 %v14663_v57  ;;  %v14664_v57 = vld [vmem:[#allocation4 + $0x6c] sm:$0x1f]   ;;  %v9911_v7 = vsel %vm3149_vm8, %v9901_v51, %v9910_v24 }
 0xa5b   : > { %v9918_v21 = vrot.slane %v9916_v25, 3  ;;  %v9922_v19 = vshrl.u32 %v14664_v57, 16 }
 0xa5c   : > { %10086 = vmatmul.mubr.bf16.gmra.mrb[32].mxu0 %v9857_v16 }
 0xa5d   : > { %10095 = vmatprep.mubr.bf16.mxu0 %v19573_v42  ;;  %10386 = vmatpush1.bf16.msra.mxu0 %v14661_v60  ;;  %v9925_v60 = vshll.u32 %v14664_v57, 16  ;;  %v9924_v16 = vrot.slane %v9922_v19, 2 }
 0xa5e   : > { %10387 = vmatprep.subr.bf16.mxu0 %v14667_v32  ;;  %v9919_v32 = vor.u32 %v9918_v21, %v9915_v56 }
 0xa5f   : > { %v9927_v36 = vrot.slane %v9925_v60, 3 }
 0xa60   : > { %v9920_v12 = vsel %vm3149_vm8, %v9910_v24, %v9919_v32 }
 0xa61   : > { %10388 = vmatpush1.bf16.msra.mxu0 %v14665_v5  ;;  %v9928_v5 = vor.u32 %v9927_v36, %v9924_v16 }
 0xa63   : > { %v9929_v13 = vsel %vm3149_vm8, %v9919_v32, %v9928_v5 }
 0xa64   : > { %10096 = vmatmul.mubr.bf16.gmra.mrb[36].mxu0 %v9866_v31 }
 0xa65   : > { %10105 = vmatprep.mubr.bf16.mxu0 %v19573_v42 }
 0xa6c   : > { %10106 = vmatmul.mubr.bf16.gmra.mrb[40].mxu0 %v9875_v43 }
 0xa6d   : > { %10115 = vmatprep.mubr.bf16.mxu0 %v19573_v42 }
 0xa74   : > { %10116 = vmatmul.mubr.bf16.gmra.mrb[44].mxu0 %v9884_v62 }
 0xa75   : > { %10125 = vmatprep.mubr.bf16.mxu0 %v19573_v42 }
 0xa7c   : > { %10126 = vmatmul.mubr.bf16.gmra.mrb[48].mxu0 %v9893_v4 }
 0xa7d   : > { %10135 = vmatprep.mubr.bf16.mxu0 %v19573_v42 }
 0xa84   : > { %10136 = vmatmul.mubr.bf16.gmra.mrb[52].mxu0 %v9902_v46 }
 0xa85   : > { %10145 = vmatprep.mubr.bf16.mxu0 %v19573_v42 }
 0xa8c   : > { %10146 = vmatmul.mubr.bf16.gmra.mrb[56].mxu0 %v9911_v7 }
 0xa8d   : > { %10155 = vmatprep.mubr.bf16.mxu0 %v19573_v42 }
 0xa94   : > { %10156 = vmatmul.mubr.bf16.gmra.mrb[60].mxu0 %v9920_v12 }
 0xa95   : > { %10165 = vmatprep.mubr.bf16.mxu0 %v19573_v42 }
 0xa9c   : > { %10166 = vmatmul.mubr.bf16.gmra.mrb[64].mxu0 %v9929_v13 }
 0xa9d   : > { %10175 = vmatprep.mubr.bf16.mxu0 %v19573_v42 }
 0xaa4   : > { %10176 = vmatmul.mubr.bf16.gmra.mrb[96].mxu0 %v9928_v5 }
 0xaa5   : > { %10405 = vmatprep.mubr.bf16.mxu0 %v19573_v42 }
 0xaa7   : > { %v9215_v14 = vpop.f32.mrb[88].mxu0 }
 0xaa8   : > { %v9270_v37 = vadd.f32 %v9215_v14, %v18964_v35  ;;  %v9217_v22 = vpop.f32.mrb[89].mxu0  ;;  %v10586_v35 = vlaneseq }
 0xaa9   : > { %v9271_v31 = vadd.f32 %v9217_v22, %v18967_v30  ;;  %v9219_v45 = vpop.f32.mrb[90].mxu0 }
 0xaaa   : > { %v9220_v3 = vpop.f32.mrb[91].mxu0  ;;  %v19067_v30 = vshrl.u32 %v10586_v35, 7 }
 0xaac   : > { %10406 = vmatmul.mubr.bf16.vlgmr.msra.gmra.mrb[20].mxu0 %v19629_v59  ;;  %v10588_v43 = vsub.s32 0, %v19067_v30 }
 0xaad   : > { %10415 = vmatprep.mubr.bf16.mxu0 %v19573_v42 }
 0xaae   : > { %v19086_v26 = vrot.slane %v10584_v52, %v10588_v43 }
 0xab4   : > { %10416 = vmatmul.mubr.bf16.gmra.mrb[24].mxu0 %v18420_v8  ;;  %v10278_v8 = vrot.slane %v14664_v57, 3 }
 0xab5   : > { %10425 = vmatprep.mubr.bf16.mxu0 %v19573_v42 }
 0xabc   : > { %10426 = vmatmul.mubr.bf16.gmra.mrb[28].mxu0 %v19630_v41 }
 0xabd   : > { %10435 = vmatprep.mubr.bf16.mxu0 %v19573_v42 }
 0xac4   : > { %10436 = vmatmul.mubr.bf16.gmra.mrb[32].mxu0 %v18433_v1  ;;  %v10279_v1 = vsel %vm1852_vm9, %v10276_v34, %v10278_v8 }
 0xac5   : > { %10445 = vmatprep.mubr.bf16.mxu0 %v19573_v42 }
 0xacc   : > { %10446 = vmatmul.mubr.bf16.gmra.mrb[36].mxu0 %v18436_v0 }
 0xacd   : > { %10455 = vmatprep.mubr.bf16.mxu0 %v19573_v42 }
 0xad4   : > { %10456 = vmatmul.mubr.bf16.gmra.mrb[40].mxu0 %v18439_v38 }
 0xad5   : > { %10465 = vmatprep.mubr.bf16.mxu0 %v19573_v42 }
 0xadc   : > { %10466 = vmatmul.mubr.bf16.gmra.mrb[44].mxu0 %v18442_v50 }
 0xadd   : > { %10475 = vmatprep.mubr.bf16.mxu0 %v19573_v42 }
 0xae4   : > { %10476 = vmatmul.mubr.bf16.gmra.mrb[48].mxu0 %v18445_v17 }
 0xae5   : > { %10485 = vmatprep.mubr.bf16.mxu0 %v19573_v42 }
 0xaec   : > { %10486 = vmatmul.mubr.bf16.gmra.mrb[52].mxu0 %v18452_v44 }
 0xaed   : > { %10495 = vmatprep.mubr.bf16.mxu0 %v19573_v42 }
 0xaf4   : > { %10496 = vmatmul.mubr.bf16.gmra.mrb[56].mxu0 %v18455_v40 }
 0xaf5   : > { %10505 = vmatprep.mubr.bf16.mxu0 %v19573_v42 }
 0xafc   : > { %10506 = vmatmul.mubr.bf16.gmra.mrb[60].mxu0 %v18463_v9  ;;  %v10592_v9 = vsub.s32 1, %v19067_v30  ;;  %v10808_v30 = vld [vmem:[%s19301_s10 + $0xa0] sm:$0xff] }
 0xafd   : > { %10515 = vmatprep.mubr.bf16.mxu0 %v19573_v42 }
 0xafe   : > { %v19088_v11 = vrot.slane %v10584_v52, %v10592_v9 }
 0xb04   : > { %10516 = vmatmul.mubr.bf16.gmra.mrb[64].mxu0 %v10279_v1 }
 0xb05   : > { %10525 = vmatprep.mubr.bf16.mxu0 %v19573_v42  ;;  %v10705_v42 = vrot.slane %v19073_v18, %v10592_v9 }
 0xb07   : > { %11979 = vmatprep.mubr.msk.f32.mxu1 %vm10707_vm11, %v10705_v42 }
 0xb0c   : > { %10526 = vmatmul.mubr.bf16.gmra.mrb[100].mxu0 %v10278_v8 }
 0xb0f   : > { %v9649_v0 = vpop.f32.mrb[92].mxu0 }
 0xb10   : > { %v9704_v38 = vadd.f32 %v9649_v0, %v9270_v37  ;;  %v9651_v50 = vpop.f32.mrb[93].mxu0 }
 0xb11   : > { %v9705_v17 = vadd.f32 %v9651_v50, %v9271_v31  ;;  %v9653_v44 = vpop.f32.mrb[94].mxu0 }
 0xb12   : > { %v9654_v40 = vpop.f32.mrb[95].mxu0 }
 0xb77   : > { %v10177_v34 = vpop.f32.mrb[96].mxu0 }
 0xb78   : > { %v19076_v27 = vadd.f32 %v10177_v34, %v9704_v38  ;;  %v10179_v61 = vpop.f32.mrb[97].mxu0 }
 0xb79   : > { %v19079_v48 = vadd.f32 %v10179_v61, %v9705_v17  ;;  %v10181_v39 = vpop.f32.mrb[98].mxu0 }
 0xb7a   : > { %v10182_v2 = vpop.f32.mrb[99].mxu0 }
 0xb7f   : > { %v10407_v62 = vpop.f32.mrb[20].mxu0 }
 0xb80   : > { %v10596_v55 = vadd.f32 %v19086_v26, %v10407_v62  ;;  %v10409_v15 = vpop.f32.mrb[21].mxu0 }
 0xb81   : > { %v10597_v63 = vadd.f32 %v19088_v11, %v10409_v15  ;;  %v10411_v23 = vpop.f32.mrb[22].mxu0 }
 0xb82   : > { %v10598_v33 = vadd.f32 %v19086_v26, %v10411_v23  ;;  %v10413_v29 = vpop.f32.mrb[23].mxu0  ;;  %v10646_v47 = vmax.f32 %v10596_v55, 0.0 }
 0xb83   : > { %v10599_v4 = vadd.f32 %v19088_v11, %v10413_v29  ;;  %v10647_v51 = vmax.f32 %v10597_v63, 0.0 }
 0xb84   : > { %v10648_v53 = vmax.f32 %v10598_v33, 0.0 }
 0xb85   : > { %v10649_v28 = vmax.f32 %v10599_v4, 0.0 }
 0xb86   : > { %v13641_v10 = vpack.c.bf16 %v10648_v53, %v10646_v47 }
 0xb87   : > { %v13639_v49 = vpack.c.bf16 %v10649_v28, %v10647_v51  ;;  %v10417_v46 = vpop.f32.mrb[24].mxu0 }
 0xb88   : > { %v10600_v58 = vadd.f32 %v19086_v26, %v10417_v46  ;;  %v10419_v20 = vpop.f32.mrb[25].mxu0 }
 0xb89   : > { %v10601_v24 = vadd.f32 %v19088_v11, %v10419_v20  ;;  %v10421_v54 = vpop.f32.mrb[26].mxu0  ;;  %13640 = vmatprep.subr.bf16.mxu1 %v13639_v49 }
 0xb8a   : > { %v10602_v6 = vadd.f32 %v19086_v26, %v10421_v54  ;;  %v10423_v25 = vpop.f32.mrb[27].mxu0  ;;  %13642 = vmatpush1.bf16.msra.mxu1 %v13641_v10  ;;  %v10650_v7 = vmax.f32 %v10600_v58, 0.0 }
 0xb8b   : > { %v10603_v57 = vadd.f32 %v19088_v11, %v10423_v25  ;;  %v10651_v21 = vmax.f32 %v10601_v24, 0.0 }
 0xb8c   : > { %v10652_v56 = vmax.f32 %v10602_v6, 0.0 }
 0xb8d   : > { %v10653_v19 = vmax.f32 %v10603_v57, 0.0 }
 0xb8e   : > { %v13645_v60 = vpack.c.bf16 %v10652_v56, %v10650_v7 }
 0xb8f   : > { %v13643_v32 = vpack.c.bf16 %v10653_v19, %v10651_v21  ;;  %v10427_v16 = vpop.f32.mrb[28].mxu0 }
 0xb90   : > { %v10604_v36 = vadd.f32 %v19086_v26, %v10427_v16  ;;  %v10429_v12 = vpop.f32.mrb[29].mxu0 }
 0xb91   : > { %v10605_v5 = vadd.f32 %v19088_v11, %v10429_v12  ;;  %v10431_v13 = vpop.f32.mrb[30].mxu0  ;;  %13644 = vmatprep.subr.bf16.mxu1 %v13643_v32 }
 0xb92   : > { %v10606_v14 = vadd.f32 %v19086_v26, %v10431_v13  ;;  %v10433_v37 = vpop.f32.mrb[31].mxu0  ;;  %13646 = vmatpush1.bf16.msra.mxu1 %v13645_v60  ;;  %v10654_v31 = vmax.f32 %v10604_v36, 0.0 }
 0xb93   : > { %v10607_v22 = vadd.f32 %v19088_v11, %v10433_v37  ;;  %v10655_v3 = vmax.f32 %v10605_v5, 0.0 }
 0xb94   : > { %v10656_v45 = vmax.f32 %v10606_v14, 0.0 }
 0xb95   : > { %v10657_v59 = vmax.f32 %v10607_v22, 0.0 }
 0xb96   : > { %v13649_v41 = vpack.c.bf16 %v10656_v45, %v10654_v31 }
 0xb97   : > { %v13647_v8 = vpack.c.bf16 %v10657_v59, %v10655_v3  ;;  %v10437_v1 = vpop.f32.mrb[32].mxu0 }
 0xb98   : > { %v10608_v0 = vadd.f32 %v19086_v26, %v10437_v1  ;;  %v10439_v38 = vpop.f32.mrb[33].mxu0 }
 0xb99   : > { %v10609_v50 = vadd.f32 %v19088_v11, %v10439_v38  ;;  %v10441_v17 = vpop.f32.mrb[34].mxu0  ;;  %13648 = vmatprep.subr.bf16.mxu1 %v13647_v8 }
 0xb9a   : > { %v10610_v44 = vadd.f32 %v19086_v26, %v10441_v17  ;;  %v10443_v40 = vpop.f32.mrb[35].mxu0  ;;  %13650 = vmatpush1.bf16.msra.mxu1 %v13649_v41  ;;  %v10658_v9 = vmax.f32 %v10608_v0, 0.0 }
 0xb9b   : > { %v10611_v35 = vadd.f32 %v19088_v11, %v10443_v40  ;;  %v10659_v34 = vmax.f32 %v10609_v50, 0.0 }
 0xb9c   : > { %v10660_v42 = vmax.f32 %v10610_v44, 0.0 }
 0xb9d   : > { %v10661_v61 = vmax.f32 %v10611_v35, 0.0 }
 0xb9e   : > { %v13653_v39 = vpack.c.bf16 %v10660_v42, %v10658_v9 }
 0xb9f   : > { %v13651_v52 = vpack.c.bf16 %v10661_v61, %v10659_v34  ;;  %v10447_v2 = vpop.f32.mrb[36].mxu0 }
 0xba0   : > { %v10612_v62 = vadd.f32 %v19086_v26, %v10447_v2  ;;  %v10449_v55 = vpop.f32.mrb[37].mxu0 }
 0xba1   : > { %v10613_v15 = vadd.f32 %v19088_v11, %v10449_v55  ;;  %v10451_v63 = vpop.f32.mrb[38].mxu0  ;;  %13652 = vmatprep.subr.bf16.mxu1 %v13651_v52 }
 0xba2   : > { %v10614_v23 = vadd.f32 %v19086_v26, %v10451_v63  ;;  %v10453_v33 = vpop.f32.mrb[39].mxu0  ;;  %13654 = vmatpush1.bf16.msra.mxu1 %v13653_v39  ;;  %v10662_v4 = vmax.f32 %v10612_v62, 0.0 }
 0xba3   : > { %v10615_v29 = vadd.f32 %v19088_v11, %v10453_v33  ;;  %v10663_v53 = vmax.f32 %v10613_v15, 0.0 }
 0xba4   : > { %v10664_v47 = vmax.f32 %v10614_v23, 0.0 }
 0xba5   : > { %v10665_v51 = vmax.f32 %v10615_v29, 0.0 }
 0xba6   : > { %v13657_v28 = vpack.c.bf16 %v10664_v47, %v10662_v4 }
 0xba7   : > { %v13655_v10 = vpack.c.bf16 %v10665_v51, %v10663_v53  ;;  %v10457_v49 = vpop.f32.mrb[40].mxu0 }
 0xba8   : > { %v10616_v46 = vadd.f32 %v19086_v26, %v10457_v49  ;;  %v10459_v58 = vpop.f32.mrb[41].mxu0 }
 0xba9   : > { %v10617_v20 = vadd.f32 %v19088_v11, %v10459_v58  ;;  %v10461_v24 = vpop.f32.mrb[42].mxu0  ;;  %13656 = vmatprep.subr.bf16.mxu1 %v13655_v10 }
 0xbaa   : > { %v10618_v54 = vadd.f32 %v19086_v26, %v10461_v24  ;;  %v10463_v6 = vpop.f32.mrb[43].mxu0  ;;  %13658 = vmatpush1.bf16.msra.mxu1 %v13657_v28  ;;  %v10666_v57 = vmax.f32 %v10616_v46, 0.0 }
 0xbab   : > { %v10619_v25 = vadd.f32 %v19088_v11, %v10463_v6  ;;  %v10667_v56 = vmax.f32 %v10617_v20, 0.0 }
 0xbac   : > { %v10668_v7 = vmax.f32 %v10618_v54, 0.0 }
 0xbad   : > { %v10669_v21 = vmax.f32 %v10619_v25, 0.0 }
 0xbae   : > { %v13661_v19 = vpack.c.bf16 %v10668_v7, %v10666_v57 }
 0xbaf   : > { %v13659_v60 = vpack.c.bf16 %v10669_v21, %v10667_v56  ;;  %v10467_v32 = vpop.f32.mrb[44].mxu0 }
 0xbb0   : > { %v10620_v16 = vadd.f32 %v19086_v26, %v10467_v32  ;;  %v10469_v36 = vpop.f32.mrb[45].mxu0 }
 0xbb1   : > { %v10621_v12 = vadd.f32 %v19088_v11, %v10469_v36  ;;  %v10471_v5 = vpop.f32.mrb[46].mxu0  ;;  %13660 = vmatprep.subr.bf16.mxu1 %v13659_v60 }
 0xbb2   : > { %v10622_v13 = vadd.f32 %v19086_v26, %v10471_v5  ;;  %v10473_v14 = vpop.f32.mrb[47].mxu0  ;;  %13662 = vmatpush1.bf16.msra.mxu1 %v13661_v19  ;;  %v10670_v22 = vmax.f32 %v10620_v16, 0.0 }
 0xbb3   : > { %v10623_v37 = vadd.f32 %v19088_v11, %v10473_v14  ;;  %v10671_v45 = vmax.f32 %v10621_v12, 0.0 }
 0xbb4   : > { %v10672_v31 = vmax.f32 %v10622_v13, 0.0 }
 0xbb5   : > { %v10673_v3 = vmax.f32 %v10623_v37, 0.0 }
 0xbb6   : > { %v13665_v59 = vpack.c.bf16 %v10672_v31, %v10670_v22 }
 0xbb7   : > { %v13663_v41 = vpack.c.bf16 %v10673_v3, %v10671_v45  ;;  %v10477_v8 = vpop.f32.mrb[48].mxu0 }
 0xbb8   : > { %v10624_v1 = vadd.f32 %v19086_v26, %v10477_v8  ;;  %v10479_v0 = vpop.f32.mrb[49].mxu0 }
 0xbb9   : > { %v10625_v38 = vadd.f32 %v19088_v11, %v10479_v0  ;;  %v10481_v50 = vpop.f32.mrb[50].mxu0  ;;  %13664 = vmatprep.subr.bf16.mxu1 %v13663_v41 }
 0xbba   : > { %v10626_v17 = vadd.f32 %v19086_v26, %v10481_v50  ;;  %v10483_v44 = vpop.f32.mrb[51].mxu0  ;;  %13666 = vmatpush1.bf16.msra.mxu1 %v13665_v59  ;;  %v10674_v35 = vmax.f32 %v10624_v1, 0.0 }
 0xbbb   : > { %v10627_v40 = vadd.f32 %v19088_v11, %v10483_v44  ;;  %v10675_v42 = vmax.f32 %v10625_v38, 0.0 }
 0xbbc   : > { %v10676_v9 = vmax.f32 %v10626_v17, 0.0 }
 0xbbd   : > { %v10677_v34 = vmax.f32 %v10627_v40, 0.0 }
 0xbbe   : > { %v13669_v61 = vpack.c.bf16 %v10676_v9, %v10674_v35 }
 0xbbf   : > { %v13667_v39 = vpack.c.bf16 %v10677_v34, %v10675_v42  ;;  %v10487_v52 = vpop.f32.mrb[52].mxu0 }
 0xbc0   : > { %v10628_v2 = vadd.f32 %v19086_v26, %v10487_v52  ;;  %v10489_v62 = vpop.f32.mrb[53].mxu0 }
 0xbc1   : > { %v10629_v55 = vadd.f32 %v19088_v11, %v10489_v62  ;;  %v10491_v15 = vpop.f32.mrb[54].mxu0  ;;  %13668 = vmatprep.subr.bf16.mxu1 %v13667_v39 }
 0xbc2   : > { %v10630_v63 = vadd.f32 %v19086_v26, %v10491_v15  ;;  %v10493_v23 = vpop.f32.mrb[55].mxu0  ;;  %13670 = vmatpush1.bf16.msra.mxu1 %v13669_v61  ;;  %v10678_v29 = vmax.f32 %v10628_v2, 0.0 }
 0xbc3   : > { %v10631_v33 = vadd.f32 %v19088_v11, %v10493_v23  ;;  %v10679_v47 = vmax.f32 %v10629_v55, 0.0  ;;  %v10804_v23 = vld [vmem:[%s19301_s10 + $0x80] sm:$0xff] }
 0xbc4   : > { %v10680_v4 = vmax.f32 %v10630_v63, 0.0 }
 0xbc5   : > { %v10681_v53 = vmax.f32 %v10631_v33, 0.0  ;;  %v10805_v33 = vld [vmem:[%s19301_s10 + $0x88] sm:$0xff] }
 0xbc6   : > { %v13673_v51 = vpack.c.bf16 %v10680_v4, %v10678_v29  ;;  %v10807_v4 = vld [vmem:[%s19301_s10 + $0x98] sm:$0xff] }
 0xbc7   : > { %v13671_v28 = vpack.c.bf16 %v10681_v53, %v10679_v47  ;;  %v10497_v10 = vpop.f32.mrb[56].mxu0  ;;  %v13687_v53 = vpack.c.bf16 %v10805_v33, %v10804_v23 }
 0xbc8   : > { %v10632_v49 = vadd.f32 %v19086_v26, %v10497_v10  ;;  %v10499_v46 = vpop.f32.mrb[57].mxu0 }
 0xbc9   : > { %v10633_v58 = vadd.f32 %v19088_v11, %v10499_v46  ;;  %v10501_v20 = vpop.f32.mrb[58].mxu0  ;;  %13672 = vmatprep.subr.bf16.mxu1 %v13671_v28  ;;  %v10791_v46 = vld [vmem:[%s19301_s10 + $0x18] sm:$0xff] }
 0xbca   : > { %v10634_v24 = vadd.f32 %v19086_v26, %v10501_v20  ;;  %v10503_v54 = vpop.f32.mrb[59].mxu0  ;;  %13674 = vmatpush1.bf16.msra.mxu1 %v13673_v51  ;;  %v10682_v25 = vmax.f32 %v10632_v49, 0.0  ;;  %v10790_v49 = vld [vmem:[%s19301_s10 + $0x10] sm:$0xff]  ;;  %v10792_v20 = vld [vmem:[%s19301_s10 + $0x20] sm:$0xff] }
 0xbcb   : > { %v10635_v6 = vadd.f32 %v19088_v11, %v10503_v54  ;;  %v10683_v7 = vmax.f32 %v10633_v58, 0.0  ;;  %v10810_v54 = vld [vmem:[%s19301_s10 + $0xb0] sm:$0xff] }
 0xbcc   : > { %v10684_v57 = vmax.f32 %v10634_v24, 0.0  ;;  %v10793_v24 = vld [vmem:[%s19301_s10 + $0x28] sm:$0xff] }
 0xbcd   : > { %v10685_v56 = vmax.f32 %v10635_v6, 0.0  ;;  %v10811_v6 = vld [vmem:[%s19301_s10 + $0xb8] sm:$0xff] }
 0xbce   : > { %v13677_v21 = vpack.c.bf16 %v10684_v57, %v10682_v25  ;;  %v13697_v25 = vpack.c.bf16 %v10793_v24, %v10792_v20  ;;  %v13699_v57 = vpack.c.bf16 %v10811_v6, %v10810_v54 }
 0xbcf   : > { %v13675_v19 = vpack.c.bf16 %v10685_v56, %v10683_v7  ;;  %v10507_v60 = vpop.f32.mrb[60].mxu0  ;;  %v10794_v7 = vld [vmem:[%s19301_s10 + $0x30] sm:$0xff]  ;;  %v10795_v56 = vld [vmem:[%s19301_s10 + $0x38] sm:$0xff] }
 0xbd0   : > { %v10636_v32 = vadd.f32 %v19086_v26, %v10507_v60  ;;  %v10509_v16 = vpop.f32.mrb[61].mxu0  ;;  %v13701_v60 = vpack.c.bf16 %v10795_v56, %v10794_v7 }
 0xbd1   : > { %v10637_v36 = vadd.f32 %v19088_v11, %v10509_v16  ;;  %v10511_v12 = vpop.f32.mrb[62].mxu0  ;;  %13676 = vmatprep.subr.bf16.mxu1 %v13675_v19  ;;  %v10813_v19 = vld [vmem:[%s19301_s10 + $0xc8] sm:$0xff]  ;;  %v10796_v16 = vld [vmem:[%s19301_s10 + $0x40] sm:$0xff] }
 0xbd2   : > { %v10638_v5 = vadd.f32 %v19086_v26, %v10511_v12  ;;  %v10513_v13 = vpop.f32.mrb[63].mxu0  ;;  %13678 = vmatpush1.bf16.msra.mxu1 %v13677_v21  ;;  %v10686_v37 = vmax.f32 %v10636_v32, 0.0  ;;  %v10812_v21 = vld [vmem:[%s19301_s10 + $0xc0] sm:$0xff]  ;;  %v10814_v12 = vld [vmem:[%s19301_s10 + $0xd0] sm:$0xff] }
 0xbd3   : > { %v10639_v14 = vadd.f32 %v19088_v11, %v10513_v13  ;;  %v10687_v31 = vmax.f32 %v10637_v36, 0.0  ;;  %v13703_v32 = vpack.c.bf16 %v10813_v19, %v10812_v21  ;;  %v10797_v36 = vld [vmem:[%s19301_s10 + $0x48] sm:$0xff] }
 0xbd4   : > { %v10688_v22 = vmax.f32 %v10638_v5, 0.0  ;;  %v10815_v5 = vld [vmem:[%s19301_s10 + $0xd8] sm:$0xff]  ;;  %v13705_v13 = vpack.c.bf16 %v10797_v36, %v10796_v16 }
 0xbd5   : > { %v10689_v45 = vmax.f32 %v10639_v14, 0.0  ;;  %v13707_v14 = vpack.c.bf16 %v10815_v5, %v10814_v12 }
 0xbd6   : > { %v13681_v3 = vpack.c.bf16 %v10688_v22, %v10686_v37  ;;  %v10798_v37 = vld [vmem:[%s19301_s10 + $0x50] sm:$0xff]  ;;  %v10799_v22 = vld [vmem:[%s19301_s10 + $0x58] sm:$0xff] }
 0xbd7   : > { %v13679_v59 = vpack.c.bf16 %v10689_v45, %v10687_v31  ;;  %v10517_v41 = vpop.f32.mrb[64].mxu0  ;;  %v10816_v31 = vld [vmem:[%s19301_s10 + $0xe0] sm:$0xff]  ;;  %v10817_v45 = vld [vmem:[%s19301_s10 + $0xe8] sm:$0xff] }
 0xbd8   : > { %v10640_v8 = vadd.f32 %v19086_v26, %v10517_v41  ;;  %v10519_v1 = vpop.f32.mrb[65].mxu0  ;;  %v10800_v41 = vld [vmem:[%s19301_s10 + $0x60] sm:$0xff] }
 0xbd9   : > { %v10641_v0 = vadd.f32 %v19088_v11, %v10519_v1  ;;  %v10521_v38 = vpop.f32.mrb[66].mxu0  ;;  %13680 = vmatprep.subr.bf16.mxu1 %v13679_v59  ;;  %v13711_v59 = vpack.c.bf16 %v10817_v45, %v10816_v31  ;;  %v10818_v1 = vld [vmem:[%s19301_s10 + $0xf0] sm:$0xff] }
 0xbda   : > { %v10642_v50 = vadd.f32 %v19086_v26, %v10521_v38  ;;  %v10523_v17 = vpop.f32.mrb[67].mxu0  ;;  %13682 = vmatpush1.bf16.msra.mxu1 %v13681_v3  ;;  %v10690_v40 = vmax.f32 %v10640_v8, 0.0  ;;  %v13709_v3 = vpack.c.bf16 %v10799_v22, %v10798_v37  ;;  %v10801_v8 = vld [vmem:[%s19301_s10 + $0x68] sm:$0xff] }
 0xbdb   : > { %v10643_v44 = vadd.f32 %v19088_v11, %v10523_v17  ;;  %v10691_v9 = vmax.f32 %v10641_v0, 0.0  ;;  %v10819_v0 = vld [vmem:[%s19301_s10 + $0xf8] sm:$0xff]  ;;  %v13713_v38 = vpack.c.bf16 %v10801_v8, %v10800_v41  ;;  %v10802_v17 = vld [vmem:[%s19301_s10 + $0x70] sm:$0xff] }
 0xbdc   : > { %v10692_v35 = vmax.f32 %v10642_v50, 0.0  ;;  %v13715_v50 = vpack.c.bf16 %v10819_v0, %v10818_v1 }
 0xbdd   : > { %v10693_v42 = vmax.f32 %v10643_v44, 0.0  ;;  %v10803_v44 = vld [vmem:[%s19301_s10 + $0x78] sm:$0xff] }
 0xbde   : > { %v13685_v34 = vpack.c.bf16 %v10692_v35, %v10690_v40  ;;  %v13717_v40 = vpack.c.bf16 %v10803_v44, %v10802_v17 }
 0xbdf   : > { %v13683_v61 = vpack.c.bf16 %v10693_v42, %v10691_v9  ;;  %v10527_v39 = vpop.f32.mrb[100].mxu0 }
 0xbe0   : > { %v10582_v52 = vadd.f32 %v10527_v39, %v19076_v27  ;;  %v10529_v2 = vpop.f32.mrb[101].mxu0  ;;  %v10788_v27 = vld [vmem:[%s19301_s10] sm:$0xff] }
 0xbe1   : > { %v10583_v62 = vadd.f32 %v10529_v2, %v19079_v48  ;;  %v10531_v55 = vpop.f32.mrb[102].mxu0  ;;  %13684 = vmatprep.subr.bf16.mxu1 %v13683_v61  ;;  %v10789_v48 = vld [vmem:[%s19301_s10 + $0x8] sm:$0xff] }
 0xbe2   : > { %v10644_v15 = vadd.f32 %v19086_v26, %v10582_v52  ;;  %v10532_v63 = vpop.f32.mrb[103].mxu0  ;;  %13686 = vmatpush1.bf16.msra.mxu1 %v13685_v34  ;;  %v10806_v26 = vld [vmem:[%s19301_s10 + $0x90] sm:$0xff]  ;;  %v13689_v28 = vpack.c.bf16 %v10789_v48, %v10788_v27  ;;  %v10820_v34 = vld [vmem:[%s19302_s11] sm:$0x1] }
 0xbe3   : > { %v10645_v29 = vadd.f32 %v19088_v11, %v10583_v62  ;;  %v10701_v11 = vrot.slane %v19073_v18, %v10588_v43  ;;  %v13691_v10 = vpack.c.bf16 %v10807_v4, %v10806_v26  ;;  %v10809_v18 = vld [vmem:[%s19301_s10 + $0xa8] sm:$0xff]  ;;  %v13693_v43 = vpack.c.bf16 %v10791_v46, %v10790_v49 }
 0xbe4   : > { %v10694_v51 = vmax.f32 %v10644_v15, 0.0  ;;  %v13695_v58 = vpack.c.bf16 %v10809_v18, %v10808_v30 }
 0xbe5   : > { %v10695_v47 = vmax.f32 %v10645_v29, 0.0 }
 0xbe7   : > { %11977 = vmatprep.subr.msk.mxu1 %vm10710_vm12, %v10695_v47 }
 0xbe8   : > { %11978 = vmatpush1.msk.msra.mxu1 %vm10710_vm12, %v10694_v51 }
 0xbe9   : > { %10782 = vmatmul.mubr.f32.vlgmr.msra.gmra.mrb[200].mxu1 %v10701_v11  ;;  %13688 = vmatprep.subr.bf16.mxu1 %v13687_v53 }
 0xbea   : > { %13690 = vmatpush3.bf16.msra.mxu1 %v13689_v28 }
 0xbeb   : > { %13692 = vmatprep.subr.bf16.mxu1 %v13691_v10 }
 0xbee   : > { %13694 = vmatpush3.bf16.msra.mxu1 %v13693_v43 }
 0xbef   : > { %13696 = vmatprep.subr.bf16.mxu1 %v13695_v58 }
 0xbf2   : > { %13698 = vmatpush3.bf16.msra.mxu1 %v13697_v25 }
 0xbf3   : > { %13700 = vmatprep.subr.bf16.mxu1 %v13699_v57 }
 0xbf6   : > { %13702 = vmatpush3.bf16.msra.mxu1 %v13701_v60 }
 0xbf7   : > { %13704 = vmatprep.subr.bf16.mxu1 %v13703_v32 }
 0xbfa   : > { %13706 = vmatpush3.bf16.msra.mxu1 %v13705_v13 }
 0xbfb   : > { %13708 = vmatprep.subr.bf16.mxu1 %v13707_v14 }
 0xbfe   : > { %13710 = vmatpush3.bf16.msra.mxu1 %v13709_v3 }
 0xbff   : > { %13712 = vmatprep.subr.bf16.mxu1 %v13711_v59 }
 0xc02   : > { %13714 = vmatpush3.bf16.msra.mxu1 %v13713_v38 }
 0xc03   : > { %13716 = vmatprep.subr.bf16.mxu1 %v13715_v50 }
 0xc06   : > { %13718 = vmatpush3.bf16.msra.mxu1 %v13717_v40 }
 0xcbc   : > { %v10783_v35 = vpop.f32.mrb[200].mxu1 }
 0xcbd   : > { %v10785_v9 = vpop.f32.mrb[201].mxu1 }
 0xcbe   : > { %10885 = vmatprep.mubr.f32.mxu1 %v10785_v9 }
 0xcbf   : > { %10886 = vmatmul.mubr.f32.vlgmr.msra.gmra.mrb[202].mxu1 %v10783_v35 }
 0xd92   : > { %v12488_v42 = vpop.f32.mrb[202].mxu1 }
 0xd93   : > { %v12489_v61 = vpop.f32.mrb[203].mxu1 }
 0xd94   : > { %v12490_v39 = vadd.f32 %v12489_v61, %v12488_v42 }
 0xd96   : > { %v10888_v52 = vadd.f32 %v12490_v39, %v10820_v34 }
 0xd98   : > { %10891 = vst [vmem:[%s405_s30] sm:$0x1] %v10888_v52 }
 0xd99   : > { %14709 = shalt.err (!%p14706_p3)
}
 0xd9a   : > { %s14710_s26 = scalar_lea.hbm %s19249_s20, 16  ;;  %s14714_s18 = scalar_lea.hbm %s19303_s12, 32 }
 0xd9b   : > { %p14711_p4 = scmp.ne.s32.totalorder %s19249_s20, %s14710_s26  ;;  %p14715_p9 = scmp.lt.u32.totalorder %s19249_s20, %s19303_s12 }
 0xd9c   : > { %p14716_p10 = scmp.lt.u32.totalorder %s14714_s18, %s14710_s26  ;;  %p14718_p12 = scmp.lt.u32.totalorder %s14710_s26, %s19249_s20 }
 0xd9d   : > { %p14712_p7 = pnand %p14711_p4, %p14867_p5 }
 0xd9e   : > { %p14717_p11 = por %p14716_p10, %p14715_p9 }
 0xd9f   : > { %p14713_p8 = pneg %p14712_p7 }
 0xda0   : > { %p14719_p13 = por %p14718_p12, %p14717_p11 }
 0xda2   : > { %p14720_p0 = pnand %p14719_p13, %p14713_p8 }
 0xda4   : > { %14723 = shalt.err (!%p14720_p0)
}
 0xda5   : > { %14112 = dma.vmem_to_hbm [thread:$0]  (%p14867_p5), %s19251_s17, 16, %s19249_s20, %s10893_s19  }
 0xda6 PF: > { %p14118_p1 = scmp.ge.s32.totalorder %s14758_s24, 2  ;;  %s10917_s0 = sand.u32 1, %s14746_s21  }
 0xda7   : > { %s10918_s28 = scalar_lea.sflag [#allocation6], %s10917_s0 }
 0xda8   : > { %p14115_p2 = pnand %p14118_p1, %p14871_p6 }
 0xdaa   : > { %14741 = dma.done.wait (!%p14115_p2), %s10918_s28, 16  }
 0xdab   : > { %14743 = vsyncadd (!%p14115_p2), %s10918_s28, 4294967280  ;;  %s19631_s29 = sld [smem:[#allocation8_spill]]  ;;  %p22_p3 = scmp.ge.s32.totalorder %s14854_s27, 4  }
 0xdac   : > { %s19632_s21 = smov %s14750_s22  ;;  %s19633_s22 = smov %s14754_s23 }
 0xdad   : > { %s19635_s24 = smov %s14854_s27  ;;  %24 = sbr.rel (!%p22_p3) target bundleno = 5 (0x5), region = 127 }
 0xdb1   : > { %s19634_s23 = smov %s19631_s29 }
 0xdb4   :  { %10922 = vsyncpa [#allocation6], 1 }
 0xdb5   :  { %10924 = vsyncpa [#allocation6 + $0x1], 1 }

</bundles_post_ra>
